<compile_context>
chip_gen: v7x
topology: tpu7x:2x2x1
jax: 0.10.0
libtpu: 0.0.40
codegen_flags: <defaults>
</compile_context>

<pallas_src>
import functools

import jax
import jax.numpy as jnp
from jax.experimental import pallas as pl
from jax.experimental.pallas import tpu as pltpu

DIN = 9      # in_features (pos 3 + dout 3 + din 3)
WIDTH = 64   # hidden width W
DOUT = 3     # out_features
DOUT_PAD = 8
DEPTH = 8    # number of pts_linears
SKIPS = (4,)


def _round_up(x, m):
    return ((x + m - 1) // m) * m


# ----------------------------------------------------------------------------
# Kernel
# ----------------------------------------------------------------------------
def _mlp_kernel(a_ref, c_ref, b_ref, d_ref, ws_ref, bs_ref, woT_ref, bout_ref,
                o_ref):
    bf = jnp.bfloat16
    f32 = jnp.float32
    tn = a_ref.shape[0]
    tm = b_ref.shape[0]
    rows = tn * tm

    a_blk = a_ref[...]            # (tn, 64)  f32   layer-0 x-term, N side
    c_blk = c_ref[...]            # (tn, 64)  f32   skip   x-term, N side
    b_blk = b_ref[...]            # (tm, 64)  f32   layer-0 x-term, M side
    d_blk = d_ref[...]            # (tm, 64)  f32   skip   x-term, M side

    def fuse(per_n, per_m):
        # (tn,64) (+) (tm,64) -> (rows,64); row n*tm+m = per_n[n] + per_m[m].
        # tm is a multiple of 128, so the flatten is a layout no-op.
        return (per_n[:, None, :] + per_m[None, :, :]).reshape(rows, WIDTH)

    # ---- layer 0: x @ W0 + b0, pre-split into per-N (A) + per-M (B) parts ---
    h = jnp.maximum(fuse(a_blk, b_blk + bs_ref[0]), 0.0).astype(bf)

    # ---- layers 1..4 --------------------------------------------------------
    for i in range(1, 5):
        z = jnp.dot(h, ws_ref[i - 1], preferred_element_type=f32)
        h = jnp.maximum(z + bs_ref[i], 0.0).astype(bf)

    # ---- layer 5 (skip): cat([x, h]) @ W5; x-part pre-split into C/D --------
    z5 = jnp.dot(h, ws_ref[4], preferred_element_type=f32)
    h = jnp.maximum(z5 + fuse(c_blk, d_blk + bs_ref[5]), 0.0).astype(bf)

    # ---- layers 6, 7 --------------------------------------------------------
    for i in range(6, 8):
        z = jnp.dot(h, ws_ref[i - 1], preferred_element_type=f32)
        h = jnp.maximum(z + bs_ref[i], 0.0).astype(bf)

    # ---- output projection, batched & transposed: (8,64) @ (rows,64)^T -----
    trans_b = (((1,), (1,)), ((), ()))   # contract last dims of both operands
    out_t = jax.lax.dot_general(woT_ref[...], h, trans_b,
                                preferred_element_type=f32)      # (8, rows)
    out_t = out_t + bout_ref[...]                                # (8, rows)

    # Lane-dense stores: vreg-aligned static lane slices, (8, tm) each.
    for n in range(tn):
        o_ref[n] = out_t[:, n * tm:(n + 1) * tm]


# ----------------------------------------------------------------------------
# Parameters
# ----------------------------------------------------------------------------
def init_params(key):
    """kaiming_normal(fan_in, relu) weights; PyTorch default uniform biases.
    Weights stored as (in, out) so the math is h @ W."""
    in_dims = [DIN] + [WIDTH if (i - 1) not in SKIPS else WIDTH + DIN
                       for i in range(1, DEPTH)]
    layer_dims = [(d, WIDTH) for d in in_dims] + [(WIDTH, DOUT)]
    params = []
    keys = jax.random.split(key, 2 * len(layer_dims))
    for idx, (din, dout) in enumerate(layer_dims):
        kw, kb = keys[2 * idx], keys[2 * idx + 1]
        std = (2.0 / din) ** 0.5
        w = std * jax.random.normal(kw, (din, dout), dtype=jnp.float32)
        bound = 1.0 / (din ** 0.5)
        b = jax.random.uniform(kb, (1, dout), dtype=jnp.float32,
                               minval=-bound, maxval=bound)
        params.append((w, b))
    return params


def _precompute_terms(params, pos, dout_dirs, din_dirs):
    """Fold layer 0 and the skip-layer x-term into per-N / per-M tables."""
    w0 = params[0][0]            # (9, 64)
    w5 = params[5][0]            # (73, 64)
    hp = jax.lax.Precision.HIGHEST
    pd = jnp.concatenate([pos, dout_dirs], axis=-1).astype(jnp.float32)  # (N, 6)
    dd = din_dirs.astype(jnp.float32)                                    # (M, 3)
    A = jnp.dot(pd, w0[:6], precision=hp)        # (N, 64)
    B = jnp.dot(dd, w0[6:DIN], precision=hp)     # (M, 64)
    C = jnp.dot(pd, w5[:6], precision=hp)        # (N, 64)
    D = jnp.dot(dd, w5[6:DIN], precision=hp)     # (M, 64)
    return A, B, C, D


# ----------------------------------------------------------------------------
# Wrapper
# ----------------------------------------------------------------------------
@functools.partial(jax.jit, static_argnames=("tile_n", "tile_m"))
def prt_forward(params, pos, dout_dirs, din_dirs, tile_n=None, tile_m=None):
    N = pos.shape[0]
    M = din_dirs.shape[0]

    if tile_m is None:
        tile_m = min(1024, _round_up(M, 128))       # lane-dense, mult of 128
    if tile_n is None:
        tile_n = min(16, _round_up(N, 8))
        # v7x megacore: if the whole problem would fit in one grid step, split
        # the N axis so both TensorCores get work (when there is enough N).
        if (_round_up(N, tile_n) == tile_n and _round_up(M, tile_m) == tile_m
                and tile_n > 8):
            tile_n //= 2
    assert tile_m % 128 == 0 and tile_n % 8 == 0

    A, B, C, D = _precompute_terms(params, pos, dout_dirs, din_dirs)

    N_pad = _round_up(N, tile_n)
    M_pad = _round_up(M, tile_m)
    A = jnp.pad(A, ((0, N_pad - N), (0, 0)))
    C = jnp.pad(C, ((0, N_pad - N), (0, 0)))
    B = jnp.pad(B, ((0, M_pad - M), (0, 0)))
    D = jnp.pad(D, ((0, M_pad - M), (0, 0)))

    # Pack resident weights: bf16 matmul operands, f32 biases.
    bf = jnp.bfloat16
    ws = jnp.stack([params[i][0] if i != 5 else params[5][0][DIN:]
                    for i in range(1, DEPTH)]).astype(bf)       # (7, 64, 64)
    bs = jnp.stack([params[i][1] for i in range(DEPTH)])        # (8, 1, 64) f32
    wout, bout = params[-1]                                     # (64,3), (1,3)
    woT = jnp.zeros((DOUT_PAD, WIDTH), jnp.float32).at[:DOUT].set(wout.T)
    woT = woT.astype(bf)                                        # (8, 64)
    boutc = jnp.zeros((DOUT_PAD, 1), jnp.float32).at[:DOUT, 0].set(bout[0])

    gn, gm = N_pad // tile_n, M_pad // tile_m

    out = pl.pallas_call(
        _mlp_kernel,
        out_shape=jax.ShapeDtypeStruct((N_pad, DOUT_PAD, M_pad), jnp.float32),
        grid=(gn, gm),
        in_specs=[
            pl.BlockSpec((tile_n, WIDTH), lambda i, j: (i, 0)),   # A
            pl.BlockSpec((tile_n, WIDTH), lambda i, j: (i, 0)),   # C
            pl.BlockSpec((tile_m, WIDTH), lambda i, j: (j, 0)),   # B
            pl.BlockSpec((tile_m, WIDTH), lambda i, j: (j, 0)),   # D
            pl.BlockSpec(ws.shape, lambda i, j: (0, 0, 0)),       # hidden W stack
            pl.BlockSpec(bs.shape, lambda i, j: (0, 0, 0)),       # bias stack
            pl.BlockSpec(woT.shape, lambda i, j: (0, 0)),         # output W^T
            pl.BlockSpec(boutc.shape, lambda i, j: (0, 0)),       # output bias
        ],
        out_specs=pl.BlockSpec((tile_n, DOUT_PAD, tile_m),
                               lambda i, j: (i, 0, j)),
        compiler_params=pltpu.CompilerParams(
            dimension_semantics=("parallel", "parallel"),
            vmem_limit_bytes=32 * 1024 * 1024),   # raise v5e's 16 MiB default
        cost_estimate=pl.CostEstimate(
            flops=2 * N_pad * M_pad * (7 * WIDTH * WIDTH + DOUT_PAD * WIDTH),
            transcendentals=0,
            bytes_accessed=(4 * WIDTH * (2 * gm * N_pad + 2 * gn * M_pad)
                            + 4 * DOUT_PAD * N_pad * M_pad
                            + 2 * 7 * WIDTH * WIDTH)),
    )(A, C, B, D, ws, bs, woT, boutc)

    # (N_pad, 8, M_pad) -> (N, M, 3)
    # TODO(synk): downstream consumers that accept (N, DOUT, M) can skip this
    # extra HBM transpose pass.
    return out[:N, :DOUT, :M].transpose(0, 2, 1)


# ----------------------------------------------------------------------------
# References (for the self-test)
# ----------------------------------------------------------------------------
def _reference_forward(params, pos, dout_dirs, din_dirs):
    """Pure-f32 JAX reference mirroring the PyTorch forward literally."""
    N, M = pos.shape[0], din_dirs.shape[0]
    pos_e = jnp.broadcast_to(pos[:, None, :], (N, M, 3))
    dout_e = jnp.broadcast_to(dout_dirs[:, None, :], (N, M, 3))
    din_e = jnp.broadcast_to(din_dirs[None, :, :], (N, M, 3))
    all_input = jnp.concatenate([pos_e, dout_e, din_e], -1).reshape(N * M, DIN)
    h = all_input
    for i in range(DEPTH):
        w, b = params[i]
        h = jnp.maximum(h @ w + b, 0.0)
        if i in SKIPS:
            h = jnp.concatenate([all_input, h], -1)
    wout, bout = params[-1]
    return (h @ wout + bout).reshape(N, M, DOUT)


def _reference_quant(params, pos, dout_dirs, din_dirs):
    """Reference mirroring the kernel's bf16-operand / f32-accum arithmetic."""
    bf = jnp.bfloat16
    f32 = jnp.float32
    A, B, C, D = _precompute_terms(params, pos, dout_dirs, din_dirs)
    h = jnp.maximum(A[:, None, :] + B[None, :, :] + params[0][1], 0.0)
    for i in (1, 2, 3, 4):
        w, b = params[i]
        h = jnp.maximum(
            jnp.dot(h.astype(bf), w.astype(bf), preferred_element_type=f32) + b,
            0.0)
    w5, b5 = params[5]
    z5 = jnp.dot(h.astype(bf), w5[DIN:].astype(bf), preferred_element_type=f32)
    h = jnp.maximum(z5 + C[:, None, :] + D[None, :, :] + b5, 0.0)
    for i in (6, 7):
        w, b = params[i]
        h = jnp.maximum(
            jnp.dot(h.astype(bf), w.astype(bf), preferred_element_type=f32) + b,
            0.0)
    wout, bout = params[-1]
    return jnp.dot(h.astype(bf), wout.astype(bf),
                   preferred_element_type=f32) + bout


# ----------------------------------------------------------------------------
if __name__ == "__main__":
    key = jax.random.PRNGKey(0)
    kp, kpos, kdo, kdi = jax.random.split(key, 4)

    params = init_params(kp)

    # --- small single-tile test ---
    N, M = 8, 8
    pos = jax.random.normal(kpos, (N, 3), dtype=jnp.float32)
    dout_dirs = jax.random.normal(kdo, (N, 3), dtype=jnp.float32)
    din_dirs = jax.random.normal(kdi, (M, 3), dtype=jnp.float32)

    out = jax.block_until_ready(prt_forward(params, pos, dout_dirs, din_dirs))
    assert out.shape == (N, M, DOUT)

    ref_q = _reference_quant(params, pos, dout_dirs, din_dirs)   # same precision
    ref_f = _reference_forward(params, pos, dout_dirs, din_dirs) # full f32
    assert jnp.allclose(out, ref_q, atol=1e-2, rtol=1e-2), "mismatch vs bf16 ref"
    assert jnp.allclose(out, ref_f, atol=0.15, rtol=0.1), "mismatch vs f32 ref"

    # --- multi-tile / padded-grid test (exercises grid > 1 and N/M padding) ---
    N2, M2 = 24, 300
    pos2 = jax.random.normal(jax.random.PRNGKey(1), (N2, 3), dtype=jnp.float32)
    dout2 = jax.random.normal(jax.random.PRNGKey(2), (N2, 3), dtype=jnp.float32)
    din2 = jax.random.normal(jax.random.PRNGKey(3), (M2, 3), dtype=jnp.float32)

    out2 = jax.block_until_ready(prt_forward(params, pos2, dout2, din2))
    assert out2.shape == (N2, M2, DOUT)
    ref_q2 = _reference_quant(params, pos2, dout2, din2)
    assert jnp.allclose(out2, ref_q2, atol=1e-2, rtol=1e-2), "mismatch vs bf16 ref"

    print("KERNEL_OK")
</pallas_src>

<mosaic_0001>
module attributes {stable_mosaic.version = 11 : i64} {
  func.func @_mlp_kernel(%arg0: i32, %arg1: i32, %arg2: memref<8x64xf32, #tpu.memory_space<vmem>>, %arg3: memref<8x64xf32, #tpu.memory_space<vmem>>, %arg4: memref<128x64xf32, #tpu.memory_space<vmem>>, %arg5: memref<128x64xf32, #tpu.memory_space<vmem>>, %arg6: memref<7x64x64xbf16, #tpu.memory_space<vmem>>, %arg7: memref<8x1x64xf32, #tpu.memory_space<vmem>>, %arg8: memref<8x64xbf16, #tpu.memory_space<vmem>>, %arg9: memref<8x1xf32, #tpu.memory_space<vmem>>, %arg10: memref<8x8x128xf32, #tpu.memory_space<vmem>>) attributes {dimension_semantics = [#tpu.dimension_semantics<parallel>, #tpu.dimension_semantics<parallel>], iteration_bounds = array<i64: 1, 1>, scalar_prefetch = 0 : i64, scratch_operands = 0 : i64, tpu.core_type = #tpu.core_type<tc>, window_params = [{transform_indices = @transform_0, window_bounds = array<i64: 8, 64>}, {transform_indices = @transform_1, window_bounds = array<i64: 8, 64>}, {transform_indices = @transform_2, window_bounds = array<i64: 128, 64>}, {transform_indices = @transform_3, window_bounds = array<i64: 128, 64>}, {pipeline_mode = #tpu.pipeline_mode<synchronous>, transform_indices = @transform_4, window_bounds = array<i64: 7, 64, 64>}, {pipeline_mode = #tpu.pipeline_mode<synchronous>, transform_indices = @transform_5, window_bounds = array<i64: 8, 1, 64>}, {pipeline_mode = #tpu.pipeline_mode<synchronous>, transform_indices = @transform_6, window_bounds = array<i64: 8, 64>}, {pipeline_mode = #tpu.pipeline_mode<synchronous>, transform_indices = @transform_7, window_bounds = array<i64: 8, 1>}, {transform_indices = @transform_8, window_bounds = array<i64: 8, 8, 128>}]} {
    %c0 = arith.constant 0 : index
    %c0_0 = arith.constant 0 : index
    %0 = vector.load %arg2[%c0, %c0_0] : memref<8x64xf32, #tpu.memory_space<vmem>>, vector<8x64xf32>
    %c0_1 = arith.constant 0 : index
    %c0_2 = arith.constant 0 : index
    %1 = vector.load %arg3[%c0_1, %c0_2] : memref<8x64xf32, #tpu.memory_space<vmem>>, vector<8x64xf32>
    %c0_3 = arith.constant 0 : index
    %c0_4 = arith.constant 0 : index
    %2 = vector.load %arg4[%c0_3, %c0_4] : memref<128x64xf32, #tpu.memory_space<vmem>>, vector<128x64xf32>
    %c0_5 = arith.constant 0 : index
    %c0_6 = arith.constant 0 : index
    %3 = vector.load %arg5[%c0_5, %c0_6] : memref<128x64xf32, #tpu.memory_space<vmem>>, vector<128x64xf32>
    %c0_7 = arith.constant 0 : index
    %c0_8 = arith.constant 0 : index
    %c0_9 = arith.constant 0 : index
    %4 = vector.load %arg7[%c0_7, %c0_8, %c0_9] : memref<8x1x64xf32, #tpu.memory_space<vmem>>, vector<1x1x64xf32>
    %5 = vector.shape_cast %4 : vector<1x1x64xf32> to vector<1x64xf32>
    %6 = vector.broadcast %5 : vector<1x64xf32> to vector<128x64xf32>
    %7 = arith.addf %2, %6 : vector<128x64xf32>
    %8 = vector.shape_cast %0 : vector<8x64xf32> to vector<8x1x64xf32>
    %9 = vector.shape_cast %7 : vector<128x64xf32> to vector<1x128x64xf32>
    %10 = vector.broadcast %8 : vector<8x1x64xf32> to vector<8x128x64xf32>
    %11 = vector.broadcast %9 : vector<1x128x64xf32> to vector<8x128x64xf32>
    %12 = arith.addf %10, %11 : vector<8x128x64xf32>
    %13 = vector.shape_cast %12 : vector<8x128x64xf32> to vector<1024x64xf32>
    %cst = arith.constant 0.000000e+00 : f32
    %14 = vector.broadcast %cst : f32 to vector<1024x64xf32>
    %15 = arith.maximumf %13, %14 : vector<1024x64xf32>
    %16 = arith.truncf %15 : vector<1024x64xf32> to vector<1024x64xbf16>
    %c0_10 = arith.constant 0 : index
    %c0_11 = arith.constant 0 : index
    %c0_12 = arith.constant 0 : index
    %17 = vector.load %arg6[%c0_10, %c0_11, %c0_12] : memref<7x64x64xbf16, #tpu.memory_space<vmem>>, vector<1x64x64xbf16>
    %18 = vector.shape_cast %17 : vector<1x64x64xbf16> to vector<64x64xbf16>
    %cst_13 = arith.constant dense<0.000000e+00> : vector<1024x64xf32>
    %19 = tpu.matmul %16, %18, %cst_13 {dimension_numbers = #tpu.dot_dimension_numbers<[1], [0], [0], [1], [0, 0, 1, 1], [], []>} : vector<1024x64xbf16>, vector<64x64xbf16>, vector<1024x64xf32> -> vector<1024x64xf32>
    %c1 = arith.constant 1 : index
    %c0_14 = arith.constant 0 : index
    %c0_15 = arith.constant 0 : index
    %20 = vector.load %arg7[%c1, %c0_14, %c0_15] : memref<8x1x64xf32, #tpu.memory_space<vmem>>, vector<1x1x64xf32>
    %21 = vector.shape_cast %20 : vector<1x1x64xf32> to vector<1x64xf32>
    %22 = vector.broadcast %21 : vector<1x64xf32> to vector<1024x64xf32>
    %23 = arith.addf %19, %22 : vector<1024x64xf32>
    %cst_16 = arith.constant 0.000000e+00 : f32
    %24 = vector.broadcast %cst_16 : f32 to vector<1024x64xf32>
    %25 = arith.maximumf %23, %24 : vector<1024x64xf32>
    %26 = arith.truncf %25 : vector<1024x64xf32> to vector<1024x64xbf16>
    %c1_17 = arith.constant 1 : index
    %c0_18 = arith.constant 0 : index
    %c0_19 = arith.constant 0 : index
    %27 = vector.load %arg6[%c1_17, %c0_18, %c0_19] : memref<7x64x64xbf16, #tpu.memory_space<vmem>>, vector<1x64x64xbf16>
    %28 = vector.shape_cast %27 : vector<1x64x64xbf16> to vector<64x64xbf16>
    %cst_20 = arith.constant dense<0.000000e+00> : vector<1024x64xf32>
    %29 = tpu.matmul %26, %28, %cst_20 {dimension_numbers = #tpu.dot_dimension_numbers<[1], [0], [0], [1], [0, 0, 1, 1], [], []>} : vector<1024x64xbf16>, vector<64x64xbf16>, vector<1024x64xf32> -> vector<1024x64xf32>
    %c2 = arith.constant 2 : index
    %c0_21 = arith.constant 0 : index
    %c0_22 = arith.constant 0 : index
    %30 = vector.load %arg7[%c2, %c0_21, %c0_22] : memref<8x1x64xf32, #tpu.memory_space<vmem>>, vector<1x1x64xf32>
    %31 = vector.shape_cast %30 : vector<1x1x64xf32> to vector<1x64xf32>
    %32 = vector.broadcast %31 : vector<1x64xf32> to vector<1024x64xf32>
    %33 = arith.addf %29, %32 : vector<1024x64xf32>
    %cst_23 = arith.constant 0.000000e+00 : f32
    %34 = vector.broadcast %cst_23 : f32 to vector<1024x64xf32>
    %35 = arith.maximumf %33, %34 : vector<1024x64xf32>
    %36 = arith.truncf %35 : vector<1024x64xf32> to vector<1024x64xbf16>
    %c2_24 = arith.constant 2 : index
    %c0_25 = arith.constant 0 : index
    %c0_26 = arith.constant 0 : index
    %37 = vector.load %arg6[%c2_24, %c0_25, %c0_26] : memref<7x64x64xbf16, #tpu.memory_space<vmem>>, vector<1x64x64xbf16>
    %38 = vector.shape_cast %37 : vector<1x64x64xbf16> to vector<64x64xbf16>
    %cst_27 = arith.constant dense<0.000000e+00> : vector<1024x64xf32>
    %39 = tpu.matmul %36, %38, %cst_27 {dimension_numbers = #tpu.dot_dimension_numbers<[1], [0], [0], [1], [0, 0, 1, 1], [], []>} : vector<1024x64xbf16>, vector<64x64xbf16>, vector<1024x64xf32> -> vector<1024x64xf32>
    %c3 = arith.constant 3 : index
    %c0_28 = arith.constant 0 : index
    %c0_29 = arith.constant 0 : index
    %40 = vector.load %arg7[%c3, %c0_28, %c0_29] : memref<8x1x64xf32, #tpu.memory_space<vmem>>, vector<1x1x64xf32>
    %41 = vector.shape_cast %40 : vector<1x1x64xf32> to vector<1x64xf32>
    %42 = vector.broadcast %41 : vector<1x64xf32> to vector<1024x64xf32>
    %43 = arith.addf %39, %42 : vector<1024x64xf32>
    %cst_30 = arith.constant 0.000000e+00 : f32
    %44 = vector.broadcast %cst_30 : f32 to vector<1024x64xf32>
    %45 = arith.maximumf %43, %44 : vector<1024x64xf32>
    %46 = arith.truncf %45 : vector<1024x64xf32> to vector<1024x64xbf16>
    %c3_31 = arith.constant 3 : index
    %c0_32 = arith.constant 0 : index
    %c0_33 = arith.constant 0 : index
    %47 = vector.load %arg6[%c3_31, %c0_32, %c0_33] : memref<7x64x64xbf16, #tpu.memory_space<vmem>>, vector<1x64x64xbf16>
    %48 = vector.shape_cast %47 : vector<1x64x64xbf16> to vector<64x64xbf16>
    %cst_34 = arith.constant dense<0.000000e+00> : vector<1024x64xf32>
    %49 = tpu.matmul %46, %48, %cst_34 {dimension_numbers = #tpu.dot_dimension_numbers<[1], [0], [0], [1], [0, 0, 1, 1], [], []>} : vector<1024x64xbf16>, vector<64x64xbf16>, vector<1024x64xf32> -> vector<1024x64xf32>
    %c4 = arith.constant 4 : index
    %c0_35 = arith.constant 0 : index
    %c0_36 = arith.constant 0 : index
    %50 = vector.load %arg7[%c4, %c0_35, %c0_36] : memref<8x1x64xf32, #tpu.memory_space<vmem>>, vector<1x1x64xf32>
    %51 = vector.shape_cast %50 : vector<1x1x64xf32> to vector<1x64xf32>
    %52 = vector.broadcast %51 : vector<1x64xf32> to vector<1024x64xf32>
    %53 = arith.addf %49, %52 : vector<1024x64xf32>
    %cst_37 = arith.constant 0.000000e+00 : f32
    %54 = vector.broadcast %cst_37 : f32 to vector<1024x64xf32>
    %55 = arith.maximumf %53, %54 : vector<1024x64xf32>
    %56 = arith.truncf %55 : vector<1024x64xf32> to vector<1024x64xbf16>
    %c4_38 = arith.constant 4 : index
    %c0_39 = arith.constant 0 : index
    %c0_40 = arith.constant 0 : index
    %57 = vector.load %arg6[%c4_38, %c0_39, %c0_40] : memref<7x64x64xbf16, #tpu.memory_space<vmem>>, vector<1x64x64xbf16>
    %58 = vector.shape_cast %57 : vector<1x64x64xbf16> to vector<64x64xbf16>
    %cst_41 = arith.constant dense<0.000000e+00> : vector<1024x64xf32>
    %59 = tpu.matmul %56, %58, %cst_41 {dimension_numbers = #tpu.dot_dimension_numbers<[1], [0], [0], [1], [0, 0, 1, 1], [], []>} : vector<1024x64xbf16>, vector<64x64xbf16>, vector<1024x64xf32> -> vector<1024x64xf32>
    %c5 = arith.constant 5 : index
    %c0_42 = arith.constant 0 : index
    %c0_43 = arith.constant 0 : index
    %60 = vector.load %arg7[%c5, %c0_42, %c0_43] : memref<8x1x64xf32, #tpu.memory_space<vmem>>, vector<1x1x64xf32>
    %61 = vector.shape_cast %60 : vector<1x1x64xf32> to vector<1x64xf32>
    %62 = vector.broadcast %61 : vector<1x64xf32> to vector<128x64xf32>
    %63 = arith.addf %3, %62 : vector<128x64xf32>
    %64 = vector.shape_cast %1 : vector<8x64xf32> to vector<8x1x64xf32>
    %65 = vector.shape_cast %63 : vector<128x64xf32> to vector<1x128x64xf32>
    %66 = vector.broadcast %64 : vector<8x1x64xf32> to vector<8x128x64xf32>
    %67 = vector.broadcast %65 : vector<1x128x64xf32> to vector<8x128x64xf32>
    %68 = arith.addf %66, %67 : vector<8x128x64xf32>
    %69 = vector.shape_cast %68 : vector<8x128x64xf32> to vector<1024x64xf32>
    %70 = arith.addf %59, %69 : vector<1024x64xf32>
    %cst_44 = arith.constant 0.000000e+00 : f32
    %71 = vector.broadcast %cst_44 : f32 to vector<1024x64xf32>
    %72 = arith.maximumf %70, %71 : vector<1024x64xf32>
    %73 = arith.truncf %72 : vector<1024x64xf32> to vector<1024x64xbf16>
    %c5_45 = arith.constant 5 : index
    %c0_46 = arith.constant 0 : index
    %c0_47 = arith.constant 0 : index
    %74 = vector.load %arg6[%c5_45, %c0_46, %c0_47] : memref<7x64x64xbf16, #tpu.memory_space<vmem>>, vector<1x64x64xbf16>
    %75 = vector.shape_cast %74 : vector<1x64x64xbf16> to vector<64x64xbf16>
    %cst_48 = arith.constant dense<0.000000e+00> : vector<1024x64xf32>
    %76 = tpu.matmul %73, %75, %cst_48 {dimension_numbers = #tpu.dot_dimension_numbers<[1], [0], [0], [1], [0, 0, 1, 1], [], []>} : vector<1024x64xbf16>, vector<64x64xbf16>, vector<1024x64xf32> -> vector<1024x64xf32>
    %c6 = arith.constant 6 : index
    %c0_49 = arith.constant 0 : index
    %c0_50 = arith.constant 0 : index
    %77 = vector.load %arg7[%c6, %c0_49, %c0_50] : memref<8x1x64xf32, #tpu.memory_space<vmem>>, vector<1x1x64xf32>
    %78 = vector.shape_cast %77 : vector<1x1x64xf32> to vector<1x64xf32>
    %79 = vector.broadcast %78 : vector<1x64xf32> to vector<1024x64xf32>
    %80 = arith.addf %76, %79 : vector<1024x64xf32>
    %cst_51 = arith.constant 0.000000e+00 : f32
    %81 = vector.broadcast %cst_51 : f32 to vector<1024x64xf32>
    %82 = arith.maximumf %80, %81 : vector<1024x64xf32>
    %83 = arith.truncf %82 : vector<1024x64xf32> to vector<1024x64xbf16>
    %c6_52 = arith.constant 6 : index
    %c0_53 = arith.constant 0 : index
    %c0_54 = arith.constant 0 : index
    %84 = vector.load %arg6[%c6_52, %c0_53, %c0_54] : memref<7x64x64xbf16, #tpu.memory_space<vmem>>, vector<1x64x64xbf16>
    %85 = vector.shape_cast %84 : vector<1x64x64xbf16> to vector<64x64xbf16>
    %cst_55 = arith.constant dense<0.000000e+00> : vector<1024x64xf32>
    %86 = tpu.matmul %83, %85, %cst_55 {dimension_numbers = #tpu.dot_dimension_numbers<[1], [0], [0], [1], [0, 0, 1, 1], [], []>} : vector<1024x64xbf16>, vector<64x64xbf16>, vector<1024x64xf32> -> vector<1024x64xf32>
    %c7 = arith.constant 7 : index
    %c0_56 = arith.constant 0 : index
    %c0_57 = arith.constant 0 : index
    %87 = vector.load %arg7[%c7, %c0_56, %c0_57] : memref<8x1x64xf32, #tpu.memory_space<vmem>>, vector<1x1x64xf32>
    %88 = vector.shape_cast %87 : vector<1x1x64xf32> to vector<1x64xf32>
    %89 = vector.broadcast %88 : vector<1x64xf32> to vector<1024x64xf32>
    %90 = arith.addf %86, %89 : vector<1024x64xf32>
    %cst_58 = arith.constant 0.000000e+00 : f32
    %91 = vector.broadcast %cst_58 : f32 to vector<1024x64xf32>
    %92 = arith.maximumf %90, %91 : vector<1024x64xf32>
    %93 = arith.truncf %92 : vector<1024x64xf32> to vector<1024x64xbf16>
    %c0_59 = arith.constant 0 : index
    %c0_60 = arith.constant 0 : index
    %94 = vector.load %arg8[%c0_59, %c0_60] : memref<8x64xbf16, #tpu.memory_space<vmem>>, vector<8x64xbf16>
    %cst_61 = arith.constant dense<0.000000e+00> : vector<8x1024xf32>
    %95 = tpu.matmul %94, %93, %cst_61 {dimension_numbers = #tpu.dot_dimension_numbers<[1], [1], [0], [0], [0, 0, 1, 0], [], []>} : vector<8x64xbf16>, vector<1024x64xbf16>, vector<8x1024xf32> -> vector<8x1024xf32>
    %c0_62 = arith.constant 0 : index
    %c0_63 = arith.constant 0 : index
    %96 = vector.load %arg9[%c0_62, %c0_63] : memref<8x1xf32, #tpu.memory_space<vmem>>, vector<8x1xf32>
    %97 = vector.broadcast %96 : vector<8x1xf32> to vector<8x1024xf32>
    %98 = arith.addf %95, %97 : vector<8x1024xf32>
    %99 = vector.extract_strided_slice %98 {offsets = [0, 0], sizes = [8, 128], strides = [1, 1]} : vector<8x1024xf32> to vector<8x128xf32>
    %c0_64 = arith.constant 0 : index
    %c0_65 = arith.constant 0 : index
    %c0_66 = arith.constant 0 : index
    %100 = vector.load %arg10[%c0_64, %c0_65, %c0_66] : memref<8x8x128xf32, #tpu.memory_space<vmem>>, vector<1x8x128xf32>
    %101 = vector.shape_cast %100 : vector<1x8x128xf32> to vector<8x128xf32>
    %102 = vector.shape_cast %99 : vector<8x128xf32> to vector<1x8x128xf32>
    tpu.vector_store %arg10[%c0_64, %c0_65, %c0_66], %102 {strides = array<i32>} : memref<8x8x128xf32, #tpu.memory_space<vmem>>, vector<1x8x128xf32>,
    %103 = vector.extract_strided_slice %98 {offsets = [0, 128], sizes = [8, 128], strides = [1, 1]} : vector<8x1024xf32> to vector<8x128xf32>
    %c1_67 = arith.constant 1 : index
    %c0_68 = arith.constant 0 : index
    %c0_69 = arith.constant 0 : index
    %104 = vector.load %arg10[%c1_67, %c0_68, %c0_69] : memref<8x8x128xf32, #tpu.memory_space<vmem>>, vector<1x8x128xf32>
    %105 = vector.shape_cast %104 : vector<1x8x128xf32> to vector<8x128xf32>
    %106 = vector.shape_cast %103 : vector<8x128xf32> to vector<1x8x128xf32>
    tpu.vector_store %arg10[%c1_67, %c0_68, %c0_69], %106 {strides = array<i32>} : memref<8x8x128xf32, #tpu.memory_space<vmem>>, vector<1x8x128xf32>,
    %107 = vector.extract_strided_slice %98 {offsets = [0, 256], sizes = [8, 128], strides = [1, 1]} : vector<8x1024xf32> to vector<8x128xf32>
    %c2_70 = arith.constant 2 : index
    %c0_71 = arith.constant 0 : index
    %c0_72 = arith.constant 0 : index
    %108 = vector.load %arg10[%c2_70, %c0_71, %c0_72] : memref<8x8x128xf32, #tpu.memory_space<vmem>>, vector<1x8x128xf32>
    %109 = vector.shape_cast %108 : vector<1x8x128xf32> to vector<8x128xf32>
    %110 = vector.shape_cast %107 : vector<8x128xf32> to vector<1x8x128xf32>
    tpu.vector_store %arg10[%c2_70, %c0_71, %c0_72], %110 {strides = array<i32>} : memref<8x8x128xf32, #tpu.memory_space<vmem>>, vector<1x8x128xf32>,
    %111 = vector.extract_strided_slice %98 {offsets = [0, 384], sizes = [8, 128], strides = [1, 1]} : vector<8x1024xf32> to vector<8x128xf32>
    %c3_73 = arith.constant 3 : index
    %c0_74 = arith.constant 0 : index
    %c0_75 = arith.constant 0 : index
    %112 = vector.load %arg10[%c3_73, %c0_74, %c0_75] : memref<8x8x128xf32, #tpu.memory_space<vmem>>, vector<1x8x128xf32>
    %113 = vector.shape_cast %112 : vector<1x8x128xf32> to vector<8x128xf32>
    %114 = vector.shape_cast %111 : vector<8x128xf32> to vector<1x8x128xf32>
    tpu.vector_store %arg10[%c3_73, %c0_74, %c0_75], %114 {strides = array<i32>} : memref<8x8x128xf32, #tpu.memory_space<vmem>>, vector<1x8x128xf32>,
    %115 = vector.extract_strided_slice %98 {offsets = [0, 512], sizes = [8, 128], strides = [1, 1]} : vector<8x1024xf32> to vector<8x128xf32>
    %c4_76 = arith.constant 4 : index
    %c0_77 = arith.constant 0 : index
    %c0_78 = arith.constant 0 : index
    %116 = vector.load %arg10[%c4_76, %c0_77, %c0_78] : memref<8x8x128xf32, #tpu.memory_space<vmem>>, vector<1x8x128xf32>
    %117 = vector.shape_cast %116 : vector<1x8x128xf32> to vector<8x128xf32>
    %118 = vector.shape_cast %115 : vector<8x128xf32> to vector<1x8x128xf32>
    tpu.vector_store %arg10[%c4_76, %c0_77, %c0_78], %118 {strides = array<i32>} : memref<8x8x128xf32, #tpu.memory_space<vmem>>, vector<1x8x128xf32>,
    %119 = vector.extract_strided_slice %98 {offsets = [0, 640], sizes = [8, 128], strides = [1, 1]} : vector<8x1024xf32> to vector<8x128xf32>
    %c5_79 = arith.constant 5 : index
    %c0_80 = arith.constant 0 : index
    %c0_81 = arith.constant 0 : index
    %120 = vector.load %arg10[%c5_79, %c0_80, %c0_81] : memref<8x8x128xf32, #tpu.memory_space<vmem>>, vector<1x8x128xf32>
    %121 = vector.shape_cast %120 : vector<1x8x128xf32> to vector<8x128xf32>
    %122 = vector.shape_cast %119 : vector<8x128xf32> to vector<1x8x128xf32>
    tpu.vector_store %arg10[%c5_79, %c0_80, %c0_81], %122 {strides = array<i32>} : memref<8x8x128xf32, #tpu.memory_space<vmem>>, vector<1x8x128xf32>,
    %123 = vector.extract_strided_slice %98 {offsets = [0, 768], sizes = [8, 128], strides = [1, 1]} : vector<8x1024xf32> to vector<8x128xf32>
    %c6_82 = arith.constant 6 : index
    %c0_83 = arith.constant 0 : index
    %c0_84 = arith.constant 0 : index
    %124 = vector.load %arg10[%c6_82, %c0_83, %c0_84] : memref<8x8x128xf32, #tpu.memory_space<vmem>>, vector<1x8x128xf32>
    %125 = vector.shape_cast %124 : vector<1x8x128xf32> to vector<8x128xf32>
    %126 = vector.shape_cast %123 : vector<8x128xf32> to vector<1x8x128xf32>
    tpu.vector_store %arg10[%c6_82, %c0_83, %c0_84], %126 {strides = array<i32>} : memref<8x8x128xf32, #tpu.memory_space<vmem>>, vector<1x8x128xf32>,
    %127 = vector.extract_strided_slice %98 {offsets = [0, 896], sizes = [8, 128], strides = [1, 1]} : vector<8x1024xf32> to vector<8x128xf32>
    %c7_85 = arith.constant 7 : index
    %c0_86 = arith.constant 0 : index
    %c0_87 = arith.constant 0 : index
    %128 = vector.load %arg10[%c7_85, %c0_86, %c0_87] : memref<8x8x128xf32, #tpu.memory_space<vmem>>, vector<1x8x128xf32>
    %129 = vector.shape_cast %128 : vector<1x8x128xf32> to vector<8x128xf32>
    %130 = vector.shape_cast %127 : vector<8x128xf32> to vector<1x8x128xf32>
    tpu.vector_store %arg10[%c7_85, %c0_86, %c0_87], %130 {strides = array<i32>} : memref<8x8x128xf32, #tpu.memory_space<vmem>>, vector<1x8x128xf32>,
    return
  }
  func.func @transform_0(%arg0: i32, %arg1: i32) -> (i32, i32) {
    %c0_i32 = arith.constant 0 : i32
    %c0_i32_0 = arith.constant 0 : i32
    return %arg0, %c0_i32 : i32, i32
  }
  func.func @transform_1(%arg0: i32, %arg1: i32) -> (i32, i32) {
    %c0_i32 = arith.constant 0 : i32
    %c0_i32_0 = arith.constant 0 : i32
    return %arg0, %c0_i32 : i32, i32
  }
  func.func @transform_2(%arg0: i32, %arg1: i32) -> (i32, i32) {
    %c0_i32 = arith.constant 0 : i32
    %c0_i32_0 = arith.constant 0 : i32
    return %arg1, %c0_i32 : i32, i32
  }
  func.func @transform_3(%arg0: i32, %arg1: i32) -> (i32, i32) {
    %c0_i32 = arith.constant 0 : i32
    %c0_i32_0 = arith.constant 0 : i32
    return %arg1, %c0_i32 : i32, i32
  }
  func.func @transform_4(%arg0: i32, %arg1: i32) -> (i32, i32, i32) {
    %c0_i32 = arith.constant 0 : i32
    %c0_i32_0 = arith.constant 0 : i32
    %c0_i32_1 = arith.constant 0 : i32
    %c0_i32_2 = arith.constant 0 : i32
    return %c0_i32, %c0_i32_0, %c0_i32_1 : i32, i32, i32
  }
  func.func @transform_5(%arg0: i32, %arg1: i32) -> (i32, i32, i32) {
    %c0_i32 = arith.constant 0 : i32
    %c0_i32_0 = arith.constant 0 : i32
    %c0_i32_1 = arith.constant 0 : i32
    %c0_i32_2 = arith.constant 0 : i32
    return %c0_i32, %c0_i32_0, %c0_i32_1 : i32, i32, i32
  }
  func.func @transform_6(%arg0: i32, %arg1: i32) -> (i32, i32) {
    %c0_i32 = arith.constant 0 : i32
    %c0_i32_0 = arith.constant 0 : i32
    %c0_i32_1 = arith.constant 0 : i32
    return %c0_i32, %c0_i32_0 : i32, i32
  }
  func.func @transform_7(%arg0: i32, %arg1: i32) -> (i32, i32) {
    %c0_i32 = arith.constant 0 : i32
    %c0_i32_0 = arith.constant 0 : i32
    %c0_i32_1 = arith.constant 0 : i32
    return %c0_i32, %c0_i32_0 : i32, i32
  }
  func.func @transform_8(%arg0: i32, %arg1: i32) -> (i32, i32, i32) {
    %c0_i32 = arith.constant 0 : i32
    %c0_i32_0 = arith.constant 0 : i32
    return %arg0, %c0_i32, %arg1 : i32, i32, i32
  }
}

</mosaic_0001>

<bundles_post_ra>
// kernel: prt_forward.1
= control target key start
LH: loop header
LB: loop body
LE: loop exit
PB: predicated region body
PF: predicated region fallthrough
CT: control target
= control target key end

     0   :  { %v92_v0 = vlaneseq  ;;  %v10036_v2 = vmov 1966171168   ;;  %vm537_vm0 = vcmask 523264   ;;  %s12459_s4 = inlined_call_operand.vmem [shape: bf16[7,64,64], index: 4, kind: input, shape index: {}]   ;;  %s12460_s0 = inlined_call_operand.vmem [shape: f32[8,64], index: 0, kind: input, shape index: {}]   ;;  %s12461_s2 = inlined_call_operand.vmem [shape: f32[128,64], index: 2, kind: input, shape index: {}]   ;;  %s12462_s5 = inlined_call_operand.vmem [shape: f32[8,1,64], index: 5, kind: input, shape index: {}]   ;;  %s12463_s1 = inlined_call_operand.vmem [shape: f32[8,64], index: 1, kind: input, shape index: {}]   ;;  %s12464_s3 = inlined_call_operand.vmem [shape: f32[128,64], index: 3, kind: input, shape index: {}]   ;;  %s12465_s6 = inlined_call_operand.vmem [shape: bf16[8,64], index: 6, kind: input, shape index: {}]   ;;  %s12466_s7 = inlined_call_operand.vmem [shape: f32[8,1], index: 7, kind: input, shape index: {}]   ;;  %s12467_s8 = inlined_call_operand.vmem [shape: f32[8,8,128], index: 8, kind: output, shape index: {}]  }
   0x1   :  { %v9999_v1 = vld [vmem:[%s12459_s4] sm:$0xff]   ;;  %v90_v3 = vunpack.c.l.s4 %v10036_v2  ;;  %v10000_v4 = vld [vmem:[%s12459_s4 + $0x8] sm:$0xff]   ;;  %v10001_v7 = vld [vmem:[%s12459_s4 + $0x10] sm:$0xff]  }
   0x2   :  { %v93_v5 = vshrl.u32 %v92_v0, 7  ;;  %9004 = vmatprep.subr.bf16.mxu0 %v9999_v1  ;;  %9956 = vmatprep.subr.bf16.mxu1 %v9999_v1  ;;  %v10095_v8 = vld [vmem:[%s12460_s0] sm:$0xff]  ;;  %v33_v11 = vld [vmem:[%s12461_s2 + $0x8] sm:$0xff]  ;;  %v10002_v15 = vld [vmem:[%s12459_s4 + $0x18] sm:$0xff]  }
   0x3   :  { %v91_v6 = vunpack.c.0.s8 %v90_v3  ;;  %9005 = vmatpush3.bf16.msra.mxu0 %v9999_v1  ;;  %9960 = vmatpush3.bf16.msra.mxu1 %v9999_v1  ;;  %v32_v9 = vld [vmem:[%s12461_s2] sm:$0xff]  ;;  %v34_v17 = vld [vmem:[%s12461_s2 + $0x10] sm:$0xff]  ;;  %v35_v18 = vld [vmem:[%s12461_s2 + $0x18] sm:$0xff] }
   0x4   :  { %9006 = vmatprep.subr.bf16.mxu0 %v10000_v4  ;;  %9957 = vmatprep.subr.bf16.mxu1 %v10000_v4  ;;  %v10108_v12 = vld [vmem:[%s12462_s5] ss:$0 sm:$0xff]  ;;  %v10114_v14 = vsub.s32 0, %v93_v5  ;;  %v37_v24 = vld [vmem:[%s12461_s2 + $0x28] sm:$0xff]  ;;  %v38_v25 = vld [vmem:[%s12461_s2 + $0x30] sm:$0xff] }
   0x5   :  { %v10100_v10 = vsub.s32 %v91_v6, %v93_v5  ;;  %v10120_v16 = vadd.f32 %v10108_v12, %v32_v9  ;;  %v10129_v19 = vadd.f32 %v10108_v12, %v33_v11  ;;  %v10136_v21 = vadd.f32 %v10108_v12, %v34_v17  ;;  %v36_v23 = vld [vmem:[%s12461_s2 + $0x20] sm:$0xff]  ;;  %v39_v28 = vld [vmem:[%s12461_s2 + $0x38] sm:$0xff]  ;;  %v41_v30 = vld [vmem:[%s12461_s2 + $0x48] sm:$0xff] }
   0x6   :  { %v10139_v22 = vadd.f32 %v10108_v12, %v35_v18  ;;  %v10151_v26 = vadd.f32 %v10108_v12, %v36_v23  ;;  %v10154_v27 = vadd.f32 %v10108_v12, %v37_v24  ;;  %v40_v29 = vld [vmem:[%s12461_s2 + $0x40] sm:$0xff]  ;;  %v10170_v32 = vadd.f32 %v10108_v12, %v38_v25  ;;  %v42_v46 = vld [vmem:[%s12461_s2 + $0x50] sm:$0xff]  ;;  %v43_v47 = vld [vmem:[%s12461_s2 + $0x58] sm:$0xff] }
   0x7   :  { %v10112_v13 = vrot.slane %v10095_v8, %v10100_v10  ;;  %9007 = vmatpush3.bf16.msra.mxu0 %v10000_v4  ;;  %9961 = vmatpush3.bf16.msra.mxu1 %v10000_v4  ;;  %v10173_v33 = vadd.f32 %v10108_v12, %v39_v28  ;;  %v10176_v34 = vadd.f32 %v10108_v12, %v40_v29  ;;  %v44_v52 = vld [vmem:[%s12461_s2 + $0x60] sm:$0xff]  ;;  %v45_v53 = vld [vmem:[%s12461_s2 + $0x68] sm:$0xff]  ;;  %v46_v4 = vld [vmem:[%s12461_s2 + $0x70] sm:$0xff] }
   0x8   :  { %9008 = vmatprep.subr.bf16.mxu0 %v10001_v7  ;;  %9958 = vmatprep.subr.bf16.mxu1 %v10001_v7  ;;  %v10179_v35 = vadd.f32 %v10108_v12, %v41_v30  ;;  %v10218_v62 = vadd.f32 %v10108_v12, %v42_v46  ;;  %v10221_v63 = vadd.f32 %v10108_v12, %v43_v47  ;;  %v47_v9 = vld [vmem:[%s12461_s2 + $0x78] sm:$0xff] }
   0x9   :  { %v10133_v20 = vrot.slane %v10112_v13, %v10100_v10  ;;  %v103_v59 = vcombine.high %v10112_v13, %v10112_v13  ;;  %v10225_v2 = vadd.f32 %v10108_v12, %v44_v52  ;;  %v10228_v3 = vadd.f32 %v10108_v12, %v45_v53 }
   0xa   :  { %v10249_v24 = vadd.f32 %v10108_v12, %v46_v4  ;;  %v10252_v25 = vadd.f32 %v10108_v12, %v47_v9 }
   0xb   :  { %v10167_v31 = vrot.slane %v10133_v20, %v10114_v14  ;;  %9009 = vmatpush3.bf16.msra.mxu0 %v10001_v7  ;;  %9962 = vmatpush3.bf16.msra.mxu1 %v10001_v7  ;;  %v10245_v17 = vrot.slane %v103_v59, %v10100_v10 }
   0xc   :  { %9010 = vmatprep.subr.bf16.mxu0 %v10002_v15  ;;  %9959 = vmatprep.subr.bf16.mxu1 %v10002_v15 }
   0xd   :  { %v177_v36 = vadd.f32 %v10167_v31, %v10120_v16  ;;  %v178_v37 = vadd.f32 %v10167_v31, %v10129_v19  ;;  %v179_v38 = vadd.f32 %v10167_v31, %v10136_v21  ;;  %v180_v39 = vadd.f32 %v10167_v31, %v10139_v22 }
   0xe   :  { %v181_v40 = vadd.f32 %v10167_v31, %v10151_v26  ;;  %v182_v41 = vadd.f32 %v10167_v31, %v10154_v27  ;;  %v183_v50 = vadd.f32 %v10167_v31, %v10170_v32  ;;  %v184_v51 = vadd.f32 %v10167_v31, %v10173_v33 }
   0xf   :  { %v305_v42 = vmax.f32 %v177_v36, 0.0  ;;  %v306_v43 = vmax.f32 %v178_v37, 0.0  ;;  %v307_v44 = vmax.f32 %v179_v38, 0.0  ;;  %v308_v45 = vmax.f32 %v180_v39, 0.0  ;;  %9011 = vmatpush3.bf16.msra.mxu0 %v10002_v15  ;;  %9963 = vmatpush3.bf16.msra.mxu1 %v10002_v15 }
  0x10   :  { %v309_v48 = vmax.f32 %v181_v40, 0.0  ;;  %v310_v49 = vmax.f32 %v182_v41, 0.0  ;;  %v185_v56 = vadd.f32 %v10167_v31, %v10176_v34  ;;  %v186_v57 = vadd.f32 %v10167_v31, %v10179_v35 }
  0x11   :  { %v433_v54 = vpack.c.bf16 %v306_v43, %v305_v42  ;;  %v434_v55 = vpack.c.bf16 %v308_v45, %v307_v44  ;;  %v311_v60 = vmax.f32 %v183_v50, 0.0  ;;  %v312_v61 = vmax.f32 %v184_v51, 0.0 }
  0x12   :  { %v435_v58 = vpack.c.bf16 %v310_v49, %v309_v48  ;;  %v313_v0 = vmax.f32 %v185_v56, 0.0  ;;  %v314_v1 = vmax.f32 %v186_v57, 0.0  ;;  %v187_v6 = vadd.f32 %v10167_v31, %v10218_v62 }
  0x13   :  { %9012 = vmatprep.mubr.msk.bf16.mxu0 %vm537_vm0, %v433_v54  ;;  %v436_v5 = vpack.c.bf16 %v312_v61, %v311_v60  ;;  %v188_v7 = vadd.f32 %v10167_v31, %v10221_v63  ;;  %v189_v13 = vadd.f32 %v10167_v31, %v10225_v2  ;;  %v190_v15 = vadd.f32 %v10167_v31, %v10228_v3 }
  0x14   :  { %9013 = vmatmul.mubr.msk.bf16.vlgmr.msra.gmra.mrb[0].mxu0 %vm537_vm0, %v434_v55  ;;  %v437_v11 = vpack.c.bf16 %v314_v1, %v313_v0  ;;  %v315_v18 = vmax.f32 %v187_v6, 0.0  ;;  %v144_v30 = vrot.slane %v10245_v17, %v10114_v14  ;;  %v191_v37 = vadd.f32 %v10167_v31, %v10249_v24 }
  0x15   :  { %9016 = vmatprep.mubr.msk.bf16.mxu0 %vm537_vm0, %v435_v58  ;;  %v316_v23 = vmax.f32 %v188_v7, 0.0  ;;  %v317_v28 = vmax.f32 %v189_v13, 0.0  ;;  %v318_v29 = vmax.f32 %v190_v15, 0.0  ;;  %v192_v38 = vadd.f32 %v10167_v31, %v10252_v25 }
  0x16   :  { %v193_v40 = vadd.f32 %v144_v30, %v10120_v16  ;;  %v194_v12 = vadd.f32 %v144_v30, %v10129_v19  ;;  %v319_v41 = vmax.f32 %v191_v37, 0.0  ;;  %v195_v46 = vadd.f32 %v144_v30, %v10136_v21 }
  0x17   :  { %v438_v36 = vpack.c.bf16 %v316_v23, %v315_v18  ;;  %v439_v39 = vpack.c.bf16 %v318_v29, %v317_v28  ;;  %v320_v42 = vmax.f32 %v192_v38, 0.0  ;;  %v196_v47 = vadd.f32 %v144_v30, %v10139_v22 }
  0x18   :  { %v321_v43 = vmax.f32 %v193_v40, 0.0  ;;  %v322_v44 = vmax.f32 %v194_v12, 0.0  ;;  %v197_v31 = vadd.f32 %v144_v30, %v10151_v26  ;;  %v198_v49 = vadd.f32 %v144_v30, %v10154_v27 }
  0x19   :  { %v440_v45 = vpack.c.bf16 %v320_v42, %v319_v41  ;;  %v323_v50 = vmax.f32 %v195_v46, 0.0  ;;  %v324_v51 = vmax.f32 %v196_v47, 0.0  ;;  %v199_v55 = vadd.f32 %v144_v30, %v10170_v32 }
  0x1a   :  { %v441_v48 = vpack.c.bf16 %v322_v44, %v321_v43  ;;  %v325_v52 = vmax.f32 %v197_v31, 0.0  ;;  %v326_v53 = vmax.f32 %v198_v49, 0.0  ;;  %v200_v56 = vadd.f32 %v144_v30, %v10173_v33 }
  0x1b   :  { %v442_v54 = vpack.c.bf16 %v324_v51, %v323_v50  ;;  %v201_v58 = vadd.f32 %v144_v30, %v10176_v34  ;;  %v202_v59 = vadd.f32 %v144_v30, %v10179_v35  ;;  %v327_v60 = vmax.f32 %v199_v55, 0.0 }
  0x1c   :  { %9017 = vmatmul.mubr.msk.bf16.gmra.mrb[4].mxu0 %vm537_vm0, %v436_v5  ;;  %v443_v57 = vpack.c.bf16 %v326_v53, %v325_v52  ;;  %v328_v61 = vmax.f32 %v200_v56, 0.0  ;;  %v203_v5 = vadd.f32 %v144_v30, %v10218_v62  ;;  %v204_v6 = vadd.f32 %v144_v30, %v10221_v63 }
  0x1d   :  { %9020 = vmatprep.mubr.msk.bf16.mxu0 %vm537_vm0, %v437_v11  ;;  %v329_v0 = vmax.f32 %v201_v58, 0.0  ;;  %v330_v1 = vmax.f32 %v202_v59, 0.0  ;;  %v133_v7 = vcombine.high %v10133_v20, %v10133_v20  ;;  %v205_v11 = vadd.f32 %v144_v30, %v10225_v2 }
  0x1e   :  { %v444_v4 = vpack.c.bf16 %v328_v61, %v327_v60  ;;  %v206_v13 = vadd.f32 %v144_v30, %v10228_v3  ;;  %v331_v15 = vmax.f32 %v203_v5, 0.0  ;;  %v332_v18 = vmax.f32 %v204_v6, 0.0 }
  0x1f   :  { %v445_v9 = vpack.c.bf16 %v330_v1, %v329_v0  ;;  %v333_v23 = vmax.f32 %v205_v11, 0.0  ;;  %v10286_v29 = vrot.slane %v133_v7, %v10114_v14  ;;  %v207_v37 = vadd.f32 %v144_v30, %v10249_v24 }
  0x20   :  { %v334_v28 = vmax.f32 %v206_v13, 0.0  ;;  %v208_v20 = vadd.f32 %v144_v30, %v10252_v25  ;;  %v88_v12 = vcombine.high %v10095_v8, %v10095_v8 }
  0x21   :  { %v210_v40 = vadd.f32 %v10286_v29, %v10129_v19  ;;  %v335_v41 = vmax.f32 %v207_v37, 0.0  ;;  %v211_v46 = vadd.f32 %v10286_v29, %v10136_v21  ;;  %v212_v47 = vadd.f32 %v10286_v29, %v10139_v22 }
  0x22   :  { %v447_v38 = vpack.c.bf16 %v334_v28, %v333_v23  ;;  %v336_v42 = vmax.f32 %v208_v20, 0.0  ;;  %v10299_v30 = vrot.slane %v88_v12, %v10100_v10  ;;  %v213_v8 = vadd.f32 %v10286_v29, %v10151_v26 }
  0x23   :  { %v338_v44 = vmax.f32 %v210_v40, 0.0  ;;  %v214_v31 = vadd.f32 %v10286_v29, %v10154_v27  ;;  %v339_v50 = vmax.f32 %v211_v46, 0.0  ;;  %v340_v51 = vmax.f32 %v212_v47, 0.0 }
  0x24   :  { %9021 = vmatmul.mubr.msk.bf16.gmra.mrb[8].mxu0 %vm537_vm0, %v438_v36  ;;  %v446_v36 = vpack.c.bf16 %v332_v18, %v331_v15  ;;  %v104_v49 = vcombine.high %v10299_v30, %v10299_v30  ;;  %v341_v52 = vmax.f32 %v213_v8, 0.0  ;;  %v215_v55 = vadd.f32 %v10286_v29, %v10170_v32 }
  0x25   :  { %9024 = vmatprep.mubr.msk.bf16.mxu0 %vm537_vm0, %v439_v39  ;;  %v209_v39 = vadd.f32 %v10286_v29, %v10120_v16  ;;  %v342_v53 = vmax.f32 %v214_v31, 0.0  ;;  %v216_v58 = vadd.f32 %v10286_v29, %v10173_v33  ;;  %v217_v59 = vadd.f32 %v10286_v29, %v10176_v34 }
  0x26   :  { %v218_v60 = vadd.f32 %v10286_v29, %v10179_v35  ;;  %v343_v7 = vmax.f32 %v215_v55, 0.0  ;;  %v220_v37 = vadd.f32 %v10286_v29, %v10221_v63  ;;  %v221_v20 = vadd.f32 %v10286_v29, %v10225_v2 }
  0x27   :  { %v337_v43 = vmax.f32 %v209_v39, 0.0  ;;  %v451_v61 = vpack.c.bf16 %v342_v53, %v341_v52  ;;  %v345_v11 = vmax.f32 %v217_v59, 0.0  ;;  %v222_v12 = vadd.f32 %v10286_v29, %v10228_v3  ;;  %v10004_v53 = vld [vmem:[%s12459_s4 + $0x20] sm:$0xff]  }
  0x28   :  { %v346_v13 = vmax.f32 %v218_v60, 0.0  ;;  %9140 = vmatprep.subr.bf16.mxu1 %v10004_v53 }
  0x2c   :  { %9025 = vmatmul.mubr.msk.bf16.gmra.mrb[12].mxu0 %vm537_vm0, %v440_v45  ;;  %v448_v45 = vpack.c.bf16 %v336_v42, %v335_v41 }
  0x2d   :  { %9028 = vmatprep.mubr.msk.bf16.mxu0 %vm537_vm0, %v441_v48  ;;  %v449_v48 = vpack.c.bf16 %v338_v44, %v337_v43  ;;  %v453_v43 = vpack.c.bf16 %v346_v13, %v345_v11  ;;  %v135_v44 = vcombine.high %v10245_v17, %v10245_v17  ;;  %v350_v17 = vmax.f32 %v222_v12, 0.0  ;;  %v10006_v12 = vld [vmem:[%s12459_s4 + $0x30] sm:$0xff]  }
  0x2f   :  { %v10365_v55 = vrot.slane %v135_v44, %v10114_v14 }
  0x34   :  { %9029 = vmatmul.mubr.msk.bf16.gmra.mrb[16].mxu0 %vm537_vm0, %v442_v54  ;;  %v10314_v54 = vrot.slane %v104_v49, %v10100_v10 }
  0x35   :  { %9032 = vmatprep.mubr.msk.bf16.mxu0 %vm537_vm0, %v443_v57  ;;  %v450_v57 = vpack.c.bf16 %v340_v51, %v339_v50  ;;  %v348_v50 = vmax.f32 %v220_v37, 0.0  ;;  %v349_v51 = vmax.f32 %v221_v20, 0.0 }
  0x36   :  { %v136_v56 = vcombine.high %v10314_v54, %v10314_v54 }
  0x37   :  { %v455_v60 = vpack.c.bf16 %v350_v17, %v349_v51  ;;  %v233_v51 = vadd.f32 %v10365_v55, %v10176_v34  ;;  %v234_v17 = vadd.f32 %v10365_v55, %v10179_v35 }
  0x38   :  { %v10327_v0 = vrot.slane %v136_v56, %v10114_v14 }
  0x3a   :  { %v293_v1 = vadd.f32 %v10327_v0, %v10151_v26  ;;  %v295_v5 = vadd.f32 %v10327_v0, %v10170_v32  ;;  %v296_v6 = vadd.f32 %v10327_v0, %v10173_v33  ;;  %v297_v41 = vadd.f32 %v10327_v0, %v10176_v34 }
  0x3b   :  { %v298_v42 = vadd.f32 %v10327_v0, %v10179_v35  ;;  %v300_v46 = vadd.f32 %v10327_v0, %v10221_v63 }
  0x3c   :  { %9033 = vmatmul.mubr.msk.bf16.gmra.mrb[20].mxu0 %vm537_vm0, %v444_v4  ;;  %v294_v4 = vadd.f32 %v10327_v0, %v10154_v27  ;;  %v421_v15 = vmax.f32 %v293_v1, 0.0  ;;  %v423_v23 = vmax.f32 %v295_v5, 0.0  ;;  %v424_v28 = vmax.f32 %v296_v6, 0.0 }
  0x3d   :  { %9036 = vmatprep.mubr.msk.bf16.mxu0 %vm537_vm0, %v445_v9  ;;  %v344_v9 = vmax.f32 %v216_v58, 0.0  ;;  %v425_v47 = vmax.f32 %v297_v41, 0.0  ;;  %v428_v49 = vmax.f32 %v300_v46, 0.0  ;;  %v224_v58 = vadd.f32 %v10286_v29, %v10252_v25  ;;  %v10007_v46 = vld [vmem:[%s12459_s4 + $0x38] sm:$0xff]  }
  0x3e   :  { %v422_v18 = vmax.f32 %v294_v4, 0.0  ;;  %v492_v39 = vpack.c.bf16 %v424_v28, %v423_v23  ;;  %v302_v1 = vadd.f32 %v10327_v0, %v10228_v3  ;;  %v225_v4 = vadd.f32 %v10365_v55, %v10120_v16  ;;  %v10005_v28 = vld [vmem:[%s12459_s4 + $0x28] sm:$0xff]  }
  0x3f   :  { %v452_v40 = vpack.c.bf16 %v344_v9, %v343_v7  ;;  %v226_v5 = vadd.f32 %v10365_v55, %v10129_v19  ;;  %v303_v6 = vadd.f32 %v10327_v0, %v10249_v24 }
  0x40   :  { %v430_v9 = vmax.f32 %v302_v1, 0.0  ;;  %v237_v1 = vadd.f32 %v10365_v55, %v10225_v2 }
  0x41   :  { %v431_v11 = vmax.f32 %v303_v6, 0.0  ;;  %v354_v37 = vmax.f32 %v226_v5, 0.0  ;;  %v10428_v5 = vrot.slane %v10299_v30, %v10100_v10 }
  0x44   :  { %9037 = vmatmul.mubr.msk.bf16.gmra.mrb[24].mxu0 %vm537_vm0, %v446_v36  ;;  %v219_v36 = vadd.f32 %v10286_v29, %v10218_v62 }
  0x45   :  { %9040 = vmatprep.mubr.msk.bf16.mxu0 %vm537_vm0, %v447_v38  ;;  %v491_v38 = vpack.c.bf16 %v422_v18, %v421_v15  ;;  %v352_v18 = vmax.f32 %v224_v58, 0.0 }
  0x46   :  { %v347_v8 = vmax.f32 %v219_v36, 0.0  ;;  %v353_v36 = vmax.f32 %v225_v4, 0.0  ;;  %v238_v4 = vadd.f32 %v10365_v55, %v10228_v3 }
  0x47   :  { %9128 = vmatprep.mubr.msk.bf16.mxu1 %vm537_vm0, %v491_v38 }
  0x48   :  { %9129 = vmatmul.mubr.msk.bf16.vlgmr.msra.gmra.mrb[0].mxu1 %vm537_vm0, %v492_v39  ;;  %v454_v59 = vpack.c.bf16 %v348_v50, %v347_v8  ;;  %v227_v39 = vadd.f32 %v10365_v55, %v10136_v21  ;;  %v457_v41 = vpack.c.bf16 %v354_v37, %v353_v36 }
  0x49   :  { %9141 = vmatpush3.bf16.msra.mxu1 %v10004_v53 }
  0x4a   :  { %9142 = vmatprep.subr.bf16.mxu1 %v10005_v28  ;;  %v355_v44 = vmax.f32 %v227_v39, 0.0 }
  0x4c   :  { %9041 = vmatmul.mubr.msk.bf16.gmra.mrb[28].mxu0 %vm537_vm0, %v448_v45  ;;  %v299_v45 = vadd.f32 %v10327_v0, %v10218_v62 }
  0x4d   :  { %9044 = vmatprep.mubr.msk.bf16.mxu0 %vm537_vm0, %v449_v48  ;;  %v426_v48 = vmax.f32 %v298_v42, 0.0  ;;  %9143 = vmatpush3.bf16.msra.mxu1 %v10005_v28  ;;  %v229_v42 = vadd.f32 %v10365_v55, %v10151_v26 }
  0x4e   :  { %v427_v31 = vmax.f32 %v299_v45, 0.0  ;;  %9144 = vmatprep.subr.bf16.mxu1 %v10006_v12 }
  0x4f   :  { %v493_v52 = vpack.c.bf16 %v426_v48, %v425_v47  ;;  %v357_v47 = vmax.f32 %v229_v42, 0.0 }
  0x50   :  { %v494_v56 = vpack.c.bf16 %v428_v49, %v427_v31  ;;  %v231_v31 = vadd.f32 %v10365_v55, %v10170_v32  ;;  %v232_v49 = vadd.f32 %v10365_v55, %v10173_v33 }
  0x51   :  { %9132 = vmatprep.mubr.msk.bf16.mxu1 %vm537_vm0, %v493_v52  ;;  %9145 = vmatpush3.bf16.msra.mxu1 %v10006_v12 }
  0x52   :  { %9133 = vmatmul.mubr.msk.bf16.gmra.mrb[4].mxu1 %vm537_vm0, %v494_v56  ;;  %9146 = vmatprep.subr.bf16.mxu1 %v10007_v46  ;;  %v359_v52 = vmax.f32 %v231_v31, 0.0  ;;  %v360_v53 = vmax.f32 %v232_v49, 0.0  ;;  %v361_v56 = vmax.f32 %v233_v51, 0.0 }
  0x54   :  { %9045 = vmatmul.mubr.msk.bf16.gmra.mrb[32].mxu0 %vm537_vm0, %v450_v57  ;;  %v223_v57 = vadd.f32 %v10286_v29, %v10249_v24  ;;  %v304_v29 = vadd.f32 %v10327_v0, %v10252_v25  ;;  %v460_v58 = vpack.c.bf16 %v360_v53, %v359_v52 }
  0x55   :  { %9048 = vmatprep.mubr.msk.bf16.mxu0 %vm537_vm0, %v451_v61  ;;  %v301_v61 = vadd.f32 %v10327_v0, %v10225_v2  ;;  %9147 = vmatpush3.bf16.msra.mxu1 %v10007_v46 }
  0x56   :  { %v432_v13 = vmax.f32 %v304_v29, 0.0  ;;  %v351_v15 = vmax.f32 %v223_v57, 0.0  ;;  %v362_v57 = vmax.f32 %v234_v17, 0.0 }
  0x57   :  { %v429_v7 = vmax.f32 %v301_v61, 0.0 }
  0x58   :  { %v496_v20 = vpack.c.bf16 %v432_v13, %v431_v11  ;;  %v456_v38 = vpack.c.bf16 %v352_v18, %v351_v15  ;;  %v461_v61 = vpack.c.bf16 %v362_v57, %v361_v56  ;;  %v156_v11 = vrot.slane %v10428_v5, %v10114_v14 }
  0x59   :  { %v495_v23 = vpack.c.bf16 %v430_v9, %v429_v7  ;;  %v365_v7 = vmax.f32 %v237_v1, 0.0  ;;  %v366_v9 = vmax.f32 %v238_v4, 0.0  ;;  %v239_v15 = vadd.f32 %v10365_v55, %v10249_v24 }
  0x5a   :  { %v240_v18 = vadd.f32 %v10365_v55, %v10252_v25  ;;  %v242_v28 = vadd.f32 %v156_v11, %v10129_v19  ;;  %v244_v12 = vadd.f32 %v156_v11, %v10139_v22  ;;  %v246_v42 = vadd.f32 %v156_v11, %v10154_v27 }
  0x5b   :  { %9136 = vmatprep.mubr.msk.bf16.mxu1 %vm537_vm0, %v495_v23  ;;  %v463_v30 = vpack.c.bf16 %v366_v9, %v365_v7  ;;  %v241_v23 = vadd.f32 %v156_v11, %v10120_v16  ;;  %v367_v36 = vmax.f32 %v239_v15, 0.0  ;;  %v249_v49 = vadd.f32 %v156_v11, %v10176_v34 }
  0x5c   :  { %9049 = vmatmul.mubr.msk.bf16.gmra.mrb[36].mxu0 %vm537_vm0, %v452_v40  ;;  %v228_v40 = vadd.f32 %v10365_v55, %v10139_v22  ;;  %9137 = vmatmul.mubr.msk.bf16.gmra.mrb[8].mxu1 %vm537_vm0, %v496_v20  ;;  %v368_v37 = vmax.f32 %v240_v18, 0.0  ;;  %v374_v46 = vmax.f32 %v246_v42, 0.0  ;;  %v251_v57 = vadd.f32 %v156_v11, %v10218_v62 }
  0x5d   :  { %9052 = vmatprep.mubr.msk.bf16.mxu0 %vm537_vm0, %v453_v43  ;;  %v230_v43 = vadd.f32 %v10365_v55, %v10154_v27  ;;  %v369_v20 = vmax.f32 %v241_v23, 0.0  ;;  %v377_v52 = vmax.f32 %v249_v49, 0.0  ;;  %v160_v7 = vrot.slane %v10314_v54, %v10114_v14 }
  0x5e   :  { %v356_v45 = vmax.f32 %v228_v40, 0.0  ;;  %v464_v39 = vpack.c.bf16 %v368_v37, %v367_v36  ;;  %v243_v40 = vadd.f32 %v156_v11, %v10136_v21  ;;  %v379_v1 = vmax.f32 %v251_v57, 0.0 }
  0x5f   :  { %v358_v48 = vmax.f32 %v230_v43, 0.0  ;;  %v256_v15 = vadd.f32 %v156_v11, %v10252_v25  ;;  %v258_v23 = vadd.f32 %v160_v7, %v10129_v19  ;;  %v259_v54 = vadd.f32 %v160_v7, %v10136_v21 }
  0x60   :  { %v458_v8 = vpack.c.bf16 %v356_v45, %v355_v44  ;;  %v371_v43 = vmax.f32 %v243_v40, 0.0  ;;  %v372_v44 = vmax.f32 %v244_v12, 0.0  ;;  %v262_v12 = vadd.f32 %v160_v7, %v10154_v27 }
  0x61   :  { %v459_v50 = vpack.c.bf16 %v358_v48, %v357_v47  ;;  %v247_v48 = vadd.f32 %v156_v11, %v10170_v32  ;;  %v384_v36 = vmax.f32 %v256_v15, 0.0  ;;  %v269_v57 = vadd.f32 %v160_v7, %v10225_v2 }
  0x62   :  { %v466_v47 = vpack.c.bf16 %v372_v44, %v371_v43  ;;  %v390_v43 = vmax.f32 %v262_v12, 0.0 }
  0x63   :  { %v375_v51 = vmax.f32 %v247_v48, 0.0  ;;  %v265_v48 = vadd.f32 %v160_v7, %v10176_v34 }
  0x64   :  { %9053 = vmatmul.mubr.msk.bf16.gmra.mrb[40].mxu0 %vm537_vm0, %v454_v59  ;;  %v235_v59 = vadd.f32 %v10365_v55, %v10218_v62 }
  0x65   :  { %9056 = vmatprep.mubr.msk.bf16.mxu0 %vm537_vm0, %v455_v60  ;;  %v236_v60 = vadd.f32 %v10365_v55, %v10221_v63  ;;  %v245_v55 = vadd.f32 %v156_v11, %v10151_v26 }
  0x66   :  { %v363_v6 = vmax.f32 %v235_v59, 0.0 }
  0x67   :  { %v364_v29 = vmax.f32 %v236_v60, 0.0  ;;  %v373_v45 = vmax.f32 %v245_v55, 0.0  ;;  %v253_v60 = vadd.f32 %v156_v11, %v10225_v2 }
  0x69   :  { %v462_v13 = vpack.c.bf16 %v364_v29, %v363_v6  ;;  %v467_v31 = vpack.c.bf16 %v374_v46, %v373_v45  ;;  %v381_v6 = vmax.f32 %v253_v60, 0.0  ;;  %v263_v45 = vadd.f32 %v160_v7, %v10170_v32 }
  0x6a   :  { %v264_v46 = vadd.f32 %v160_v7, %v10173_v33 }
  0x6c   :  { %9057 = vmatmul.mubr.msk.bf16.gmra.mrb[44].mxu0 %vm537_vm0, %v456_v38  ;;  %v370_v38 = vmax.f32 %v242_v28, 0.0  ;;  %v392_v49 = vmax.f32 %v264_v46, 0.0 }
  0x6d   :  { %9060 = vmatprep.mubr.msk.bf16.mxu0 %vm537_vm0, %v457_v41 }
  0x6e   :  { %v465_v41 = vpack.c.bf16 %v370_v38, %v369_v20  ;;  %v386_v20 = vmax.f32 %v258_v23, 0.0 }
  0x74   :  { %9061 = vmatmul.mubr.msk.bf16.gmra.mrb[48].mxu0 %vm537_vm0, %v458_v8  ;;  %v248_v8 = vadd.f32 %v156_v11, %v10173_v33 }
  0x75   :  { %9064 = vmatprep.mubr.msk.bf16.mxu0 %vm537_vm0, %v459_v50  ;;  %v250_v50 = vadd.f32 %v156_v11, %v10179_v35 }
  0x76   :  { %v376_v17 = vmax.f32 %v248_v8, 0.0  ;;  %v266_v8 = vadd.f32 %v160_v7, %v10179_v35 }
  0x77   :  { %v378_v53 = vmax.f32 %v250_v50, 0.0  ;;  %v393_v50 = vmax.f32 %v265_v48, 0.0 }
  0x78   :  { %v468_v56 = vpack.c.bf16 %v376_v17, %v375_v51  ;;  %v394_v51 = vmax.f32 %v266_v8, 0.0 }
  0x79   :  { %v469_v59 = vpack.c.bf16 %v378_v53, %v377_v52  ;;  %v267_v52 = vadd.f32 %v160_v7, %v10218_v62  ;;  %v268_v53 = vadd.f32 %v160_v7, %v10221_v63 }
  0x7b   :  { %v395_v60 = vmax.f32 %v267_v52, 0.0 }
  0x7c   :  { %9065 = vmatmul.mubr.msk.bf16.gmra.mrb[52].mxu0 %vm537_vm0, %v460_v58  ;;  %v252_v58 = vadd.f32 %v156_v11, %v10221_v63 }
  0x7d   :  { %9068 = vmatprep.mubr.msk.bf16.mxu0 %vm537_vm0, %v461_v61  ;;  %v254_v61 = vadd.f32 %v156_v11, %v10228_v3 }
  0x7e   :  { %v380_v4 = vmax.f32 %v252_v58, 0.0  ;;  %v270_v58 = vadd.f32 %v160_v7, %v10228_v3 }
  0x7f   :  { %v382_v29 = vmax.f32 %v254_v61, 0.0  ;;  %v396_v61 = vmax.f32 %v268_v53, 0.0 }
  0x80   :  { %v470_v9 = vpack.c.bf16 %v380_v4, %v379_v1  ;;  %v397_v1 = vmax.f32 %v269_v57, 0.0  ;;  %v398_v4 = vmax.f32 %v270_v58, 0.0  ;;  %v10523_v58 = vld [vmem:[%s12462_s5 + $0x1] ss:$0 sm:$0xff] }
  0x81   :  { %v471_v18 = vpack.c.bf16 %v382_v29, %v381_v6  ;;  %v478_v29 = vpack.c.bf16 %v396_v61, %v395_v60 }
  0x82   :  { %v479_v15 = vpack.c.bf16 %v398_v4, %v397_v1  ;;  %v292_v1 = vadd.f32 %v10327_v0, %v10139_v22 }
  0x84   :  { %9069 = vmatmul.mubr.msk.bf16.gmra.mrb[56].mxu0 %vm537_vm0, %v462_v13  ;;  %v255_v13 = vadd.f32 %v156_v11, %v10249_v24  ;;  %v261_v11 = vadd.f32 %v160_v7, %v10151_v26 }
  0x85   :  { %9072 = vmatprep.mubr.msk.bf16.mxu0 %vm537_vm0, %v463_v30  ;;  %v257_v30 = vadd.f32 %v160_v7, %v10120_v16 }
  0x86   :  { %v383_v28 = vmax.f32 %v255_v13, 0.0  ;;  %v389_v42 = vmax.f32 %v261_v11, 0.0  ;;  %v272_v13 = vadd.f32 %v160_v7, %v10252_v25 }
  0x87   :  { %v385_v37 = vmax.f32 %v257_v30, 0.0 }
  0x88   :  { %v472_v38 = vpack.c.bf16 %v384_v36, %v383_v28  ;;  %v400_v23 = vmax.f32 %v272_v13, 0.0 }
  0x89   :  { %v473_v40 = vpack.c.bf16 %v386_v20, %v385_v37 }
  0x8c   :  { %9073 = vmatmul.mubr.msk.bf16.gmra.mrb[60].mxu0 %vm537_vm0, %v464_v39  ;;  %v260_v39 = vadd.f32 %v160_v7, %v10139_v22 }
  0x8d   :  { %9076 = vmatprep.mubr.msk.bf16.mxu0 %vm537_vm0, %v465_v41  ;;  %v387_v41 = vmax.f32 %v259_v54, 0.0 }
  0x8e   :  { %v388_v55 = vmax.f32 %v260_v39, 0.0 }
  0x90   :  { %v474_v44 = vpack.c.bf16 %v388_v55, %v387_v41 }
  0x94   :  { %9077 = vmatmul.mubr.msk.bf16.gmra.mrb[64].mxu0 %vm537_vm0, %v466_v47  ;;  %v475_v47 = vpack.c.bf16 %v390_v43, %v389_v42 }
  0x95   :  { %9080 = vmatprep.mubr.msk.bf16.mxu0 %vm537_vm0, %v467_v31  ;;  %v391_v31 = vmax.f32 %v263_v45, 0.0 }
  0x97   :  { %v476_v17 = vpack.c.bf16 %v392_v49, %v391_v31 }
  0x9c   :  { %9081 = vmatmul.mubr.msk.bf16.gmra.mrb[68].mxu0 %vm537_vm0, %v468_v56  ;;  %v477_v56 = vpack.c.bf16 %v394_v51, %v393_v50 }
  0x9d   :  { %9084 = vmatprep.mubr.msk.bf16.mxu0 %vm537_vm0, %v469_v59  ;;  %v134_v59 = vcombine.high %v10428_v5, %v10428_v5 }
  0x9f   :  { %v164_v6 = vrot.slane %v134_v59, %v10114_v14 }
  0xa1   :  { %v274_v5 = vadd.f32 %v164_v6, %v10129_v19  ;;  %v275_v20 = vadd.f32 %v164_v6, %v10136_v21  ;;  %v278_v39 = vadd.f32 %v164_v6, %v10154_v27  ;;  %v279_v42 = vadd.f32 %v164_v6, %v10170_v32 }
  0xa2   :  { %v280_v43 = vadd.f32 %v164_v6, %v10173_v33  ;;  %v281_v45 = vadd.f32 %v164_v6, %v10176_v34  ;;  %v283_v31 = vadd.f32 %v164_v6, %v10218_v62  ;;  %v284_v32 = vadd.f32 %v164_v6, %v10221_v63 }
  0xa3   :  { %v402_v36 = vmax.f32 %v274_v5, 0.0  ;;  %v406_v41 = vmax.f32 %v278_v39, 0.0  ;;  %v407_v27 = vmax.f32 %v279_v42, 0.0  ;;  %v285_v33 = vadd.f32 %v164_v6, %v10225_v2 }
  0xa4   :  { %9085 = vmatmul.mubr.msk.bf16.gmra.mrb[72].mxu0 %vm537_vm0, %v470_v9  ;;  %v271_v9 = vadd.f32 %v160_v7, %v10249_v24  ;;  %v277_v7 = vadd.f32 %v164_v6, %v10151_v26  ;;  %v282_v26 = vadd.f32 %v164_v6, %v10179_v35  ;;  %v408_v46 = vmax.f32 %v280_v43, 0.0 }
  0xa5   :  { %9088 = vmatprep.mubr.msk.bf16.mxu0 %vm537_vm0, %v471_v18  ;;  %v273_v18 = vadd.f32 %v164_v6, %v10120_v16  ;;  %v286_v34 = vadd.f32 %v164_v6, %v10228_v3  ;;  %v411_v35 = vmax.f32 %v283_v31, 0.0  ;;  %v412_v50 = vmax.f32 %v284_v32, 0.0 }
  0xa6   :  { %v399_v30 = vmax.f32 %v271_v9, 0.0  ;;  %v405_v12 = vmax.f32 %v277_v7, 0.0  ;;  %v410_v48 = vmax.f32 %v282_v26, 0.0  ;;  %v484_v8 = vpack.c.bf16 %v408_v46, %v407_v27 }
  0xa7   :  { %v401_v28 = vmax.f32 %v273_v18, 0.0  ;;  %v413_v51 = vmax.f32 %v285_v33, 0.0  ;;  %v486_v52 = vpack.c.bf16 %v412_v50, %v411_v35  ;;  %v287_v53 = vadd.f32 %v164_v6, %v10249_v24 }
  0xa8   :  { %v480_v37 = vpack.c.bf16 %v400_v23, %v399_v30  ;;  %v288_v62 = vadd.f32 %v164_v6, %v10252_v25  ;;  %v289_v63 = vadd.f32 %v10327_v0, %v10120_v16  ;;  %v290_v2 = vadd.f32 %v10327_v0, %v10129_v19 }
  0xa9   :  { %v481_v54 = vpack.c.bf16 %v402_v36, %v401_v28  ;;  %v415_v3 = vmax.f32 %v287_v53, 0.0  ;;  %v291_v19 = vadd.f32 %v10327_v0, %v10136_v21  ;;  %v420_v23 = vmax.f32 %v292_v1, 0.0 }
  0xaa   :  { %v416_v57 = vmax.f32 %v288_v62, 0.0  ;;  %v417_v24 = vmax.f32 %v289_v63, 0.0  ;;  %v418_v25 = vmax.f32 %v290_v2, 0.0 }
  0xab   :  { %v419_v30 = vmax.f32 %v291_v19, 0.0 }
  0xac   :  { %9089 = vmatmul.mubr.msk.bf16.gmra.mrb[76].mxu0 %vm537_vm0, %v472_v38  ;;  %v276_v38 = vadd.f32 %v164_v6, %v10139_v22  ;;  %v488_v61 = vpack.c.bf16 %v416_v57, %v415_v3 }
  0xad   :  { %9092 = vmatprep.mubr.msk.bf16.mxu0 %vm537_vm0, %v473_v40  ;;  %v403_v40 = vmax.f32 %v275_v20, 0.0 }
  0xae   :  { %v404_v11 = vmax.f32 %v276_v38, 0.0  ;;  %v490_v38 = vpack.c.bf16 %v420_v23, %v419_v30 }
  0xb0   :  { %v482_v55 = vpack.c.bf16 %v404_v11, %v403_v40 }
  0xb4   :  { %9093 = vmatmul.mubr.msk.bf16.gmra.mrb[80].mxu0 %vm537_vm0, %v474_v44  ;;  %v483_v44 = vpack.c.bf16 %v406_v41, %v405_v12 }
  0xb5   :  { %9096 = vmatprep.mubr.msk.bf16.mxu0 %vm537_vm0, %v475_v47  ;;  %v409_v47 = vmax.f32 %v281_v45, 0.0 }
  0xb7   :  { %v485_v49 = vpack.c.bf16 %v410_v48, %v409_v47 }
  0xbc   :  { %9097 = vmatmul.mubr.msk.bf16.gmra.mrb[84].mxu0 %vm537_vm0, %v476_v17  ;;  %v414_v17 = vmax.f32 %v286_v34, 0.0 }
  0xbd   :  { %9100 = vmatprep.mubr.msk.bf16.mxu0 %vm537_vm0, %v477_v56 }
  0xbe   :  { %v487_v56 = vpack.c.bf16 %v414_v17, %v413_v51 }
  0xc4   :  { %9101 = vmatmul.mubr.msk.bf16.gmra.mrb[88].mxu0 %vm537_vm0, %v478_v29  ;;  %v489_v29 = vpack.c.bf16 %v418_v25, %v417_v24 }
  0xc5   :  { %9104 = vmatprep.mubr.msk.bf16.mxu0 %vm537_vm0, %v479_v15 }
  0xcc   :  { %9105 = vmatmul.mubr.msk.bf16.gmra.mrb[92].mxu0 %vm537_vm0, %v480_v37 }
  0xcd   :  { %9108 = vmatprep.mubr.msk.bf16.mxu0 %vm537_vm0, %v481_v54 }
  0xd4   :  { %9109 = vmatmul.mubr.msk.bf16.gmra.mrb[96].mxu0 %vm537_vm0, %v482_v55 }
  0xd5   :  { %9112 = vmatprep.mubr.msk.bf16.mxu0 %vm537_vm0, %v483_v44 }
  0xdc   :  { %9113 = vmatmul.mubr.msk.bf16.gmra.mrb[100].mxu0 %vm537_vm0, %v484_v8 }
  0xdd   :  { %9116 = vmatprep.mubr.msk.bf16.mxu0 %vm537_vm0, %v485_v49 }
  0xe4   :  { %9117 = vmatmul.mubr.msk.bf16.gmra.mrb[104].mxu0 %vm537_vm0, %v486_v52 }
  0xe5   :  { %9120 = vmatprep.mubr.msk.bf16.mxu0 %vm537_vm0, %v487_v56 }
  0xe7   :  { %v9014_v59 = vpop.f32.mrb[0].mxu0 }
  0xe8   :  { %v773_v60 = vadd.f32 %v9014_v59, %v10523_v58  ;;  %v764_v16 = vpop.f32.mrb[1].mxu0 }
  0xe9   :  { %v765_v4 = vadd.f32 %v10523_v58, %v764_v16  ;;  %v9015_v6 = vpop.f32.mrb[2].mxu0 }
  0xea   :  { %v776_v9 = vadd.f32 %v9015_v6, %v10523_v58  ;;  %v767_v13 = vpop.f32.mrb[3].mxu0  ;;  %v1277_v18 = vmax.f32 %v773_v60, 0.0 }
  0xeb   :  { %v768_v15 = vadd.f32 %v10523_v58, %v767_v13  ;;  %v1275_v28 = vmax.f32 %v765_v4, 0.0 }
  0xec   :  { %v1278_v5 = vmax.f32 %v776_v9, 0.0  ;;  %9121 = vmatmul.mubr.msk.bf16.gmra.mrb[108].mxu0 %vm537_vm0, %v488_v61 }
  0xed   :  { %v1276_v21 = vmax.f32 %v768_v15, 0.0  ;;  %9124 = vmatprep.mubr.msk.bf16.mxu0 %vm537_vm0, %v489_v29 }
  0xee   :  { %v1404_v22 = vpack.c.bf16 %v1278_v5, %v1277_v18 }
  0xef   :  { %v1403_v0 = vpack.c.bf16 %v1276_v21, %v1275_v28  ;;  %v9018_v36 = vpop.f32.mrb[4].mxu0 }
  0xf0   :  { %v789_v37 = vadd.f32 %v9018_v36, %v10523_v58  ;;  %v780_v20 = vpop.f32.mrb[5].mxu0 }
  0xf1   :  { %v781_v54 = vadd.f32 %v10523_v58, %v780_v20  ;;  %v9019_v7 = vpop.f32.mrb[6].mxu0  ;;  %9148 = vmatprep.mubr.msk.bf16.mxu1 %vm537_vm0, %v1403_v0 }
  0xf2   :  { %v792_v39 = vadd.f32 %v9019_v7, %v10523_v58  ;;  %v783_v40 = vpop.f32.mrb[7].mxu0  ;;  %9149 = vmatmul.mubr.msk.bf16.vlgmr.msra.gmra.mrb[12].mxu1 %vm537_vm0, %v1404_v22  ;;  %v1281_v12 = vmax.f32 %v789_v37, 0.0 }
  0xf3   :  { %v784_v11 = vadd.f32 %v10523_v58, %v783_v40  ;;  %v1279_v55 = vmax.f32 %v781_v54, 0.0 }
  0xf4   :  { %v1282_v41 = vmax.f32 %v792_v39, 0.0  ;;  %9125 = vmatmul.mubr.msk.bf16.gmra.mrb[112].mxu0 %vm537_vm0, %v490_v38 }
  0xf5   :  { %v1280_v42 = vmax.f32 %v784_v11, 0.0 }
  0xf6   :  { %v1406_v43 = vpack.c.bf16 %v1282_v41, %v1281_v12 }
  0xf7   :  { %v1405_v44 = vpack.c.bf16 %v1280_v42, %v1279_v55  ;;  %v9022_v45 = vpop.f32.mrb[8].mxu0 }
  0xf8   :  { %v805_v26 = vadd.f32 %v9022_v45, %v10523_v58  ;;  %v796_v27 = vpop.f32.mrb[9].mxu0 }
  0xf9   :  { %v797_v46 = vadd.f32 %v10523_v58, %v796_v27  ;;  %v9023_v47 = vpop.f32.mrb[10].mxu0  ;;  %9152 = vmatprep.mubr.msk.bf16.mxu1 %vm537_vm0, %v1405_v44 }
  0xfa   :  { %v808_v48 = vadd.f32 %v9023_v47, %v10523_v58  ;;  %v799_v8 = vpop.f32.mrb[11].mxu0  ;;  %9153 = vmatmul.mubr.msk.bf16.gmra.mrb[16].mxu1 %vm537_vm0, %v1406_v43  ;;  %v1285_v32 = vmax.f32 %v805_v26, 0.0 }
  0xfb   :  { %v800_v31 = vadd.f32 %v10523_v58, %v799_v8  ;;  %v1283_v33 = vmax.f32 %v797_v46, 0.0 }
  0xfc   :  { %v1286_v49 = vmax.f32 %v808_v48, 0.0 }
  0xfd   :  { %v1284_v34 = vmax.f32 %v800_v31, 0.0 }
  0xfe   :  { %v1408_v35 = vpack.c.bf16 %v1286_v49, %v1285_v32 }
  0xff   :  { %v1407_v50 = vpack.c.bf16 %v1284_v34, %v1283_v33  ;;  %v9026_v51 = vpop.f32.mrb[12].mxu0 }
 0x100   :  { %v821_v17 = vadd.f32 %v9026_v51, %v10523_v58  ;;  %v812_v52 = vpop.f32.mrb[13].mxu0 }
 0x101   :  { %v813_v53 = vadd.f32 %v10523_v58, %v812_v52  ;;  %v9027_v62 = vpop.f32.mrb[14].mxu0  ;;  %9156 = vmatprep.mubr.msk.bf16.mxu1 %vm537_vm0, %v1407_v50 }
 0x102   :  { %v824_v56 = vadd.f32 %v9027_v62, %v10523_v58  ;;  %v815_v63 = vpop.f32.mrb[15].mxu0  ;;  %9157 = vmatmul.mubr.msk.bf16.gmra.mrb[20].mxu1 %vm537_vm0, %v1408_v35  ;;  %v1289_v3 = vmax.f32 %v821_v17, 0.0 }
 0x103   :  { %v816_v2 = vadd.f32 %v10523_v58, %v815_v63  ;;  %v1287_v24 = vmax.f32 %v813_v53, 0.0 }
 0x104   :  { %v1290_v57 = vmax.f32 %v824_v56, 0.0 }
 0x105   :  { %v1288_v25 = vmax.f32 %v816_v2, 0.0 }
 0x106   :  { %v1410_v59 = vpack.c.bf16 %v1290_v57, %v1289_v3 }
 0x107   :  { %v1409_v60 = vpack.c.bf16 %v1288_v25, %v1287_v24  ;;  %v9030_v16 = vpop.f32.mrb[16].mxu0 }
 0x108   :  { %v837_v61 = vadd.f32 %v9030_v16, %v10523_v58  ;;  %v828_v19 = vpop.f32.mrb[17].mxu0 }
 0x109   :  { %v829_v1 = vadd.f32 %v10523_v58, %v828_v19  ;;  %v9031_v4 = vpop.f32.mrb[18].mxu0  ;;  %9160 = vmatprep.mubr.msk.bf16.mxu1 %vm537_vm0, %v1409_v60  ;;  %v10008_v19 = vld [vmem:[%s12459_s4 + $0x40] sm:$0xff]  }
 0x10a   :  { %v840_v6 = vadd.f32 %v9031_v4, %v10523_v58  ;;  %v831_v29 = vpop.f32.mrb[19].mxu0  ;;  %9161 = vmatmul.mubr.msk.bf16.gmra.mrb[24].mxu1 %vm537_vm0, %v1410_v59  ;;  %v1293_v13 = vmax.f32 %v837_v61, 0.0  ;;  %9276 = vmatprep.subr.bf16.mxu0 %v10008_v19 }
 0x10b   :  { %v832_v9 = vadd.f32 %v10523_v58, %v831_v29  ;;  %v1291_v18 = vmax.f32 %v829_v1, 0.0  ;;  %9277 = vmatpush3.bf16.msra.mxu0 %v10008_v19 }
 0x10c   :  { %v1294_v15 = vmax.f32 %v840_v6, 0.0 }
 0x10d   :  { %v1292_v5 = vmax.f32 %v832_v9, 0.0 }
 0x10e   :  { %v1412_v30 = vpack.c.bf16 %v1294_v15, %v1293_v13 }
 0x10f   :  { %v1411_v23 = vpack.c.bf16 %v1292_v5, %v1291_v18  ;;  %v9034_v28 = vpop.f32.mrb[20].mxu0 }
 0x110   :  { %v853_v21 = vadd.f32 %v9034_v28, %v10523_v58  ;;  %v844_v22 = vpop.f32.mrb[21].mxu0 }
 0x111   :  { %v845_v0 = vadd.f32 %v10523_v58, %v844_v22  ;;  %v9035_v36 = vpop.f32.mrb[22].mxu0  ;;  %9164 = vmatprep.mubr.msk.bf16.mxu1 %vm537_vm0, %v1411_v23 }
 0x112   :  { %v856_v37 = vadd.f32 %v9035_v36, %v10523_v58  ;;  %v847_v20 = vpop.f32.mrb[23].mxu0  ;;  %9165 = vmatmul.mubr.msk.bf16.gmra.mrb[28].mxu1 %vm537_vm0, %v1412_v30  ;;  %v1297_v54 = vmax.f32 %v853_v21, 0.0 }
 0x113   :  { %v848_v38 = vadd.f32 %v10523_v58, %v847_v20  ;;  %v1295_v39 = vmax.f32 %v845_v0, 0.0 }
 0x114   :  { %v1298_v7 = vmax.f32 %v856_v37, 0.0 }
 0x115   :  { %v1296_v40 = vmax.f32 %v848_v38, 0.0 }
 0x116   :  { %v1414_v11 = vpack.c.bf16 %v1298_v7, %v1297_v54 }
 0x117   :  { %v1413_v12 = vpack.c.bf16 %v1296_v40, %v1295_v39  ;;  %v9038_v41 = vpop.f32.mrb[24].mxu0 }
 0x118   :  { %v869_v55 = vadd.f32 %v9038_v41, %v10523_v58  ;;  %v860_v42 = vpop.f32.mrb[25].mxu0 }
 0x119   :  { %v861_v43 = vadd.f32 %v10523_v58, %v860_v42  ;;  %v9039_v44 = vpop.f32.mrb[26].mxu0  ;;  %9168 = vmatprep.mubr.msk.bf16.mxu1 %vm537_vm0, %v1413_v12 }
 0x11a   :  { %v872_v45 = vadd.f32 %v9039_v44, %v10523_v58  ;;  %v863_v26 = vpop.f32.mrb[27].mxu0  ;;  %9169 = vmatmul.mubr.msk.bf16.gmra.mrb[32].mxu1 %vm537_vm0, %v1414_v11  ;;  %v1301_v46 = vmax.f32 %v869_v55, 0.0 }
 0x11b   :  { %v864_v27 = vadd.f32 %v10523_v58, %v863_v26  ;;  %v1299_v48 = vmax.f32 %v861_v43, 0.0  ;;  %v9130_v13 = vpop.f32.mrb[0].mxu1 }
 0x11c   :  { %v1302_v47 = vmax.f32 %v872_v45, 0.0  ;;  %v1237_v18 = vadd.f32 %v9130_v13, %v10523_v58  ;;  %v1228_v5 = vpop.f32.mrb[1].mxu1 }
 0x11d   :  { %v1300_v8 = vmax.f32 %v864_v27, 0.0  ;;  %v1229_v28 = vadd.f32 %v10523_v58, %v1228_v5  ;;  %v9131_v21 = vpop.f32.mrb[2].mxu1 }
 0x11e   :  { %v1416_v31 = vpack.c.bf16 %v1302_v47, %v1301_v46  ;;  %v1393_v36 = vmax.f32 %v1237_v18, 0.0  ;;  %v1240_v37 = vadd.f32 %v9131_v21, %v10523_v58  ;;  %v1231_v20 = vpop.f32.mrb[3].mxu1 }
 0x11f   :  { %v1415_v32 = vpack.c.bf16 %v1300_v8, %v1299_v48  ;;  %v9042_v49 = vpop.f32.mrb[28].mxu0  ;;  %v1391_v7 = vmax.f32 %v1229_v28, 0.0  ;;  %v1232_v39 = vadd.f32 %v10523_v58, %v1231_v20 }
 0x120   :  { %v885_v33 = vadd.f32 %v9042_v49, %v10523_v58  ;;  %v876_v34 = vpop.f32.mrb[29].mxu0  ;;  %v1394_v12 = vmax.f32 %v1240_v37, 0.0 }
 0x121   :  { %v877_v35 = vadd.f32 %v10523_v58, %v876_v34  ;;  %v9043_v50 = vpop.f32.mrb[30].mxu0  ;;  %9172 = vmatprep.mubr.msk.bf16.mxu1 %vm537_vm0, %v1415_v32  ;;  %v1392_v55 = vmax.f32 %v1232_v39, 0.0 }
 0x122   :  { %v888_v51 = vadd.f32 %v9043_v50, %v10523_v58  ;;  %v879_v17 = vpop.f32.mrb[31].mxu0  ;;  %9173 = vmatmul.mubr.msk.bf16.gmra.mrb[36].mxu1 %vm537_vm0, %v1416_v31  ;;  %v1305_v53 = vmax.f32 %v885_v33, 0.0  ;;  %v10598_v44 = vpack.c.bf16 %v1394_v12, %v1393_v36 }
 0x123   :  { %v880_v52 = vadd.f32 %v10523_v58, %v879_v17  ;;  %v1303_v56 = vmax.f32 %v877_v35, 0.0  ;;  %v10600_v27 = vpack.c.bf16 %v1392_v55, %v1391_v7  ;;  %v10009_v7 = vld [vmem:[%s12459_s4 + $0x48] sm:$0xff]  }
 0x124   :  { %v1306_v62 = vmax.f32 %v888_v51, 0.0  ;;  %9278 = vmatprep.subr.bf16.mxu0 %v10009_v7 }
 0x125   :  { %v1304_v63 = vmax.f32 %v880_v52, 0.0  ;;  %v9134_v46 = vpop.f32.mrb[4].mxu1  ;;  %9279 = vmatpush3.bf16.msra.mxu0 %v10009_v7 }
 0x126   :  { %v1418_v2 = vpack.c.bf16 %v1306_v62, %v1305_v53  ;;  %v1253_v48 = vadd.f32 %v9134_v46, %v10523_v58  ;;  %v1244_v8 = vpop.f32.mrb[5].mxu1 }
 0x127   :  { %v1417_v3 = vpack.c.bf16 %v1304_v63, %v1303_v56  ;;  %v9046_v57 = vpop.f32.mrb[32].mxu0  ;;  %v1245_v49 = vadd.f32 %v10523_v58, %v1244_v8  ;;  %v9135_v33 = vpop.f32.mrb[6].mxu1 }
 0x128   :  { %v901_v24 = vadd.f32 %v9046_v57, %v10523_v58  ;;  %v892_v25 = vpop.f32.mrb[33].mxu0  ;;  %v1397_v50 = vmax.f32 %v1253_v48, 0.0  ;;  %v1256_v51 = vadd.f32 %v9135_v33, %v10523_v58  ;;  %v1247_v17 = vpop.f32.mrb[7].mxu1 }
 0x129   :  { %v893_v59 = vadd.f32 %v10523_v58, %v892_v25  ;;  %v9047_v60 = vpop.f32.mrb[34].mxu0  ;;  %9176 = vmatprep.mubr.msk.bf16.mxu1 %vm537_vm0, %v1417_v3  ;;  %v1395_v62 = vmax.f32 %v1245_v49, 0.0  ;;  %v1248_v56 = vadd.f32 %v10523_v58, %v1247_v17 }
 0x12a   :  { %v904_v16 = vadd.f32 %v9047_v60, %v10523_v58  ;;  %v895_v61 = vpop.f32.mrb[35].mxu0  ;;  %9177 = vmatmul.mubr.msk.bf16.gmra.mrb[40].mxu1 %vm537_vm0, %v1418_v2  ;;  %v1309_v4 = vmax.f32 %v901_v24, 0.0  ;;  %v1398_v3 = vmax.f32 %v1256_v51, 0.0 }
 0x12b   :  { %v896_v1 = vadd.f32 %v10523_v58, %v895_v61  ;;  %v1307_v29 = vmax.f32 %v893_v59, 0.0  ;;  %v1396_v24 = vmax.f32 %v1248_v56, 0.0 }
 0x12c   :  { %v1310_v6 = vmax.f32 %v904_v16, 0.0  ;;  %v10612_v60 = vpack.c.bf16 %v1398_v3, %v1397_v50 }
 0x12d   :  { %v1308_v9 = vmax.f32 %v896_v1, 0.0  ;;  %v10614_v19 = vpack.c.bf16 %v1396_v24, %v1395_v62 }
 0x12e   :  { %v1420_v15 = vpack.c.bf16 %v1310_v6, %v1309_v4 }
 0x12f   :  { %v1419_v30 = vpack.c.bf16 %v1308_v9, %v1307_v29  ;;  %v9050_v23 = vpop.f32.mrb[36].mxu0  ;;  %v9138_v1 = vpop.f32.mrb[8].mxu1 }
 0x130   :  { %v917_v22 = vadd.f32 %v9050_v23, %v10523_v58  ;;  %v908_v0 = vpop.f32.mrb[37].mxu0  ;;  %v1269_v6 = vadd.f32 %v9138_v1, %v10523_v58  ;;  %v1260_v29 = vpop.f32.mrb[9].mxu1 }
 0x131   :  { %v909_v38 = vadd.f32 %v10523_v58, %v908_v0  ;;  %v9051_v54 = vpop.f32.mrb[38].mxu0  ;;  %9180 = vmatprep.mubr.msk.bf16.mxu1 %vm537_vm0, %v1419_v30  ;;  %v9139_v18 = vpop.f32.mrb[10].mxu1 }
 0x132   :  { %v920_v40 = vadd.f32 %v9051_v54, %v10523_v58  ;;  %v911_v11 = vpop.f32.mrb[39].mxu0  ;;  %9181 = vmatmul.mubr.msk.bf16.gmra.mrb[44].mxu1 %vm537_vm0, %v1420_v15  ;;  %v1313_v42 = vmax.f32 %v917_v22, 0.0  ;;  %v1261_v15 = vadd.f32 %v10523_v58, %v1260_v29  ;;  %v1401_v23 = vmax.f32 %v1269_v6, 0.0  ;;  %v1263_v21 = vpop.f32.mrb[11].mxu1 }
 0x133   :  { %v912_v41 = vadd.f32 %v10523_v58, %v911_v11  ;;  %v1311_v45 = vmax.f32 %v909_v38, 0.0  ;;  %v1272_v28 = vadd.f32 %v9139_v18, %v10523_v58  ;;  %v1264_v37 = vadd.f32 %v10523_v58, %v1263_v21 }
 0x134   :  { %v1314_v43 = vmax.f32 %v920_v40, 0.0  ;;  %v1399_v36 = vmax.f32 %v1261_v15, 0.0 }
 0x135   :  { %v1312_v26 = vmax.f32 %v912_v41, 0.0  ;;  %v1402_v54 = vmax.f32 %v1272_v28, 0.0  ;;  %v1400_v40 = vmax.f32 %v1264_v37, 0.0 }
 0x136   :  { %v1422_v47 = vpack.c.bf16 %v1314_v43, %v1313_v42 }
 0x137   :  { %v1421_v31 = vpack.c.bf16 %v1312_v26, %v1311_v45  ;;  %v9054_v32 = vpop.f32.mrb[40].mxu0  ;;  %v10629_v41 = vpack.c.bf16 %v1402_v54, %v1401_v23  ;;  %v10631_v43 = vpack.c.bf16 %v1400_v40, %v1399_v36  ;;  %v10010_v26 = vld [vmem:[%s12459_s4 + $0x50] sm:$0xff]  }
 0x138   :  { %v933_v34 = vadd.f32 %v9054_v32, %v10523_v58  ;;  %v924_v35 = vpop.f32.mrb[41].mxu0  ;;  %9280 = vmatprep.subr.bf16.mxu0 %v10010_v26 }
 0x139   :  { %v925_v52 = vadd.f32 %v10523_v58, %v924_v35  ;;  %v9055_v53 = vpop.f32.mrb[42].mxu0  ;;  %9184 = vmatprep.mubr.msk.bf16.mxu1 %vm537_vm0, %v1421_v31  ;;  %9281 = vmatpush3.bf16.msra.mxu0 %v10010_v26 }
 0x13a   :  { %v936_v63 = vadd.f32 %v9055_v53, %v10523_v58  ;;  %v927_v2 = vpop.f32.mrb[43].mxu0  ;;  %9185 = vmatmul.mubr.msk.bf16.gmra.mrb[48].mxu1 %vm537_vm0, %v1422_v47  ;;  %v1317_v25 = vmax.f32 %v933_v34, 0.0  ;;  %v10011_v34 = vld [vmem:[%s12459_s4 + $0x58] sm:$0xff]  }
 0x13b   :  { %v928_v57 = vadd.f32 %v10523_v58, %v927_v2  ;;  %v1315_v16 = vmax.f32 %v925_v52, 0.0  ;;  %9282 = vmatprep.subr.bf16.mxu0 %v10011_v34 }
 0x13c   :  { %v1318_v59 = vmax.f32 %v936_v63, 0.0 }
 0x13d   :  { %v1316_v61 = vmax.f32 %v928_v57, 0.0  ;;  %9283 = vmatpush3.bf16.msra.mxu0 %v10011_v34 }
 0x13e   :  { %v1424_v4 = vpack.c.bf16 %v1318_v59, %v1317_v25 }
 0x13f   :  { %v1423_v9 = vpack.c.bf16 %v1316_v61, %v1315_v16  ;;  %v9058_v13 = vpop.f32.mrb[44].mxu0 }
 0x140   :  { %v949_v5 = vadd.f32 %v9058_v13, %v10523_v58  ;;  %v940_v30 = vpop.f32.mrb[45].mxu0 }
 0x141   :  { %v941_v22 = vadd.f32 %v10523_v58, %v940_v30  ;;  %v9059_v0 = vpop.f32.mrb[46].mxu0  ;;  %9188 = vmatprep.mubr.msk.bf16.mxu1 %vm537_vm0, %v1423_v9 }
 0x142   :  { %v952_v20 = vadd.f32 %v9059_v0, %v10523_v58  ;;  %v943_v38 = vpop.f32.mrb[47].mxu0  ;;  %9189 = vmatmul.mubr.msk.bf16.gmra.mrb[52].mxu1 %vm537_vm0, %v1424_v4  ;;  %v1321_v11 = vmax.f32 %v949_v5, 0.0 }
 0x143   :  { %v944_v39 = vadd.f32 %v10523_v58, %v943_v38  ;;  %v1319_v55 = vmax.f32 %v941_v22, 0.0 }
 0x144   :  { %v1322_v12 = vmax.f32 %v952_v20, 0.0 }
 0x145   :  { %v1320_v42 = vmax.f32 %v944_v39, 0.0 }
 0x146   :  { %v1426_v45 = vpack.c.bf16 %v1322_v12, %v1321_v11 }
 0x147   :  { %v1425_v46 = vpack.c.bf16 %v1320_v42, %v1319_v55  ;;  %v9062_v47 = vpop.f32.mrb[48].mxu0 }
 0x148   :  { %v965_v48 = vadd.f32 %v9062_v47, %v10523_v58  ;;  %v956_v8 = vpop.f32.mrb[49].mxu0 }
 0x149   :  { %v957_v31 = vadd.f32 %v10523_v58, %v956_v8  ;;  %v9063_v32 = vpop.f32.mrb[50].mxu0  ;;  %9192 = vmatprep.mubr.msk.bf16.mxu1 %vm537_vm0, %v1425_v46 }
 0x14a   :  { %v968_v49 = vadd.f32 %v9063_v32, %v10523_v58  ;;  %v959_v33 = vpop.f32.mrb[51].mxu0  ;;  %9193 = vmatmul.mubr.msk.bf16.gmra.mrb[56].mxu1 %vm537_vm0, %v1426_v45  ;;  %v1325_v50 = vmax.f32 %v965_v48, 0.0 }
 0x14b   :  { %v960_v35 = vadd.f32 %v10523_v58, %v959_v33  ;;  %v1323_v17 = vmax.f32 %v957_v31, 0.0 }
 0x14c   :  { %v1326_v51 = vmax.f32 %v968_v49, 0.0 }
 0x14d   :  { %v1324_v52 = vmax.f32 %v960_v35, 0.0 }
 0x14e   :  { %v1428_v53 = vpack.c.bf16 %v1326_v51, %v1325_v50 }
 0x14f   :  { %v1427_v62 = vpack.c.bf16 %v1324_v52, %v1323_v17  ;;  %v9066_v56 = vpop.f32.mrb[52].mxu0 }
 0x150   :  { %v981_v63 = vadd.f32 %v9066_v56, %v10523_v58  ;;  %v972_v2 = vpop.f32.mrb[53].mxu0 }
 0x151   :  { %v973_v3 = vadd.f32 %v10523_v58, %v972_v2  ;;  %v9067_v57 = vpop.f32.mrb[54].mxu0  ;;  %9196 = vmatprep.mubr.msk.bf16.mxu1 %vm537_vm0, %v1427_v62 }
 0x152   :  { %v984_v24 = vadd.f32 %v9067_v57, %v10523_v58  ;;  %v975_v25 = vpop.f32.mrb[55].mxu0  ;;  %9197 = vmatmul.mubr.msk.bf16.gmra.mrb[60].mxu1 %vm537_vm0, %v1428_v53  ;;  %v1329_v16 = vmax.f32 %v981_v63, 0.0 }
 0x153   :  { %v976_v59 = vadd.f32 %v10523_v58, %v975_v25  ;;  %v1327_v1 = vmax.f32 %v973_v3, 0.0 }
 0x154   :  { %v1330_v61 = vmax.f32 %v984_v24, 0.0 }
 0x155   :  { %v1328_v4 = vmax.f32 %v976_v59, 0.0 }
 0x156   :  { %v1430_v6 = vpack.c.bf16 %v1330_v61, %v1329_v16 }
 0x157   :  { %v1429_v29 = vpack.c.bf16 %v1328_v4, %v1327_v1  ;;  %v9070_v9 = vpop.f32.mrb[56].mxu0 }
 0x158   :  { %v997_v13 = vadd.f32 %v9070_v9, %v10523_v58  ;;  %v988_v15 = vpop.f32.mrb[57].mxu0 }
 0x159   :  { %v989_v18 = vadd.f32 %v10523_v58, %v988_v15  ;;  %v9071_v5 = vpop.f32.mrb[58].mxu0  ;;  %9200 = vmatprep.mubr.msk.bf16.mxu1 %vm537_vm0, %v1429_v29 }
 0x15a   :  { %v1000_v30 = vadd.f32 %v9071_v5, %v10523_v58  ;;  %v991_v23 = vpop.f32.mrb[59].mxu0  ;;  %9201 = vmatmul.mubr.msk.bf16.gmra.mrb[64].mxu1 %vm537_vm0, %v1430_v6  ;;  %v1333_v21 = vmax.f32 %v997_v13, 0.0 }
 0x15b   :  { %v992_v28 = vadd.f32 %v10523_v58, %v991_v23  ;;  %v1331_v0 = vmax.f32 %v989_v18, 0.0 }
 0x15c   :  { %v1334_v22 = vmax.f32 %v1000_v30, 0.0 }
 0x15d   :  { %v1332_v36 = vmax.f32 %v992_v28, 0.0 }
 0x15e   :  { %v1432_v37 = vpack.c.bf16 %v1334_v22, %v1333_v21 }
 0x15f   :  { %v1431_v20 = vpack.c.bf16 %v1332_v36, %v1331_v0  ;;  %v9074_v38 = vpop.f32.mrb[60].mxu0 }
 0x160   :  { %v1013_v54 = vadd.f32 %v9074_v38, %v10523_v58  ;;  %v1004_v7 = vpop.f32.mrb[61].mxu0 }
 0x161   :  { %v1005_v39 = vadd.f32 %v10523_v58, %v1004_v7  ;;  %v9075_v40 = vpop.f32.mrb[62].mxu0  ;;  %9204 = vmatprep.mubr.msk.bf16.mxu1 %vm537_vm0, %v1431_v20 }
 0x162   :  { %v1016_v11 = vadd.f32 %v9075_v40, %v10523_v58  ;;  %v1007_v12 = vpop.f32.mrb[63].mxu0  ;;  %9205 = vmatmul.mubr.msk.bf16.gmra.mrb[68].mxu1 %vm537_vm0, %v1432_v37  ;;  %v1337_v42 = vmax.f32 %v1013_v54, 0.0 }
 0x163   :  { %v1008_v55 = vadd.f32 %v10523_v58, %v1007_v12  ;;  %v1335_v26 = vmax.f32 %v1005_v39, 0.0 }
 0x164   :  { %v1338_v45 = vmax.f32 %v1016_v11, 0.0 }
 0x165   :  { %v1336_v46 = vmax.f32 %v1008_v55, 0.0 }
 0x166   :  { %v1434_v47 = vpack.c.bf16 %v1338_v45, %v1337_v42 }
 0x167   :  { %v1433_v48 = vpack.c.bf16 %v1336_v46, %v1335_v26  ;;  %v9078_v8 = vpop.f32.mrb[64].mxu0 }
 0x168   :  { %v1029_v31 = vadd.f32 %v9078_v8, %v10523_v58  ;;  %v1020_v32 = vpop.f32.mrb[65].mxu0 }
 0x169   :  { %v1021_v49 = vadd.f32 %v10523_v58, %v1020_v32  ;;  %v9079_v33 = vpop.f32.mrb[66].mxu0  ;;  %9208 = vmatprep.mubr.msk.bf16.mxu1 %vm537_vm0, %v1433_v48 }
 0x16a   :  { %v1032_v34 = vadd.f32 %v9079_v33, %v10523_v58  ;;  %v1023_v35 = vpop.f32.mrb[67].mxu0  ;;  %9209 = vmatmul.mubr.msk.bf16.gmra.mrb[72].mxu1 %vm537_vm0, %v1434_v47  ;;  %v1341_v51 = vmax.f32 %v1029_v31, 0.0 }
 0x16b   :  { %v1024_v50 = vadd.f32 %v10523_v58, %v1023_v35  ;;  %v1339_v52 = vmax.f32 %v1021_v49, 0.0 }
 0x16c   :  { %v1342_v17 = vmax.f32 %v1032_v34, 0.0 }
 0x16d   :  { %v1340_v53 = vmax.f32 %v1024_v50, 0.0 }
 0x16e   :  { %v1436_v62 = vpack.c.bf16 %v1342_v17, %v1341_v51 }
 0x16f   :  { %v1435_v56 = vpack.c.bf16 %v1340_v53, %v1339_v52  ;;  %v9082_v63 = vpop.f32.mrb[68].mxu0 }
 0x170   :  { %v1045_v2 = vadd.f32 %v9082_v63, %v10523_v58  ;;  %v1036_v3 = vpop.f32.mrb[69].mxu0 }
 0x171   :  { %v1037_v57 = vadd.f32 %v10523_v58, %v1036_v3  ;;  %v9083_v24 = vpop.f32.mrb[70].mxu0  ;;  %9212 = vmatprep.mubr.msk.bf16.mxu1 %vm537_vm0, %v1435_v56 }
 0x172   :  { %v1048_v25 = vadd.f32 %v9083_v24, %v10523_v58  ;;  %v1039_v59 = vpop.f32.mrb[71].mxu0  ;;  %9213 = vmatmul.mubr.msk.bf16.gmra.mrb[76].mxu1 %vm537_vm0, %v1436_v62  ;;  %v1345_v61 = vmax.f32 %v1045_v2, 0.0 }
 0x173   :  { %v1040_v16 = vadd.f32 %v10523_v58, %v1039_v59  ;;  %v1343_v4 = vmax.f32 %v1037_v57, 0.0 }
 0x174   :  { %v1346_v1 = vmax.f32 %v1048_v25, 0.0 }
 0x175   :  { %v1344_v6 = vmax.f32 %v1040_v16, 0.0 }
 0x176   :  { %v1438_v29 = vpack.c.bf16 %v1346_v1, %v1345_v61 }
 0x177   :  { %v1437_v9 = vpack.c.bf16 %v1344_v6, %v1343_v4  ;;  %v9086_v13 = vpop.f32.mrb[72].mxu0 }
 0x178   :  { %v1061_v15 = vadd.f32 %v9086_v13, %v10523_v58  ;;  %v1052_v18 = vpop.f32.mrb[73].mxu0 }
 0x179   :  { %v1053_v5 = vadd.f32 %v10523_v58, %v1052_v18  ;;  %v9087_v30 = vpop.f32.mrb[74].mxu0  ;;  %9216 = vmatprep.mubr.msk.bf16.mxu1 %vm537_vm0, %v1437_v9 }
 0x17a   :  { %v1064_v23 = vadd.f32 %v9087_v30, %v10523_v58  ;;  %v1055_v28 = vpop.f32.mrb[75].mxu0  ;;  %9217 = vmatmul.mubr.msk.bf16.gmra.mrb[80].mxu1 %vm537_vm0, %v1438_v29  ;;  %v1349_v22 = vmax.f32 %v1061_v15, 0.0 }
 0x17b   :  { %v1056_v21 = vadd.f32 %v10523_v58, %v1055_v28  ;;  %v1347_v36 = vmax.f32 %v1053_v5, 0.0 }
 0x17c   :  { %v1350_v0 = vmax.f32 %v1064_v23, 0.0 }
 0x17d   :  { %v1348_v37 = vmax.f32 %v1056_v21, 0.0 }
 0x17e   :  { %v1440_v20 = vpack.c.bf16 %v1350_v0, %v1349_v22 }
 0x17f   :  { %v1439_v38 = vpack.c.bf16 %v1348_v37, %v1347_v36  ;;  %v9090_v54 = vpop.f32.mrb[76].mxu0 }
 0x180   :  { %v1077_v7 = vadd.f32 %v9090_v54, %v10523_v58  ;;  %v1068_v39 = vpop.f32.mrb[77].mxu0 }
 0x181   :  { %v1069_v40 = vadd.f32 %v10523_v58, %v1068_v39  ;;  %v9091_v11 = vpop.f32.mrb[78].mxu0  ;;  %9220 = vmatprep.mubr.msk.bf16.mxu1 %vm537_vm0, %v1439_v38 }
 0x182   :  { %v1080_v12 = vadd.f32 %v9091_v11, %v10523_v58  ;;  %v1071_v55 = vpop.f32.mrb[79].mxu0  ;;  %9221 = vmatmul.mubr.msk.bf16.gmra.mrb[84].mxu1 %vm537_vm0, %v1440_v20  ;;  %v1353_v45 = vmax.f32 %v1077_v7, 0.0 }
 0x183   :  { %v1072_v42 = vadd.f32 %v10523_v58, %v1071_v55  ;;  %v1351_v46 = vmax.f32 %v1069_v40, 0.0 }
 0x184   :  { %v1354_v26 = vmax.f32 %v1080_v12, 0.0 }
 0x185   :  { %v1352_v47 = vmax.f32 %v1072_v42, 0.0 }
 0x186   :  { %v1442_v48 = vpack.c.bf16 %v1354_v26, %v1353_v45 }
 0x187   :  { %v1441_v8 = vpack.c.bf16 %v1352_v47, %v1351_v46  ;;  %v9094_v31 = vpop.f32.mrb[80].mxu0 }
 0x188   :  { %v1093_v32 = vadd.f32 %v9094_v31, %v10523_v58  ;;  %v1084_v49 = vpop.f32.mrb[81].mxu0 }
 0x189   :  { %v1085_v33 = vadd.f32 %v10523_v58, %v1084_v49  ;;  %v9095_v34 = vpop.f32.mrb[82].mxu0  ;;  %9224 = vmatprep.mubr.msk.bf16.mxu1 %vm537_vm0, %v1441_v8 }
 0x18a   :  { %v1096_v35 = vadd.f32 %v9095_v34, %v10523_v58  ;;  %v1087_v50 = vpop.f32.mrb[83].mxu0  ;;  %9225 = vmatmul.mubr.msk.bf16.gmra.mrb[88].mxu1 %vm537_vm0, %v1442_v48  ;;  %v1357_v17 = vmax.f32 %v1093_v32, 0.0 }
 0x18b   :  { %v1088_v51 = vadd.f32 %v10523_v58, %v1087_v50  ;;  %v1355_v53 = vmax.f32 %v1085_v33, 0.0 }
 0x18c   :  { %v1358_v52 = vmax.f32 %v1096_v35, 0.0 }
 0x18d   :  { %v1356_v62 = vmax.f32 %v1088_v51, 0.0 }
 0x18e   :  { %v1444_v56 = vpack.c.bf16 %v1358_v52, %v1357_v17 }
 0x18f   :  { %v1443_v63 = vpack.c.bf16 %v1356_v62, %v1355_v53  ;;  %v9098_v2 = vpop.f32.mrb[84].mxu0 }
 0x190   :  { %v1109_v3 = vadd.f32 %v9098_v2, %v10523_v58  ;;  %v1100_v57 = vpop.f32.mrb[85].mxu0 }
 0x191   :  { %v1101_v24 = vadd.f32 %v10523_v58, %v1100_v57  ;;  %v9099_v25 = vpop.f32.mrb[86].mxu0  ;;  %9228 = vmatprep.mubr.msk.bf16.mxu1 %vm537_vm0, %v1443_v63 }
 0x192   :  { %v1112_v59 = vadd.f32 %v9099_v25, %v10523_v58  ;;  %v1103_v16 = vpop.f32.mrb[87].mxu0  ;;  %9229 = vmatmul.mubr.msk.bf16.gmra.mrb[92].mxu1 %vm537_vm0, %v1444_v56  ;;  %v1361_v1 = vmax.f32 %v1109_v3, 0.0 }
 0x193   :  { %v1104_v61 = vadd.f32 %v10523_v58, %v1103_v16  ;;  %v1359_v6 = vmax.f32 %v1101_v24, 0.0 }
 0x194   :  { %v1362_v4 = vmax.f32 %v1112_v59, 0.0 }
 0x195   :  { %v1360_v29 = vmax.f32 %v1104_v61, 0.0 }
 0x196   :  { %v1446_v9 = vpack.c.bf16 %v1362_v4, %v1361_v1 }
 0x197   :  { %v1445_v13 = vpack.c.bf16 %v1360_v29, %v1359_v6  ;;  %v9102_v15 = vpop.f32.mrb[88].mxu0 }
 0x198   :  { %v1125_v18 = vadd.f32 %v9102_v15, %v10523_v58  ;;  %v1116_v5 = vpop.f32.mrb[89].mxu0 }
 0x199   :  { %v1117_v30 = vadd.f32 %v10523_v58, %v1116_v5  ;;  %v9103_v23 = vpop.f32.mrb[90].mxu0  ;;  %9232 = vmatprep.mubr.msk.bf16.mxu1 %vm537_vm0, %v1445_v13 }
 0x19a   :  { %v1128_v28 = vadd.f32 %v9103_v23, %v10523_v58  ;;  %v1119_v21 = vpop.f32.mrb[91].mxu0  ;;  %9233 = vmatmul.mubr.msk.bf16.gmra.mrb[96].mxu1 %vm537_vm0, %v1446_v9  ;;  %v1365_v0 = vmax.f32 %v1125_v18, 0.0 }
 0x19b   :  { %v1120_v22 = vadd.f32 %v10523_v58, %v1119_v21  ;;  %v1363_v37 = vmax.f32 %v1117_v30, 0.0 }
 0x19c   :  { %v1366_v36 = vmax.f32 %v1128_v28, 0.0 }
 0x19d   :  { %v1364_v20 = vmax.f32 %v1120_v22, 0.0 }
 0x19e   :  { %v1448_v38 = vpack.c.bf16 %v1366_v36, %v1365_v0 }
 0x19f   :  { %v1447_v54 = vpack.c.bf16 %v1364_v20, %v1363_v37  ;;  %v9106_v7 = vpop.f32.mrb[92].mxu0 }
 0x1a0   :  { %v1141_v39 = vadd.f32 %v9106_v7, %v10523_v58  ;;  %v1132_v40 = vpop.f32.mrb[93].mxu0 }
 0x1a1   :  { %v1133_v11 = vadd.f32 %v10523_v58, %v1132_v40  ;;  %v9107_v12 = vpop.f32.mrb[94].mxu0  ;;  %9236 = vmatprep.mubr.msk.bf16.mxu1 %vm537_vm0, %v1447_v54 }
 0x1a2   :  { %v1144_v55 = vadd.f32 %v9107_v12, %v10523_v58  ;;  %v1135_v42 = vpop.f32.mrb[95].mxu0  ;;  %9237 = vmatmul.mubr.msk.bf16.gmra.mrb[100].mxu1 %vm537_vm0, %v1448_v38  ;;  %v1369_v26 = vmax.f32 %v1141_v39, 0.0 }
 0x1a3   :  { %v1136_v45 = vadd.f32 %v10523_v58, %v1135_v42  ;;  %v1367_v47 = vmax.f32 %v1133_v11, 0.0 }
 0x1a4   :  { %v1370_v46 = vmax.f32 %v1144_v55, 0.0 }
 0x1a5   :  { %v1368_v48 = vmax.f32 %v1136_v45, 0.0 }
 0x1a6   :  { %v1450_v8 = vpack.c.bf16 %v1370_v46, %v1369_v26  ;;  %v10737_v26 = vld [vmem:[%s12462_s5 + $0x2] ss:$0 sm:$0xff] }
 0x1a7   :  { %v1449_v31 = vpack.c.bf16 %v1368_v48, %v1367_v47  ;;  %v9110_v32 = vpop.f32.mrb[96].mxu0 }
 0x1a8   :  { %v1157_v49 = vadd.f32 %v9110_v32, %v10523_v58  ;;  %v1148_v33 = vpop.f32.mrb[97].mxu0 }
 0x1a9   :  { %v1149_v34 = vadd.f32 %v10523_v58, %v1148_v33  ;;  %v9111_v35 = vpop.f32.mrb[98].mxu0  ;;  %9240 = vmatprep.mubr.msk.bf16.mxu1 %vm537_vm0, %v1449_v31 }
 0x1aa   :  { %v1160_v50 = vadd.f32 %v9111_v35, %v10523_v58  ;;  %v1151_v51 = vpop.f32.mrb[99].mxu0  ;;  %9241 = vmatmul.mubr.msk.bf16.gmra.mrb[104].mxu1 %vm537_vm0, %v1450_v8  ;;  %v1373_v52 = vmax.f32 %v1157_v49, 0.0 }
 0x1ab   :  { %v1152_v17 = vadd.f32 %v10523_v58, %v1151_v51  ;;  %v1371_v62 = vmax.f32 %v1149_v34, 0.0 }
 0x1ac   :  { %v1374_v53 = vmax.f32 %v1160_v50, 0.0 }
 0x1ad   :  { %v1372_v56 = vmax.f32 %v1152_v17, 0.0 }
 0x1ae   :  { %v1452_v63 = vpack.c.bf16 %v1374_v53, %v1373_v52  ;;  %v10029_v52 = vld [vmem:[%s12462_s5 + $0x1] ss:$0 sm:$0xff] }
 0x1af   :  { %v1451_v2 = vpack.c.bf16 %v1372_v56, %v1371_v62  ;;  %v9114_v3 = vpop.f32.mrb[100].mxu0 }
 0x1b0   :  { %v1173_v57 = vadd.f32 %v9114_v3, %v10523_v58  ;;  %v1164_v24 = vpop.f32.mrb[101].mxu0 }
 0x1b1   :  { %v1165_v25 = vadd.f32 %v10523_v58, %v1164_v24  ;;  %v9115_v59 = vpop.f32.mrb[102].mxu0  ;;  %9244 = vmatprep.mubr.msk.bf16.mxu1 %vm537_vm0, %v1451_v2 }
 0x1b2   :  { %v1176_v16 = vadd.f32 %v9115_v59, %v10523_v58  ;;  %v1167_v61 = vpop.f32.mrb[103].mxu0  ;;  %9245 = vmatmul.mubr.msk.bf16.gmra.mrb[108].mxu1 %vm537_vm0, %v1452_v63  ;;  %v1377_v4 = vmax.f32 %v1173_v57, 0.0 }
 0x1b3   :  { %v1168_v1 = vadd.f32 %v10523_v58, %v1167_v61  ;;  %v1375_v29 = vmax.f32 %v1165_v25, 0.0 }
 0x1b4   :  { %v1378_v6 = vmax.f32 %v1176_v16, 0.0 }
 0x1b5   :  { %v1376_v9 = vmax.f32 %v1168_v1, 0.0 }
 0x1b6   :  { %v1454_v13 = vpack.c.bf16 %v1378_v6, %v1377_v4 }
 0x1b7   :  { %v1453_v15 = vpack.c.bf16 %v1376_v9, %v1375_v29  ;;  %v9118_v18 = vpop.f32.mrb[104].mxu0 }
 0x1b8   :  { %v1189_v5 = vadd.f32 %v9118_v18, %v10523_v58  ;;  %v1180_v30 = vpop.f32.mrb[105].mxu0 }
 0x1b9   :  { %v1181_v23 = vadd.f32 %v10523_v58, %v1180_v30  ;;  %v9119_v28 = vpop.f32.mrb[106].mxu0  ;;  %9248 = vmatprep.mubr.msk.bf16.mxu1 %vm537_vm0, %v1453_v15 }
 0x1ba   :  { %v1192_v21 = vadd.f32 %v9119_v28, %v10523_v58  ;;  %v1183_v22 = vpop.f32.mrb[107].mxu0  ;;  %9249 = vmatmul.mubr.msk.bf16.gmra.mrb[112].mxu1 %vm537_vm0, %v1454_v13  ;;  %v1381_v36 = vmax.f32 %v1189_v5, 0.0 }
 0x1bb   :  { %v1184_v0 = vadd.f32 %v10523_v58, %v1183_v22  ;;  %v1379_v20 = vmax.f32 %v1181_v23, 0.0 }
 0x1bc   :  { %v1382_v37 = vmax.f32 %v1192_v21, 0.0 }
 0x1bd   :  { %v1380_v38 = vmax.f32 %v1184_v0, 0.0 }
 0x1be   :  { %v1456_v54 = vpack.c.bf16 %v1382_v37, %v1381_v36 }
 0x1bf   :  { %v1455_v7 = vpack.c.bf16 %v1380_v38, %v1379_v20  ;;  %v9122_v39 = vpop.f32.mrb[108].mxu0 }
 0x1c0   :  { %v1205_v40 = vadd.f32 %v9122_v39, %v10523_v58  ;;  %v1196_v11 = vpop.f32.mrb[109].mxu0 }
 0x1c1   :  { %v1197_v12 = vadd.f32 %v10523_v58, %v1196_v11  ;;  %v9123_v55 = vpop.f32.mrb[110].mxu0  ;;  %9252 = vmatprep.mubr.msk.bf16.mxu1 %vm537_vm0, %v1455_v7 }
 0x1c2   :  { %v1208_v42 = vadd.f32 %v9123_v55, %v10523_v58  ;;  %v1199_v45 = vpop.f32.mrb[111].mxu0  ;;  %9253 = vmatmul.mubr.msk.bf16.gmra.mrb[116].mxu1 %vm537_vm0, %v1456_v54  ;;  %v1385_v47 = vmax.f32 %v1205_v40, 0.0 }
 0x1c3   :  { %v1200_v46 = vadd.f32 %v10523_v58, %v1199_v45  ;;  %v1383_v8 = vmax.f32 %v1197_v12, 0.0 }
 0x1c4   :  { %v1386_v48 = vmax.f32 %v1208_v42, 0.0 }
 0x1c5   :  { %v1384_v31 = vmax.f32 %v1200_v46, 0.0  ;;  %v9150_v32 = vpop.f32.mrb[12].mxu1 }
 0x1c6   :  { %v1458_v49 = vpack.c.bf16 %v1386_v48, %v1385_v47  ;;  %v1743_v33 = vadd.f32 %v9150_v32, %v10737_v26  ;;  %v1734_v34 = vpop.f32.mrb[13].mxu1 }
 0x1c7   :  { %v1457_v35 = vpack.c.bf16 %v1384_v31, %v1383_v8  ;;  %v1735_v50 = vadd.f32 %v10737_v26, %v1734_v34  ;;  %v9126_v51 = vpop.f32.mrb[112].mxu0  ;;  %v9151_v17 = vpop.f32.mrb[14].mxu1 }
 0x1c8   :  { %v1221_v53 = vadd.f32 %v10029_v52, %v9126_v51  ;;  %v1746_v58 = vadd.f32 %v9151_v17, %v10737_v26  ;;  %v1212_v62 = vpop.f32.mrb[113].mxu0  ;;  %v1737_v56 = vpop.f32.mrb[15].mxu1  ;;  %v2247_v57 = vmax.f32 %v1743_v33, 0.0 }
 0x1c9   :  { %v1213_v63 = vadd.f32 %v10029_v52, %v1212_v62  ;;  %v1738_v2 = vadd.f32 %v10737_v26, %v1737_v56  ;;  %v9127_v3 = vpop.f32.mrb[114].mxu0  ;;  %9256 = vmatprep.mubr.msk.bf16.mxu1 %vm537_vm0, %v1457_v35  ;;  %v2245_v16 = vmax.f32 %v1735_v50, 0.0 }
 0x1ca   :  { %v2248_v24 = vmax.f32 %v1746_v58, 0.0  ;;  %v1224_v25 = vadd.f32 %v10029_v52, %v9127_v3  ;;  %v1215_v59 = vpop.f32.mrb[115].mxu0  ;;  %9257 = vmatmul.mubr.msk.bf16.gmra.mrb[120].mxu1 %vm537_vm0, %v1458_v49  ;;  %v1389_v4 = vmax.f32 %v1221_v53, 0.0 }
 0x1cb   :  { %v2246_v61 = vmax.f32 %v1738_v2, 0.0  ;;  %v1216_v1 = vadd.f32 %v10029_v52, %v1215_v59  ;;  %v1387_v9 = vmax.f32 %v1213_v63, 0.0 }
 0x1cc   :  { %v2374_v6 = vpack.c.bf16 %v2248_v24, %v2247_v57  ;;  %v1390_v29 = vmax.f32 %v1224_v25, 0.0 }
 0x1cd   :  { %v2373_v13 = vpack.c.bf16 %v2246_v61, %v2245_v16  ;;  %v1388_v15 = vmax.f32 %v1216_v1, 0.0  ;;  %v9154_v18 = vpop.f32.mrb[16].mxu1 }
 0x1ce   :  { %v1460_v5 = vpack.c.bf16 %v1390_v29, %v1389_v4  ;;  %v1759_v30 = vadd.f32 %v9154_v18, %v10737_v26  ;;  %v1750_v23 = vpop.f32.mrb[17].mxu1 }
 0x1cf   :  { %v1459_v28 = vpack.c.bf16 %v1388_v15, %v1387_v9  ;;  %v1751_v21 = vadd.f32 %v10737_v26, %v1750_v23  ;;  %v9155_v22 = vpop.f32.mrb[18].mxu1  ;;  %9284 = vmatprep.mubr.msk.bf16.mxu0 %vm537_vm0, %v2373_v13 }
 0x1d0   :  { %v1762_v0 = vadd.f32 %v9155_v22, %v10737_v26  ;;  %v1753_v36 = vpop.f32.mrb[19].mxu1  ;;  %9285 = vmatmul.mubr.msk.bf16.vlgmr.msra.gmra.mrb[116].mxu0 %vm537_vm0, %v2374_v6  ;;  %v2251_v20 = vmax.f32 %v1759_v30, 0.0 }
 0x1d1   :  { %v1754_v37 = vadd.f32 %v10737_v26, %v1753_v36  ;;  %9260 = vmatprep.mubr.msk.bf16.mxu1 %vm537_vm0, %v1459_v28  ;;  %v2249_v54 = vmax.f32 %v1751_v21, 0.0 }
 0x1d2   :  { %v2252_v38 = vmax.f32 %v1762_v0, 0.0  ;;  %9261 = vmatmul.mubr.msk.bf16.gmra.mrb[124].mxu1 %vm537_vm0, %v1460_v5 }
 0x1d3   :  { %v2250_v7 = vmax.f32 %v1754_v37, 0.0  ;;  %9264 = vmatprep.mubr.msk.bf16.mxu1 %vm537_vm0, %v10600_v27 }
 0x1d4   :  { %v2376_v39 = vpack.c.bf16 %v2252_v38, %v2251_v20 }
 0x1d5   :  { %v2375_v40 = vpack.c.bf16 %v2250_v7, %v2249_v54  ;;  %v9158_v11 = vpop.f32.mrb[20].mxu1 }
 0x1d6   :  { %v1775_v12 = vadd.f32 %v9158_v11, %v10737_v26  ;;  %v1766_v55 = vpop.f32.mrb[21].mxu1 }
 0x1d7   :  { %v1767_v42 = vadd.f32 %v10737_v26, %v1766_v55  ;;  %v9159_v45 = vpop.f32.mrb[22].mxu1  ;;  %9288 = vmatprep.mubr.msk.bf16.mxu0 %vm537_vm0, %v2375_v40 }
 0x1d8   :  { %v1778_v46 = vadd.f32 %v9159_v45, %v10737_v26  ;;  %v1769_v47 = vpop.f32.mrb[23].mxu1  ;;  %9289 = vmatmul.mubr.msk.bf16.gmra.mrb[120].mxu0 %vm537_vm0, %v2376_v39  ;;  %v2255_v8 = vmax.f32 %v1775_v12, 0.0 }
 0x1d9   :  { %v1770_v48 = vadd.f32 %v10737_v26, %v1769_v47  ;;  %v2253_v31 = vmax.f32 %v1767_v42, 0.0 }
 0x1da   :  { %v2256_v27 = vmax.f32 %v1778_v46, 0.0  ;;  %9265 = vmatmul.mubr.msk.bf16.gmra.mrb[128].mxu1 %vm537_vm0, %v10598_v44 }
 0x1db   :  { %v2254_v32 = vmax.f32 %v1770_v48, 0.0  ;;  %9268 = vmatprep.mubr.msk.bf16.mxu1 %vm537_vm0, %v10614_v19 }
 0x1dc   :  { %v2378_v49 = vpack.c.bf16 %v2256_v27, %v2255_v8 }
 0x1dd   :  { %v2377_v33 = vpack.c.bf16 %v2254_v32, %v2253_v31  ;;  %v9162_v34 = vpop.f32.mrb[24].mxu1 }
 0x1de   :  { %v1791_v35 = vadd.f32 %v9162_v34, %v10737_v26  ;;  %v1782_v50 = vpop.f32.mrb[25].mxu1 }
 0x1df   :  { %v1783_v51 = vadd.f32 %v10737_v26, %v1782_v50  ;;  %v9163_v17 = vpop.f32.mrb[26].mxu1  ;;  %9292 = vmatprep.mubr.msk.bf16.mxu0 %vm537_vm0, %v2377_v33 }
 0x1e0   :  { %v1794_v52 = vadd.f32 %v9163_v17, %v10737_v26  ;;  %v1785_v53 = vpop.f32.mrb[27].mxu1  ;;  %9293 = vmatmul.mubr.msk.bf16.gmra.mrb[124].mxu0 %vm537_vm0, %v2378_v49  ;;  %v2259_v58 = vmax.f32 %v1791_v35, 0.0 }
 0x1e1   :  { %v1786_v44 = vadd.f32 %v10737_v26, %v1785_v53  ;;  %v2257_v62 = vmax.f32 %v1783_v51, 0.0 }
 0x1e2   :  { %v2260_v19 = vmax.f32 %v1794_v52, 0.0  ;;  %9269 = vmatmul.mubr.msk.bf16.gmra.mrb[132].mxu1 %vm537_vm0, %v10612_v60 }
 0x1e3   :  { %v2258_v56 = vmax.f32 %v1786_v44, 0.0  ;;  %9272 = vmatprep.mubr.msk.bf16.mxu1 %vm537_vm0, %v10631_v43 }
 0x1e4   :  { %v2380_v63 = vpack.c.bf16 %v2260_v19, %v2259_v58 }
 0x1e5   :  { %v2379_v2 = vpack.c.bf16 %v2258_v56, %v2257_v62  ;;  %v9166_v3 = vpop.f32.mrb[28].mxu1 }
 0x1e6   :  { %v1807_v57 = vadd.f32 %v9166_v3, %v10737_v26  ;;  %v1798_v24 = vpop.f32.mrb[29].mxu1 }
 0x1e7   :  { %v1799_v25 = vadd.f32 %v10737_v26, %v1798_v24  ;;  %v9167_v59 = vpop.f32.mrb[30].mxu1  ;;  %9296 = vmatprep.mubr.msk.bf16.mxu0 %vm537_vm0, %v2379_v2 }
 0x1e8   :  { %v1810_v16 = vadd.f32 %v9167_v59, %v10737_v26  ;;  %v1801_v61 = vpop.f32.mrb[31].mxu1  ;;  %9297 = vmatmul.mubr.msk.bf16.gmra.mrb[128].mxu0 %vm537_vm0, %v2380_v63  ;;  %v2263_v1 = vmax.f32 %v1807_v57, 0.0 }
 0x1e9   :  { %v1802_v60 = vadd.f32 %v10737_v26, %v1801_v61  ;;  %v2261_v4 = vmax.f32 %v1799_v25, 0.0 }
 0x1ea   :  { %v2264_v43 = vmax.f32 %v1810_v16, 0.0  ;;  %9273 = vmatmul.mubr.msk.bf16.gmra.mrb[136].mxu1 %vm537_vm0, %v10629_v41  ;;  %v10012_v41 = vld [vmem:[%s12459_s4 + $0x60] sm:$0xff]  }
 0x1eb   :  { %v2262_v6 = vmax.f32 %v1802_v60, 0.0  ;;  %9412 = vmatprep.subr.bf16.mxu1 %v10012_v41 }
 0x1ec   :  { %v2382_v29 = vpack.c.bf16 %v2264_v43, %v2263_v1  ;;  %9413 = vmatpush3.bf16.msra.mxu1 %v10012_v41 }
 0x1ed   :  { %v2381_v9 = vpack.c.bf16 %v2262_v6, %v2261_v4  ;;  %v9170_v13 = vpop.f32.mrb[32].mxu1 }
 0x1ee   :  { %v1823_v15 = vadd.f32 %v9170_v13, %v10737_v26  ;;  %v1814_v18 = vpop.f32.mrb[33].mxu1 }
 0x1ef   :  { %v1815_v5 = vadd.f32 %v10737_v26, %v1814_v18  ;;  %v9171_v30 = vpop.f32.mrb[34].mxu1  ;;  %9300 = vmatprep.mubr.msk.bf16.mxu0 %vm537_vm0, %v2381_v9 }
 0x1f0   :  { %v1826_v23 = vadd.f32 %v9171_v30, %v10737_v26  ;;  %v1817_v28 = vpop.f32.mrb[35].mxu1  ;;  %9301 = vmatmul.mubr.msk.bf16.gmra.mrb[132].mxu0 %vm537_vm0, %v2382_v29  ;;  %v2267_v22 = vmax.f32 %v1823_v15, 0.0 }
 0x1f1   :  { %v1818_v21 = vadd.f32 %v10737_v26, %v1817_v28  ;;  %v2265_v36 = vmax.f32 %v1815_v5, 0.0 }
 0x1f2   :  { %v2268_v0 = vmax.f32 %v1826_v23, 0.0 }
 0x1f3   :  { %v2266_v37 = vmax.f32 %v1818_v21, 0.0 }
 0x1f4   :  { %v2384_v20 = vpack.c.bf16 %v2268_v0, %v2267_v22 }
 0x1f5   :  { %v2383_v38 = vpack.c.bf16 %v2266_v37, %v2265_v36  ;;  %v9174_v54 = vpop.f32.mrb[36].mxu1 }
 0x1f6   :  { %v1839_v7 = vadd.f32 %v9174_v54, %v10737_v26  ;;  %v1830_v39 = vpop.f32.mrb[37].mxu1 }
 0x1f7   :  { %v1831_v40 = vadd.f32 %v10737_v26, %v1830_v39  ;;  %v9175_v11 = vpop.f32.mrb[38].mxu1  ;;  %9304 = vmatprep.mubr.msk.bf16.mxu0 %vm537_vm0, %v2383_v38 }
 0x1f8   :  { %v1842_v12 = vadd.f32 %v9175_v11, %v10737_v26  ;;  %v1833_v55 = vpop.f32.mrb[39].mxu1  ;;  %9305 = vmatmul.mubr.msk.bf16.gmra.mrb[136].mxu0 %vm537_vm0, %v2384_v20  ;;  %v2271_v45 = vmax.f32 %v1839_v7, 0.0 }
 0x1f9   :  { %v1834_v42 = vadd.f32 %v10737_v26, %v1833_v55  ;;  %v2269_v47 = vmax.f32 %v1831_v40, 0.0 }
 0x1fa   :  { %v2272_v46 = vmax.f32 %v1842_v12, 0.0 }
 0x1fb   :  { %v2270_v48 = vmax.f32 %v1834_v42, 0.0 }
 0x1fc   :  { %v2386_v8 = vpack.c.bf16 %v2272_v46, %v2271_v45 }
 0x1fd   :  { %v2385_v27 = vpack.c.bf16 %v2270_v48, %v2269_v47  ;;  %v9178_v31 = vpop.f32.mrb[40].mxu1 }
 0x1fe   :  { %v1855_v32 = vadd.f32 %v9178_v31, %v10737_v26  ;;  %v1846_v49 = vpop.f32.mrb[41].mxu1 }
 0x1ff   :  { %v1847_v33 = vadd.f32 %v10737_v26, %v1846_v49  ;;  %v9179_v34 = vpop.f32.mrb[42].mxu1  ;;  %9308 = vmatprep.mubr.msk.bf16.mxu0 %vm537_vm0, %v2385_v27  ;;  %v10013_v49 = vld [vmem:[%s12459_s4 + $0x68] sm:$0xff]  }
 0x200   :  { %v1858_v35 = vadd.f32 %v9179_v34, %v10737_v26  ;;  %v1849_v50 = vpop.f32.mrb[43].mxu1  ;;  %9309 = vmatmul.mubr.msk.bf16.gmra.mrb[140].mxu0 %vm537_vm0, %v2386_v8  ;;  %v2275_v17 = vmax.f32 %v1855_v32, 0.0  ;;  %9414 = vmatprep.subr.bf16.mxu1 %v10013_v49 }
 0x201   :  { %v1850_v51 = vadd.f32 %v10737_v26, %v1849_v50  ;;  %v2273_v53 = vmax.f32 %v1847_v33, 0.0  ;;  %9415 = vmatpush3.bf16.msra.mxu1 %v10013_v49 }
 0x202   :  { %v2276_v52 = vmax.f32 %v1858_v35, 0.0 }
 0x203   :  { %v2274_v44 = vmax.f32 %v1850_v51, 0.0 }
 0x204   :  { %v2388_v58 = vpack.c.bf16 %v2276_v52, %v2275_v17  ;;  %v10014_v52 = vld [vmem:[%s12459_s4 + $0x70] sm:$0xff]  }
 0x205   :  { %v2387_v19 = vpack.c.bf16 %v2274_v44, %v2273_v53  ;;  %v9182_v62 = vpop.f32.mrb[44].mxu1  ;;  %9416 = vmatprep.subr.bf16.mxu1 %v10014_v52 }
 0x206   :  { %v1871_v56 = vadd.f32 %v9182_v62, %v10737_v26  ;;  %v1862_v63 = vpop.f32.mrb[45].mxu1  ;;  %9417 = vmatpush3.bf16.msra.mxu1 %v10014_v52 }
 0x207   :  { %v1863_v2 = vadd.f32 %v10737_v26, %v1862_v63  ;;  %v9183_v3 = vpop.f32.mrb[46].mxu1  ;;  %9312 = vmatprep.mubr.msk.bf16.mxu0 %vm537_vm0, %v2387_v19 }
 0x208   :  { %v1874_v57 = vadd.f32 %v9183_v3, %v10737_v26  ;;  %v1865_v24 = vpop.f32.mrb[47].mxu1  ;;  %9313 = vmatmul.mubr.msk.bf16.gmra.mrb[144].mxu0 %vm537_vm0, %v2388_v58  ;;  %v2279_v59 = vmax.f32 %v1871_v56, 0.0  ;;  %v10015_v3 = vld [vmem:[%s12459_s4 + $0x78] sm:$0xff]  }
 0x209   :  { %v1866_v25 = vadd.f32 %v10737_v26, %v1865_v24  ;;  %v2277_v61 = vmax.f32 %v1863_v2, 0.0  ;;  %9418 = vmatprep.subr.bf16.mxu1 %v10015_v3 }
 0x20a   :  { %v2280_v16 = vmax.f32 %v1874_v57, 0.0  ;;  %9419 = vmatpush3.bf16.msra.mxu1 %v10015_v3 }
 0x20b   :  { %v2278_v60 = vmax.f32 %v1866_v25, 0.0 }
 0x20c   :  { %v2390_v1 = vpack.c.bf16 %v2280_v16, %v2279_v59 }
 0x20d   :  { %v2389_v43 = vpack.c.bf16 %v2278_v60, %v2277_v61  ;;  %v9186_v4 = vpop.f32.mrb[48].mxu1 }
 0x20e   :  { %v1887_v6 = vadd.f32 %v9186_v4, %v10737_v26  ;;  %v1878_v29 = vpop.f32.mrb[49].mxu1 }
 0x20f   :  { %v1879_v9 = vadd.f32 %v10737_v26, %v1878_v29  ;;  %v9187_v13 = vpop.f32.mrb[50].mxu1  ;;  %9316 = vmatprep.mubr.msk.bf16.mxu0 %vm537_vm0, %v2389_v43 }
 0x210   :  { %v1890_v15 = vadd.f32 %v9187_v13, %v10737_v26  ;;  %v1881_v18 = vpop.f32.mrb[51].mxu1  ;;  %9317 = vmatmul.mubr.msk.bf16.gmra.mrb[148].mxu0 %vm537_vm0, %v2390_v1  ;;  %v2283_v30 = vmax.f32 %v1887_v6, 0.0 }
 0x211   :  { %v1882_v5 = vadd.f32 %v10737_v26, %v1881_v18  ;;  %v2281_v28 = vmax.f32 %v1879_v9, 0.0 }
 0x212   :  { %v2284_v23 = vmax.f32 %v1890_v15, 0.0 }
 0x213   :  { %v2282_v41 = vmax.f32 %v1882_v5, 0.0 }
 0x214   :  { %v2392_v21 = vpack.c.bf16 %v2284_v23, %v2283_v30 }
 0x215   :  { %v2391_v22 = vpack.c.bf16 %v2282_v41, %v2281_v28  ;;  %v9190_v0 = vpop.f32.mrb[52].mxu1 }
 0x216   :  { %v1903_v36 = vadd.f32 %v9190_v0, %v10737_v26  ;;  %v1894_v37 = vpop.f32.mrb[53].mxu1 }
 0x217   :  { %v1895_v20 = vadd.f32 %v10737_v26, %v1894_v37  ;;  %v9191_v38 = vpop.f32.mrb[54].mxu1  ;;  %9320 = vmatprep.mubr.msk.bf16.mxu0 %vm537_vm0, %v2391_v22 }
 0x218   :  { %v1906_v54 = vadd.f32 %v9191_v38, %v10737_v26  ;;  %v1897_v7 = vpop.f32.mrb[55].mxu1  ;;  %9321 = vmatmul.mubr.msk.bf16.gmra.mrb[152].mxu0 %vm537_vm0, %v2392_v21  ;;  %v2287_v40 = vmax.f32 %v1903_v36, 0.0 }
 0x219   :  { %v1898_v39 = vadd.f32 %v10737_v26, %v1897_v7  ;;  %v2285_v12 = vmax.f32 %v1895_v20, 0.0 }
 0x21a   :  { %v2288_v11 = vmax.f32 %v1906_v54, 0.0 }
 0x21b   :  { %v2286_v55 = vmax.f32 %v1898_v39, 0.0 }
 0x21c   :  { %v2394_v42 = vpack.c.bf16 %v2288_v11, %v2287_v40 }
 0x21d   :  { %v2393_v45 = vpack.c.bf16 %v2286_v55, %v2285_v12  ;;  %v9194_v46 = vpop.f32.mrb[56].mxu1 }
 0x21e   :  { %v1919_v47 = vadd.f32 %v9194_v46, %v10737_v26  ;;  %v1910_v48 = vpop.f32.mrb[57].mxu1 }
 0x21f   :  { %v1911_v8 = vadd.f32 %v10737_v26, %v1910_v48  ;;  %v9195_v27 = vpop.f32.mrb[58].mxu1  ;;  %9324 = vmatprep.mubr.msk.bf16.mxu0 %vm537_vm0, %v2393_v45 }
 0x220   :  { %v1922_v31 = vadd.f32 %v9195_v27, %v10737_v26  ;;  %v1913_v32 = vpop.f32.mrb[59].mxu1  ;;  %9325 = vmatmul.mubr.msk.bf16.gmra.mrb[156].mxu0 %vm537_vm0, %v2394_v42  ;;  %v2291_v34 = vmax.f32 %v1919_v47, 0.0 }
 0x221   :  { %v1914_v33 = vadd.f32 %v10737_v26, %v1913_v32  ;;  %v2289_v50 = vmax.f32 %v1911_v8, 0.0 }
 0x222   :  { %v2292_v35 = vmax.f32 %v1922_v31, 0.0 }
 0x223   :  { %v2290_v51 = vmax.f32 %v1914_v33, 0.0 }
 0x224   :  { %v2396_v17 = vpack.c.bf16 %v2292_v35, %v2291_v34 }
 0x225   :  { %v2395_v53 = vpack.c.bf16 %v2290_v51, %v2289_v50  ;;  %v9198_v44 = vpop.f32.mrb[60].mxu1 }
 0x226   :  { %v1935_v58 = vadd.f32 %v9198_v44, %v10737_v26  ;;  %v1926_v19 = vpop.f32.mrb[61].mxu1 }
 0x227   :  { %v1927_v62 = vadd.f32 %v10737_v26, %v1926_v19  ;;  %v9199_v56 = vpop.f32.mrb[62].mxu1  ;;  %9328 = vmatprep.mubr.msk.bf16.mxu0 %vm537_vm0, %v2395_v53 }
 0x228   :  { %v1938_v63 = vadd.f32 %v9199_v56, %v10737_v26  ;;  %v1929_v2 = vpop.f32.mrb[63].mxu1  ;;  %9329 = vmatmul.mubr.msk.bf16.gmra.mrb[160].mxu0 %vm537_vm0, %v2396_v17  ;;  %v2295_v24 = vmax.f32 %v1935_v58, 0.0 }
 0x229   :  { %v1930_v57 = vadd.f32 %v10737_v26, %v1929_v2  ;;  %v2293_v59 = vmax.f32 %v1927_v62, 0.0 }
 0x22a   :  { %v2296_v25 = vmax.f32 %v1938_v63, 0.0 }
 0x22b   :  { %v2294_v16 = vmax.f32 %v1930_v57, 0.0 }
 0x22c   :  { %v2398_v61 = vpack.c.bf16 %v2296_v25, %v2295_v24 }
 0x22d   :  { %v2397_v60 = vpack.c.bf16 %v2294_v16, %v2293_v59  ;;  %v9202_v1 = vpop.f32.mrb[64].mxu1 }
 0x22e   :  { %v1951_v43 = vadd.f32 %v9202_v1, %v10737_v26  ;;  %v1942_v4 = vpop.f32.mrb[65].mxu1 }
 0x22f   :  { %v1943_v6 = vadd.f32 %v10737_v26, %v1942_v4  ;;  %v9203_v29 = vpop.f32.mrb[66].mxu1  ;;  %9332 = vmatprep.mubr.msk.bf16.mxu0 %vm537_vm0, %v2397_v60 }
 0x230   :  { %v1954_v9 = vadd.f32 %v9203_v29, %v10737_v26  ;;  %v1945_v13 = vpop.f32.mrb[67].mxu1  ;;  %9333 = vmatmul.mubr.msk.bf16.gmra.mrb[164].mxu0 %vm537_vm0, %v2398_v61  ;;  %v2299_v18 = vmax.f32 %v1951_v43, 0.0 }
 0x231   :  { %v1946_v15 = vadd.f32 %v10737_v26, %v1945_v13  ;;  %v2297_v30 = vmax.f32 %v1943_v6, 0.0 }
 0x232   :  { %v2300_v5 = vmax.f32 %v1954_v9, 0.0 }
 0x233   :  { %v2298_v23 = vmax.f32 %v1946_v15, 0.0 }
 0x234   :  { %v2400_v28 = vpack.c.bf16 %v2300_v5, %v2299_v18 }
 0x235   :  { %v2399_v41 = vpack.c.bf16 %v2298_v23, %v2297_v30  ;;  %v9206_v21 = vpop.f32.mrb[68].mxu1 }
 0x236   :  { %v1967_v22 = vadd.f32 %v9206_v21, %v10737_v26  ;;  %v1958_v0 = vpop.f32.mrb[69].mxu1 }
 0x237   :  { %v1959_v36 = vadd.f32 %v10737_v26, %v1958_v0  ;;  %v9207_v37 = vpop.f32.mrb[70].mxu1  ;;  %9336 = vmatprep.mubr.msk.bf16.mxu0 %vm537_vm0, %v2399_v41 }
 0x238   :  { %v1970_v20 = vadd.f32 %v9207_v37, %v10737_v26  ;;  %v1961_v38 = vpop.f32.mrb[71].mxu1  ;;  %9337 = vmatmul.mubr.msk.bf16.gmra.mrb[168].mxu0 %vm537_vm0, %v2400_v28  ;;  %v2303_v7 = vmax.f32 %v1967_v22, 0.0 }
 0x239   :  { %v1962_v54 = vadd.f32 %v10737_v26, %v1961_v38  ;;  %v2301_v40 = vmax.f32 %v1959_v36, 0.0 }
 0x23a   :  { %v2304_v39 = vmax.f32 %v1970_v20, 0.0 }
 0x23b   :  { %v2302_v11 = vmax.f32 %v1962_v54, 0.0 }
 0x23c   :  { %v2402_v12 = vpack.c.bf16 %v2304_v39, %v2303_v7 }
 0x23d   :  { %v2401_v55 = vpack.c.bf16 %v2302_v11, %v2301_v40  ;;  %v9210_v42 = vpop.f32.mrb[72].mxu1 }
 0x23e   :  { %v1983_v45 = vadd.f32 %v9210_v42, %v10737_v26  ;;  %v1974_v46 = vpop.f32.mrb[73].mxu1 }
 0x23f   :  { %v1975_v47 = vadd.f32 %v10737_v26, %v1974_v46  ;;  %v9211_v48 = vpop.f32.mrb[74].mxu1  ;;  %9340 = vmatprep.mubr.msk.bf16.mxu0 %vm537_vm0, %v2401_v55 }
 0x240   :  { %v1986_v8 = vadd.f32 %v9211_v48, %v10737_v26  ;;  %v1977_v27 = vpop.f32.mrb[75].mxu1  ;;  %9341 = vmatmul.mubr.msk.bf16.gmra.mrb[172].mxu0 %vm537_vm0, %v2402_v12  ;;  %v2307_v32 = vmax.f32 %v1983_v45, 0.0 }
 0x241   :  { %v1978_v31 = vadd.f32 %v10737_v26, %v1977_v27  ;;  %v2305_v33 = vmax.f32 %v1975_v47, 0.0 }
 0x242   :  { %v2308_v49 = vmax.f32 %v1986_v8, 0.0 }
 0x243   :  { %v2306_v34 = vmax.f32 %v1978_v31, 0.0 }
 0x244   :  { %v2404_v35 = vpack.c.bf16 %v2308_v49, %v2307_v32 }
 0x245   :  { %v2403_v50 = vpack.c.bf16 %v2306_v34, %v2305_v33  ;;  %v9214_v51 = vpop.f32.mrb[76].mxu1 }
 0x246   :  { %v1999_v17 = vadd.f32 %v9214_v51, %v10737_v26  ;;  %v1990_v52 = vpop.f32.mrb[77].mxu1 }
 0x247   :  { %v1991_v53 = vadd.f32 %v10737_v26, %v1990_v52  ;;  %v9215_v44 = vpop.f32.mrb[78].mxu1  ;;  %9344 = vmatprep.mubr.msk.bf16.mxu0 %vm537_vm0, %v2403_v50 }
 0x248   :  { %v2002_v58 = vadd.f32 %v9215_v44, %v10737_v26  ;;  %v1993_v19 = vpop.f32.mrb[79].mxu1  ;;  %9345 = vmatmul.mubr.msk.bf16.gmra.mrb[176].mxu0 %vm537_vm0, %v2404_v35  ;;  %v2311_v56 = vmax.f32 %v1999_v17, 0.0 }
 0x249   :  { %v1994_v62 = vadd.f32 %v10737_v26, %v1993_v19  ;;  %v2309_v2 = vmax.f32 %v1991_v53, 0.0 }
 0x24a   :  { %v2312_v63 = vmax.f32 %v2002_v58, 0.0 }
 0x24b   :  { %v2310_v3 = vmax.f32 %v1994_v62, 0.0 }
 0x24c   :  { %v2406_v57 = vpack.c.bf16 %v2312_v63, %v2311_v56 }
 0x24d   :  { %v2405_v24 = vpack.c.bf16 %v2310_v3, %v2309_v2  ;;  %v9218_v25 = vpop.f32.mrb[80].mxu1 }
 0x24e   :  { %v2015_v59 = vadd.f32 %v9218_v25, %v10737_v26  ;;  %v2006_v16 = vpop.f32.mrb[81].mxu1 }
 0x24f   :  { %v2007_v61 = vadd.f32 %v10737_v26, %v2006_v16  ;;  %v9219_v60 = vpop.f32.mrb[82].mxu1  ;;  %9348 = vmatprep.mubr.msk.bf16.mxu0 %vm537_vm0, %v2405_v24 }
 0x250   :  { %v2018_v1 = vadd.f32 %v9219_v60, %v10737_v26  ;;  %v2009_v43 = vpop.f32.mrb[83].mxu1  ;;  %9349 = vmatmul.mubr.msk.bf16.gmra.mrb[180].mxu0 %vm537_vm0, %v2406_v57  ;;  %v2315_v6 = vmax.f32 %v2015_v59, 0.0 }
 0x251   :  { %v2010_v4 = vadd.f32 %v10737_v26, %v2009_v43  ;;  %v2313_v9 = vmax.f32 %v2007_v61, 0.0 }
 0x252   :  { %v2316_v29 = vmax.f32 %v2018_v1, 0.0 }
 0x253   :  { %v2314_v13 = vmax.f32 %v2010_v4, 0.0 }
 0x254   :  { %v2408_v15 = vpack.c.bf16 %v2316_v29, %v2315_v6 }
 0x255   :  { %v2407_v18 = vpack.c.bf16 %v2314_v13, %v2313_v9  ;;  %v9222_v5 = vpop.f32.mrb[84].mxu1 }
 0x256   :  { %v2031_v30 = vadd.f32 %v9222_v5, %v10737_v26  ;;  %v2022_v23 = vpop.f32.mrb[85].mxu1 }
 0x257   :  { %v2023_v28 = vadd.f32 %v10737_v26, %v2022_v23  ;;  %v9223_v41 = vpop.f32.mrb[86].mxu1  ;;  %9352 = vmatprep.mubr.msk.bf16.mxu0 %vm537_vm0, %v2407_v18 }
 0x258   :  { %v2034_v21 = vadd.f32 %v9223_v41, %v10737_v26  ;;  %v2025_v22 = vpop.f32.mrb[87].mxu1  ;;  %9353 = vmatmul.mubr.msk.bf16.gmra.mrb[184].mxu0 %vm537_vm0, %v2408_v15  ;;  %v2319_v36 = vmax.f32 %v2031_v30, 0.0 }
 0x259   :  { %v2026_v0 = vadd.f32 %v10737_v26, %v2025_v22  ;;  %v2317_v20 = vmax.f32 %v2023_v28, 0.0 }
 0x25a   :  { %v2320_v37 = vmax.f32 %v2034_v21, 0.0 }
 0x25b   :  { %v2318_v38 = vmax.f32 %v2026_v0, 0.0 }
 0x25c   :  { %v2410_v54 = vpack.c.bf16 %v2320_v37, %v2319_v36 }
 0x25d   :  { %v2409_v7 = vpack.c.bf16 %v2318_v38, %v2317_v20  ;;  %v9226_v39 = vpop.f32.mrb[88].mxu1 }
 0x25e   :  { %v2047_v40 = vadd.f32 %v9226_v39, %v10737_v26  ;;  %v2038_v11 = vpop.f32.mrb[89].mxu1 }
 0x25f   :  { %v2039_v12 = vadd.f32 %v10737_v26, %v2038_v11  ;;  %v9227_v55 = vpop.f32.mrb[90].mxu1  ;;  %9356 = vmatprep.mubr.msk.bf16.mxu0 %vm537_vm0, %v2409_v7 }
 0x260   :  { %v2050_v42 = vadd.f32 %v9227_v55, %v10737_v26  ;;  %v2041_v45 = vpop.f32.mrb[91].mxu1  ;;  %9357 = vmatmul.mubr.msk.bf16.gmra.mrb[188].mxu0 %vm537_vm0, %v2410_v54  ;;  %v2323_v47 = vmax.f32 %v2047_v40, 0.0 }
 0x261   :  { %v2042_v46 = vadd.f32 %v10737_v26, %v2041_v45  ;;  %v2321_v8 = vmax.f32 %v2039_v12, 0.0 }
 0x262   :  { %v2324_v48 = vmax.f32 %v2050_v42, 0.0 }
 0x263   :  { %v2322_v27 = vmax.f32 %v2042_v46, 0.0 }
 0x264   :  { %v2412_v31 = vpack.c.bf16 %v2324_v48, %v2323_v47 }
 0x265   :  { %v2411_v32 = vpack.c.bf16 %v2322_v27, %v2321_v8  ;;  %v9230_v49 = vpop.f32.mrb[92].mxu1 }
 0x266   :  { %v2063_v33 = vadd.f32 %v9230_v49, %v10737_v26  ;;  %v2054_v34 = vpop.f32.mrb[93].mxu1 }
 0x267   :  { %v2055_v35 = vadd.f32 %v10737_v26, %v2054_v34  ;;  %v9231_v50 = vpop.f32.mrb[94].mxu1  ;;  %9360 = vmatprep.mubr.msk.bf16.mxu0 %vm537_vm0, %v2411_v32 }
 0x268   :  { %v2066_v51 = vadd.f32 %v9231_v50, %v10737_v26  ;;  %v2057_v17 = vpop.f32.mrb[95].mxu1  ;;  %9361 = vmatmul.mubr.msk.bf16.gmra.mrb[192].mxu0 %vm537_vm0, %v2412_v31  ;;  %v2327_v53 = vmax.f32 %v2063_v33, 0.0 }
 0x269   :  { %v2058_v52 = vadd.f32 %v10737_v26, %v2057_v17  ;;  %v2325_v58 = vmax.f32 %v2055_v35, 0.0 }
 0x26a   :  { %v2328_v44 = vmax.f32 %v2066_v51, 0.0 }
 0x26b   :  { %v2326_v19 = vmax.f32 %v2058_v52, 0.0 }
 0x26c   :  { %v2414_v62 = vpack.c.bf16 %v2328_v44, %v2327_v53 }
 0x26d   :  { %v2413_v56 = vpack.c.bf16 %v2326_v19, %v2325_v58  ;;  %v9234_v63 = vpop.f32.mrb[96].mxu1 }
 0x26e   :  { %v2079_v2 = vadd.f32 %v9234_v63, %v10737_v26  ;;  %v2070_v3 = vpop.f32.mrb[97].mxu1 }
 0x26f   :  { %v2071_v57 = vadd.f32 %v10737_v26, %v2070_v3  ;;  %v9235_v24 = vpop.f32.mrb[98].mxu1  ;;  %9364 = vmatprep.mubr.msk.bf16.mxu0 %vm537_vm0, %v2413_v56 }
 0x270   :  { %v2082_v25 = vadd.f32 %v9235_v24, %v10737_v26  ;;  %v2073_v59 = vpop.f32.mrb[99].mxu1  ;;  %9365 = vmatmul.mubr.msk.bf16.gmra.mrb[196].mxu0 %vm537_vm0, %v2414_v62  ;;  %v2331_v61 = vmax.f32 %v2079_v2, 0.0 }
 0x271   :  { %v2074_v16 = vadd.f32 %v10737_v26, %v2073_v59  ;;  %v2329_v1 = vmax.f32 %v2071_v57, 0.0 }
 0x272   :  { %v2332_v60 = vmax.f32 %v2082_v25, 0.0 }
 0x273   :  { %v2330_v43 = vmax.f32 %v2074_v16, 0.0 }
 0x274   :  { %v2416_v4 = vpack.c.bf16 %v2332_v60, %v2331_v61 }
 0x275   :  { %v2415_v6 = vpack.c.bf16 %v2330_v43, %v2329_v1  ;;  %v9238_v29 = vpop.f32.mrb[100].mxu1 }
 0x276   :  { %v2095_v9 = vadd.f32 %v9238_v29, %v10737_v26  ;;  %v2086_v13 = vpop.f32.mrb[101].mxu1 }
 0x277   :  { %v2087_v15 = vadd.f32 %v10737_v26, %v2086_v13  ;;  %v9239_v18 = vpop.f32.mrb[102].mxu1  ;;  %9368 = vmatprep.mubr.msk.bf16.mxu0 %vm537_vm0, %v2415_v6 }
 0x278   :  { %v2098_v5 = vadd.f32 %v9239_v18, %v10737_v26  ;;  %v2089_v30 = vpop.f32.mrb[103].mxu1  ;;  %9369 = vmatmul.mubr.msk.bf16.gmra.mrb[200].mxu0 %vm537_vm0, %v2416_v4  ;;  %v2335_v28 = vmax.f32 %v2095_v9, 0.0 }
 0x279   :  { %v2090_v23 = vadd.f32 %v10737_v26, %v2089_v30  ;;  %v2333_v21 = vmax.f32 %v2087_v15, 0.0 }
 0x27a   :  { %v2336_v41 = vmax.f32 %v2098_v5, 0.0 }
 0x27b   :  { %v2334_v22 = vmax.f32 %v2090_v23, 0.0 }
 0x27c   :  { %v2418_v0 = vpack.c.bf16 %v2336_v41, %v2335_v28 }
 0x27d   :  { %v2417_v36 = vpack.c.bf16 %v2334_v22, %v2333_v21  ;;  %v9242_v37 = vpop.f32.mrb[104].mxu1 }
 0x27e   :  { %v2111_v20 = vadd.f32 %v9242_v37, %v10737_v26  ;;  %v2102_v38 = vpop.f32.mrb[105].mxu1 }
 0x27f   :  { %v2103_v54 = vadd.f32 %v10737_v26, %v2102_v38  ;;  %v9243_v7 = vpop.f32.mrb[106].mxu1  ;;  %9372 = vmatprep.mubr.msk.bf16.mxu0 %vm537_vm0, %v2417_v36  ;;  %v10939_v38 = vld [vmem:[%s12462_s5 + $0x3] ss:$0 sm:$0xff] }
 0x280   :  { %v2114_v39 = vadd.f32 %v9243_v7, %v10737_v26  ;;  %v2105_v40 = vpop.f32.mrb[107].mxu1  ;;  %9373 = vmatmul.mubr.msk.bf16.gmra.mrb[204].mxu0 %vm537_vm0, %v2418_v0  ;;  %v2339_v12 = vmax.f32 %v2111_v20, 0.0 }
 0x281   :  { %v2106_v11 = vadd.f32 %v10737_v26, %v2105_v40  ;;  %v2337_v42 = vmax.f32 %v2103_v54, 0.0 }
 0x282   :  { %v2340_v55 = vmax.f32 %v2114_v39, 0.0 }
 0x283   :  { %v2338_v45 = vmax.f32 %v2106_v11, 0.0 }
 0x284   :  { %v2420_v46 = vpack.c.bf16 %v2340_v55, %v2339_v12 }
 0x285   :  { %v2419_v47 = vpack.c.bf16 %v2338_v45, %v2337_v42  ;;  %v9246_v48 = vpop.f32.mrb[108].mxu1 }
 0x286   :  { %v2127_v8 = vadd.f32 %v9246_v48, %v10737_v26  ;;  %v2118_v27 = vpop.f32.mrb[109].mxu1 }
 0x287   :  { %v2119_v31 = vadd.f32 %v10737_v26, %v2118_v27  ;;  %v9247_v32 = vpop.f32.mrb[110].mxu1  ;;  %9376 = vmatprep.mubr.msk.bf16.mxu0 %vm537_vm0, %v2419_v47 }
 0x288   :  { %v2130_v49 = vadd.f32 %v9247_v32, %v10737_v26  ;;  %v2121_v33 = vpop.f32.mrb[111].mxu1  ;;  %9377 = vmatmul.mubr.msk.bf16.gmra.mrb[208].mxu0 %vm537_vm0, %v2420_v46  ;;  %v2343_v35 = vmax.f32 %v2127_v8, 0.0 }
 0x289   :  { %v2122_v34 = vadd.f32 %v10737_v26, %v2121_v33  ;;  %v2341_v51 = vmax.f32 %v2119_v31, 0.0 }
 0x28a   :  { %v2344_v50 = vmax.f32 %v2130_v49, 0.0 }
 0x28b   :  { %v2342_v17 = vmax.f32 %v2122_v34, 0.0 }
 0x28c   :  { %v2422_v52 = vpack.c.bf16 %v2344_v50, %v2343_v35 }
 0x28d   :  { %v2421_v53 = vpack.c.bf16 %v2342_v17, %v2341_v51  ;;  %v9250_v44 = vpop.f32.mrb[112].mxu1 }
 0x28e   :  { %v2143_v58 = vadd.f32 %v9250_v44, %v10737_v26  ;;  %v2134_v19 = vpop.f32.mrb[113].mxu1 }
 0x28f   :  { %v2135_v62 = vadd.f32 %v10737_v26, %v2134_v19  ;;  %v9251_v56 = vpop.f32.mrb[114].mxu1  ;;  %9380 = vmatprep.mubr.msk.bf16.mxu0 %vm537_vm0, %v2421_v53 }
 0x290   :  { %v2146_v63 = vadd.f32 %v9251_v56, %v10737_v26  ;;  %v2137_v2 = vpop.f32.mrb[115].mxu1  ;;  %9381 = vmatmul.mubr.msk.bf16.gmra.mrb[212].mxu0 %vm537_vm0, %v2422_v52  ;;  %v2347_v57 = vmax.f32 %v2143_v58, 0.0  ;;  %v10954_v58 = vld [vmem:[%s12462_s5 + $0x2] ss:$0 sm:$0xff] }
 0x291   :  { %v2138_v3 = vadd.f32 %v10737_v26, %v2137_v2  ;;  %v2345_v25 = vmax.f32 %v2135_v62, 0.0 }
 0x292   :  { %v2348_v24 = vmax.f32 %v2146_v63, 0.0 }
 0x293   :  { %v2346_v59 = vmax.f32 %v2138_v3, 0.0 }
 0x294   :  { %v2424_v16 = vpack.c.bf16 %v2348_v24, %v2347_v57 }
 0x295   :  { %v2423_v61 = vpack.c.bf16 %v2346_v59, %v2345_v25  ;;  %v9254_v60 = vpop.f32.mrb[116].mxu1 }
 0x296   :  { %v2159_v1 = vadd.f32 %v9254_v60, %v10737_v26  ;;  %v2150_v43 = vpop.f32.mrb[117].mxu1 }
 0x297   :  { %v2151_v4 = vadd.f32 %v10737_v26, %v2150_v43  ;;  %v9255_v6 = vpop.f32.mrb[118].mxu1  ;;  %9384 = vmatprep.mubr.msk.bf16.mxu0 %vm537_vm0, %v2423_v61 }
 0x298   :  { %v2162_v29 = vadd.f32 %v9255_v6, %v10737_v26  ;;  %v2153_v9 = vpop.f32.mrb[119].mxu1  ;;  %9385 = vmatmul.mubr.msk.bf16.gmra.mrb[216].mxu0 %vm537_vm0, %v2424_v16  ;;  %v2351_v15 = vmax.f32 %v2159_v1, 0.0 }
 0x299   :  { %v2154_v13 = vadd.f32 %v10737_v26, %v2153_v9  ;;  %v2349_v5 = vmax.f32 %v2151_v4, 0.0 }
 0x29a   :  { %v2352_v18 = vmax.f32 %v2162_v29, 0.0 }
 0x29b   :  { %v2350_v30 = vmax.f32 %v2154_v13, 0.0 }
 0x29c   :  { %v2426_v23 = vpack.c.bf16 %v2352_v18, %v2351_v15 }
 0x29d   :  { %v2425_v28 = vpack.c.bf16 %v2350_v30, %v2349_v5  ;;  %v9258_v41 = vpop.f32.mrb[120].mxu1 }
 0x29e   :  { %v2175_v21 = vadd.f32 %v9258_v41, %v10737_v26  ;;  %v2166_v22 = vpop.f32.mrb[121].mxu1 }
 0x29f   :  { %v2167_v0 = vadd.f32 %v10737_v26, %v2166_v22  ;;  %v9259_v36 = vpop.f32.mrb[122].mxu1  ;;  %9388 = vmatprep.mubr.msk.bf16.mxu0 %vm537_vm0, %v2425_v28 }
 0x2a0   :  { %v2178_v37 = vadd.f32 %v9259_v36, %v10737_v26  ;;  %v2169_v20 = vpop.f32.mrb[123].mxu1  ;;  %9389 = vmatmul.mubr.msk.bf16.gmra.mrb[220].mxu0 %vm537_vm0, %v2426_v23  ;;  %v2355_v7 = vmax.f32 %v2175_v21, 0.0 }
 0x2a1   :  { %v2170_v54 = vadd.f32 %v10737_v26, %v2169_v20  ;;  %v2353_v40 = vmax.f32 %v2167_v0, 0.0 }
 0x2a2   :  { %v2356_v39 = vmax.f32 %v2178_v37, 0.0 }
 0x2a3   :  { %v2354_v11 = vmax.f32 %v2170_v54, 0.0  ;;  %v9286_v12 = vpop.f32.mrb[116].mxu0 }
 0x2a4   :  { %v2428_v55 = vpack.c.bf16 %v2356_v39, %v2355_v7  ;;  %v2713_v42 = vadd.f32 %v9286_v12, %v10939_v38  ;;  %v2704_v45 = vpop.f32.mrb[117].mxu0 }
 0x2a5   :  { %v2427_v46 = vpack.c.bf16 %v2354_v11, %v2353_v40  ;;  %v2705_v47 = vadd.f32 %v10939_v38, %v2704_v45  ;;  %v9262_v48 = vpop.f32.mrb[124].mxu1  ;;  %v9287_v8 = vpop.f32.mrb[118].mxu0 }
 0x2a6   :  { %v2191_v27 = vadd.f32 %v9262_v48, %v10737_v26  ;;  %v2716_v31 = vadd.f32 %v9287_v8, %v10939_v38  ;;  %v2182_v32 = vpop.f32.mrb[125].mxu1  ;;  %v2707_v49 = vpop.f32.mrb[119].mxu0  ;;  %v3217_v50 = vmax.f32 %v2713_v42, 0.0 }
 0x2a7   :  { %v2183_v33 = vadd.f32 %v10737_v26, %v2182_v32  ;;  %v2708_v34 = vadd.f32 %v10939_v38, %v2707_v49  ;;  %v9263_v35 = vpop.f32.mrb[126].mxu1  ;;  %9392 = vmatprep.mubr.msk.bf16.mxu0 %vm537_vm0, %v2427_v46  ;;  %v3215_v53 = vmax.f32 %v2705_v47, 0.0 }
 0x2a8   :  { %v3218_v51 = vmax.f32 %v2716_v31, 0.0  ;;  %v2194_v17 = vadd.f32 %v9263_v35, %v10737_v26  ;;  %v2185_v52 = vpop.f32.mrb[127].mxu1  ;;  %9393 = vmatmul.mubr.msk.bf16.gmra.mrb[224].mxu0 %vm537_vm0, %v2428_v55  ;;  %v2359_v62 = vmax.f32 %v2191_v27, 0.0 }
 0x2a9   :  { %v3216_v44 = vmax.f32 %v2708_v34, 0.0  ;;  %v2186_v19 = vadd.f32 %v10954_v58, %v2185_v52  ;;  %v2357_v2 = vmax.f32 %v2183_v33, 0.0 }
 0x2aa   :  { %v3344_v56 = vpack.c.bf16 %v3218_v51, %v3217_v50  ;;  %v2360_v63 = vmax.f32 %v2194_v17, 0.0 }
 0x2ab   :  { %v3343_v3 = vpack.c.bf16 %v3216_v44, %v3215_v53  ;;  %v2358_v57 = vmax.f32 %v2186_v19, 0.0  ;;  %v9290_v24 = vpop.f32.mrb[120].mxu0 }
 0x2ac   :  { %v2430_v26 = vpack.c.bf16 %v2360_v63, %v2359_v62  ;;  %v2729_v25 = vadd.f32 %v9290_v24, %v10939_v38  ;;  %v2720_v59 = vpop.f32.mrb[121].mxu0 }
 0x2ad   :  { %v2429_v16 = vpack.c.bf16 %v2358_v57, %v2357_v2  ;;  %v2721_v61 = vadd.f32 %v10939_v38, %v2720_v59  ;;  %v9266_v60 = vpop.f32.mrb[128].mxu1  ;;  %v9291_v1 = vpop.f32.mrb[122].mxu0  ;;  %9420 = vmatprep.mubr.msk.bf16.mxu1 %vm537_vm0, %v3343_v3 }
 0x2ae   :  { %v2207_v43 = vadd.f32 %v10954_v58, %v9266_v60  ;;  %v2732_v4 = vadd.f32 %v9291_v1, %v10939_v38  ;;  %v2198_v6 = vpop.f32.mrb[129].mxu1  ;;  %v2723_v29 = vpop.f32.mrb[123].mxu0  ;;  %9421 = vmatmul.mubr.msk.bf16.vlgmr.msra.gmra.mrb[140].mxu1 %vm537_vm0, %v3344_v56  ;;  %v3221_v18 = vmax.f32 %v2729_v25, 0.0 }
 0x2af   :  { %v2199_v9 = vadd.f32 %v10954_v58, %v2198_v6  ;;  %v2724_v13 = vadd.f32 %v10939_v38, %v2723_v29  ;;  %v9267_v15 = vpop.f32.mrb[130].mxu1  ;;  %9396 = vmatprep.mubr.msk.bf16.mxu0 %vm537_vm0, %v2429_v16  ;;  %v3219_v28 = vmax.f32 %v2721_v61, 0.0 }
 0x2b0   :  { %v3222_v5 = vmax.f32 %v2732_v4, 0.0  ;;  %v2210_v30 = vadd.f32 %v10954_v58, %v9267_v15  ;;  %v2201_v23 = vpop.f32.mrb[131].mxu1  ;;  %9397 = vmatmul.mubr.msk.bf16.gmra.mrb[228].mxu0 %vm537_vm0, %v2430_v26  ;;  %v2363_v22 = vmax.f32 %v2207_v43, 0.0 }
 0x2b1   :  { %v3220_v41 = vmax.f32 %v2724_v13, 0.0  ;;  %v2202_v21 = vadd.f32 %v10954_v58, %v2201_v23  ;;  %v2361_v37 = vmax.f32 %v2199_v9, 0.0 }
 0x2b2   :  { %v3346_v0 = vpack.c.bf16 %v3222_v5, %v3221_v18  ;;  %v2364_v36 = vmax.f32 %v2210_v30, 0.0 }
 0x2b3   :  { %v3345_v20 = vpack.c.bf16 %v3220_v41, %v3219_v28  ;;  %v2362_v54 = vmax.f32 %v2202_v21, 0.0  ;;  %v9294_v7 = vpop.f32.mrb[124].mxu0 }
 0x2b4   :  { %v2432_v39 = vpack.c.bf16 %v2364_v36, %v2363_v22  ;;  %v2745_v40 = vadd.f32 %v9294_v7, %v10939_v38  ;;  %v2736_v11 = vpop.f32.mrb[125].mxu0 }
 0x2b5   :  { %v2431_v12 = vpack.c.bf16 %v2362_v54, %v2361_v37  ;;  %v2737_v55 = vadd.f32 %v10939_v38, %v2736_v11  ;;  %v9270_v42 = vpop.f32.mrb[132].mxu1  ;;  %v9295_v45 = vpop.f32.mrb[126].mxu0  ;;  %9424 = vmatprep.mubr.msk.bf16.mxu1 %vm537_vm0, %v3345_v20 }
 0x2b6   :  { %v2223_v46 = vadd.f32 %v10954_v58, %v9270_v42  ;;  %v2748_v47 = vadd.f32 %v9295_v45, %v10939_v38  ;;  %v2214_v48 = vpop.f32.mrb[133].mxu1  ;;  %v2739_v8 = vpop.f32.mrb[127].mxu0  ;;  %9425 = vmatmul.mubr.msk.bf16.gmra.mrb[144].mxu1 %vm537_vm0, %v3346_v0  ;;  %v3225_v49 = vmax.f32 %v2745_v40, 0.0 }
 0x2b7   :  { %v2215_v27 = vadd.f32 %v10954_v58, %v2214_v48  ;;  %v2740_v31 = vadd.f32 %v10939_v38, %v2739_v8  ;;  %v9271_v32 = vpop.f32.mrb[134].mxu1  ;;  %9400 = vmatprep.mubr.msk.bf16.mxu0 %vm537_vm0, %v2431_v12  ;;  %v3223_v50 = vmax.f32 %v2737_v55, 0.0 }
 0x2b8   :  { %v3226_v33 = vmax.f32 %v2748_v47, 0.0  ;;  %v2226_v34 = vadd.f32 %v10954_v58, %v9271_v32  ;;  %v2217_v35 = vpop.f32.mrb[135].mxu1  ;;  %9401 = vmatmul.mubr.msk.bf16.gmra.mrb[232].mxu0 %vm537_vm0, %v2432_v39  ;;  %v2367_v52 = vmax.f32 %v2223_v46, 0.0 }
 0x2b9   :  { %v3224_v51 = vmax.f32 %v2740_v31, 0.0  ;;  %v2218_v17 = vadd.f32 %v10954_v58, %v2217_v35  ;;  %v2365_v19 = vmax.f32 %v2215_v27, 0.0  ;;  %v10016_v35 = vld [vmem:[%s12459_s4 + $0x80] sm:$0xff]  }
 0x2ba   :  { %v3348_v53 = vpack.c.bf16 %v3226_v33, %v3225_v49  ;;  %v2368_v44 = vmax.f32 %v2226_v34, 0.0  ;;  %9548 = vmatprep.subr.bf16.mxu0 %v10016_v35 }
 0x2bb   :  { %v3347_v62 = vpack.c.bf16 %v3224_v51, %v3223_v50  ;;  %v2366_v56 = vmax.f32 %v2218_v17, 0.0  ;;  %v9298_v63 = vpop.f32.mrb[128].mxu0  ;;  %9549 = vmatpush3.bf16.msra.mxu0 %v10016_v35 }
 0x2bc   :  { %v2434_v2 = vpack.c.bf16 %v2368_v44, %v2367_v52  ;;  %v2761_v3 = vadd.f32 %v9298_v63, %v10939_v38  ;;  %v2752_v57 = vpop.f32.mrb[129].mxu0 }
 0x2bd   :  { %v2433_v24 = vpack.c.bf16 %v2366_v56, %v2365_v19  ;;  %v2753_v26 = vadd.f32 %v10939_v38, %v2752_v57  ;;  %v9274_v25 = vpop.f32.mrb[136].mxu1  ;;  %v9299_v59 = vpop.f32.mrb[130].mxu0  ;;  %9428 = vmatprep.mubr.msk.bf16.mxu1 %vm537_vm0, %v3347_v62 }
 0x2be   :  { %v2239_v16 = vadd.f32 %v10954_v58, %v9274_v25  ;;  %v2764_v61 = vadd.f32 %v9299_v59, %v10939_v38  ;;  %v2230_v60 = vpop.f32.mrb[137].mxu1  ;;  %v2755_v1 = vpop.f32.mrb[131].mxu0  ;;  %9429 = vmatmul.mubr.msk.bf16.gmra.mrb[148].mxu1 %vm537_vm0, %v3348_v53  ;;  %v3229_v29 = vmax.f32 %v2761_v3, 0.0 }
 0x2bf   :  { %v2231_v43 = vadd.f32 %v10954_v58, %v2230_v60  ;;  %v2756_v4 = vadd.f32 %v10939_v38, %v2755_v1  ;;  %v9275_v6 = vpop.f32.mrb[138].mxu1  ;;  %9404 = vmatprep.mubr.msk.bf16.mxu0 %vm537_vm0, %v2433_v24  ;;  %v3227_v18 = vmax.f32 %v2753_v26, 0.0 }
 0x2c0   :  { %v3230_v9 = vmax.f32 %v2764_v61, 0.0  ;;  %v2242_v13 = vadd.f32 %v10954_v58, %v9275_v6  ;;  %v2233_v15 = vpop.f32.mrb[139].mxu1  ;;  %9405 = vmatmul.mubr.msk.bf16.gmra.mrb[236].mxu0 %vm537_vm0, %v2434_v2  ;;  %v2371_v23 = vmax.f32 %v2239_v16, 0.0 }
 0x2c1   :  { %v3228_v5 = vmax.f32 %v2756_v4, 0.0  ;;  %v2234_v30 = vadd.f32 %v10954_v58, %v2233_v15  ;;  %v2369_v21 = vmax.f32 %v2231_v43, 0.0 }
 0x2c2   :  { %v3350_v28 = vpack.c.bf16 %v3230_v9, %v3229_v29  ;;  %v2372_v41 = vmax.f32 %v2242_v13, 0.0 }
 0x2c3   :  { %v3349_v22 = vpack.c.bf16 %v3228_v5, %v3227_v18  ;;  %v2370_v0 = vmax.f32 %v2234_v30, 0.0  ;;  %v9302_v36 = vpop.f32.mrb[132].mxu0 }
 0x2c4   :  { %v2436_v37 = vpack.c.bf16 %v2372_v41, %v2371_v23  ;;  %v2777_v20 = vadd.f32 %v9302_v36, %v10939_v38  ;;  %v2768_v54 = vpop.f32.mrb[133].mxu0 }
 0x2c5   :  { %v2435_v7 = vpack.c.bf16 %v2370_v0, %v2369_v21  ;;  %v2769_v39 = vadd.f32 %v10939_v38, %v2768_v54  ;;  %v9303_v40 = vpop.f32.mrb[134].mxu0  ;;  %9432 = vmatprep.mubr.msk.bf16.mxu1 %vm537_vm0, %v3349_v22 }
 0x2c6   :  { %v2780_v11 = vadd.f32 %v9303_v40, %v10939_v38  ;;  %v2771_v58 = vpop.f32.mrb[135].mxu0  ;;  %9433 = vmatmul.mubr.msk.bf16.gmra.mrb[152].mxu1 %vm537_vm0, %v3350_v28  ;;  %v3233_v55 = vmax.f32 %v2777_v20, 0.0 }
 0x2c7   :  { %v2772_v12 = vadd.f32 %v10939_v38, %v2771_v58  ;;  %9408 = vmatprep.mubr.msk.bf16.mxu0 %vm537_vm0, %v2435_v7  ;;  %v3231_v45 = vmax.f32 %v2769_v39, 0.0 }
 0x2c8   :  { %v3234_v42 = vmax.f32 %v2780_v11, 0.0  ;;  %9409 = vmatmul.mubr.msk.bf16.gmra.mrb[240].mxu0 %vm537_vm0, %v2436_v37 }
 0x2c9   :  { %v3232_v46 = vmax.f32 %v2772_v12, 0.0 }
 0x2ca   :  { %v3352_v47 = vpack.c.bf16 %v3234_v42, %v3233_v55 }
 0x2cb   :  { %v3351_v48 = vpack.c.bf16 %v3232_v46, %v3231_v45  ;;  %v9306_v8 = vpop.f32.mrb[136].mxu0 }
 0x2cc   :  { %v2793_v27 = vadd.f32 %v9306_v8, %v10939_v38  ;;  %v2784_v31 = vpop.f32.mrb[137].mxu0 }
 0x2cd   :  { %v2785_v32 = vadd.f32 %v10939_v38, %v2784_v31  ;;  %v9307_v49 = vpop.f32.mrb[138].mxu0  ;;  %9436 = vmatprep.mubr.msk.bf16.mxu1 %vm537_vm0, %v3351_v48 }
 0x2ce   :  { %v2796_v33 = vadd.f32 %v9307_v49, %v10939_v38  ;;  %v2787_v34 = vpop.f32.mrb[139].mxu0  ;;  %9437 = vmatmul.mubr.msk.bf16.gmra.mrb[156].mxu1 %vm537_vm0, %v3352_v47  ;;  %v3237_v51 = vmax.f32 %v2793_v27, 0.0 }
 0x2cf   :  { %v2788_v50 = vadd.f32 %v10939_v38, %v2787_v34  ;;  %v3235_v52 = vmax.f32 %v2785_v32, 0.0 }
 0x2d0   :  { %v3238_v17 = vmax.f32 %v2796_v33, 0.0 }
 0x2d1   :  { %v3236_v53 = vmax.f32 %v2788_v50, 0.0 }
 0x2d2   :  { %v3354_v44 = vpack.c.bf16 %v3238_v17, %v3237_v51 }
 0x2d3   :  { %v3353_v19 = vpack.c.bf16 %v3236_v53, %v3235_v52  ;;  %v9310_v62 = vpop.f32.mrb[140].mxu0 }
 0x2d4   :  { %v2809_v56 = vadd.f32 %v9310_v62, %v10939_v38  ;;  %v2800_v63 = vpop.f32.mrb[141].mxu0 }
 0x2d5   :  { %v2801_v2 = vadd.f32 %v10939_v38, %v2800_v63  ;;  %v9311_v3 = vpop.f32.mrb[142].mxu0  ;;  %9440 = vmatprep.mubr.msk.bf16.mxu1 %vm537_vm0, %v3353_v19 }
 0x2d6   :  { %v2812_v57 = vadd.f32 %v9311_v3, %v10939_v38  ;;  %v2803_v24 = vpop.f32.mrb[143].mxu0  ;;  %9441 = vmatmul.mubr.msk.bf16.gmra.mrb[160].mxu1 %vm537_vm0, %v3354_v44  ;;  %v3241_v25 = vmax.f32 %v2809_v56, 0.0 }
 0x2d7   :  { %v2804_v26 = vadd.f32 %v10939_v38, %v2803_v24  ;;  %v3239_v16 = vmax.f32 %v2801_v2, 0.0 }
 0x2d8   :  { %v3242_v59 = vmax.f32 %v2812_v57, 0.0 }
 0x2d9   :  { %v3240_v61 = vmax.f32 %v2804_v26, 0.0 }
 0x2da   :  { %v3356_v60 = vpack.c.bf16 %v3242_v59, %v3241_v25 }
 0x2db   :  { %v3355_v1 = vpack.c.bf16 %v3240_v61, %v3239_v16  ;;  %v9314_v43 = vpop.f32.mrb[144].mxu0 }
 0x2dc   :  { %v2825_v4 = vadd.f32 %v9314_v43, %v10939_v38  ;;  %v2816_v6 = vpop.f32.mrb[145].mxu0 }
 0x2dd   :  { %v2817_v29 = vadd.f32 %v10939_v38, %v2816_v6  ;;  %v9315_v9 = vpop.f32.mrb[146].mxu0  ;;  %9444 = vmatprep.mubr.msk.bf16.mxu1 %vm537_vm0, %v3355_v1  ;;  %v10017_v6 = vld [vmem:[%s12459_s4 + $0x88] sm:$0xff]  }
 0x2de   :  { %v2828_v13 = vadd.f32 %v9315_v9, %v10939_v38  ;;  %v2819_v15 = vpop.f32.mrb[147].mxu0  ;;  %9445 = vmatmul.mubr.msk.bf16.gmra.mrb[164].mxu1 %vm537_vm0, %v3356_v60  ;;  %v3245_v5 = vmax.f32 %v2825_v4, 0.0  ;;  %9550 = vmatprep.subr.bf16.mxu0 %v10017_v6 }
 0x2df   :  { %v2820_v18 = vadd.f32 %v10939_v38, %v2819_v15  ;;  %v3243_v23 = vmax.f32 %v2817_v29, 0.0  ;;  %9551 = vmatpush3.bf16.msra.mxu0 %v10017_v6 }
 0x2e0   :  { %v3246_v30 = vmax.f32 %v2828_v13, 0.0 }
 0x2e1   :  { %v3244_v28 = vmax.f32 %v2820_v18, 0.0 }
 0x2e2   :  { %v3358_v41 = vpack.c.bf16 %v3246_v30, %v3245_v5  ;;  %v10018_v30 = vld [vmem:[%s12459_s4 + $0x90] sm:$0xff]  }
 0x2e3   :  { %v3357_v21 = vpack.c.bf16 %v3244_v28, %v3243_v23  ;;  %v9318_v22 = vpop.f32.mrb[148].mxu0  ;;  %9552 = vmatprep.subr.bf16.mxu0 %v10018_v30 }
 0x2e4   :  { %v2841_v0 = vadd.f32 %v9318_v22, %v10939_v38  ;;  %v2832_v36 = vpop.f32.mrb[149].mxu0  ;;  %9553 = vmatpush3.bf16.msra.mxu0 %v10018_v30 }
 0x2e5   :  { %v2833_v37 = vadd.f32 %v10939_v38, %v2832_v36  ;;  %v9319_v20 = vpop.f32.mrb[150].mxu0  ;;  %9448 = vmatprep.mubr.msk.bf16.mxu1 %vm537_vm0, %v3357_v21 }
 0x2e6   :  { %v2844_v54 = vadd.f32 %v9319_v20, %v10939_v38  ;;  %v2835_v7 = vpop.f32.mrb[151].mxu0  ;;  %9449 = vmatmul.mubr.msk.bf16.gmra.mrb[168].mxu1 %vm537_vm0, %v3358_v41  ;;  %v3249_v40 = vmax.f32 %v2841_v0, 0.0  ;;  %v10019_v20 = vld [vmem:[%s12459_s4 + $0x98] sm:$0xff]  }
 0x2e7   :  { %v2836_v39 = vadd.f32 %v10939_v38, %v2835_v7  ;;  %v3247_v58 = vmax.f32 %v2833_v37, 0.0  ;;  %9554 = vmatprep.subr.bf16.mxu0 %v10019_v20 }
 0x2e8   :  { %v3250_v11 = vmax.f32 %v2844_v54, 0.0  ;;  %9555 = vmatpush3.bf16.msra.mxu0 %v10019_v20 }
 0x2e9   :  { %v3248_v12 = vmax.f32 %v2836_v39, 0.0 }
 0x2ea   :  { %v3360_v55 = vpack.c.bf16 %v3250_v11, %v3249_v40 }
 0x2eb   :  { %v3359_v42 = vpack.c.bf16 %v3248_v12, %v3247_v58  ;;  %v9322_v45 = vpop.f32.mrb[152].mxu0 }
 0x2ec   :  { %v2857_v46 = vadd.f32 %v9322_v45, %v10939_v38  ;;  %v2848_v47 = vpop.f32.mrb[153].mxu0 }
 0x2ed   :  { %v2849_v48 = vadd.f32 %v10939_v38, %v2848_v47  ;;  %v9323_v8 = vpop.f32.mrb[154].mxu0  ;;  %9452 = vmatprep.mubr.msk.bf16.mxu1 %vm537_vm0, %v3359_v42 }
 0x2ee   :  { %v2860_v27 = vadd.f32 %v9323_v8, %v10939_v38  ;;  %v2851_v31 = vpop.f32.mrb[155].mxu0  ;;  %9453 = vmatmul.mubr.msk.bf16.gmra.mrb[172].mxu1 %vm537_vm0, %v3360_v55  ;;  %v3253_v49 = vmax.f32 %v2857_v46, 0.0 }
 0x2ef   :  { %v2852_v32 = vadd.f32 %v10939_v38, %v2851_v31  ;;  %v3251_v34 = vmax.f32 %v2849_v48, 0.0 }
 0x2f0   :  { %v3254_v33 = vmax.f32 %v2860_v27, 0.0 }
 0x2f1   :  { %v3252_v35 = vmax.f32 %v2852_v32, 0.0 }
 0x2f2   :  { %v3362_v50 = vpack.c.bf16 %v3254_v33, %v3253_v49 }
 0x2f3   :  { %v3361_v51 = vpack.c.bf16 %v3252_v35, %v3251_v34  ;;  %v9326_v17 = vpop.f32.mrb[156].mxu0 }
 0x2f4   :  { %v2873_v52 = vadd.f32 %v9326_v17, %v10939_v38  ;;  %v2864_v53 = vpop.f32.mrb[157].mxu0 }
 0x2f5   :  { %v2865_v44 = vadd.f32 %v10939_v38, %v2864_v53  ;;  %v9327_v19 = vpop.f32.mrb[158].mxu0  ;;  %9456 = vmatprep.mubr.msk.bf16.mxu1 %vm537_vm0, %v3361_v51 }
 0x2f6   :  { %v2876_v62 = vadd.f32 %v9327_v19, %v10939_v38  ;;  %v2867_v56 = vpop.f32.mrb[159].mxu0  ;;  %9457 = vmatmul.mubr.msk.bf16.gmra.mrb[176].mxu1 %vm537_vm0, %v3362_v50  ;;  %v3257_v2 = vmax.f32 %v2873_v52, 0.0 }
 0x2f7   :  { %v2868_v63 = vadd.f32 %v10939_v38, %v2867_v56  ;;  %v3255_v57 = vmax.f32 %v2865_v44, 0.0 }
 0x2f8   :  { %v3258_v3 = vmax.f32 %v2876_v62, 0.0 }
 0x2f9   :  { %v3256_v24 = vmax.f32 %v2868_v63, 0.0 }
 0x2fa   :  { %v3364_v26 = vpack.c.bf16 %v3258_v3, %v3257_v2 }
 0x2fb   :  { %v3363_v25 = vpack.c.bf16 %v3256_v24, %v3255_v57  ;;  %v9330_v59 = vpop.f32.mrb[160].mxu0 }
 0x2fc   :  { %v2889_v16 = vadd.f32 %v9330_v59, %v10939_v38  ;;  %v2880_v61 = vpop.f32.mrb[161].mxu0 }
 0x2fd   :  { %v2881_v60 = vadd.f32 %v10939_v38, %v2880_v61  ;;  %v9331_v1 = vpop.f32.mrb[162].mxu0  ;;  %9460 = vmatprep.mubr.msk.bf16.mxu1 %vm537_vm0, %v3363_v25 }
 0x2fe   :  { %v2892_v43 = vadd.f32 %v9331_v1, %v10939_v38  ;;  %v2883_v4 = vpop.f32.mrb[163].mxu0  ;;  %9461 = vmatmul.mubr.msk.bf16.gmra.mrb[180].mxu1 %vm537_vm0, %v3364_v26  ;;  %v3261_v9 = vmax.f32 %v2889_v16, 0.0 }
 0x2ff   :  { %v2884_v29 = vadd.f32 %v10939_v38, %v2883_v4  ;;  %v3259_v15 = vmax.f32 %v2881_v60, 0.0 }
 0x300   :  { %v3262_v13 = vmax.f32 %v2892_v43, 0.0 }
 0x301   :  { %v3260_v18 = vmax.f32 %v2884_v29, 0.0 }
 0x302   :  { %v3366_v5 = vpack.c.bf16 %v3262_v13, %v3261_v9 }
 0x303   :  { %v3365_v23 = vpack.c.bf16 %v3260_v18, %v3259_v15  ;;  %v9334_v28 = vpop.f32.mrb[164].mxu0 }
 0x304   :  { %v2905_v41 = vadd.f32 %v9334_v28, %v10939_v38  ;;  %v2896_v21 = vpop.f32.mrb[165].mxu0 }
 0x305   :  { %v2897_v22 = vadd.f32 %v10939_v38, %v2896_v21  ;;  %v9335_v0 = vpop.f32.mrb[166].mxu0  ;;  %9464 = vmatprep.mubr.msk.bf16.mxu1 %vm537_vm0, %v3365_v23 }
 0x306   :  { %v2908_v36 = vadd.f32 %v9335_v0, %v10939_v38  ;;  %v2899_v37 = vpop.f32.mrb[167].mxu0  ;;  %9465 = vmatmul.mubr.msk.bf16.gmra.mrb[184].mxu1 %vm537_vm0, %v3366_v5  ;;  %v3265_v7 = vmax.f32 %v2905_v41, 0.0 }
 0x307   :  { %v2900_v54 = vadd.f32 %v10939_v38, %v2899_v37  ;;  %v3263_v40 = vmax.f32 %v2897_v22, 0.0 }
 0x308   :  { %v3266_v39 = vmax.f32 %v2908_v36, 0.0 }
 0x309   :  { %v3264_v11 = vmax.f32 %v2900_v54, 0.0 }
 0x30a   :  { %v3368_v58 = vpack.c.bf16 %v3266_v39, %v3265_v7 }
 0x30b   :  { %v3367_v12 = vpack.c.bf16 %v3264_v11, %v3263_v40  ;;  %v9338_v55 = vpop.f32.mrb[168].mxu0 }
 0x30c   :  { %v2921_v42 = vadd.f32 %v9338_v55, %v10939_v38  ;;  %v2912_v45 = vpop.f32.mrb[169].mxu0 }
 0x30d   :  { %v2913_v46 = vadd.f32 %v10939_v38, %v2912_v45  ;;  %v9339_v47 = vpop.f32.mrb[170].mxu0  ;;  %9468 = vmatprep.mubr.msk.bf16.mxu1 %vm537_vm0, %v3367_v12 }
 0x30e   :  { %v2924_v48 = vadd.f32 %v9339_v47, %v10939_v38  ;;  %v2915_v8 = vpop.f32.mrb[171].mxu0  ;;  %9469 = vmatmul.mubr.msk.bf16.gmra.mrb[188].mxu1 %vm537_vm0, %v3368_v58  ;;  %v3269_v31 = vmax.f32 %v2921_v42, 0.0 }
 0x30f   :  { %v2916_v27 = vadd.f32 %v10939_v38, %v2915_v8  ;;  %v3267_v49 = vmax.f32 %v2913_v46, 0.0 }
 0x310   :  { %v3270_v32 = vmax.f32 %v2924_v48, 0.0 }
 0x311   :  { %v3268_v33 = vmax.f32 %v2916_v27, 0.0 }
 0x312   :  { %v3370_v34 = vpack.c.bf16 %v3270_v32, %v3269_v31 }
 0x313   :  { %v3369_v35 = vpack.c.bf16 %v3268_v33, %v3267_v49  ;;  %v9342_v50 = vpop.f32.mrb[172].mxu0 }
 0x314   :  { %v2937_v51 = vadd.f32 %v9342_v50, %v10939_v38  ;;  %v2928_v17 = vpop.f32.mrb[173].mxu0 }
 0x315   :  { %v2929_v52 = vadd.f32 %v10939_v38, %v2928_v17  ;;  %v9343_v53 = vpop.f32.mrb[174].mxu0  ;;  %9472 = vmatprep.mubr.msk.bf16.mxu1 %vm537_vm0, %v3369_v35 }
 0x316   :  { %v2940_v44 = vadd.f32 %v9343_v53, %v10939_v38  ;;  %v2931_v19 = vpop.f32.mrb[175].mxu0  ;;  %9473 = vmatmul.mubr.msk.bf16.gmra.mrb[192].mxu1 %vm537_vm0, %v3370_v34  ;;  %v3273_v56 = vmax.f32 %v2937_v51, 0.0 }
 0x317   :  { %v2932_v62 = vadd.f32 %v10939_v38, %v2931_v19  ;;  %v3271_v2 = vmax.f32 %v2929_v52, 0.0 }
 0x318   :  { %v3274_v63 = vmax.f32 %v2940_v44, 0.0 }
 0x319   :  { %v3272_v3 = vmax.f32 %v2932_v62, 0.0 }
 0x31a   :  { %v3372_v57 = vpack.c.bf16 %v3274_v63, %v3273_v56 }
 0x31b   :  { %v3371_v24 = vpack.c.bf16 %v3272_v3, %v3271_v2  ;;  %v9346_v26 = vpop.f32.mrb[176].mxu0 }
 0x31c   :  { %v2953_v25 = vadd.f32 %v9346_v26, %v10939_v38  ;;  %v2944_v59 = vpop.f32.mrb[177].mxu0 }
 0x31d   :  { %v2945_v16 = vadd.f32 %v10939_v38, %v2944_v59  ;;  %v9347_v61 = vpop.f32.mrb[178].mxu0  ;;  %9476 = vmatprep.mubr.msk.bf16.mxu1 %vm537_vm0, %v3371_v24 }
 0x31e   :  { %v2956_v60 = vadd.f32 %v9347_v61, %v10939_v38  ;;  %v2947_v1 = vpop.f32.mrb[179].mxu0  ;;  %9477 = vmatmul.mubr.msk.bf16.gmra.mrb[196].mxu1 %vm537_vm0, %v3372_v57  ;;  %v3277_v4 = vmax.f32 %v2953_v25, 0.0 }
 0x31f   :  { %v2948_v43 = vadd.f32 %v10939_v38, %v2947_v1  ;;  %v3275_v29 = vmax.f32 %v2945_v16, 0.0 }
 0x320   :  { %v3278_v6 = vmax.f32 %v2956_v60, 0.0 }
 0x321   :  { %v3276_v9 = vmax.f32 %v2948_v43, 0.0 }
 0x322   :  { %v3374_v13 = vpack.c.bf16 %v3278_v6, %v3277_v4 }
 0x323   :  { %v3373_v15 = vpack.c.bf16 %v3276_v9, %v3275_v29  ;;  %v9350_v18 = vpop.f32.mrb[180].mxu0 }
 0x324   :  { %v2969_v5 = vadd.f32 %v9350_v18, %v10939_v38  ;;  %v2960_v30 = vpop.f32.mrb[181].mxu0 }
 0x325   :  { %v2961_v23 = vadd.f32 %v10939_v38, %v2960_v30  ;;  %v9351_v28 = vpop.f32.mrb[182].mxu0  ;;  %9480 = vmatprep.mubr.msk.bf16.mxu1 %vm537_vm0, %v3373_v15 }
 0x326   :  { %v2972_v41 = vadd.f32 %v9351_v28, %v10939_v38  ;;  %v2963_v21 = vpop.f32.mrb[183].mxu0  ;;  %9481 = vmatmul.mubr.msk.bf16.gmra.mrb[200].mxu1 %vm537_vm0, %v3374_v13  ;;  %v3281_v0 = vmax.f32 %v2969_v5, 0.0 }
 0x327   :  { %v2964_v22 = vadd.f32 %v10939_v38, %v2963_v21  ;;  %v3279_v37 = vmax.f32 %v2961_v23, 0.0 }
 0x328   :  { %v3282_v36 = vmax.f32 %v2972_v41, 0.0 }
 0x329   :  { %v3280_v20 = vmax.f32 %v2964_v22, 0.0 }
 0x32a   :  { %v3376_v54 = vpack.c.bf16 %v3282_v36, %v3281_v0 }
 0x32b   :  { %v3375_v7 = vpack.c.bf16 %v3280_v20, %v3279_v37  ;;  %v9354_v39 = vpop.f32.mrb[184].mxu0 }
 0x32c   :  { %v2985_v40 = vadd.f32 %v9354_v39, %v10939_v38  ;;  %v2976_v11 = vpop.f32.mrb[185].mxu0 }
 0x32d   :  { %v2977_v58 = vadd.f32 %v10939_v38, %v2976_v11  ;;  %v9355_v12 = vpop.f32.mrb[186].mxu0  ;;  %9484 = vmatprep.mubr.msk.bf16.mxu1 %vm537_vm0, %v3375_v7 }
 0x32e   :  { %v2988_v55 = vadd.f32 %v9355_v12, %v10939_v38  ;;  %v2979_v42 = vpop.f32.mrb[187].mxu0  ;;  %9485 = vmatmul.mubr.msk.bf16.gmra.mrb[204].mxu1 %vm537_vm0, %v3376_v54  ;;  %v3285_v46 = vmax.f32 %v2985_v40, 0.0 }
 0x32f   :  { %v2980_v45 = vadd.f32 %v10939_v38, %v2979_v42  ;;  %v3283_v48 = vmax.f32 %v2977_v58, 0.0 }
 0x330   :  { %v3286_v47 = vmax.f32 %v2988_v55, 0.0 }
 0x331   :  { %v3284_v8 = vmax.f32 %v2980_v45, 0.0 }
 0x332   :  { %v3378_v27 = vpack.c.bf16 %v3286_v47, %v3285_v46 }
 0x333   :  { %v3377_v31 = vpack.c.bf16 %v3284_v8, %v3283_v48  ;;  %v9358_v32 = vpop.f32.mrb[188].mxu0 }
 0x334   :  { %v3001_v49 = vadd.f32 %v9358_v32, %v10939_v38  ;;  %v2992_v33 = vpop.f32.mrb[189].mxu0 }
 0x335   :  { %v2993_v34 = vadd.f32 %v10939_v38, %v2992_v33  ;;  %v9359_v35 = vpop.f32.mrb[190].mxu0  ;;  %9488 = vmatprep.mubr.msk.bf16.mxu1 %vm537_vm0, %v3377_v31 }
 0x336   :  { %v3004_v50 = vadd.f32 %v9359_v35, %v10939_v38  ;;  %v2995_v51 = vpop.f32.mrb[191].mxu0  ;;  %9489 = vmatmul.mubr.msk.bf16.gmra.mrb[208].mxu1 %vm537_vm0, %v3378_v27  ;;  %v3289_v52 = vmax.f32 %v3001_v49, 0.0 }
 0x337   :  { %v2996_v17 = vadd.f32 %v10939_v38, %v2995_v51  ;;  %v3287_v44 = vmax.f32 %v2993_v34, 0.0 }
 0x338   :  { %v3290_v53 = vmax.f32 %v3004_v50, 0.0 }
 0x339   :  { %v3288_v19 = vmax.f32 %v2996_v17, 0.0 }
 0x33a   :  { %v3380_v62 = vpack.c.bf16 %v3290_v53, %v3289_v52 }
 0x33b   :  { %v3379_v56 = vpack.c.bf16 %v3288_v19, %v3287_v44  ;;  %v9362_v63 = vpop.f32.mrb[192].mxu0 }
 0x33c   :  { %v3017_v2 = vadd.f32 %v9362_v63, %v10939_v38  ;;  %v3008_v3 = vpop.f32.mrb[193].mxu0 }
 0x33d   :  { %v3009_v57 = vadd.f32 %v10939_v38, %v3008_v3  ;;  %v9363_v24 = vpop.f32.mrb[194].mxu0  ;;  %9492 = vmatprep.mubr.msk.bf16.mxu1 %vm537_vm0, %v3379_v56 }
 0x33e   :  { %v3020_v26 = vadd.f32 %v9363_v24, %v10939_v38  ;;  %v3011_v25 = vpop.f32.mrb[195].mxu0  ;;  %9493 = vmatmul.mubr.msk.bf16.gmra.mrb[212].mxu1 %vm537_vm0, %v3380_v62  ;;  %v3293_v16 = vmax.f32 %v3017_v2, 0.0 }
 0x33f   :  { %v3012_v59 = vadd.f32 %v10939_v38, %v3011_v25  ;;  %v3291_v60 = vmax.f32 %v3009_v57, 0.0 }
 0x340   :  { %v3294_v61 = vmax.f32 %v3020_v26, 0.0 }
 0x341   :  { %v3292_v1 = vmax.f32 %v3012_v59, 0.0 }
 0x342   :  { %v3382_v43 = vpack.c.bf16 %v3294_v61, %v3293_v16 }
 0x343   :  { %v3381_v4 = vpack.c.bf16 %v3292_v1, %v3291_v60  ;;  %v9366_v6 = vpop.f32.mrb[196].mxu0 }
 0x344   :  { %v3033_v29 = vadd.f32 %v9366_v6, %v10939_v38  ;;  %v3024_v9 = vpop.f32.mrb[197].mxu0 }
 0x345   :  { %v3025_v13 = vadd.f32 %v10939_v38, %v3024_v9  ;;  %v9367_v15 = vpop.f32.mrb[198].mxu0  ;;  %9496 = vmatprep.mubr.msk.bf16.mxu1 %vm537_vm0, %v3381_v4 }
 0x346   :  { %v3036_v18 = vadd.f32 %v9367_v15, %v10939_v38  ;;  %v3027_v5 = vpop.f32.mrb[199].mxu0  ;;  %9497 = vmatmul.mubr.msk.bf16.gmra.mrb[216].mxu1 %vm537_vm0, %v3382_v43  ;;  %v3297_v23 = vmax.f32 %v3033_v29, 0.0 }
 0x347   :  { %v3028_v30 = vadd.f32 %v10939_v38, %v3027_v5  ;;  %v3295_v41 = vmax.f32 %v3025_v13, 0.0 }
 0x348   :  { %v3298_v28 = vmax.f32 %v3036_v18, 0.0 }
 0x349   :  { %v3296_v21 = vmax.f32 %v3028_v30, 0.0 }
 0x34a   :  { %v3384_v22 = vpack.c.bf16 %v3298_v28, %v3297_v23 }
 0x34b   :  { %v3383_v0 = vpack.c.bf16 %v3296_v21, %v3295_v41  ;;  %v9370_v36 = vpop.f32.mrb[200].mxu0 }
 0x34c   :  { %v3049_v37 = vadd.f32 %v9370_v36, %v10939_v38  ;;  %v3040_v20 = vpop.f32.mrb[201].mxu0 }
 0x34d   :  { %v3041_v54 = vadd.f32 %v10939_v38, %v3040_v20  ;;  %v9371_v7 = vpop.f32.mrb[202].mxu0  ;;  %9500 = vmatprep.mubr.msk.bf16.mxu1 %vm537_vm0, %v3383_v0 }
 0x34e   :  { %v3052_v39 = vadd.f32 %v9371_v7, %v10939_v38  ;;  %v3043_v40 = vpop.f32.mrb[203].mxu0  ;;  %9501 = vmatmul.mubr.msk.bf16.gmra.mrb[220].mxu1 %vm537_vm0, %v3384_v22  ;;  %v3301_v58 = vmax.f32 %v3049_v37, 0.0 }
 0x34f   :  { %v3044_v11 = vadd.f32 %v10939_v38, %v3043_v40  ;;  %v3299_v55 = vmax.f32 %v3041_v54, 0.0 }
 0x350   :  { %v3302_v12 = vmax.f32 %v3052_v39, 0.0 }
 0x351   :  { %v3300_v42 = vmax.f32 %v3044_v11, 0.0 }
 0x352   :  { %v3386_v45 = vpack.c.bf16 %v3302_v12, %v3301_v58 }
 0x353   :  { %v3385_v46 = vpack.c.bf16 %v3300_v42, %v3299_v55  ;;  %v9374_v47 = vpop.f32.mrb[204].mxu0 }
 0x354   :  { %v3065_v48 = vadd.f32 %v9374_v47, %v10939_v38  ;;  %v3056_v8 = vpop.f32.mrb[205].mxu0 }
 0x355   :  { %v3057_v27 = vadd.f32 %v10939_v38, %v3056_v8  ;;  %v9375_v31 = vpop.f32.mrb[206].mxu0  ;;  %9504 = vmatprep.mubr.msk.bf16.mxu1 %vm537_vm0, %v3385_v46 }
 0x356   :  { %v3068_v32 = vadd.f32 %v9375_v31, %v10939_v38  ;;  %v3059_v49 = vpop.f32.mrb[207].mxu0  ;;  %9505 = vmatmul.mubr.msk.bf16.gmra.mrb[224].mxu1 %vm537_vm0, %v3386_v45  ;;  %v3305_v34 = vmax.f32 %v3065_v48, 0.0 }
 0x357   :  { %v3060_v33 = vadd.f32 %v10939_v38, %v3059_v49  ;;  %v3303_v50 = vmax.f32 %v3057_v27, 0.0 }
 0x358   :  { %v3306_v35 = vmax.f32 %v3068_v32, 0.0 }
 0x359   :  { %v3304_v51 = vmax.f32 %v3060_v33, 0.0 }
 0x35a   :  { %v3388_v17 = vpack.c.bf16 %v3306_v35, %v3305_v34 }
 0x35b   :  { %v3387_v52 = vpack.c.bf16 %v3304_v51, %v3303_v50  ;;  %v9378_v53 = vpop.f32.mrb[208].mxu0  ;;  %v11148_v50 = vld [vmem:[%s12462_s5 + $0x3] ss:$0 sm:$0xff] }
 0x35c   :  { %v3081_v44 = vadd.f32 %v9378_v53, %v10939_v38  ;;  %v3072_v19 = vpop.f32.mrb[209].mxu0 }
 0x35d   :  { %v3073_v62 = vadd.f32 %v10939_v38, %v3072_v19  ;;  %v9379_v56 = vpop.f32.mrb[210].mxu0  ;;  %9508 = vmatprep.mubr.msk.bf16.mxu1 %vm537_vm0, %v3387_v52  ;;  %v11158_v19 = vld [vmem:[%s12462_s5 + $0x4] ss:$0 sm:$0xff] }
 0x35e   :  { %v3084_v63 = vadd.f32 %v9379_v56, %v10939_v38  ;;  %v3075_v2 = vpop.f32.mrb[211].mxu0  ;;  %9509 = vmatmul.mubr.msk.bf16.gmra.mrb[228].mxu1 %vm537_vm0, %v3388_v17  ;;  %v3309_v57 = vmax.f32 %v3081_v44, 0.0 }
 0x35f   :  { %v3076_v3 = vadd.f32 %v10939_v38, %v3075_v2  ;;  %v3307_v26 = vmax.f32 %v3073_v62, 0.0 }
 0x360   :  { %v3310_v24 = vmax.f32 %v3084_v63, 0.0 }
 0x361   :  { %v3308_v25 = vmax.f32 %v3076_v3, 0.0 }
 0x362   :  { %v3390_v59 = vpack.c.bf16 %v3310_v24, %v3309_v57 }
 0x363   :  { %v3389_v16 = vpack.c.bf16 %v3308_v25, %v3307_v26  ;;  %v9382_v61 = vpop.f32.mrb[212].mxu0 }
 0x364   :  { %v3097_v60 = vadd.f32 %v9382_v61, %v10939_v38  ;;  %v3088_v1 = vpop.f32.mrb[213].mxu0 }
 0x365   :  { %v3089_v43 = vadd.f32 %v10939_v38, %v3088_v1  ;;  %v9383_v4 = vpop.f32.mrb[214].mxu0  ;;  %9512 = vmatprep.mubr.msk.bf16.mxu1 %vm537_vm0, %v3389_v16 }
 0x366   :  { %v3100_v6 = vadd.f32 %v9383_v4, %v10939_v38  ;;  %v3091_v29 = vpop.f32.mrb[215].mxu0  ;;  %9513 = vmatmul.mubr.msk.bf16.gmra.mrb[232].mxu1 %vm537_vm0, %v3390_v59  ;;  %v3313_v13 = vmax.f32 %v3097_v60, 0.0 }
 0x367   :  { %v3092_v9 = vadd.f32 %v10939_v38, %v3091_v29  ;;  %v3311_v18 = vmax.f32 %v3089_v43, 0.0 }
 0x368   :  { %v3314_v15 = vmax.f32 %v3100_v6, 0.0 }
 0x369   :  { %v3312_v5 = vmax.f32 %v3092_v9, 0.0 }
 0x36a   :  { %v3392_v30 = vpack.c.bf16 %v3314_v15, %v3313_v13 }
 0x36b   :  { %v3391_v23 = vpack.c.bf16 %v3312_v5, %v3311_v18  ;;  %v9386_v28 = vpop.f32.mrb[216].mxu0 }
 0x36c   :  { %v3113_v41 = vadd.f32 %v9386_v28, %v10939_v38  ;;  %v3104_v21 = vpop.f32.mrb[217].mxu0 }
 0x36d   :  { %v3105_v22 = vadd.f32 %v10939_v38, %v3104_v21  ;;  %v9387_v0 = vpop.f32.mrb[218].mxu0  ;;  %9516 = vmatprep.mubr.msk.bf16.mxu1 %vm537_vm0, %v3391_v23 }
 0x36e   :  { %v3116_v36 = vadd.f32 %v9387_v0, %v10939_v38  ;;  %v3107_v37 = vpop.f32.mrb[219].mxu0  ;;  %9517 = vmatmul.mubr.msk.bf16.gmra.mrb[236].mxu1 %vm537_vm0, %v3392_v30  ;;  %v3317_v54 = vmax.f32 %v3113_v41, 0.0 }
 0x36f   :  { %v3108_v20 = vadd.f32 %v10939_v38, %v3107_v37  ;;  %v3315_v39 = vmax.f32 %v3105_v22, 0.0 }
 0x370   :  { %v3318_v7 = vmax.f32 %v3116_v36, 0.0 }
 0x371   :  { %v3316_v40 = vmax.f32 %v3108_v20, 0.0 }
 0x372   :  { %v3394_v11 = vpack.c.bf16 %v3318_v7, %v3317_v54 }
 0x373   :  { %v3393_v58 = vpack.c.bf16 %v3316_v40, %v3315_v39  ;;  %v9390_v12 = vpop.f32.mrb[220].mxu0 }
 0x374   :  { %v3129_v55 = vadd.f32 %v9390_v12, %v10939_v38  ;;  %v3120_v42 = vpop.f32.mrb[221].mxu0 }
 0x375   :  { %v3121_v45 = vadd.f32 %v10939_v38, %v3120_v42  ;;  %v9391_v46 = vpop.f32.mrb[222].mxu0  ;;  %9520 = vmatprep.mubr.msk.bf16.mxu1 %vm537_vm0, %v3393_v58 }
 0x376   :  { %v3132_v47 = vadd.f32 %v9391_v46, %v10939_v38  ;;  %v3123_v48 = vpop.f32.mrb[223].mxu0  ;;  %9521 = vmatmul.mubr.msk.bf16.gmra.mrb[240].mxu1 %vm537_vm0, %v3394_v11  ;;  %v3321_v27 = vmax.f32 %v3129_v55, 0.0 }
 0x377   :  { %v3124_v8 = vadd.f32 %v10939_v38, %v3123_v48  ;;  %v3319_v32 = vmax.f32 %v3121_v45, 0.0 }
 0x378   :  { %v3322_v31 = vmax.f32 %v3132_v47, 0.0 }
 0x379   :  { %v3320_v49 = vmax.f32 %v3124_v8, 0.0 }
 0x37a   :  { %v3396_v33 = vpack.c.bf16 %v3322_v31, %v3321_v27 }
 0x37b   :  { %v3395_v34 = vpack.c.bf16 %v3320_v49, %v3319_v32  ;;  %v9394_v35 = vpop.f32.mrb[224].mxu0 }
 0x37c   :  { %v3145_v51 = vadd.f32 %v11148_v50, %v9394_v35  ;;  %v3136_v17 = vpop.f32.mrb[225].mxu0 }
 0x37d   :  { %v3137_v52 = vadd.f32 %v11148_v50, %v3136_v17  ;;  %v9395_v53 = vpop.f32.mrb[226].mxu0  ;;  %9524 = vmatprep.mubr.msk.bf16.mxu1 %vm537_vm0, %v3395_v34 }
 0x37e   :  { %v3148_v38 = vadd.f32 %v11148_v50, %v9395_v53  ;;  %v3139_v44 = vpop.f32.mrb[227].mxu0  ;;  %9525 = vmatmul.mubr.msk.bf16.gmra.mrb[244].mxu1 %vm537_vm0, %v3396_v33  ;;  %v3325_v56 = vmax.f32 %v3145_v51, 0.0 }
 0x37f   :  { %v3140_v62 = vadd.f32 %v11148_v50, %v3139_v44  ;;  %v3323_v2 = vmax.f32 %v3137_v52, 0.0 }
 0x380   :  { %v3326_v63 = vmax.f32 %v3148_v38, 0.0 }
 0x381   :  { %v3324_v3 = vmax.f32 %v3140_v62, 0.0  ;;  %v9422_v57 = vpop.f32.mrb[140].mxu1 }
 0x382   :  { %v3398_v24 = vpack.c.bf16 %v3326_v63, %v3325_v56  ;;  %v3683_v26 = vadd.f32 %v9422_v57, %v11158_v19  ;;  %v3674_v25 = vpop.f32.mrb[141].mxu1 }
 0x383   :  { %v3397_v59 = vpack.c.bf16 %v3324_v3, %v3323_v2  ;;  %v3675_v16 = vadd.f32 %v11158_v19, %v3674_v25  ;;  %v9398_v61 = vpop.f32.mrb[228].mxu0  ;;  %v9423_v60 = vpop.f32.mrb[142].mxu1 }
 0x384   :  { %v3161_v1 = vadd.f32 %v11148_v50, %v9398_v61  ;;  %v3686_v43 = vadd.f32 %v9423_v60, %v11158_v19  ;;  %v3152_v4 = vpop.f32.mrb[229].mxu0  ;;  %v3677_v6 = vpop.f32.mrb[143].mxu1  ;;  %v4187_v15 = vmax.f32 %v3683_v26, 0.0 }
 0x385   :  { %v3153_v29 = vadd.f32 %v11148_v50, %v3152_v4  ;;  %v3678_v9 = vadd.f32 %v11158_v19, %v3677_v6  ;;  %v9399_v13 = vpop.f32.mrb[230].mxu0  ;;  %9528 = vmatprep.mubr.msk.bf16.mxu1 %vm537_vm0, %v3397_v59  ;;  %v4185_v23 = vmax.f32 %v3675_v16, 0.0 }
 0x386   :  { %v4188_v18 = vmax.f32 %v3686_v43, 0.0  ;;  %v3164_v5 = vadd.f32 %v11148_v50, %v9399_v13  ;;  %v3155_v30 = vpop.f32.mrb[231].mxu0  ;;  %9529 = vmatmul.mubr.msk.bf16.gmra.mrb[248].mxu1 %vm537_vm0, %v3398_v24  ;;  %v3329_v21 = vmax.f32 %v3161_v1, 0.0 }
 0x387   :  { %v4186_v28 = vmax.f32 %v3678_v9, 0.0  ;;  %v3156_v41 = vadd.f32 %v11148_v50, %v3155_v30  ;;  %v3327_v36 = vmax.f32 %v3153_v29, 0.0 }
 0x388   :  { %v4314_v22 = vpack.c.bf16 %v4188_v18, %v4187_v15  ;;  %v3330_v0 = vmax.f32 %v3164_v5, 0.0 }
 0x389   :  { %v4313_v37 = vpack.c.bf16 %v4186_v28, %v4185_v23  ;;  %v3328_v20 = vmax.f32 %v3156_v41, 0.0  ;;  %v9426_v54 = vpop.f32.mrb[144].mxu1 }
 0x38a   :  { %v3400_v7 = vpack.c.bf16 %v3330_v0, %v3329_v21  ;;  %v3699_v39 = vadd.f32 %v9426_v54, %v11158_v19  ;;  %v3690_v40 = vpop.f32.mrb[145].mxu1 }
 0x38b   :  { %v3399_v11 = vpack.c.bf16 %v3328_v20, %v3327_v36  ;;  %v3691_v58 = vadd.f32 %v11158_v19, %v3690_v40  ;;  %v9402_v12 = vpop.f32.mrb[232].mxu0  ;;  %v9427_v55 = vpop.f32.mrb[146].mxu1  ;;  %9556 = vmatprep.mubr.msk.bf16.mxu0 %vm537_vm0, %v4313_v37 }
 0x38c   :  { %v3177_v42 = vadd.f32 %v11148_v50, %v9402_v12  ;;  %v3702_v45 = vadd.f32 %v9427_v55, %v11158_v19  ;;  %v3168_v46 = vpop.f32.mrb[233].mxu0  ;;  %v3693_v47 = vpop.f32.mrb[147].mxu1  ;;  %9557 = vmatmul.mubr.msk.bf16.vlgmr.msra.gmra.mrb[244].mxu0 %vm537_vm0, %v4314_v22  ;;  %v4191_v31 = vmax.f32 %v3699_v39, 0.0 }
 0x38d   :  { %v3169_v48 = vadd.f32 %v11148_v50, %v3168_v46  ;;  %v3694_v8 = vadd.f32 %v11158_v19, %v3693_v47  ;;  %v9403_v27 = vpop.f32.mrb[234].mxu0  ;;  %9532 = vmatprep.mubr.msk.bf16.mxu1 %vm537_vm0, %v3399_v11  ;;  %v4189_v34 = vmax.f32 %v3691_v58, 0.0 }
 0x38e   :  { %v4192_v32 = vmax.f32 %v3702_v45, 0.0  ;;  %v3180_v49 = vadd.f32 %v11148_v50, %v9403_v27  ;;  %v3171_v33 = vpop.f32.mrb[235].mxu0  ;;  %9533 = vmatmul.mubr.msk.bf16.gmra.mrb[252].mxu1 %vm537_vm0, %v3400_v7  ;;  %v3333_v17 = vmax.f32 %v3177_v42, 0.0 }
 0x38f   :  { %v4190_v35 = vmax.f32 %v3694_v8, 0.0  ;;  %v3172_v51 = vadd.f32 %v11148_v50, %v3171_v33  ;;  %v3331_v38 = vmax.f32 %v3169_v48, 0.0 }
 0x390   :  { %v4316_v52 = vpack.c.bf16 %v4192_v32, %v4191_v31  ;;  %v3334_v53 = vmax.f32 %v3180_v49, 0.0 }
 0x391   :  { %v4315_v44 = vpack.c.bf16 %v4190_v35, %v4189_v34  ;;  %v3332_v62 = vmax.f32 %v3172_v51, 0.0  ;;  %v9430_v56 = vpop.f32.mrb[148].mxu1 }
 0x392   :  { %v3402_v63 = vpack.c.bf16 %v3334_v53, %v3333_v17  ;;  %v3715_v2 = vadd.f32 %v9430_v56, %v11158_v19  ;;  %v3706_v3 = vpop.f32.mrb[149].mxu1 }
 0x393   :  { %v3401_v57 = vpack.c.bf16 %v3332_v62, %v3331_v38  ;;  %v3707_v24 = vadd.f32 %v11158_v19, %v3706_v3  ;;  %v9406_v26 = vpop.f32.mrb[236].mxu0  ;;  %v9431_v25 = vpop.f32.mrb[150].mxu1  ;;  %9560 = vmatprep.mubr.msk.bf16.mxu0 %vm537_vm0, %v4315_v44 }
 0x394   :  { %v3193_v59 = vadd.f32 %v11148_v50, %v9406_v26  ;;  %v3718_v16 = vadd.f32 %v9431_v25, %v11158_v19  ;;  %v3184_v61 = vpop.f32.mrb[237].mxu0  ;;  %v3709_v60 = vpop.f32.mrb[151].mxu1  ;;  %9561 = vmatmul.mubr.msk.bf16.gmra.mrb[248].mxu0 %vm537_vm0, %v4316_v52  ;;  %v4195_v6 = vmax.f32 %v3715_v2, 0.0 }
 0x395   :  { %v3185_v1 = vadd.f32 %v11148_v50, %v3184_v61  ;;  %v3710_v43 = vadd.f32 %v11158_v19, %v3709_v60  ;;  %v9407_v4 = vpop.f32.mrb[238].mxu0  ;;  %9536 = vmatprep.mubr.msk.bf16.mxu1 %vm537_vm0, %v3401_v57  ;;  %v4193_v15 = vmax.f32 %v3707_v24, 0.0 }
 0x396   :  { %v4196_v29 = vmax.f32 %v3718_v16, 0.0  ;;  %v3196_v9 = vadd.f32 %v11148_v50, %v9407_v4  ;;  %v3187_v13 = vpop.f32.mrb[239].mxu0  ;;  %9537 = vmatmul.mubr.msk.bf16.gmra.mrb[0].mxu1 %vm537_vm0, %v3402_v63  ;;  %v3337_v30 = vmax.f32 %v3193_v59, 0.0 }
 0x397   :  { %v4194_v18 = vmax.f32 %v3710_v43, 0.0  ;;  %v3188_v5 = vadd.f32 %v11148_v50, %v3187_v13  ;;  %v3335_v41 = vmax.f32 %v3185_v1, 0.0  ;;  %v10020_v13 = vld [vmem:[%s12459_s4 + $0xa0] sm:$0xff]  }
 0x398   :  { %v4318_v23 = vpack.c.bf16 %v4196_v29, %v4195_v6  ;;  %v3338_v28 = vmax.f32 %v3196_v9, 0.0  ;;  %9684 = vmatprep.subr.bf16.mxu1 %v10020_v13 }
 0x399   :  { %v4317_v21 = vpack.c.bf16 %v4194_v18, %v4193_v15  ;;  %v3336_v22 = vmax.f32 %v3188_v5, 0.0  ;;  %v9434_v0 = vpop.f32.mrb[152].mxu1  ;;  %9685 = vmatpush3.bf16.msra.mxu1 %v10020_v13 }
 0x39a   :  { %v3404_v36 = vpack.c.bf16 %v3338_v28, %v3337_v30  ;;  %v3731_v37 = vadd.f32 %v9434_v0, %v11158_v19  ;;  %v3722_v20 = vpop.f32.mrb[153].mxu1 }
 0x39b   :  { %v3403_v54 = vpack.c.bf16 %v3336_v22, %v3335_v41  ;;  %v3723_v7 = vadd.f32 %v11158_v19, %v3722_v20  ;;  %v9410_v39 = vpop.f32.mrb[240].mxu0  ;;  %v9435_v40 = vpop.f32.mrb[154].mxu1  ;;  %9564 = vmatprep.mubr.msk.bf16.mxu0 %vm537_vm0, %v4317_v21 }
 0x39c   :  { %v3209_v11 = vadd.f32 %v11148_v50, %v9410_v39  ;;  %v3734_v58 = vadd.f32 %v9435_v40, %v11158_v19  ;;  %v3200_v12 = vpop.f32.mrb[241].mxu0  ;;  %v3725_v55 = vpop.f32.mrb[155].mxu1  ;;  %9565 = vmatmul.mubr.msk.bf16.gmra.mrb[252].mxu0 %vm537_vm0, %v4318_v23  ;;  %v4199_v47 = vmax.f32 %v3731_v37, 0.0 }
 0x39d   :  { %v3201_v42 = vadd.f32 %v11148_v50, %v3200_v12  ;;  %v3726_v45 = vadd.f32 %v11158_v19, %v3725_v55  ;;  %v9411_v46 = vpop.f32.mrb[242].mxu0  ;;  %9540 = vmatprep.mubr.msk.bf16.mxu1 %vm537_vm0, %v3403_v54  ;;  %v4197_v31 = vmax.f32 %v3723_v7, 0.0 }
 0x39e   :  { %v4200_v48 = vmax.f32 %v3734_v58, 0.0  ;;  %v3212_v8 = vadd.f32 %v11148_v50, %v9411_v46  ;;  %v3203_v27 = vpop.f32.mrb[243].mxu0  ;;  %9541 = vmatmul.mubr.msk.bf16.gmra.mrb[4].mxu1 %vm537_vm0, %v3404_v36  ;;  %v3341_v33 = vmax.f32 %v3209_v11, 0.0 }
 0x39f   :  { %v4198_v32 = vmax.f32 %v3726_v45, 0.0  ;;  %v3204_v49 = vadd.f32 %v11148_v50, %v3203_v27  ;;  %v3339_v51 = vmax.f32 %v3201_v42, 0.0 }
 0x3a0   :  { %v4320_v34 = vpack.c.bf16 %v4200_v48, %v4199_v47  ;;  %v3342_v35 = vmax.f32 %v3212_v8, 0.0 }
 0x3a1   :  { %v4319_v17 = vpack.c.bf16 %v4198_v32, %v4197_v31  ;;  %v3340_v52 = vmax.f32 %v3204_v49, 0.0  ;;  %v9438_v53 = vpop.f32.mrb[156].mxu1 }
 0x3a2   :  { %v3406_v38 = vpack.c.bf16 %v3342_v35, %v3341_v33  ;;  %v3747_v44 = vadd.f32 %v9438_v53, %v11158_v19  ;;  %v3738_v62 = vpop.f32.mrb[157].mxu1 }
 0x3a3   :  { %v3405_v56 = vpack.c.bf16 %v3340_v52, %v3339_v51  ;;  %v3739_v63 = vadd.f32 %v11158_v19, %v3738_v62  ;;  %v9439_v2 = vpop.f32.mrb[158].mxu1  ;;  %9568 = vmatprep.mubr.msk.bf16.mxu0 %vm537_vm0, %v4319_v17 }
 0x3a4   :  { %v3750_v3 = vadd.f32 %v9439_v2, %v11158_v19  ;;  %v3741_v50 = vpop.f32.mrb[159].mxu1  ;;  %9569 = vmatmul.mubr.msk.bf16.gmra.mrb[0].mxu0 %vm537_vm0, %v4320_v34  ;;  %v4203_v24 = vmax.f32 %v3747_v44, 0.0 }
 0x3a5   :  { %v3742_v57 = vadd.f32 %v11158_v19, %v3741_v50  ;;  %9544 = vmatprep.mubr.msk.bf16.mxu1 %vm537_vm0, %v3405_v56  ;;  %v4201_v25 = vmax.f32 %v3739_v63, 0.0 }
 0x3a6   :  { %v4204_v26 = vmax.f32 %v3750_v3, 0.0  ;;  %9545 = vmatmul.mubr.msk.bf16.gmra.mrb[8].mxu1 %vm537_vm0, %v3406_v38 }
 0x3a7   :  { %v4202_v59 = vmax.f32 %v3742_v57, 0.0 }
 0x3a8   :  { %v4322_v16 = vpack.c.bf16 %v4204_v26, %v4203_v24 }
 0x3a9   :  { %v4321_v61 = vpack.c.bf16 %v4202_v59, %v4201_v25  ;;  %v9442_v60 = vpop.f32.mrb[160].mxu1 }
 0x3aa   :  { %v3763_v1 = vadd.f32 %v9442_v60, %v11158_v19  ;;  %v3754_v43 = vpop.f32.mrb[161].mxu1 }
 0x3ab   :  { %v3755_v4 = vadd.f32 %v11158_v19, %v3754_v43  ;;  %v9443_v6 = vpop.f32.mrb[162].mxu1  ;;  %9572 = vmatprep.mubr.msk.bf16.mxu0 %vm537_vm0, %v4321_v61 }
 0x3ac   :  { %v3766_v29 = vadd.f32 %v9443_v6, %v11158_v19  ;;  %v3757_v9 = vpop.f32.mrb[163].mxu1  ;;  %9573 = vmatmul.mubr.msk.bf16.gmra.mrb[4].mxu0 %vm537_vm0, %v4322_v16  ;;  %v4207_v18 = vmax.f32 %v3763_v1, 0.0 }
 0x3ad   :  { %v3758_v15 = vadd.f32 %v11158_v19, %v3757_v9  ;;  %v4205_v30 = vmax.f32 %v3755_v4, 0.0 }
 0x3ae   :  { %v4208_v5 = vmax.f32 %v3766_v29, 0.0 }
 0x3af   :  { %v4206_v23 = vmax.f32 %v3758_v15, 0.0 }
 0x3b0   :  { %v4324_v28 = vpack.c.bf16 %v4208_v5, %v4207_v18 }
 0x3b1   :  { %v4323_v41 = vpack.c.bf16 %v4206_v23, %v4205_v30  ;;  %v9446_v21 = vpop.f32.mrb[164].mxu1 }
 0x3b2   :  { %v3779_v22 = vadd.f32 %v9446_v21, %v11158_v19  ;;  %v3770_v0 = vpop.f32.mrb[165].mxu1 }
 0x3b3   :  { %v3771_v36 = vadd.f32 %v11158_v19, %v3770_v0  ;;  %v9447_v37 = vpop.f32.mrb[166].mxu1  ;;  %9576 = vmatprep.mubr.msk.bf16.mxu0 %vm537_vm0, %v4323_v41 }
 0x3b4   :  { %v3782_v20 = vadd.f32 %v9447_v37, %v11158_v19  ;;  %v3773_v54 = vpop.f32.mrb[167].mxu1  ;;  %9577 = vmatmul.mubr.msk.bf16.gmra.mrb[8].mxu0 %vm537_vm0, %v4324_v28  ;;  %v4211_v39 = vmax.f32 %v3779_v22, 0.0 }
 0x3b5   :  { %v3774_v7 = vadd.f32 %v11158_v19, %v3773_v54  ;;  %v4209_v11 = vmax.f32 %v3771_v36, 0.0 }
 0x3b6   :  { %v4212_v40 = vmax.f32 %v3782_v20, 0.0 }
 0x3b7   :  { %v4210_v58 = vmax.f32 %v3774_v7, 0.0 }
 0x3b8   :  { %v4326_v12 = vpack.c.bf16 %v4212_v40, %v4211_v39 }
 0x3b9   :  { %v4325_v55 = vpack.c.bf16 %v4210_v58, %v4209_v11  ;;  %v9450_v42 = vpop.f32.mrb[168].mxu1 }
 0x3ba   :  { %v3795_v45 = vadd.f32 %v9450_v42, %v11158_v19  ;;  %v3786_v46 = vpop.f32.mrb[169].mxu1 }
 0x3bb   :  { %v3787_v47 = vadd.f32 %v11158_v19, %v3786_v46  ;;  %v9451_v48 = vpop.f32.mrb[170].mxu1  ;;  %9580 = vmatprep.mubr.msk.bf16.mxu0 %vm537_vm0, %v4325_v55  ;;  %v10021_v46 = vld [vmem:[%s12459_s4 + $0xa8] sm:$0xff]  }
 0x3bc   :  { %v3798_v8 = vadd.f32 %v9451_v48, %v11158_v19  ;;  %v3789_v27 = vpop.f32.mrb[171].mxu1  ;;  %9581 = vmatmul.mubr.msk.bf16.gmra.mrb[12].mxu0 %vm537_vm0, %v4326_v12  ;;  %v4215_v32 = vmax.f32 %v3795_v45, 0.0  ;;  %9686 = vmatprep.subr.bf16.mxu1 %v10021_v46 }
 0x3bd   :  { %v3790_v31 = vadd.f32 %v11158_v19, %v3789_v27  ;;  %v4213_v33 = vmax.f32 %v3787_v47, 0.0  ;;  %9687 = vmatpush3.bf16.msra.mxu1 %v10021_v46 }
 0x3be   :  { %v4216_v49 = vmax.f32 %v3798_v8, 0.0 }
 0x3bf   :  { %v4214_v34 = vmax.f32 %v3790_v31, 0.0 }
 0x3c0   :  { %v4328_v35 = vpack.c.bf16 %v4216_v49, %v4215_v32  ;;  %v10022_v49 = vld [vmem:[%s12459_s4 + $0xb0] sm:$0xff]  }
 0x3c1   :  { %v4327_v51 = vpack.c.bf16 %v4214_v34, %v4213_v33  ;;  %v9454_v17 = vpop.f32.mrb[172].mxu1  ;;  %9688 = vmatprep.subr.bf16.mxu1 %v10022_v49 }
 0x3c2   :  { %v3811_v52 = vadd.f32 %v9454_v17, %v11158_v19  ;;  %v3802_v53 = vpop.f32.mrb[173].mxu1  ;;  %9689 = vmatpush3.bf16.msra.mxu1 %v10022_v49 }
 0x3c3   :  { %v3803_v38 = vadd.f32 %v11158_v19, %v3802_v53  ;;  %v9455_v44 = vpop.f32.mrb[174].mxu1  ;;  %9584 = vmatprep.mubr.msk.bf16.mxu0 %vm537_vm0, %v4327_v51 }
 0x3c4   :  { %v3814_v62 = vadd.f32 %v9455_v44, %v11158_v19  ;;  %v3805_v56 = vpop.f32.mrb[175].mxu1  ;;  %9585 = vmatmul.mubr.msk.bf16.gmra.mrb[16].mxu0 %vm537_vm0, %v4328_v35  ;;  %v4219_v2 = vmax.f32 %v3811_v52, 0.0  ;;  %v10023_v44 = vld [vmem:[%s12459_s4 + $0xb8] sm:$0xff]  }
 0x3c5   :  { %v3806_v63 = vadd.f32 %v11158_v19, %v3805_v56  ;;  %v4217_v50 = vmax.f32 %v3803_v38, 0.0  ;;  %9690 = vmatprep.subr.bf16.mxu1 %v10023_v44 }
 0x3c6   :  { %v4220_v3 = vmax.f32 %v3814_v62, 0.0  ;;  %9691 = vmatpush3.bf16.msra.mxu1 %v10023_v44 }
 0x3c7   :  { %v4218_v57 = vmax.f32 %v3806_v63, 0.0 }
 0x3c8   :  { %v4330_v24 = vpack.c.bf16 %v4220_v3, %v4219_v2 }
 0x3c9   :  { %v4329_v26 = vpack.c.bf16 %v4218_v57, %v4217_v50  ;;  %v9458_v25 = vpop.f32.mrb[176].mxu1 }
 0x3ca   :  { %v3827_v59 = vadd.f32 %v9458_v25, %v11158_v19  ;;  %v3818_v16 = vpop.f32.mrb[177].mxu1 }
 0x3cb   :  { %v3819_v61 = vadd.f32 %v11158_v19, %v3818_v16  ;;  %v9459_v60 = vpop.f32.mrb[178].mxu1  ;;  %9588 = vmatprep.mubr.msk.bf16.mxu0 %vm537_vm0, %v4329_v26 }
 0x3cc   :  { %v3830_v1 = vadd.f32 %v9459_v60, %v11158_v19  ;;  %v3821_v43 = vpop.f32.mrb[179].mxu1  ;;  %9589 = vmatmul.mubr.msk.bf16.gmra.mrb[20].mxu0 %vm537_vm0, %v4330_v24  ;;  %v4223_v6 = vmax.f32 %v3827_v59, 0.0 }
 0x3cd   :  { %v3822_v4 = vadd.f32 %v11158_v19, %v3821_v43  ;;  %v4221_v9 = vmax.f32 %v3819_v61, 0.0 }
 0x3ce   :  { %v4224_v29 = vmax.f32 %v3830_v1, 0.0 }
 0x3cf   :  { %v4222_v13 = vmax.f32 %v3822_v4, 0.0 }
 0x3d0   :  { %v4332_v15 = vpack.c.bf16 %v4224_v29, %v4223_v6 }
 0x3d1   :  { %v4331_v18 = vpack.c.bf16 %v4222_v13, %v4221_v9  ;;  %v9462_v5 = vpop.f32.mrb[180].mxu1 }
 0x3d2   :  { %v3843_v30 = vadd.f32 %v9462_v5, %v11158_v19  ;;  %v3834_v23 = vpop.f32.mrb[181].mxu1 }
 0x3d3   :  { %v3835_v28 = vadd.f32 %v11158_v19, %v3834_v23  ;;  %v9463_v41 = vpop.f32.mrb[182].mxu1  ;;  %9592 = vmatprep.mubr.msk.bf16.mxu0 %vm537_vm0, %v4331_v18 }
 0x3d4   :  { %v3846_v21 = vadd.f32 %v9463_v41, %v11158_v19  ;;  %v3837_v22 = vpop.f32.mrb[183].mxu1  ;;  %9593 = vmatmul.mubr.msk.bf16.gmra.mrb[24].mxu0 %vm537_vm0, %v4332_v15  ;;  %v4227_v36 = vmax.f32 %v3843_v30, 0.0 }
 0x3d5   :  { %v3838_v0 = vadd.f32 %v11158_v19, %v3837_v22  ;;  %v4225_v20 = vmax.f32 %v3835_v28, 0.0 }
 0x3d6   :  { %v4228_v37 = vmax.f32 %v3846_v21, 0.0 }
 0x3d7   :  { %v4226_v54 = vmax.f32 %v3838_v0, 0.0 }
 0x3d8   :  { %v4334_v7 = vpack.c.bf16 %v4228_v37, %v4227_v36 }
 0x3d9   :  { %v4333_v39 = vpack.c.bf16 %v4226_v54, %v4225_v20  ;;  %v9466_v40 = vpop.f32.mrb[184].mxu1 }
 0x3da   :  { %v3859_v11 = vadd.f32 %v9466_v40, %v11158_v19  ;;  %v3850_v58 = vpop.f32.mrb[185].mxu1 }
 0x3db   :  { %v3851_v12 = vadd.f32 %v11158_v19, %v3850_v58  ;;  %v9467_v55 = vpop.f32.mrb[186].mxu1  ;;  %9596 = vmatprep.mubr.msk.bf16.mxu0 %vm537_vm0, %v4333_v39 }
 0x3dc   :  { %v3862_v42 = vadd.f32 %v9467_v55, %v11158_v19  ;;  %v3853_v45 = vpop.f32.mrb[187].mxu1  ;;  %9597 = vmatmul.mubr.msk.bf16.gmra.mrb[28].mxu0 %vm537_vm0, %v4334_v7  ;;  %v4231_v48 = vmax.f32 %v3859_v11, 0.0 }
 0x3dd   :  { %v3854_v47 = vadd.f32 %v11158_v19, %v3853_v45  ;;  %v4229_v27 = vmax.f32 %v3851_v12, 0.0 }
 0x3de   :  { %v4232_v8 = vmax.f32 %v3862_v42, 0.0 }
 0x3df   :  { %v4230_v31 = vmax.f32 %v3854_v47, 0.0 }
 0x3e0   :  { %v4336_v32 = vpack.c.bf16 %v4232_v8, %v4231_v48 }
 0x3e1   :  { %v4335_v33 = vpack.c.bf16 %v4230_v31, %v4229_v27  ;;  %v9470_v34 = vpop.f32.mrb[188].mxu1 }
 0x3e2   :  { %v3875_v35 = vadd.f32 %v9470_v34, %v11158_v19  ;;  %v3866_v51 = vpop.f32.mrb[189].mxu1 }
 0x3e3   :  { %v3867_v17 = vadd.f32 %v11158_v19, %v3866_v51  ;;  %v9471_v52 = vpop.f32.mrb[190].mxu1  ;;  %9600 = vmatprep.mubr.msk.bf16.mxu0 %vm537_vm0, %v4335_v33 }
 0x3e4   :  { %v3878_v53 = vadd.f32 %v9471_v52, %v11158_v19  ;;  %v3869_v38 = vpop.f32.mrb[191].mxu1  ;;  %9601 = vmatmul.mubr.msk.bf16.gmra.mrb[32].mxu0 %vm537_vm0, %v4336_v32  ;;  %v4235_v56 = vmax.f32 %v3875_v35, 0.0 }
 0x3e5   :  { %v3870_v62 = vadd.f32 %v11158_v19, %v3869_v38  ;;  %v4233_v2 = vmax.f32 %v3867_v17, 0.0 }
 0x3e6   :  { %v4236_v63 = vmax.f32 %v3878_v53, 0.0 }
 0x3e7   :  { %v4234_v3 = vmax.f32 %v3870_v62, 0.0 }
 0x3e8   :  { %v4338_v50 = vpack.c.bf16 %v4236_v63, %v4235_v56 }
 0x3e9   :  { %v4337_v57 = vpack.c.bf16 %v4234_v3, %v4233_v2  ;;  %v9474_v24 = vpop.f32.mrb[192].mxu1 }
 0x3ea   :  { %v3891_v26 = vadd.f32 %v9474_v24, %v11158_v19  ;;  %v3882_v25 = vpop.f32.mrb[193].mxu1 }
 0x3eb   :  { %v3883_v59 = vadd.f32 %v11158_v19, %v3882_v25  ;;  %v9475_v16 = vpop.f32.mrb[194].mxu1  ;;  %9604 = vmatprep.mubr.msk.bf16.mxu0 %vm537_vm0, %v4337_v57 }
 0x3ec   :  { %v3894_v61 = vadd.f32 %v9475_v16, %v11158_v19  ;;  %v3885_v60 = vpop.f32.mrb[195].mxu1  ;;  %9605 = vmatmul.mubr.msk.bf16.gmra.mrb[36].mxu0 %vm537_vm0, %v4338_v50  ;;  %v4239_v43 = vmax.f32 %v3891_v26, 0.0 }
 0x3ed   :  { %v3886_v1 = vadd.f32 %v11158_v19, %v3885_v60  ;;  %v4237_v6 = vmax.f32 %v3883_v59, 0.0 }
 0x3ee   :  { %v4240_v4 = vmax.f32 %v3894_v61, 0.0 }
 0x3ef   :  { %v4238_v29 = vmax.f32 %v3886_v1, 0.0 }
 0x3f0   :  { %v4340_v9 = vpack.c.bf16 %v4240_v4, %v4239_v43 }
 0x3f1   :  { %v4339_v13 = vpack.c.bf16 %v4238_v29, %v4237_v6  ;;  %v9478_v15 = vpop.f32.mrb[196].mxu1 }
 0x3f2   :  { %v3907_v18 = vadd.f32 %v9478_v15, %v11158_v19  ;;  %v3898_v5 = vpop.f32.mrb[197].mxu1 }
 0x3f3   :  { %v3899_v30 = vadd.f32 %v11158_v19, %v3898_v5  ;;  %v9479_v23 = vpop.f32.mrb[198].mxu1  ;;  %9608 = vmatprep.mubr.msk.bf16.mxu0 %vm537_vm0, %v4339_v13 }
 0x3f4   :  { %v3910_v28 = vadd.f32 %v9479_v23, %v11158_v19  ;;  %v3901_v41 = vpop.f32.mrb[199].mxu1  ;;  %9609 = vmatmul.mubr.msk.bf16.gmra.mrb[40].mxu0 %vm537_vm0, %v4340_v9  ;;  %v4243_v22 = vmax.f32 %v3907_v18, 0.0 }
 0x3f5   :  { %v3902_v21 = vadd.f32 %v11158_v19, %v3901_v41  ;;  %v4241_v36 = vmax.f32 %v3899_v30, 0.0 }
 0x3f6   :  { %v4244_v0 = vmax.f32 %v3910_v28, 0.0 }
 0x3f7   :  { %v4242_v37 = vmax.f32 %v3902_v21, 0.0 }
 0x3f8   :  { %v4342_v20 = vpack.c.bf16 %v4244_v0, %v4243_v22 }
 0x3f9   :  { %v4341_v54 = vpack.c.bf16 %v4242_v37, %v4241_v36  ;;  %v9482_v7 = vpop.f32.mrb[200].mxu1 }
 0x3fa   :  { %v3923_v39 = vadd.f32 %v9482_v7, %v11158_v19  ;;  %v3914_v40 = vpop.f32.mrb[201].mxu1 }
 0x3fb   :  { %v3915_v11 = vadd.f32 %v11158_v19, %v3914_v40  ;;  %v9483_v58 = vpop.f32.mrb[202].mxu1  ;;  %9612 = vmatprep.mubr.msk.bf16.mxu0 %vm537_vm0, %v4341_v54 }
 0x3fc   :  { %v3926_v12 = vadd.f32 %v9483_v58, %v11158_v19  ;;  %v3917_v55 = vpop.f32.mrb[203].mxu1  ;;  %9613 = vmatmul.mubr.msk.bf16.gmra.mrb[44].mxu0 %vm537_vm0, %v4342_v20  ;;  %v4247_v45 = vmax.f32 %v3923_v39, 0.0 }
 0x3fd   :  { %v3918_v42 = vadd.f32 %v11158_v19, %v3917_v55  ;;  %v4245_v47 = vmax.f32 %v3915_v11, 0.0 }
 0x3fe   :  { %v4248_v46 = vmax.f32 %v3926_v12, 0.0 }
 0x3ff   :  { %v4246_v48 = vmax.f32 %v3918_v42, 0.0 }
 0x400   :  { %v4344_v8 = vpack.c.bf16 %v4248_v46, %v4247_v45 }
 0x401   :  { %v4343_v27 = vpack.c.bf16 %v4246_v48, %v4245_v47  ;;  %v9486_v31 = vpop.f32.mrb[204].mxu1 }
 0x402   :  { %v3939_v32 = vadd.f32 %v9486_v31, %v11158_v19  ;;  %v3930_v49 = vpop.f32.mrb[205].mxu1 }
 0x403   :  { %v3931_v33 = vadd.f32 %v11158_v19, %v3930_v49  ;;  %v9487_v34 = vpop.f32.mrb[206].mxu1  ;;  %9616 = vmatprep.mubr.msk.bf16.mxu0 %vm537_vm0, %v4343_v27 }
 0x404   :  { %v3942_v35 = vadd.f32 %v9487_v34, %v11158_v19  ;;  %v3933_v51 = vpop.f32.mrb[207].mxu1  ;;  %9617 = vmatmul.mubr.msk.bf16.gmra.mrb[48].mxu0 %vm537_vm0, %v4344_v8  ;;  %v4251_v52 = vmax.f32 %v3939_v32, 0.0 }
 0x405   :  { %v3934_v17 = vadd.f32 %v11158_v19, %v3933_v51  ;;  %v4249_v38 = vmax.f32 %v3931_v33, 0.0 }
 0x406   :  { %v4252_v53 = vmax.f32 %v3942_v35, 0.0 }
 0x407   :  { %v4250_v44 = vmax.f32 %v3934_v17, 0.0 }
 0x408   :  { %v4346_v62 = vpack.c.bf16 %v4252_v53, %v4251_v52 }
 0x409   :  { %v4345_v56 = vpack.c.bf16 %v4250_v44, %v4249_v38  ;;  %v9490_v63 = vpop.f32.mrb[208].mxu1 }
 0x40a   :  { %v3955_v2 = vadd.f32 %v9490_v63, %v11158_v19  ;;  %v3946_v3 = vpop.f32.mrb[209].mxu1 }
 0x40b   :  { %v3947_v50 = vadd.f32 %v11158_v19, %v3946_v3  ;;  %v9491_v57 = vpop.f32.mrb[210].mxu1  ;;  %9620 = vmatprep.mubr.msk.bf16.mxu0 %vm537_vm0, %v4345_v56 }
 0x40c   :  { %v3958_v24 = vadd.f32 %v9491_v57, %v11158_v19  ;;  %v3949_v26 = vpop.f32.mrb[211].mxu1  ;;  %9621 = vmatmul.mubr.msk.bf16.gmra.mrb[52].mxu0 %vm537_vm0, %v4346_v62  ;;  %v4255_v59 = vmax.f32 %v3955_v2, 0.0 }
 0x40d   :  { %v3950_v25 = vadd.f32 %v11158_v19, %v3949_v26  ;;  %v4253_v61 = vmax.f32 %v3947_v50, 0.0 }
 0x40e   :  { %v4256_v16 = vmax.f32 %v3958_v24, 0.0 }
 0x40f   :  { %v4254_v60 = vmax.f32 %v3950_v25, 0.0 }
 0x410   :  { %v4348_v1 = vpack.c.bf16 %v4256_v16, %v4255_v59 }
 0x411   :  { %v4347_v43 = vpack.c.bf16 %v4254_v60, %v4253_v61  ;;  %v9494_v4 = vpop.f32.mrb[212].mxu1 }
 0x412   :  { %v3971_v6 = vadd.f32 %v9494_v4, %v11158_v19  ;;  %v3962_v29 = vpop.f32.mrb[213].mxu1 }
 0x413   :  { %v3963_v9 = vadd.f32 %v11158_v19, %v3962_v29  ;;  %v9495_v13 = vpop.f32.mrb[214].mxu1  ;;  %9624 = vmatprep.mubr.msk.bf16.mxu0 %vm537_vm0, %v4347_v43 }
 0x414   :  { %v3974_v15 = vadd.f32 %v9495_v13, %v11158_v19  ;;  %v3965_v18 = vpop.f32.mrb[215].mxu1  ;;  %9625 = vmatmul.mubr.msk.bf16.gmra.mrb[56].mxu0 %vm537_vm0, %v4348_v1  ;;  %v4259_v30 = vmax.f32 %v3971_v6, 0.0 }
 0x415   :  { %v3966_v5 = vadd.f32 %v11158_v19, %v3965_v18  ;;  %v4257_v28 = vmax.f32 %v3963_v9, 0.0 }
 0x416   :  { %v4260_v23 = vmax.f32 %v3974_v15, 0.0 }
 0x417   :  { %v4258_v41 = vmax.f32 %v3966_v5, 0.0 }
 0x418   :  { %v4350_v21 = vpack.c.bf16 %v4260_v23, %v4259_v30 }
 0x419   :  { %v4349_v22 = vpack.c.bf16 %v4258_v41, %v4257_v28  ;;  %v9498_v0 = vpop.f32.mrb[216].mxu1 }
 0x41a   :  { %v3987_v36 = vadd.f32 %v9498_v0, %v11158_v19  ;;  %v3978_v37 = vpop.f32.mrb[217].mxu1 }
 0x41b   :  { %v3979_v20 = vadd.f32 %v11158_v19, %v3978_v37  ;;  %v9499_v54 = vpop.f32.mrb[218].mxu1  ;;  %9628 = vmatprep.mubr.msk.bf16.mxu0 %vm537_vm0, %v4349_v22 }
 0x41c   :  { %v3990_v7 = vadd.f32 %v9499_v54, %v11158_v19  ;;  %v3981_v39 = vpop.f32.mrb[219].mxu1  ;;  %9629 = vmatmul.mubr.msk.bf16.gmra.mrb[60].mxu0 %vm537_vm0, %v4350_v21  ;;  %v4263_v11 = vmax.f32 %v3987_v36, 0.0 }
 0x41d   :  { %v3982_v40 = vadd.f32 %v11158_v19, %v3981_v39  ;;  %v4261_v12 = vmax.f32 %v3979_v20, 0.0 }
 0x41e   :  { %v4264_v58 = vmax.f32 %v3990_v7, 0.0 }
 0x41f   :  { %v4262_v55 = vmax.f32 %v3982_v40, 0.0 }
 0x420   :  { %v4352_v42 = vpack.c.bf16 %v4264_v58, %v4263_v11 }
 0x421   :  { %v4351_v45 = vpack.c.bf16 %v4262_v55, %v4261_v12  ;;  %v9502_v46 = vpop.f32.mrb[220].mxu1 }
 0x422   :  { %v4003_v47 = vadd.f32 %v9502_v46, %v11158_v19  ;;  %v3994_v48 = vpop.f32.mrb[221].mxu1 }
 0x423   :  { %v3995_v8 = vadd.f32 %v11158_v19, %v3994_v48  ;;  %v9503_v27 = vpop.f32.mrb[222].mxu1  ;;  %9632 = vmatprep.mubr.msk.bf16.mxu0 %vm537_vm0, %v4351_v45 }
 0x424   :  { %v4006_v31 = vadd.f32 %v9503_v27, %v11158_v19  ;;  %v3997_v32 = vpop.f32.mrb[223].mxu1  ;;  %9633 = vmatmul.mubr.msk.bf16.gmra.mrb[64].mxu0 %vm537_vm0, %v4352_v42  ;;  %v4267_v33 = vmax.f32 %v4003_v47, 0.0 }
 0x425   :  { %v3998_v49 = vadd.f32 %v11158_v19, %v3997_v32  ;;  %v4265_v35 = vmax.f32 %v3995_v8, 0.0 }
 0x426   :  { %v4268_v34 = vmax.f32 %v4006_v31, 0.0 }
 0x427   :  { %v4266_v51 = vmax.f32 %v3998_v49, 0.0 }
 0x428   :  { %v4354_v17 = vpack.c.bf16 %v4268_v34, %v4267_v33 }
 0x429   :  { %v4353_v52 = vpack.c.bf16 %v4266_v51, %v4265_v35  ;;  %v9506_v53 = vpop.f32.mrb[224].mxu1 }
 0x42a   :  { %v4019_v38 = vadd.f32 %v9506_v53, %v11158_v19  ;;  %v4010_v44 = vpop.f32.mrb[225].mxu1 }
 0x42b   :  { %v4011_v62 = vadd.f32 %v11158_v19, %v4010_v44  ;;  %v9507_v56 = vpop.f32.mrb[226].mxu1  ;;  %9636 = vmatprep.mubr.msk.bf16.mxu0 %vm537_vm0, %v4353_v52 }
 0x42c   :  { %v4022_v63 = vadd.f32 %v9507_v56, %v11158_v19  ;;  %v4013_v2 = vpop.f32.mrb[227].mxu1  ;;  %9637 = vmatmul.mubr.msk.bf16.gmra.mrb[68].mxu0 %vm537_vm0, %v4354_v17  ;;  %v4271_v50 = vmax.f32 %v4019_v38, 0.0 }
 0x42d   :  { %v4014_v3 = vadd.f32 %v11158_v19, %v4013_v2  ;;  %v4269_v24 = vmax.f32 %v4011_v62, 0.0  ;;  %v11356_v62 = vld [vmem:[%s12463_s1] sm:$0xff] }
 0x42e   :  { %v4272_v57 = vmax.f32 %v4022_v63, 0.0 }
 0x42f   :  { %v4270_v26 = vmax.f32 %v4014_v3, 0.0 }
 0x430   :  { %v4356_v25 = vpack.c.bf16 %v4272_v57, %v4271_v50  ;;  %v11360_v57 = vrot.slane %v11356_v62, %v10100_v10 }
 0x431   :  { %v4355_v59 = vpack.c.bf16 %v4270_v26, %v4269_v24  ;;  %v9510_v16 = vpop.f32.mrb[228].mxu1 }
 0x432   :  { %v4035_v61 = vadd.f32 %v9510_v16, %v11158_v19  ;;  %v4026_v60 = vpop.f32.mrb[229].mxu1 }
 0x433   :  { %v4027_v1 = vadd.f32 %v11158_v19, %v4026_v60  ;;  %v9511_v43 = vpop.f32.mrb[230].mxu1  ;;  %9640 = vmatprep.mubr.msk.bf16.mxu0 %vm537_vm0, %v4355_v59 }
 0x434   :  { %v4038_v4 = vadd.f32 %v9511_v43, %v11158_v19  ;;  %v4029_v6 = vpop.f32.mrb[231].mxu1  ;;  %9641 = vmatmul.mubr.msk.bf16.gmra.mrb[72].mxu0 %vm537_vm0, %v4356_v25  ;;  %v4275_v9 = vmax.f32 %v4035_v61, 0.0  ;;  %v11369_v43 = vrot.slane %v11360_v57, %v10100_v10 }
 0x435   :  { %v4030_v29 = vadd.f32 %v11158_v19, %v4029_v6  ;;  %v4273_v15 = vmax.f32 %v4027_v1, 0.0 }
 0x436   :  { %v4276_v13 = vmax.f32 %v4038_v4, 0.0  ;;  %v11374_v4 = vld [vmem:[%s12462_s5 + $0x4] ss:$0 sm:$0xff] }
 0x437   :  { %v4274_v18 = vmax.f32 %v4030_v29, 0.0  ;;  %v50_v29 = vld [vmem:[%s12464_s3 + $0x10] sm:$0xff] }
 0x438   :  { %v4358_v5 = vpack.c.bf16 %v4276_v13, %v4275_v9 }
 0x439   :  { %v4357_v30 = vpack.c.bf16 %v4274_v18, %v4273_v15  ;;  %v9514_v23 = vpop.f32.mrb[232].mxu1  ;;  %v48_v15 = vld [vmem:[%s12464_s3] sm:$0xff] }
 0x43a   :  { %v4051_v28 = vadd.f32 %v9514_v23, %v11158_v19  ;;  %v4042_v41 = vpop.f32.mrb[233].mxu1 }
 0x43b   :  { %v4043_v21 = vadd.f32 %v11158_v19, %v4042_v41  ;;  %v9515_v22 = vpop.f32.mrb[234].mxu1  ;;  %9644 = vmatprep.mubr.msk.bf16.mxu0 %vm537_vm0, %v4357_v30  ;;  %v51_v30 = vld [vmem:[%s12464_s3 + $0x18] sm:$0xff]  ;;  %v11396_v41 = vrot.slane %v11369_v43, %v10114_v14 }
 0x43c   :  { %v4054_v0 = vadd.f32 %v9515_v22, %v11158_v19  ;;  %v4045_v36 = vpop.f32.mrb[235].mxu1  ;;  %9645 = vmatmul.mubr.msk.bf16.gmra.mrb[76].mxu0 %vm537_vm0, %v4358_v5  ;;  %v4279_v20 = vmax.f32 %v4051_v28, 0.0 }
 0x43d   :  { %v4046_v37 = vadd.f32 %v11158_v19, %v4045_v36  ;;  %v4277_v7 = vmax.f32 %v4043_v21, 0.0  ;;  %v49_v21 = vld [vmem:[%s12464_s3 + $0x8] sm:$0xff] }
 0x43e   :  { %v4280_v54 = vmax.f32 %v4054_v0, 0.0 }
 0x43f   :  { %v4278_v39 = vmax.f32 %v4046_v37, 0.0 }
 0x440   :  { %v4360_v40 = vpack.c.bf16 %v4280_v54, %v4279_v20 }
 0x441   :  { %v4359_v11 = vpack.c.bf16 %v4278_v39, %v4277_v7  ;;  %v9518_v58 = vpop.f32.mrb[236].mxu1 }
 0x442   :  { %v4067_v12 = vadd.f32 %v9518_v58, %v11158_v19  ;;  %v4058_v55 = vpop.f32.mrb[237].mxu1 }
 0x443   :  { %v4059_v42 = vadd.f32 %v11158_v19, %v4058_v55  ;;  %v9519_v45 = vpop.f32.mrb[238].mxu1  ;;  %9648 = vmatprep.mubr.msk.bf16.mxu0 %vm537_vm0, %v4359_v11  ;;  %v54_v55 = vld [vmem:[%s12464_s3 + $0x30] sm:$0xff] }
 0x444   :  { %v4070_v46 = vadd.f32 %v9519_v45, %v11158_v19  ;;  %v4061_v47 = vpop.f32.mrb[239].mxu1  ;;  %9649 = vmatmul.mubr.msk.bf16.gmra.mrb[80].mxu0 %vm537_vm0, %v4360_v40  ;;  %v4283_v8 = vmax.f32 %v4067_v12, 0.0 }
 0x445   :  { %v4062_v48 = vadd.f32 %v11158_v19, %v4061_v47  ;;  %v4281_v31 = vmax.f32 %v4059_v42, 0.0 }
 0x446   :  { %v4284_v27 = vmax.f32 %v4070_v46, 0.0  ;;  %v52_v46 = vld [vmem:[%s12464_s3 + $0x20] sm:$0xff] }
 0x447   :  { %v4282_v32 = vmax.f32 %v4062_v48, 0.0 }
 0x448   :  { %v4362_v49 = vpack.c.bf16 %v4284_v27, %v4283_v8  ;;  %v55_v27 = vld [vmem:[%s12464_s3 + $0x38] sm:$0xff] }
 0x449   :  { %v4361_v33 = vpack.c.bf16 %v4282_v32, %v4281_v31  ;;  %v9522_v34 = vpop.f32.mrb[240].mxu1 }
 0x44a   :  { %v4083_v35 = vadd.f32 %v9522_v34, %v11158_v19  ;;  %v4074_v51 = vpop.f32.mrb[241].mxu1 }
 0x44b   :  { %v4075_v17 = vadd.f32 %v11158_v19, %v4074_v51  ;;  %v9523_v52 = vpop.f32.mrb[242].mxu1  ;;  %9652 = vmatprep.mubr.msk.bf16.mxu0 %vm537_vm0, %v4361_v33 }
 0x44c   :  { %v4086_v53 = vadd.f32 %v9523_v52, %v11158_v19  ;;  %v4077_v38 = vpop.f32.mrb[243].mxu1  ;;  %9653 = vmatmul.mubr.msk.bf16.gmra.mrb[84].mxu0 %vm537_vm0, %v4362_v49  ;;  %v4287_v56 = vmax.f32 %v4083_v35, 0.0  ;;  %v53_v35 = vld [vmem:[%s12464_s3 + $0x28] sm:$0xff] }
 0x44d   :  { %v4078_v44 = vadd.f32 %v11158_v19, %v4077_v38  ;;  %v4285_v2 = vmax.f32 %v4075_v17, 0.0 }
 0x44e   :  { %v4288_v63 = vmax.f32 %v4086_v53, 0.0 }
 0x44f   :  { %v4286_v3 = vmax.f32 %v4078_v44, 0.0 }
 0x450   :  { %v4364_v50 = vpack.c.bf16 %v4288_v63, %v4287_v56 }
 0x451   :  { %v4363_v24 = vpack.c.bf16 %v4286_v3, %v4285_v2  ;;  %v9526_v26 = vpop.f32.mrb[244].mxu1 }
 0x452   :  { %v4099_v25 = vadd.f32 %v9526_v26, %v11158_v19  ;;  %v4090_v59 = vpop.f32.mrb[245].mxu1 }
 0x453   :  { %v4091_v16 = vadd.f32 %v11158_v19, %v4090_v59  ;;  %v9527_v61 = vpop.f32.mrb[246].mxu1  ;;  %9656 = vmatprep.mubr.msk.bf16.mxu0 %vm537_vm0, %v4363_v24 }
 0x454   :  { %v4102_v60 = vadd.f32 %v9527_v61, %v11158_v19  ;;  %v4093_v1 = vpop.f32.mrb[247].mxu1  ;;  %9657 = vmatmul.mubr.msk.bf16.gmra.mrb[88].mxu0 %vm537_vm0, %v4364_v50  ;;  %v11383_v19 = vld [vmem:[%s12462_s5 + $0x5] ss:$0 sm:$0xff]  ;;  %v4291_v9 = vmax.f32 %v4099_v25, 0.0 }
 0x455   :  { %v4094_v6 = vadd.f32 %v11374_v4, %v4093_v1  ;;  %v4289_v18 = vmax.f32 %v4091_v16, 0.0  ;;  %v11392_v28 = vadd.f32 %v11383_v19, %v50_v29  ;;  %v11402_v36 = vadd.f32 %v11383_v19, %v48_v15  ;;  %v58_v15 = vld [vmem:[%s12464_s3 + $0x50] sm:$0xff] }
 0x456   :  { %v4292_v13 = vmax.f32 %v4102_v60, 0.0  ;;  %v11406_v54 = vadd.f32 %v11383_v19, %v51_v30  ;;  %v11411_v40 = vadd.f32 %v11383_v19, %v49_v21  ;;  %v11434_v34 = vadd.f32 %v11383_v19, %v54_v55  ;;  %v56_v21 = vld [vmem:[%s12464_s3 + $0x40] sm:$0xff] }
 0x457   :  { %v4290_v5 = vmax.f32 %v4094_v6, 0.0  ;;  %v4502_v12 = vadd.f32 %v11396_v41, %v11392_v28  ;;  %v4500_v45 = vadd.f32 %v11396_v41, %v11402_v36  ;;  %v11440_v53 = vadd.f32 %v11383_v19, %v52_v46 }
 0x458   :  { %v4366_v23 = vpack.c.bf16 %v4292_v13, %v4291_v9  ;;  %v4503_v8 = vadd.f32 %v11396_v41, %v11406_v54  ;;  %v4501_v33 = vadd.f32 %v11396_v41, %v11411_v40  ;;  %v11443_v2 = vadd.f32 %v11383_v19, %v55_v27 }
 0x459   :  { %v4365_v22 = vpack.c.bf16 %v4290_v5, %v4289_v18  ;;  %v9530_v0 = vpop.f32.mrb[248].mxu1  ;;  %v11447_v25 = vadd.f32 %v11383_v19, %v53_v35  ;;  %v4506_v60 = vadd.f32 %v11396_v41, %v11434_v34  ;;  %v4504_v13 = vadd.f32 %v11396_v41, %v11440_v53 }
 0x45a   :  { %v4115_v37 = vadd.f32 %v11374_v4, %v9530_v0  ;;  %v4106_v20 = vpop.f32.mrb[249].mxu1  ;;  %v11472_v55 = vadd.f32 %v11383_v19, %v58_v15 }
 0x45b   :  { %v4107_v7 = vadd.f32 %v11374_v4, %v4106_v20  ;;  %v9531_v39 = vpop.f32.mrb[250].mxu1  ;;  %9660 = vmatprep.mubr.msk.bf16.mxu0 %vm537_vm0, %v4365_v22  ;;  %v4505_v20 = vadd.f32 %v11396_v41, %v11447_v25 }
 0x45c   :  { %v4118_v11 = vadd.f32 %v11374_v4, %v9531_v39  ;;  %v4109_v58 = vpop.f32.mrb[251].mxu1  ;;  %9661 = vmatmul.mubr.msk.bf16.gmra.mrb[92].mxu0 %vm537_vm0, %v4366_v23  ;;  %v4295_v47 = vmax.f32 %v4115_v37, 0.0  ;;  %v4507_v23 = vadd.f32 %v11396_v41, %v11443_v2 }
 0x45d   :  { %v4110_v42 = vadd.f32 %v11374_v4, %v4109_v58  ;;  %v4293_v31 = vmax.f32 %v4107_v7, 0.0  ;;  %v59_v7 = vld [vmem:[%s12464_s3 + $0x58] sm:$0xff] }
 0x45e   :  { %v4296_v48 = vmax.f32 %v4118_v11, 0.0 }
 0x45f   :  { %v4294_v32 = vmax.f32 %v4110_v42, 0.0  ;;  %v9558_v49 = vpop.f32.mrb[244].mxu0  ;;  %v57_v42 = vld [vmem:[%s12464_s3 + $0x48] sm:$0xff] }
 0x460   :  { %v4368_v51 = vpack.c.bf16 %v4296_v48, %v4295_v47  ;;  %v4887_v17 = vadd.f32 %v9558_v49, %v4502_v12  ;;  %v4878_v52 = vpop.f32.mrb[245].mxu0  ;;  %v11478_v48 = vadd.f32 %v11383_v19, %v56_v21  ;;  %v11482_v49 = vadd.f32 %v11383_v19, %v59_v7 }
 0x461   :  { %v4367_v38 = vpack.c.bf16 %v4294_v32, %v4293_v31  ;;  %v4879_v44 = vadd.f32 %v4878_v52, %v4500_v45  ;;  %v9534_v56 = vpop.f32.mrb[252].mxu1  ;;  %v9559_v63 = vpop.f32.mrb[246].mxu0  ;;  %v11487_v52 = vadd.f32 %v11383_v19, %v57_v42 }
 0x462   :  { %v4131_v3 = vadd.f32 %v11374_v4, %v9534_v56  ;;  %v4890_v50 = vadd.f32 %v9559_v63, %v4503_v8  ;;  %v4122_v24 = vpop.f32.mrb[253].mxu1  ;;  %v4881_v26 = vpop.f32.mrb[247].mxu0  ;;  %v5391_v1 = vmax.f32 %v4887_v17, 0.0  ;;  %v4510_v63 = vadd.f32 %v11396_v41, %v11472_v55 }
 0x463   :  { %v4123_v59 = vadd.f32 %v11374_v4, %v4122_v24  ;;  %v4882_v16 = vadd.f32 %v4881_v26, %v4501_v33  ;;  %v9535_v61 = vpop.f32.mrb[254].mxu1  ;;  %9664 = vmatprep.mubr.msk.bf16.mxu0 %vm537_vm0, %v4367_v38  ;;  %v5389_v18 = vmax.f32 %v4879_v44, 0.0  ;;  %v4509_v15 = vadd.f32 %v11396_v41, %v11487_v52 }
 0x464   :  { %v5392_v6 = vmax.f32 %v4890_v50, 0.0  ;;  %v4134_v29 = vadd.f32 %v11374_v4, %v9535_v61  ;;  %v4125_v9 = vpop.f32.mrb[255].mxu1  ;;  %9665 = vmatmul.mubr.msk.bf16.gmra.mrb[96].mxu0 %vm537_vm0, %v4368_v51  ;;  %v4299_v22 = vmax.f32 %v4131_v3, 0.0 }
 0x465   :  { %v5390_v5 = vmax.f32 %v4882_v16, 0.0  ;;  %v4126_v30 = vadd.f32 %v11374_v4, %v4125_v9  ;;  %v4297_v39 = vmax.f32 %v4123_v59, 0.0  ;;  %v4508_v59 = vadd.f32 %v11396_v41, %v11478_v48  ;;  %v62_v16 = vld [vmem:[%s12464_s3 + $0x70] sm:$0xff] }
 0x466   :  { %v5518_v0 = vpack.c.bf16 %v5392_v6, %v5391_v1  ;;  %v4300_v37 = vmax.f32 %v4134_v29, 0.0  ;;  %v4511_v6 = vadd.f32 %v11396_v41, %v11482_v49 }
 0x467   :  { %v5517_v11 = vpack.c.bf16 %v5390_v5, %v5389_v18  ;;  %v4298_v58 = vmax.f32 %v4126_v30, 0.0  ;;  %v9562_v12 = vpop.f32.mrb[248].mxu0  ;;  %v60_v18 = vld [vmem:[%s12464_s3 + $0x60] sm:$0xff] }
 0x468   :  { %v4370_v45 = vpack.c.bf16 %v4300_v37, %v4299_v22  ;;  %v4903_v46 = vadd.f32 %v9562_v12, %v4506_v60  ;;  %v4894_v47 = vpop.f32.mrb[249].mxu0  ;;  %v11509_v22 = vadd.f32 %v11383_v19, %v62_v16 }
 0x469   :  { %v4369_v8 = vpack.c.bf16 %v4298_v58, %v4297_v39  ;;  %v4895_v27 = vadd.f32 %v4894_v47, %v4504_v13  ;;  %v9538_v31 = vpop.f32.mrb[0].mxu1  ;;  %v9563_v32 = vpop.f32.mrb[250].mxu0  ;;  %9692 = vmatprep.mubr.msk.bf16.mxu1 %vm537_vm0, %v5517_v11  ;;  %v61_v39 = vld [vmem:[%s12464_s3 + $0x68] sm:$0xff]  ;;  %v4426_v11 = vcombine.high %v11360_v57, %v11360_v57 }
 0x46a   :  { %v4147_v33 = vadd.f32 %v11374_v4, %v9538_v31  ;;  %v4906_v35 = vadd.f32 %v9563_v32, %v4507_v23  ;;  %v4138_v51 = vpop.f32.mrb[1].mxu1  ;;  %v4897_v17 = vpop.f32.mrb[251].mxu0  ;;  %9693 = vmatmul.mubr.msk.bf16.vlgmr.msra.gmra.mrb[12].mxu1 %vm537_vm0, %v5518_v0  ;;  %v5395_v3 = vmax.f32 %v4903_v46, 0.0  ;;  %v63_v0 = vld [vmem:[%s12464_s3 + $0x78] sm:$0xff]  ;;  %v11521_v46 = vadd.f32 %v11383_v19, %v60_v18 }
 0x46b   :  { %v4139_v38 = vadd.f32 %v11374_v4, %v4138_v51  ;;  %v4898_v44 = vadd.f32 %v4897_v17, %v4505_v20  ;;  %v9539_v56 = vpop.f32.mrb[2].mxu1  ;;  %9668 = vmatprep.mubr.msk.bf16.mxu0 %vm537_vm0, %v4369_v8  ;;  %v5393_v61 = vmax.f32 %v4895_v27, 0.0  ;;  %v11526_v32 = vadd.f32 %v11383_v19, %v63_v0 }
 0x46c   :  { %v5396_v50 = vmax.f32 %v4906_v35, 0.0  ;;  %v4150_v24 = vadd.f32 %v11374_v4, %v9539_v56  ;;  %v4141_v26 = vpop.f32.mrb[3].mxu1  ;;  %9669 = vmatmul.mubr.msk.bf16.gmra.mrb[100].mxu0 %vm537_vm0, %v4370_v45  ;;  %v4303_v29 = vmax.f32 %v4147_v33, 0.0  ;;  %v4514_v51 = vadd.f32 %v11396_v41, %v11509_v22 }
 0x46d   :  { %v5394_v60 = vmax.f32 %v4898_v44, 0.0  ;;  %v4142_v1 = vadd.f32 %v11374_v4, %v4141_v26  ;;  %v4301_v5 = vmax.f32 %v4139_v38, 0.0  ;;  %v11533_v17 = vadd.f32 %v11383_v19, %v61_v39 }
 0x46e   :  { %v5520_v9 = vpack.c.bf16 %v5396_v50, %v5395_v3  ;;  %v4304_v13 = vmax.f32 %v4150_v24, 0.0  ;;  %v11538_v3 = vrot.slane %v4426_v11, %v10100_v10 }
 0x46f   :  { %v5519_v30 = vpack.c.bf16 %v5394_v60, %v5393_v61  ;;  %v4302_v23 = vmax.f32 %v4142_v1, 0.0  ;;  %v9566_v21 = vpop.f32.mrb[252].mxu0  ;;  %v4515_v60 = vadd.f32 %v11396_v41, %v11526_v32 }
 0x470   :  { %v4372_v37 = vpack.c.bf16 %v4304_v13, %v4303_v29  ;;  %v4919_v20 = vadd.f32 %v9566_v21, %v4510_v63  ;;  %v4910_v7 = vpop.f32.mrb[253].mxu0  ;;  %v4513_v13 = vadd.f32 %v11396_v41, %v11533_v17 }
 0x471   :  { %v4371_v58 = vpack.c.bf16 %v4302_v23, %v4301_v5  ;;  %v4911_v12 = vadd.f32 %v4910_v7, %v4508_v59  ;;  %v9542_v42 = vpop.f32.mrb[4].mxu1  ;;  %v9567_v45 = vpop.f32.mrb[254].mxu0  ;;  %9696 = vmatprep.mubr.msk.bf16.mxu1 %vm537_vm0, %v5519_v30  ;;  %v4512_v59 = vadd.f32 %v11396_v41, %v11521_v46  ;;  %v11549_v30 = vrot.slane %v11538_v3, %v10114_v14 }
 0x472   :  { %v4163_v47 = vadd.f32 %v11374_v4, %v9542_v42  ;;  %v4922_v8 = vadd.f32 %v9567_v45, %v4511_v6  ;;  %v4154_v27 = vpop.f32.mrb[5].mxu1  ;;  %v4913_v31 = vpop.f32.mrb[255].mxu0  ;;  %9697 = vmatmul.mubr.msk.bf16.gmra.mrb[16].mxu1 %vm537_vm0, %v5520_v9  ;;  %v5399_v38 = vmax.f32 %v4919_v20, 0.0 }
 0x473   :  { %v4155_v57 = vadd.f32 %v11374_v4, %v4154_v27  ;;  %v4914_v33 = vadd.f32 %v4913_v31, %v4509_v15  ;;  %v9543_v35 = vpop.f32.mrb[6].mxu1  ;;  %9672 = vmatprep.mubr.msk.bf16.mxu0 %vm537_vm0, %v4371_v58  ;;  %v5397_v50 = vmax.f32 %v4911_v12, 0.0  ;;  %v4518_v27 = vadd.f32 %v11549_v30, %v11392_v28 }
 0x474   :  { %v5400_v44 = vmax.f32 %v4922_v8, 0.0  ;;  %v4166_v56 = vadd.f32 %v11374_v4, %v9543_v35  ;;  %v4157_v63 = vpop.f32.mrb[7].mxu1  ;;  %9673 = vmatmul.mubr.msk.bf16.gmra.mrb[104].mxu0 %vm537_vm0, %v4372_v37  ;;  %v4307_v16 = vmax.f32 %v4163_v47, 0.0  ;;  %v4516_v35 = vadd.f32 %v11549_v30, %v11402_v36 }
 0x475   :  { %v5398_v24 = vmax.f32 %v4914_v33, 0.0  ;;  %v4158_v26 = vadd.f32 %v11374_v4, %v4157_v63  ;;  %v4305_v1 = vmax.f32 %v4155_v57, 0.0 }
 0x476   :  { %v5522_v19 = vpack.c.bf16 %v5400_v44, %v5399_v38  ;;  %v4308_v61 = vmax.f32 %v4166_v56, 0.0  ;;  %v4519_v56 = vadd.f32 %v11549_v30, %v11406_v54 }
 0x477   :  { %v5521_v6 = vpack.c.bf16 %v5398_v24, %v5397_v50  ;;  %v4306_v29 = vmax.f32 %v4158_v26, 0.0  ;;  %v9570_v9 = vpop.f32.mrb[0].mxu0 }
 0x478   :  { %v4374_v15 = vpack.c.bf16 %v4308_v61, %v4307_v16  ;;  %v4935_v18 = vadd.f32 %v9570_v9, %v4514_v51  ;;  %v4926_v5 = vpop.f32.mrb[1].mxu0 }
 0x479   :  { %v4373_v23 = vpack.c.bf16 %v4306_v29, %v4305_v1  ;;  %v4927_v21 = vadd.f32 %v4926_v5, %v4512_v59  ;;  %v9546_v0 = vpop.f32.mrb[8].mxu1  ;;  %v9571_v37 = vpop.f32.mrb[2].mxu0  ;;  %9700 = vmatprep.mubr.msk.bf16.mxu1 %vm537_vm0, %v5521_v6  ;;  %v4517_v59 = vadd.f32 %v11549_v30, %v11411_v40 }
 0x47a   :  { %v4179_v20 = vadd.f32 %v11374_v4, %v9546_v0  ;;  %v4938_v7 = vadd.f32 %v9571_v37, %v4515_v60  ;;  %v4170_v39 = vpop.f32.mrb[9].mxu1  ;;  %v4929_v11 = vpop.f32.mrb[3].mxu0  ;;  %9701 = vmatmul.mubr.msk.bf16.gmra.mrb[20].mxu1 %vm537_vm0, %v5522_v19  ;;  %v5403_v42 = vmax.f32 %v4935_v18, 0.0  ;;  %v4522_v18 = vadd.f32 %v11549_v30, %v11434_v34 }
 0x47b   :  { %v4171_v41 = vadd.f32 %v11374_v4, %v4170_v39  ;;  %v4930_v58 = vadd.f32 %v4929_v11, %v4513_v13  ;;  %v9547_v12 = vpop.f32.mrb[10].mxu1  ;;  %9676 = vmatprep.mubr.msk.bf16.mxu0 %vm537_vm0, %v4373_v23  ;;  %v5401_v31 = vmax.f32 %v4927_v21, 0.0  ;;  %v4520_v21 = vadd.f32 %v11549_v30, %v11440_v53 }
 0x47c   :  { %v5404_v45 = vmax.f32 %v4938_v7, 0.0  ;;  %v4182_v47 = vadd.f32 %v11374_v4, %v9547_v12  ;;  %v4173_v8 = vpop.f32.mrb[11].mxu1  ;;  %9677 = vmatmul.mubr.msk.bf16.gmra.mrb[108].mxu0 %vm537_vm0, %v4374_v15  ;;  %v4311_v51 = vmax.f32 %v4179_v20, 0.0  ;;  %v4523_v37 = vadd.f32 %v11549_v30, %v11443_v2 }
 0x47d   :  { %v5402_v57 = vmax.f32 %v4930_v58, 0.0  ;;  %v4174_v33 = vadd.f32 %v11374_v4, %v4173_v8  ;;  %v4309_v63 = vmax.f32 %v4171_v41, 0.0  ;;  %v4521_v39 = vadd.f32 %v11549_v30, %v11447_v25 }
 0x47e   :  { %v5524_v38 = vpack.c.bf16 %v5404_v45, %v5403_v42  ;;  %v4312_v44 = vmax.f32 %v4182_v47, 0.0  ;;  %v10025_v47 = vld [vmem:[%s12459_s4 + $0xc0] sm:$0xff]  }
 0x47f   :  { %v5523_v50 = vpack.c.bf16 %v5402_v57, %v5401_v31  ;;  %v4310_v24 = vmax.f32 %v4174_v33, 0.0  ;;  %v9574_v26 = vpop.f32.mrb[4].mxu0  ;;  %v4526_v57 = vadd.f32 %v11549_v30, %v11472_v55  ;;  %9820 = vmatprep.subr.bf16.mxu0 %v10025_v47 }
 0x480   :  { %v4376_v16 = vpack.c.bf16 %v4312_v44, %v4311_v51  ;;  %v4951_v19 = vadd.f32 %v9574_v26, %v4518_v27  ;;  %v4942_v61 = vpop.f32.mrb[5].mxu0  ;;  %v4524_v51 = vadd.f32 %v11549_v30, %v11478_v48  ;;  %9821 = vmatpush3.bf16.msra.mxu0 %v10025_v47  ;;  %v4527_v44 = vadd.f32 %v11549_v30, %v11482_v49 }
 0x481   :  { %v4375_v4 = vpack.c.bf16 %v4310_v24, %v4309_v63  ;;  %v4943_v60 = vadd.f32 %v4942_v61, %v4516_v35  ;;  %v9575_v1 = vpop.f32.mrb[6].mxu0  ;;  %9704 = vmatprep.mubr.msk.bf16.mxu1 %vm537_vm0, %v5523_v50  ;;  %v4525_v50 = vadd.f32 %v11549_v30, %v11487_v52 }
 0x482   :  { %v4954_v6 = vadd.f32 %v9575_v1, %v4519_v56  ;;  %v4945_v29 = vpop.f32.mrb[7].mxu0  ;;  %9705 = vmatmul.mubr.msk.bf16.gmra.mrb[24].mxu1 %vm537_vm0, %v5524_v38  ;;  %v5407_v13 = vmax.f32 %v4951_v19, 0.0 }
 0x483   :  { %v4946_v9 = vadd.f32 %v4945_v29, %v4517_v59  ;;  %9680 = vmatprep.mubr.msk.bf16.mxu0 %vm537_vm0, %v4375_v4  ;;  %v5405_v5 = vmax.f32 %v4943_v60, 0.0  ;;  %v4456_v29 = vcombine.high %v11369_v43, %v11369_v43 }
 0x484   :  { %v5408_v15 = vmax.f32 %v4954_v6, 0.0  ;;  %9681 = vmatmul.mubr.msk.bf16.gmra.mrb[112].mxu0 %vm537_vm0, %v4376_v16  ;;  %v4530_v6 = vadd.f32 %v11549_v30, %v11509_v22 }
 0x485   :  { %v5406_v23 = vmax.f32 %v4946_v9, 0.0 }
 0x486   :  { %v5526_v0 = vpack.c.bf16 %v5408_v15, %v5407_v13  ;;  %v4528_v15 = vadd.f32 %v11549_v30, %v11521_v46 }
 0x487   :  { %v5525_v20 = vpack.c.bf16 %v5406_v23, %v5405_v5  ;;  %v9578_v7 = vpop.f32.mrb[8].mxu0  ;;  %v4531_v5 = vadd.f32 %v11549_v30, %v11526_v32 }
 0x488   :  { %v4967_v11 = vadd.f32 %v9578_v7, %v4522_v18  ;;  %v4958_v41 = vpop.f32.mrb[9].mxu0  ;;  %v11605_v7 = vrot.slane %v4456_v29, %v10114_v14 }
 0x489   :  { %v4959_v58 = vadd.f32 %v4958_v41, %v4520_v21  ;;  %v9579_v12 = vpop.f32.mrb[10].mxu0  ;;  %9708 = vmatprep.mubr.msk.bf16.mxu1 %vm537_vm0, %v5525_v20 }
 0x48a   :  { %v4970_v42 = vadd.f32 %v9579_v12, %v4523_v37  ;;  %v4961_v45 = vpop.f32.mrb[11].mxu0  ;;  %9709 = vmatmul.mubr.msk.bf16.gmra.mrb[28].mxu1 %vm537_vm0, %v5526_v0  ;;  %v5411_v27 = vmax.f32 %v4967_v11, 0.0  ;;  %v4529_v0 = vadd.f32 %v11549_v30, %v11533_v17 }
 0x48b   :  { %v4962_v8 = vadd.f32 %v4961_v45, %v4521_v39  ;;  %v5409_v33 = vmax.f32 %v4959_v58, 0.0  ;;  %v4534_v45 = vadd.f32 %v11605_v7, %v11392_v28 }
 0x48c   :  { %v5412_v31 = vmax.f32 %v4970_v42, 0.0 }
 0x48d   :  { %v5410_v35 = vmax.f32 %v4962_v8, 0.0  ;;  %v4532_v8 = vadd.f32 %v11605_v7, %v11402_v36 }
 0x48e   :  { %v5528_v38 = vpack.c.bf16 %v5412_v31, %v5411_v27  ;;  %v4535_v31 = vadd.f32 %v11605_v7, %v11406_v54 }
 0x48f   :  { %v5527_v56 = vpack.c.bf16 %v5410_v35, %v5409_v33  ;;  %v9582_v63 = vpop.f32.mrb[12].mxu0  ;;  %v4533_v35 = vadd.f32 %v11605_v7, %v11411_v40 }
 0x490   :  { %v4983_v24 = vadd.f32 %v9582_v63, %v4526_v57  ;;  %v4974_v26 = vpop.f32.mrb[13].mxu0 }
 0x491   :  { %v4975_v59 = vadd.f32 %v4974_v26, %v4524_v51  ;;  %v9583_v16 = vpop.f32.mrb[14].mxu0  ;;  %9712 = vmatprep.mubr.msk.bf16.mxu1 %vm537_vm0, %v5527_v56 }
 0x492   :  { %v4986_v19 = vadd.f32 %v9583_v16, %v4527_v44  ;;  %v4977_v61 = vpop.f32.mrb[15].mxu0  ;;  %9713 = vmatmul.mubr.msk.bf16.gmra.mrb[32].mxu1 %vm537_vm0, %v5528_v38  ;;  %v5415_v60 = vmax.f32 %v4983_v24, 0.0  ;;  %v4538_v16 = vadd.f32 %v11605_v7, %v11434_v34 }
 0x493   :  { %v4978_v4 = vadd.f32 %v4977_v61, %v4525_v50  ;;  %v5413_v9 = vmax.f32 %v4975_v59, 0.0 }
 0x494   :  { %v5416_v1 = vmax.f32 %v4986_v19, 0.0 }
 0x495   :  { %v5414_v13 = vmax.f32 %v4978_v4, 0.0  ;;  %v4536_v4 = vadd.f32 %v11605_v7, %v11440_v53 }
 0x496   :  { %v5530_v18 = vpack.c.bf16 %v5416_v1, %v5415_v60  ;;  %v4539_v1 = vadd.f32 %v11605_v7, %v11443_v2 }
 0x497   :  { %v5529_v23 = vpack.c.bf16 %v5414_v13, %v5413_v9  ;;  %v9586_v21 = vpop.f32.mrb[16].mxu0  ;;  %v4537_v9 = vadd.f32 %v11605_v7, %v11447_v25 }
 0x498   :  { %v4999_v37 = vadd.f32 %v9586_v21, %v4530_v6  ;;  %v4990_v20 = vpop.f32.mrb[17].mxu0 }
 0x499   :  { %v4991_v43 = vadd.f32 %v4990_v20, %v4528_v15  ;;  %v9587_v39 = vpop.f32.mrb[18].mxu0  ;;  %9716 = vmatprep.mubr.msk.bf16.mxu1 %vm537_vm0, %v5529_v23 }
 0x49a   :  { %v5002_v11 = vadd.f32 %v9587_v39, %v4531_v5  ;;  %v4993_v41 = vpop.f32.mrb[19].mxu0  ;;  %9717 = vmatmul.mubr.msk.bf16.gmra.mrb[36].mxu1 %vm537_vm0, %v5530_v18  ;;  %v5419_v12 = vmax.f32 %v4999_v37, 0.0 }
 0x49b   :  { %v4994_v58 = vadd.f32 %v4993_v41, %v4529_v0  ;;  %v5417_v30 = vmax.f32 %v4991_v43, 0.0  ;;  %v4542_v43 = vadd.f32 %v11605_v7, %v11472_v55  ;;  %v4540_v41 = vadd.f32 %v11605_v7, %v11478_v48 }
 0x49c   :  { %v5420_v42 = vmax.f32 %v5002_v11, 0.0 }
 0x49d   :  { %v5418_v47 = vmax.f32 %v4994_v58, 0.0 }
 0x49e   :  { %v5532_v27 = vpack.c.bf16 %v5420_v42, %v5419_v12  ;;  %v4543_v12 = vadd.f32 %v11605_v7, %v11482_v49 }
 0x49f   :  { %v5531_v57 = vpack.c.bf16 %v5418_v47, %v5417_v30  ;;  %v9590_v33 = vpop.f32.mrb[20].mxu0  ;;  %v4541_v30 = vadd.f32 %v11605_v7, %v11487_v52 }
 0x4a0   :  { %v5015_v51 = vadd.f32 %v9590_v33, %v4534_v45  ;;  %v5006_v38 = vpop.f32.mrb[21].mxu0 }
 0x4a1   :  { %v5007_v44 = vadd.f32 %v5006_v38, %v4532_v8  ;;  %v9591_v56 = vpop.f32.mrb[22].mxu0  ;;  %9720 = vmatprep.mubr.msk.bf16.mxu1 %vm537_vm0, %v5531_v57 }
 0x4a2   :  { %v5018_v63 = vadd.f32 %v9591_v56, %v4535_v31  ;;  %v5009_v50 = vpop.f32.mrb[23].mxu0  ;;  %9721 = vmatmul.mubr.msk.bf16.gmra.mrb[40].mxu1 %vm537_vm0, %v5532_v27  ;;  %v5423_v26 = vmax.f32 %v5015_v51, 0.0  ;;  %v4458_v56 = vcombine.high %v11538_v3, %v11538_v3 }
 0x4a3   :  { %v5010_v24 = vadd.f32 %v5009_v50, %v4533_v35  ;;  %v5421_v19 = vmax.f32 %v5007_v44, 0.0  ;;  %v4546_v44 = vadd.f32 %v11605_v7, %v11509_v22 }
 0x4a4   :  { %v5424_v59 = vmax.f32 %v5018_v63, 0.0 }
 0x4a5   :  { %v5422_v61 = vmax.f32 %v5010_v24, 0.0  ;;  %v4544_v24 = vadd.f32 %v11605_v7, %v11521_v46 }
 0x4a6   :  { %v5534_v60 = vpack.c.bf16 %v5424_v59, %v5423_v26  ;;  %v4547_v59 = vadd.f32 %v11605_v7, %v11526_v32 }
 0x4a7   :  { %v5533_v6 = vpack.c.bf16 %v5422_v61, %v5421_v19  ;;  %v9594_v29 = vpop.f32.mrb[24].mxu0  ;;  %v4545_v61 = vadd.f32 %v11605_v7, %v11533_v17 }
 0x4a8   :  { %v5031_v13 = vadd.f32 %v9594_v29, %v4538_v16  ;;  %v5022_v15 = vpop.f32.mrb[25].mxu0 }
 0x4a9   :  { %v5023_v18 = vadd.f32 %v5022_v15, %v4536_v4  ;;  %v9595_v5 = vpop.f32.mrb[26].mxu0  ;;  %9724 = vmatprep.mubr.msk.bf16.mxu1 %vm537_vm0, %v5533_v6 }
 0x4aa   :  { %v5034_v23 = vadd.f32 %v9595_v5, %v4539_v1  ;;  %v5025_v21 = vpop.f32.mrb[27].mxu0  ;;  %9725 = vmatmul.mubr.msk.bf16.gmra.mrb[44].mxu1 %vm537_vm0, %v5534_v60  ;;  %v5427_v37 = vmax.f32 %v5031_v13, 0.0  ;;  %v11650_v1 = vrot.slane %v4458_v56, %v10114_v14  ;;  %v10026_v13 = vld [vmem:[%s12459_s4 + $0xc8] sm:$0xff]  }
 0x4ab   :  { %v5026_v0 = vadd.f32 %v5025_v21, %v4537_v9  ;;  %v5425_v39 = vmax.f32 %v5023_v18, 0.0  ;;  %9822 = vmatprep.subr.bf16.mxu0 %v10026_v13 }
 0x4ac   :  { %v5428_v20 = vmax.f32 %v5034_v23, 0.0  ;;  %v4550_v5 = vadd.f32 %v11650_v1, %v11392_v28  ;;  %9823 = vmatpush3.bf16.msra.mxu0 %v10026_v13  ;;  %v4555_v56 = vadd.f32 %v11650_v1, %v11443_v2 }
 0x4ad   :  { %v5426_v11 = vmax.f32 %v5026_v0, 0.0  ;;  %v4548_v0 = vadd.f32 %v11650_v1, %v11402_v36 }
 0x4ae   :  { %v5536_v58 = vpack.c.bf16 %v5428_v20, %v5427_v37  ;;  %v4551_v20 = vadd.f32 %v11650_v1, %v11406_v54 }
 0x4af   :  { %v5535_v42 = vpack.c.bf16 %v5426_v11, %v5425_v39  ;;  %v9598_v45 = vpop.f32.mrb[28].mxu0 }
 0x4b0   :  { %v5047_v47 = vadd.f32 %v9598_v45, %v4542_v43  ;;  %v5038_v8 = vpop.f32.mrb[29].mxu0  ;;  %v10027_v43 = vld [vmem:[%s12459_s4 + $0xd0] sm:$0xff]  }
 0x4b1   :  { %v5039_v27 = vadd.f32 %v5038_v8, %v4540_v41  ;;  %v9599_v31 = vpop.f32.mrb[30].mxu0  ;;  %9728 = vmatprep.mubr.msk.bf16.mxu1 %vm537_vm0, %v5535_v42  ;;  %v4549_v41 = vadd.f32 %v11650_v1, %v11411_v40  ;;  %9824 = vmatprep.subr.bf16.mxu0 %v10027_v43  ;;  %v10028_v8 = vld [vmem:[%s12459_s4 + $0xd8] sm:$0xff]  }
 0x4b2   :  { %v5050_v57 = vadd.f32 %v9599_v31, %v4543_v12  ;;  %v5041_v33 = vpop.f32.mrb[31].mxu0  ;;  %9729 = vmatmul.mubr.msk.bf16.gmra.mrb[48].mxu1 %vm537_vm0, %v5536_v58  ;;  %v5431_v51 = vmax.f32 %v5047_v47, 0.0  ;;  %9825 = vmatpush3.bf16.msra.mxu0 %v10027_v43 }
 0x4b3   :  { %v5042_v35 = vadd.f32 %v5041_v33, %v4541_v30  ;;  %v5429_v63 = vmax.f32 %v5039_v27, 0.0  ;;  %v4554_v33 = vadd.f32 %v11650_v1, %v11434_v34  ;;  %9826 = vmatprep.subr.bf16.mxu0 %v10028_v8 }
 0x4b4   :  { %v5432_v38 = vmax.f32 %v5050_v57, 0.0 }
 0x4b5   :  { %v5430_v50 = vmax.f32 %v5042_v35, 0.0 }
 0x4b6   :  { %v5538_v26 = vpack.c.bf16 %v5432_v38, %v5431_v51  ;;  %v4552_v38 = vadd.f32 %v11650_v1, %v11440_v53  ;;  %9827 = vmatpush3.bf16.msra.mxu0 %v10028_v8 }
 0x4b7   :  { %v5537_v16 = vpack.c.bf16 %v5430_v50, %v5429_v63  ;;  %v9602_v19 = vpop.f32.mrb[32].mxu0 }
 0x4b8   :  { %v5063_v4 = vadd.f32 %v9602_v19, %v4546_v44  ;;  %v5054_v60 = vpop.f32.mrb[33].mxu0 }
 0x4b9   :  { %v5055_v3 = vadd.f32 %v5054_v60, %v4544_v24  ;;  %v9603_v6 = vpop.f32.mrb[34].mxu0  ;;  %9732 = vmatprep.mubr.msk.bf16.mxu1 %vm537_vm0, %v5537_v16  ;;  %v4553_v24 = vadd.f32 %v11650_v1, %v11447_v25 }
 0x4ba   :  { %v5066_v29 = vadd.f32 %v9603_v6, %v4547_v59  ;;  %v5057_v9 = vpop.f32.mrb[35].mxu0  ;;  %9733 = vmatmul.mubr.msk.bf16.gmra.mrb[52].mxu1 %vm537_vm0, %v5538_v26  ;;  %v5435_v18 = vmax.f32 %v5063_v4, 0.0 }
 0x4bb   :  { %v5058_v15 = vadd.f32 %v5057_v9, %v4545_v61  ;;  %v5433_v23 = vmax.f32 %v5055_v3, 0.0  ;;  %v4411_v9 = vcombine.high %v11356_v62, %v11356_v62 }
 0x4bc   :  { %v5436_v7 = vmax.f32 %v5066_v29, 0.0  ;;  %v4558_v29 = vadd.f32 %v11650_v1, %v11472_v55 }
 0x4bd   :  { %v5434_v21 = vmax.f32 %v5058_v15, 0.0  ;;  %v11694_v43 = vrot.slane %v4411_v9, %v10100_v10 }
 0x4be   :  { %v5540_v37 = vpack.c.bf16 %v5436_v7, %v5435_v18  ;;  %v4556_v18 = vadd.f32 %v11650_v1, %v11478_v48 }
 0x4bf   :  { %v5539_v39 = vpack.c.bf16 %v5434_v21, %v5433_v23  ;;  %v9606_v11 = vpop.f32.mrb[36].mxu0 }
 0x4c0   :  { %v5079_v58 = vadd.f32 %v9606_v11, %v4550_v5  ;;  %v5070_v12 = vpop.f32.mrb[37].mxu0  ;;  %v4559_v5 = vadd.f32 %v11650_v1, %v11482_v49 }
 0x4c1   :  { %v5071_v42 = vadd.f32 %v5070_v12, %v4548_v0  ;;  %v9607_v45 = vpop.f32.mrb[38].mxu0  ;;  %9736 = vmatprep.mubr.msk.bf16.mxu1 %vm537_vm0, %v5539_v39  ;;  %v4557_v0 = vadd.f32 %v11650_v1, %v11487_v52 }
 0x4c2   :  { %v5082_v30 = vadd.f32 %v9607_v45, %v4551_v20  ;;  %v5073_v47 = vpop.f32.mrb[39].mxu0  ;;  %9737 = vmatmul.mubr.msk.bf16.gmra.mrb[56].mxu1 %vm537_vm0, %v5540_v37  ;;  %v5439_v31 = vmax.f32 %v5079_v58, 0.0  ;;  %v4562_v45 = vadd.f32 %v11650_v1, %v11509_v22 }
 0x4c3   :  { %v5074_v27 = vadd.f32 %v5073_v47, %v4549_v41  ;;  %v5437_v35 = vmax.f32 %v5071_v42, 0.0 }
 0x4c4   :  { %v5440_v57 = vmax.f32 %v5082_v30, 0.0  ;;  %v11702_v30 = vrot.slane %v11694_v43, %v10100_v10 }
 0x4c5   :  { %v5438_v51 = vmax.f32 %v5074_v27, 0.0  ;;  %v4560_v27 = vadd.f32 %v11650_v1, %v11521_v46 }
 0x4c6   :  { %v5542_v44 = vpack.c.bf16 %v5440_v57, %v5439_v31  ;;  %v4563_v57 = vadd.f32 %v11650_v1, %v11526_v32 }
 0x4c7   :  { %v5541_v63 = vpack.c.bf16 %v5438_v51, %v5437_v35  ;;  %v9610_v50 = vpop.f32.mrb[40].mxu0  ;;  %v4561_v51 = vadd.f32 %v11650_v1, %v11533_v17 }
 0x4c8   :  { %v5095_v26 = vadd.f32 %v9610_v50, %v4554_v33  ;;  %v5086_v59 = vpop.f32.mrb[41].mxu0 }
 0x4c9   :  { %v5087_v16 = vadd.f32 %v5086_v59, %v4552_v38  ;;  %v9611_v19 = vpop.f32.mrb[42].mxu0  ;;  %9740 = vmatprep.mubr.msk.bf16.mxu1 %vm537_vm0, %v5541_v63 }
 0x4ca   :  { %v5098_v61 = vadd.f32 %v9611_v19, %v4555_v56  ;;  %v5089_v4 = vpop.f32.mrb[43].mxu0  ;;  %9741 = vmatmul.mubr.msk.bf16.gmra.mrb[60].mxu1 %vm537_vm0, %v5542_v44  ;;  %v5443_v3 = vmax.f32 %v5095_v26, 0.0  ;;  %v11712_v56 = vrot.slane %v11702_v30, %v10114_v14 }
 0x4cb   :  { %v5090_v60 = vadd.f32 %v5089_v4, %v4553_v24  ;;  %v5441_v13 = vmax.f32 %v5087_v16, 0.0 }
 0x4cc   :  { %v5444_v6 = vmax.f32 %v5098_v61, 0.0  ;;  %v4566_v1 = vadd.f32 %v11712_v56, %v11392_v28 }
 0x4cd   :  { %v5442_v15 = vmax.f32 %v5090_v60, 0.0  ;;  %v4564_v60 = vadd.f32 %v11712_v56, %v11402_v36 }
 0x4ce   :  { %v5544_v7 = vpack.c.bf16 %v5444_v6, %v5443_v3  ;;  %v4567_v6 = vadd.f32 %v11712_v56, %v11406_v54 }
 0x4cf   :  { %v5543_v23 = vpack.c.bf16 %v5442_v15, %v5441_v13  ;;  %v9614_v21 = vpop.f32.mrb[44].mxu0  ;;  %v4565_v13 = vadd.f32 %v11712_v56, %v11411_v40 }
 0x4d0   :  { %v5111_v37 = vadd.f32 %v9614_v21, %v4558_v29  ;;  %v5102_v20 = vpop.f32.mrb[45].mxu0 }
 0x4d1   :  { %v5103_v62 = vadd.f32 %v5102_v20, %v4556_v18  ;;  %v9615_v39 = vpop.f32.mrb[46].mxu0  ;;  %9744 = vmatprep.mubr.msk.bf16.mxu1 %vm537_vm0, %v5543_v23 }
 0x4d2   :  { %v5114_v11 = vadd.f32 %v9615_v39, %v4559_v5  ;;  %v5105_v41 = vpop.f32.mrb[47].mxu0  ;;  %9745 = vmatmul.mubr.msk.bf16.gmra.mrb[64].mxu1 %vm537_vm0, %v5544_v7  ;;  %v5447_v12 = vmax.f32 %v5111_v37, 0.0 }
 0x4d3   :  { %v5106_v58 = vadd.f32 %v5105_v41, %v4557_v0  ;;  %v5445_v47 = vmax.f32 %v5103_v62, 0.0  ;;  %v4570_v62 = vadd.f32 %v11712_v56, %v11434_v34  ;;  %v4568_v41 = vadd.f32 %v11712_v56, %v11440_v53 }
 0x4d4   :  { %v5448_v42 = vmax.f32 %v5114_v11, 0.0 }
 0x4d5   :  { %v5446_v8 = vmax.f32 %v5106_v58, 0.0 }
 0x4d6   :  { %v5546_v31 = vpack.c.bf16 %v5448_v42, %v5447_v12  ;;  %v4571_v12 = vadd.f32 %v11712_v56, %v11443_v2 }
 0x4d7   :  { %v5545_v33 = vpack.c.bf16 %v5446_v8, %v5445_v47  ;;  %v9618_v35 = vpop.f32.mrb[48].mxu0  ;;  %v4569_v47 = vadd.f32 %v11712_v56, %v11447_v25 }
 0x4d8   :  { %v5127_v38 = vadd.f32 %v9618_v35, %v4562_v45  ;;  %v5118_v44 = vpop.f32.mrb[49].mxu0 }
 0x4d9   :  { %v5119_v63 = vadd.f32 %v5118_v44, %v4560_v27  ;;  %v9619_v50 = vpop.f32.mrb[50].mxu0  ;;  %9748 = vmatprep.mubr.msk.bf16.mxu1 %vm537_vm0, %v5545_v33 }
 0x4da   :  { %v5130_v24 = vadd.f32 %v9619_v50, %v4563_v57  ;;  %v5121_v26 = vpop.f32.mrb[51].mxu0  ;;  %9749 = vmatmul.mubr.msk.bf16.gmra.mrb[68].mxu1 %vm537_vm0, %v5546_v31  ;;  %v5451_v16 = vmax.f32 %v5127_v38, 0.0 }
 0x4db   :  { %v5122_v59 = vadd.f32 %v5121_v26, %v4561_v51  ;;  %v5449_v61 = vmax.f32 %v5119_v63, 0.0  ;;  %v4574_v63 = vadd.f32 %v11712_v56, %v11472_v55  ;;  %v4572_v26 = vadd.f32 %v11712_v56, %v11478_v48 }
 0x4dc   :  { %v5452_v19 = vmax.f32 %v5130_v24, 0.0 }
 0x4dd   :  { %v5450_v4 = vmax.f32 %v5122_v59, 0.0 }
 0x4de   :  { %v5548_v3 = vpack.c.bf16 %v5452_v19, %v5451_v16  ;;  %v4575_v16 = vadd.f32 %v11712_v56, %v11482_v49 }
 0x4df   :  { %v5547_v29 = vpack.c.bf16 %v5450_v4, %v5449_v61  ;;  %v9622_v9 = vpop.f32.mrb[52].mxu0  ;;  %v4573_v61 = vadd.f32 %v11712_v56, %v11487_v52 }
 0x4e0   :  { %v5143_v15 = vadd.f32 %v9622_v9, %v4566_v1  ;;  %v5134_v18 = vpop.f32.mrb[53].mxu0 }
 0x4e1   :  { %v5135_v7 = vadd.f32 %v5134_v18, %v4564_v60  ;;  %v9623_v5 = vpop.f32.mrb[54].mxu0  ;;  %9752 = vmatprep.mubr.msk.bf16.mxu1 %vm537_vm0, %v5547_v29 }
 0x4e2   :  { %v5146_v23 = vadd.f32 %v9623_v5, %v4567_v6  ;;  %v5137_v21 = vpop.f32.mrb[55].mxu0  ;;  %9753 = vmatmul.mubr.msk.bf16.gmra.mrb[72].mxu1 %vm537_vm0, %v5548_v3  ;;  %v5455_v37 = vmax.f32 %v5143_v15, 0.0  ;;  %v4427_v3 = vcombine.high %v11694_v43, %v11694_v43  ;;  %v4578_v5 = vadd.f32 %v11712_v56, %v11509_v22 }
 0x4e3   :  { %v5138_v0 = vadd.f32 %v5137_v21, %v4565_v13  ;;  %v5453_v39 = vmax.f32 %v5135_v7, 0.0  ;;  %v4576_v43 = vadd.f32 %v11712_v56, %v11521_v46 }
 0x4e4   :  { %v5456_v20 = vmax.f32 %v5146_v23, 0.0  ;;  %v11751_v23 = vrot.slane %v4427_v3, %v10100_v10 }
 0x4e5   :  { %v5454_v11 = vmax.f32 %v5138_v0, 0.0 }
 0x4e6   :  { %v5550_v58 = vpack.c.bf16 %v5456_v20, %v5455_v37  ;;  %v4579_v20 = vadd.f32 %v11712_v56, %v11526_v32  ;;  %v11761_v10 = vrot.slane %v11751_v23, %v10114_v14 }
 0x4e7   :  { %v5549_v42 = vpack.c.bf16 %v5454_v11, %v5453_v39  ;;  %v9626_v45 = vpop.f32.mrb[56].mxu0  ;;  %v4577_v11 = vadd.f32 %v11712_v56, %v11533_v17 }
 0x4e8   :  { %v5159_v8 = vadd.f32 %v9626_v45, %v4570_v62  ;;  %v5150_v27 = vpop.f32.mrb[57].mxu0  ;;  %v4582_v56 = vadd.f32 %v11761_v10, %v11392_v28  ;;  %v4586_v3 = vadd.f32 %v11761_v10, %v11434_v34 }
 0x4e9   :  { %v5151_v31 = vadd.f32 %v5150_v27, %v4568_v41  ;;  %v9627_v57 = vpop.f32.mrb[58].mxu0  ;;  %9756 = vmatprep.mubr.msk.bf16.mxu1 %vm537_vm0, %v5549_v42 }
 0x4ea   :  { %v5162_v33 = vadd.f32 %v9627_v57, %v4571_v12  ;;  %v5153_v35 = vpop.f32.mrb[59].mxu0  ;;  %9757 = vmatmul.mubr.msk.bf16.gmra.mrb[76].mxu1 %vm537_vm0, %v5550_v58  ;;  %v5459_v38 = vmax.f32 %v5159_v8, 0.0 }
 0x4eb   :  { %v5154_v51 = vadd.f32 %v5153_v35, %v4569_v47  ;;  %v5457_v50 = vmax.f32 %v5151_v31, 0.0  ;;  %v4580_v35 = vadd.f32 %v11761_v10, %v11402_v36 }
 0x4ec   :  { %v5460_v44 = vmax.f32 %v5162_v33, 0.0 }
 0x4ed   :  { %v5458_v24 = vmax.f32 %v5154_v51, 0.0 }
 0x4ee   :  { %v5552_v59 = vpack.c.bf16 %v5460_v44, %v5459_v38  ;;  %v4583_v38 = vadd.f32 %v11761_v10, %v11406_v54 }
 0x4ef   :  { %v5551_v19 = vpack.c.bf16 %v5458_v24, %v5457_v50  ;;  %v9630_v1 = vpop.f32.mrb[60].mxu0  ;;  %v4581_v50 = vadd.f32 %v11761_v10, %v11411_v40 }
 0x4f0   :  { %v5175_v4 = vadd.f32 %v9630_v1, %v4574_v63  ;;  %v5166_v60 = vpop.f32.mrb[61].mxu0 }
 0x4f1   :  { %v5167_v6 = vadd.f32 %v5166_v60, %v4572_v26  ;;  %v9631_v29 = vpop.f32.mrb[62].mxu0  ;;  %9760 = vmatprep.mubr.msk.bf16.mxu1 %vm537_vm0, %v5551_v19 }
 0x4f2   :  { %v5178_v9 = vadd.f32 %v9631_v29, %v4575_v16  ;;  %v5169_v13 = vpop.f32.mrb[63].mxu0  ;;  %9761 = vmatmul.mubr.msk.bf16.gmra.mrb[80].mxu1 %vm537_vm0, %v5552_v59  ;;  %v5463_v18 = vmax.f32 %v5175_v4, 0.0 }
 0x4f3   :  { %v5170_v15 = vadd.f32 %v5169_v13, %v4573_v61  ;;  %v5461_v21 = vmax.f32 %v5167_v6, 0.0 }
 0x4f4   :  { %v5464_v7 = vmax.f32 %v5178_v9, 0.0  ;;  %v4584_v9 = vadd.f32 %v11761_v10, %v11440_v53 }
 0x4f5   :  { %v5462_v0 = vmax.f32 %v5170_v15, 0.0  ;;  %v4587_v15 = vadd.f32 %v11761_v10, %v11443_v2 }
 0x4f6   :  { %v5554_v37 = vpack.c.bf16 %v5464_v7, %v5463_v18 }
 0x4f7   :  { %v5553_v62 = vpack.c.bf16 %v5462_v0, %v5461_v21  ;;  %v9634_v39 = vpop.f32.mrb[64].mxu0 }
 0x4f8   :  { %v5191_v41 = vadd.f32 %v9634_v39, %v4578_v5  ;;  %v5182_v58 = vpop.f32.mrb[65].mxu0  ;;  %v4585_v5 = vadd.f32 %v11761_v10, %v11447_v25 }
 0x4f9   :  { %v5183_v12 = vadd.f32 %v5182_v58, %v4576_v43  ;;  %v9635_v42 = vpop.f32.mrb[66].mxu0  ;;  %9764 = vmatprep.mubr.msk.bf16.mxu1 %vm537_vm0, %v5553_v62  ;;  %v4590_v58 = vadd.f32 %v11761_v10, %v11472_v55 }
 0x4fa   :  { %v5194_v45 = vadd.f32 %v9635_v42, %v4579_v20  ;;  %v5185_v47 = vpop.f32.mrb[67].mxu0  ;;  %9765 = vmatmul.mubr.msk.bf16.gmra.mrb[84].mxu1 %vm537_vm0, %v5554_v37  ;;  %v5467_v27 = vmax.f32 %v5191_v41, 0.0 }
 0x4fb   :  { %v5186_v8 = vadd.f32 %v5185_v47, %v4577_v11  ;;  %v5465_v57 = vmax.f32 %v5183_v12, 0.0 }
 0x4fc   :  { %v5468_v31 = vmax.f32 %v5194_v45, 0.0  ;;  %v4588_v45 = vadd.f32 %v11761_v10, %v11478_v48 }
 0x4fd   :  { %v5466_v33 = vmax.f32 %v5186_v8, 0.0  ;;  %v4591_v8 = vadd.f32 %v11761_v10, %v11482_v49 }
 0x4fe   :  { %v5556_v51 = vpack.c.bf16 %v5468_v31, %v5467_v27 }
 0x4ff   :  { %v5555_v44 = vpack.c.bf16 %v5466_v33, %v5465_v57  ;;  %v9638_v63 = vpop.f32.mrb[68].mxu0 }
 0x500   :  { %v5207_v24 = vadd.f32 %v9638_v63, %v4582_v56  ;;  %v5198_v26 = vpop.f32.mrb[69].mxu0  ;;  %v4589_v56 = vadd.f32 %v11761_v10, %v11487_v52 }
 0x501   :  { %v5199_v59 = vadd.f32 %v5198_v26, %v4580_v35  ;;  %v9639_v16 = vpop.f32.mrb[70].mxu0  ;;  %9768 = vmatprep.mubr.msk.bf16.mxu1 %vm537_vm0, %v5555_v44  ;;  %v4594_v26 = vadd.f32 %v11761_v10, %v11509_v22 }
 0x502   :  { %v5210_v19 = vadd.f32 %v9639_v16, %v4583_v38  ;;  %v5201_v1 = vpop.f32.mrb[71].mxu0  ;;  %9769 = vmatmul.mubr.msk.bf16.gmra.mrb[88].mxu1 %vm537_vm0, %v5556_v51  ;;  %v5471_v4 = vmax.f32 %v5207_v24, 0.0 }
 0x503   :  { %v5202_v61 = vadd.f32 %v5201_v1, %v4581_v50  ;;  %v5469_v6 = vmax.f32 %v5199_v59, 0.0  ;;  %v4457_v59 = vcombine.high %v11702_v30, %v11702_v30  ;;  %v4592_v1 = vadd.f32 %v11761_v10, %v11521_v46 }
 0x504   :  { %v5472_v60 = vmax.f32 %v5210_v19, 0.0 }
 0x505   :  { %v5470_v29 = vmax.f32 %v5202_v61, 0.0 }
 0x506   :  { %v5558_v13 = vpack.c.bf16 %v5472_v60, %v5471_v4  ;;  %v4595_v4 = vadd.f32 %v11761_v10, %v11526_v32 }
 0x507   :  { %v5557_v18 = vpack.c.bf16 %v5470_v29, %v5469_v6  ;;  %v9642_v7 = vpop.f32.mrb[72].mxu0  ;;  %v4593_v6 = vadd.f32 %v11761_v10, %v11533_v17 }
 0x508   :  { %v5223_v21 = vadd.f32 %v9642_v7, %v4586_v3  ;;  %v5214_v0 = vpop.f32.mrb[73].mxu0 }
 0x509   :  { %v5215_v43 = vadd.f32 %v5214_v0, %v4584_v9  ;;  %v9643_v37 = vpop.f32.mrb[74].mxu0  ;;  %9772 = vmatprep.mubr.msk.bf16.mxu1 %vm537_vm0, %v5557_v18 }
 0x50a   :  { %v5226_v20 = vadd.f32 %v9643_v37, %v4587_v15  ;;  %v5217_v62 = vpop.f32.mrb[75].mxu0  ;;  %9773 = vmatmul.mubr.msk.bf16.gmra.mrb[92].mxu1 %vm537_vm0, %v5558_v13  ;;  %v5475_v11 = vmax.f32 %v5223_v21, 0.0  ;;  %v11806_v13 = vrot.slane %v4457_v59, %v10114_v14 }
 0x50b   :  { %v5218_v39 = vadd.f32 %v5217_v62, %v4585_v5  ;;  %v5473_v12 = vmax.f32 %v5215_v43, 0.0 }
 0x50c   :  { %v5476_v41 = vmax.f32 %v5226_v20, 0.0  ;;  %v4598_v43 = vadd.f32 %v11806_v13, %v11392_v28  ;;  %v4596_v20 = vadd.f32 %v11806_v13, %v11402_v36 }
 0x50d   :  { %v5474_v42 = vmax.f32 %v5218_v39, 0.0  ;;  %v4599_v39 = vadd.f32 %v11806_v13, %v11406_v54 }
 0x50e   :  { %v5560_v47 = vpack.c.bf16 %v5476_v41, %v5475_v11 }
 0x50f   :  { %v5559_v27 = vpack.c.bf16 %v5474_v42, %v5473_v12  ;;  %v9646_v31 = vpop.f32.mrb[76].mxu0 }
 0x510   :  { %v5239_v57 = vadd.f32 %v9646_v31, %v4590_v58  ;;  %v5230_v33 = vpop.f32.mrb[77].mxu0  ;;  %v4597_v58 = vadd.f32 %v11806_v13, %v11411_v40 }
 0x511   :  { %v5231_v35 = vadd.f32 %v5230_v33, %v4588_v45  ;;  %v9647_v51 = vpop.f32.mrb[78].mxu0  ;;  %9776 = vmatprep.mubr.msk.bf16.mxu1 %vm537_vm0, %v5559_v27  ;;  %v4602_v33 = vadd.f32 %v11806_v13, %v11434_v34 }
 0x512   :  { %v5242_v38 = vadd.f32 %v9647_v51, %v4591_v8  ;;  %v5233_v44 = vpop.f32.mrb[79].mxu0  ;;  %9777 = vmatmul.mubr.msk.bf16.gmra.mrb[96].mxu1 %vm537_vm0, %v5560_v47  ;;  %v5479_v50 = vmax.f32 %v5239_v57, 0.0 }
 0x513   :  { %v5234_v63 = vadd.f32 %v5233_v44, %v4589_v56  ;;  %v5477_v16 = vmax.f32 %v5231_v35, 0.0 }
 0x514   :  { %v5480_v24 = vmax.f32 %v5242_v38, 0.0  ;;  %v4600_v38 = vadd.f32 %v11806_v13, %v11440_v53 }
 0x515   :  { %v5478_v19 = vmax.f32 %v5234_v63, 0.0  ;;  %v4603_v63 = vadd.f32 %v11806_v13, %v11443_v2 }
 0x516   :  { %v5562_v61 = vpack.c.bf16 %v5480_v24, %v5479_v50 }
 0x517   :  { %v5561_v60 = vpack.c.bf16 %v5478_v19, %v5477_v16  ;;  %v9650_v3 = vpop.f32.mrb[80].mxu0 }
 0x518   :  { %v5255_v29 = vadd.f32 %v9650_v3, %v4594_v26  ;;  %v5246_v9 = vpop.f32.mrb[81].mxu0  ;;  %v4601_v26 = vadd.f32 %v11806_v13, %v11447_v25 }
 0x519   :  { %v5247_v30 = vadd.f32 %v5246_v9, %v4592_v1  ;;  %v9651_v15 = vpop.f32.mrb[82].mxu0  ;;  %9780 = vmatprep.mubr.msk.bf16.mxu1 %vm537_vm0, %v5561_v60 }
 0x51a   :  { %v5258_v18 = vadd.f32 %v9651_v15, %v4595_v4  ;;  %v5249_v7 = vpop.f32.mrb[83].mxu0  ;;  %9781 = vmatmul.mubr.msk.bf16.gmra.mrb[100].mxu1 %vm537_vm0, %v5562_v61  ;;  %v5483_v21 = vmax.f32 %v5255_v29, 0.0  ;;  %v4606_v29 = vadd.f32 %v11806_v13, %v11472_v55  ;;  %v4604_v15 = vadd.f32 %v11806_v13, %v11478_v48 }
 0x51b   :  { %v5250_v5 = vadd.f32 %v5249_v7, %v4593_v6  ;;  %v5481_v10 = vmax.f32 %v5247_v30, 0.0  ;;  %v4607_v7 = vadd.f32 %v11806_v13, %v11482_v49 }
 0x51c   :  { %v5484_v0 = vmax.f32 %v5258_v18, 0.0 }
 0x51d   :  { %v5482_v37 = vmax.f32 %v5250_v5, 0.0 }
 0x51e   :  { %v5564_v62 = vpack.c.bf16 %v5484_v0, %v5483_v21  ;;  %v4605_v0 = vadd.f32 %v11806_v13, %v11487_v52 }
 0x51f   :  { %v5563_v11 = vpack.c.bf16 %v5482_v37, %v5481_v10  ;;  %v9654_v41 = vpop.f32.mrb[84].mxu0 }
 0x520   :  { %v5271_v12 = vadd.f32 %v9654_v41, %v4598_v43  ;;  %v5262_v42 = vpop.f32.mrb[85].mxu0 }
 0x521   :  { %v5263_v45 = vadd.f32 %v5262_v42, %v4596_v20  ;;  %v9655_v47 = vpop.f32.mrb[86].mxu0  ;;  %9784 = vmatprep.mubr.msk.bf16.mxu1 %vm537_vm0, %v5563_v11  ;;  %v4459_v42 = vcombine.high %v11751_v23, %v11751_v23 }
 0x522   :  { %v5274_v8 = vadd.f32 %v9655_v47, %v4599_v39  ;;  %v5265_v27 = vpop.f32.mrb[87].mxu0  ;;  %9785 = vmatmul.mubr.msk.bf16.gmra.mrb[104].mxu1 %vm537_vm0, %v5564_v62  ;;  %v5487_v56 = vmax.f32 %v5271_v12, 0.0  ;;  %v4610_v12 = vadd.f32 %v11806_v13, %v11509_v22 }
 0x523   :  { %v5266_v31 = vadd.f32 %v5265_v27, %v4597_v58  ;;  %v5485_v35 = vmax.f32 %v5263_v45, 0.0 }
 0x524   :  { %v5488_v57 = vmax.f32 %v5274_v8, 0.0  ;;  %v4608_v8 = vadd.f32 %v11806_v13, %v11521_v46 }
 0x525   :  { %v5486_v51 = vmax.f32 %v5266_v31, 0.0  ;;  %v4611_v31 = vadd.f32 %v11806_v13, %v11526_v32 }
 0x526   :  { %v5566_v44 = vpack.c.bf16 %v5488_v57, %v5487_v56 }
 0x527   :  { %v5565_v50 = vpack.c.bf16 %v5486_v51, %v5485_v35  ;;  %v9658_v24 = vpop.f32.mrb[88].mxu0 }
 0x528   :  { %v5287_v59 = vadd.f32 %v9658_v24, %v4602_v33  ;;  %v5278_v16 = vpop.f32.mrb[89].mxu0  ;;  %v4609_v33 = vadd.f32 %v11806_v13, %v11533_v17  ;;  %v11858_v24 = vld [vmem:[%s12462_s5 + $0x6] ss:$0 sm:$0xff] }
 0x529   :  { %v5279_v19 = vadd.f32 %v5278_v16, %v4600_v38  ;;  %v9659_v1 = vpop.f32.mrb[90].mxu0  ;;  %9788 = vmatprep.mubr.msk.bf16.mxu1 %vm537_vm0, %v5565_v50  ;;  %v11851_v38 = vrot.slane %v4459_v42, %v10114_v14 }
 0x52a   :  { %v5290_v61 = vadd.f32 %v9659_v1, %v4603_v63  ;;  %v5281_v4 = vpop.f32.mrb[91].mxu0  ;;  %9789 = vmatmul.mubr.msk.bf16.gmra.mrb[108].mxu1 %vm537_vm0, %v5566_v44  ;;  %v5491_v3 = vmax.f32 %v5287_v59, 0.0 }
 0x52b   :  { %v5282_v60 = vadd.f32 %v5281_v4, %v4601_v26  ;;  %v5489_v9 = vmax.f32 %v5279_v19, 0.0  ;;  %v4614_v14 = vadd.f32 %v11851_v38, %v11392_v28  ;;  %v4613_v28 = vadd.f32 %v11851_v38, %v11411_v40 }
 0x52c   :  { %v5492_v6 = vmax.f32 %v5290_v61, 0.0  ;;  %v4612_v61 = vadd.f32 %v11851_v38, %v11402_v36 }
 0x52d   :  { %v5490_v30 = vmax.f32 %v5282_v60, 0.0 }
 0x52e   :  { %v5568_v18 = vpack.c.bf16 %v5492_v6, %v5491_v3  ;;  %v4615_v6 = vadd.f32 %v11851_v38, %v11406_v54 }
 0x52f   :  { %v5567_v5 = vpack.c.bf16 %v5490_v30, %v5489_v9  ;;  %v9662_v21 = vpop.f32.mrb[92].mxu0 }
 0x530   :  { %v5303_v43 = vadd.f32 %v9662_v21, %v4606_v29  ;;  %v5294_v10 = vpop.f32.mrb[93].mxu0 }
 0x531   :  { %v5295_v37 = vadd.f32 %v5294_v10, %v4604_v15  ;;  %v9663_v20 = vpop.f32.mrb[94].mxu0  ;;  %9792 = vmatprep.mubr.msk.bf16.mxu1 %vm537_vm0, %v5567_v5 }
 0x532   :  { %v5306_v62 = vadd.f32 %v9663_v20, %v4607_v7  ;;  %v5297_v39 = vpop.f32.mrb[95].mxu0  ;;  %9793 = vmatmul.mubr.msk.bf16.gmra.mrb[112].mxu1 %vm537_vm0, %v5568_v18  ;;  %v5495_v41 = vmax.f32 %v5303_v43, 0.0 }
 0x533   :  { %v5298_v11 = vadd.f32 %v5297_v39, %v4605_v0  ;;  %v5493_v45 = vmax.f32 %v5295_v37, 0.0 }
 0x534   :  { %v5496_v58 = vmax.f32 %v5306_v62, 0.0 }
 0x535   :  { %v5494_v47 = vmax.f32 %v5298_v11, 0.0 }
 0x536   :  { %v5570_v27 = vpack.c.bf16 %v5496_v58, %v5495_v41 }
 0x537   :  { %v5569_v56 = vpack.c.bf16 %v5494_v47, %v5493_v45  ;;  %v9666_v57 = vpop.f32.mrb[96].mxu0 }
 0x538   :  { %v5319_v35 = vadd.f32 %v9666_v57, %v4610_v12  ;;  %v5310_v51 = vpop.f32.mrb[97].mxu0  ;;  %v4618_v12 = vadd.f32 %v11851_v38, %v11434_v34  ;;  %v4617_v34 = vadd.f32 %v11851_v38, %v11447_v25 }
 0x539   :  { %v5311_v23 = vadd.f32 %v5310_v51, %v4608_v8  ;;  %v9667_v44 = vpop.f32.mrb[98].mxu0  ;;  %9796 = vmatprep.mubr.msk.bf16.mxu1 %vm537_vm0, %v5569_v56 }
 0x53a   :  { %v5322_v63 = vadd.f32 %v9667_v44, %v4611_v31  ;;  %v5313_v50 = vpop.f32.mrb[99].mxu0  ;;  %9797 = vmatmul.mubr.msk.bf16.gmra.mrb[116].mxu1 %vm537_vm0, %v5570_v27  ;;  %v5499_v13 = vmax.f32 %v5319_v35, 0.0  ;;  %v4616_v27 = vadd.f32 %v11851_v38, %v11440_v53 }
 0x53b   :  { %v5314_v26 = vadd.f32 %v5313_v50, %v4609_v33  ;;  %v5497_v16 = vmax.f32 %v5311_v23, 0.0  ;;  %v4619_v33 = vadd.f32 %v11851_v38, %v11443_v2 }
 0x53c   :  { %v5500_v59 = vmax.f32 %v5322_v63, 0.0 }
 0x53d   :  { %v5498_v19 = vmax.f32 %v5314_v26, 0.0  ;;  %v9694_v1 = vpop.f32.mrb[12].mxu1 }
 0x53e   :  { %v5572_v4 = vpack.c.bf16 %v5500_v59, %v5499_v13  ;;  %v5857_v60 = vadd.f32 %v9694_v1, %v11858_v24  ;;  %v5848_v3 = vpop.f32.mrb[13].mxu1 }
 0x53f   :  { %v5571_v29 = vpack.c.bf16 %v5498_v19, %v5497_v16  ;;  %v5849_v9 = vadd.f32 %v11858_v24, %v5848_v3  ;;  %v9670_v30 = vpop.f32.mrb[100].mxu0  ;;  %v9695_v15 = vpop.f32.mrb[14].mxu1 }
 0x540   :  { %v5335_v18 = vadd.f32 %v9670_v30, %v4614_v14  ;;  %v5860_v7 = vadd.f32 %v9695_v15, %v11858_v24  ;;  %v5326_v5 = vpop.f32.mrb[101].mxu0  ;;  %v5851_v36 = vpop.f32.mrb[15].mxu1  ;;  %v6361_v54 = vmax.f32 %v5857_v60, 0.0 }
 0x541   :  { %v5327_v21 = vadd.f32 %v5326_v5, %v4612_v61  ;;  %v5852_v0 = vadd.f32 %v11858_v24, %v5851_v36  ;;  %v9671_v43 = vpop.f32.mrb[102].mxu0  ;;  %9800 = vmatprep.mubr.msk.bf16.mxu1 %vm537_vm0, %v5571_v29  ;;  %v6359_v62 = vmax.f32 %v5849_v9, 0.0  ;;  %v4622_v29 = vadd.f32 %v11851_v38, %v11472_v55 }
 0x542   :  { %v6362_v10 = vmax.f32 %v5860_v7, 0.0  ;;  %v5338_v37 = vadd.f32 %v9671_v43, %v4615_v6  ;;  %v5329_v20 = vpop.f32.mrb[103].mxu0  ;;  %9801 = vmatmul.mubr.msk.bf16.gmra.mrb[120].mxu1 %vm537_vm0, %v5572_v4  ;;  %v5503_v11 = vmax.f32 %v5335_v18, 0.0  ;;  %v4620_v18 = vadd.f32 %v11851_v38, %v11478_v48 }
 0x543   :  { %v6360_v39 = vmax.f32 %v5852_v0, 0.0  ;;  %v5330_v40 = vadd.f32 %v5329_v20, %v4613_v28  ;;  %v5501_v42 = vmax.f32 %v5327_v21, 0.0  ;;  %v4623_v21 = vadd.f32 %v11851_v38, %v11482_v49 }
 0x544   :  { %v6488_v41 = vpack.c.bf16 %v6362_v10, %v6361_v54  ;;  %v5504_v58 = vmax.f32 %v5338_v37, 0.0  ;;  %v4621_v55 = vadd.f32 %v11851_v38, %v11487_v52 }
 0x545   :  { %v6487_v45 = vpack.c.bf16 %v6360_v39, %v6359_v62  ;;  %v5502_v47 = vmax.f32 %v5330_v40, 0.0  ;;  %v9698_v8 = vpop.f32.mrb[16].mxu1 }
 0x546   :  { %v5574_v31 = vpack.c.bf16 %v5504_v58, %v5503_v11  ;;  %v5873_v56 = vadd.f32 %v9698_v8, %v11858_v24  ;;  %v5864_v57 = vpop.f32.mrb[17].mxu1 }
 0x547   :  { %v5573_v35 = vpack.c.bf16 %v5502_v47, %v5501_v42  ;;  %v5865_v51 = vadd.f32 %v11858_v24, %v5864_v57  ;;  %v9674_v23 = vpop.f32.mrb[104].mxu0  ;;  %v9699_v44 = vpop.f32.mrb[18].mxu1  ;;  %9828 = vmatprep.mubr.msk.bf16.mxu0 %vm537_vm0, %v6487_v45 }
 0x548   :  { %v5351_v63 = vadd.f32 %v9674_v23, %v4618_v12  ;;  %v5876_v53 = vadd.f32 %v9699_v44, %v11858_v24  ;;  %v5342_v50 = vpop.f32.mrb[105].mxu0  ;;  %v5867_v26 = vpop.f32.mrb[19].mxu1  ;;  %9829 = vmatmul.mubr.msk.bf16.vlgmr.msra.gmra.mrb[116].mxu0 %vm537_vm0, %v6488_v41  ;;  %v6365_v14 = vmax.f32 %v5873_v56, 0.0 }
 0x549   :  { %v5343_v13 = vadd.f32 %v5342_v50, %v4616_v27  ;;  %v5868_v2 = vadd.f32 %v11858_v24, %v5867_v26  ;;  %v9675_v59 = vpop.f32.mrb[106].mxu0  ;;  %9804 = vmatprep.mubr.msk.bf16.mxu1 %vm537_vm0, %v5573_v35  ;;  %v6363_v25 = vmax.f32 %v5865_v51, 0.0  ;;  %v4624_v51 = vadd.f32 %v11851_v38, %v11521_v46 }
 0x54a   :  { %v6366_v16 = vmax.f32 %v5876_v53, 0.0  ;;  %v5354_v19 = vadd.f32 %v9675_v59, %v4619_v33  ;;  %v5345_v1 = vpop.f32.mrb[107].mxu0  ;;  %9805 = vmatmul.mubr.msk.bf16.gmra.mrb[124].mxu1 %vm537_vm0, %v5574_v31  ;;  %v5507_v60 = vmax.f32 %v5351_v63, 0.0  ;;  %v4626_v31 = vadd.f32 %v11851_v38, %v11509_v22 }
 0x54b   :  { %v6364_v61 = vmax.f32 %v5868_v2, 0.0  ;;  %v5346_v4 = vadd.f32 %v5345_v1, %v4617_v34  ;;  %v5505_v9 = vmax.f32 %v5343_v13, 0.0  ;;  %v4627_v63 = vadd.f32 %v11851_v38, %v11526_v32 }
 0x54c   :  { %v6490_v3 = vpack.c.bf16 %v6366_v16, %v6365_v14  ;;  %v5508_v6 = vmax.f32 %v5354_v19, 0.0  ;;  %v4625_v22 = vadd.f32 %v11851_v38, %v11533_v17 }
 0x54d   :  { %v6489_v30 = vpack.c.bf16 %v6364_v61, %v6363_v25  ;;  %v5506_v15 = vmax.f32 %v5346_v4, 0.0  ;;  %v9702_v28 = vpop.f32.mrb[20].mxu1 }
 0x54e   :  { %v5576_v7 = vpack.c.bf16 %v5508_v6, %v5507_v60  ;;  %v5889_v5 = vadd.f32 %v9702_v28, %v11858_v24  ;;  %v5880_v36 = vpop.f32.mrb[21].mxu1 }
 0x54f   :  { %v5575_v0 = vpack.c.bf16 %v5506_v15, %v5505_v9  ;;  %v5881_v43 = vadd.f32 %v11858_v24, %v5880_v36  ;;  %v9678_v54 = vpop.f32.mrb[108].mxu0  ;;  %v9703_v10 = vpop.f32.mrb[22].mxu1  ;;  %9832 = vmatprep.mubr.msk.bf16.mxu0 %vm537_vm0, %v6489_v30 }
 0x550   :  { %v5367_v37 = vadd.f32 %v9678_v54, %v4622_v29  ;;  %v5892_v48 = vadd.f32 %v9703_v10, %v11858_v24  ;;  %v5358_v20 = vpop.f32.mrb[109].mxu0  ;;  %v5883_v62 = vpop.f32.mrb[23].mxu1  ;;  %9833 = vmatmul.mubr.msk.bf16.gmra.mrb[120].mxu0 %vm537_vm0, %v6490_v3  ;;  %v6369_v11 = vmax.f32 %v5889_v5, 0.0 }
 0x551   :  { %v5359_v39 = vadd.f32 %v5358_v20, %v4620_v18  ;;  %v5884_v49 = vadd.f32 %v11858_v24, %v5883_v62  ;;  %v9679_v40 = vpop.f32.mrb[110].mxu0  ;;  %9808 = vmatprep.mubr.msk.bf16.mxu1 %vm537_vm0, %v5575_v0  ;;  %v6367_v52 = vmax.f32 %v5881_v43, 0.0 }
 0x552   :  { %v6370_v41 = vmax.f32 %v5892_v48, 0.0  ;;  %v5370_v58 = vadd.f32 %v9679_v40, %v4623_v21  ;;  %v5361_v12 = vpop.f32.mrb[111].mxu0  ;;  %9809 = vmatmul.mubr.msk.bf16.gmra.mrb[128].mxu1 %vm537_vm0, %v5576_v7  ;;  %v5511_v47 = vmax.f32 %v5367_v37, 0.0 }
 0x553   :  { %v6368_v42 = vmax.f32 %v5884_v49, 0.0  ;;  %v5362_v45 = vadd.f32 %v5361_v12, %v4621_v55  ;;  %v5509_v56 = vmax.f32 %v5359_v39, 0.0 }
 0x554   :  { %v6492_v8 = vpack.c.bf16 %v6370_v41, %v6369_v11  ;;  %v5512_v27 = vmax.f32 %v5370_v58, 0.0 }
 0x555   :  { %v6491_v57 = vpack.c.bf16 %v6368_v42, %v6367_v52  ;;  %v5510_v33 = vmax.f32 %v5362_v45, 0.0  ;;  %v9706_v35 = vpop.f32.mrb[24].mxu1 }
 0x556   :  { %v5578_v23 = vpack.c.bf16 %v5512_v27, %v5511_v47  ;;  %v5905_v44 = vadd.f32 %v9706_v35, %v11858_v24  ;;  %v5896_v34 = vpop.f32.mrb[25].mxu1 }
 0x557   :  { %v5577_v53 = vpack.c.bf16 %v5510_v33, %v5509_v56  ;;  %v5897_v50 = vadd.f32 %v11858_v24, %v5896_v34  ;;  %v9682_v26 = vpop.f32.mrb[112].mxu0  ;;  %v9707_v13 = vpop.f32.mrb[26].mxu1  ;;  %9836 = vmatprep.mubr.msk.bf16.mxu0 %vm537_vm0, %v6491_v57 }
 0x558   :  { %v5383_v2 = vadd.f32 %v9682_v26, %v4626_v31  ;;  %v5908_v46 = vadd.f32 %v9707_v13, %v11858_v24  ;;  %v5374_v59 = vpop.f32.mrb[113].mxu0  ;;  %v5899_v14 = vpop.f32.mrb[27].mxu1  ;;  %9837 = vmatmul.mubr.msk.bf16.gmra.mrb[124].mxu0 %vm537_vm0, %v6492_v8  ;;  %v6373_v1 = vmax.f32 %v5905_v44, 0.0 }
 0x559   :  { %v5375_v16 = vadd.f32 %v5374_v59, %v4624_v51  ;;  %v5900_v32 = vadd.f32 %v11858_v24, %v5899_v14  ;;  %v9683_v19 = vpop.f32.mrb[114].mxu0  ;;  %9812 = vmatprep.mubr.msk.bf16.mxu1 %vm537_vm0, %v5577_v53  ;;  %v6371_v17 = vmax.f32 %v5897_v50, 0.0 }
 0x55a   :  { %v6374_v25 = vmax.f32 %v5908_v46, 0.0  ;;  %v5386_v61 = vadd.f32 %v9683_v19, %v4627_v63  ;;  %v5377_v4 = vpop.f32.mrb[115].mxu0  ;;  %9813 = vmatmul.mubr.msk.bf16.gmra.mrb[132].mxu1 %vm537_vm0, %v5578_v23  ;;  %v5515_v3 = vmax.f32 %v5383_v2, 0.0 }
 0x55b   :  { %v6372_v38 = vmax.f32 %v5900_v32, 0.0  ;;  %v5378_v60 = vadd.f32 %v5377_v4, %v4625_v22  ;;  %v5513_v9 = vmax.f32 %v5375_v16, 0.0 }
 0x55c   :  { %v6494_v6 = vpack.c.bf16 %v6374_v25, %v6373_v1  ;;  %v5516_v29 = vmax.f32 %v5386_v61, 0.0 }
 0x55d   :  { %v6493_v30 = vpack.c.bf16 %v6372_v38, %v6371_v17  ;;  %v5514_v15 = vmax.f32 %v5378_v60, 0.0  ;;  %v9710_v28 = vpop.f32.mrb[28].mxu1 }
 0x55e   :  { %v5580_v18 = vpack.c.bf16 %v5516_v29, %v5515_v3  ;;  %v5921_v7 = vadd.f32 %v9710_v28, %v11858_v24  ;;  %v5912_v5 = vpop.f32.mrb[29].mxu1 }
 0x55f   :  { %v5579_v36 = vpack.c.bf16 %v5514_v15, %v5513_v9  ;;  %v5913_v21 = vadd.f32 %v11858_v24, %v5912_v5  ;;  %v9711_v0 = vpop.f32.mrb[30].mxu1  ;;  %9840 = vmatprep.mubr.msk.bf16.mxu0 %vm537_vm0, %v6493_v30 }
 0x560   :  { %v5924_v43 = vadd.f32 %v9711_v0, %v11858_v24  ;;  %v5915_v54 = vpop.f32.mrb[31].mxu1  ;;  %9841 = vmatmul.mubr.msk.bf16.gmra.mrb[128].mxu0 %vm537_vm0, %v6494_v6  ;;  %v6377_v55 = vmax.f32 %v5921_v7, 0.0 }
 0x561   :  { %v5916_v10 = vadd.f32 %v11858_v24, %v5915_v54  ;;  %9816 = vmatprep.mubr.msk.bf16.mxu1 %vm537_vm0, %v5579_v36  ;;  %v6375_v48 = vmax.f32 %v5913_v21, 0.0 }
 0x562   :  { %v6378_v37 = vmax.f32 %v5924_v43, 0.0  ;;  %9817 = vmatmul.mubr.msk.bf16.gmra.mrb[136].mxu1 %vm537_vm0, %v5580_v18 }
 0x563   :  { %v6376_v20 = vmax.f32 %v5916_v10, 0.0 }
 0x564   :  { %v6496_v62 = vpack.c.bf16 %v6378_v37, %v6377_v55 }
 0x565   :  { %v6495_v39 = vpack.c.bf16 %v6376_v20, %v6375_v48  ;;  %v9714_v49 = vpop.f32.mrb[32].mxu1 }
 0x566   :  { %v5937_v40 = vadd.f32 %v9714_v49, %v11858_v24  ;;  %v5928_v11 = vpop.f32.mrb[33].mxu1 }
 0x567   :  { %v5929_v41 = vadd.f32 %v11858_v24, %v5928_v11  ;;  %v9715_v58 = vpop.f32.mrb[34].mxu1  ;;  %9844 = vmatprep.mubr.msk.bf16.mxu0 %vm537_vm0, %v6495_v39 }
 0x568   :  { %v5940_v12 = vadd.f32 %v9715_v58, %v11858_v24  ;;  %v5931_v52 = vpop.f32.mrb[35].mxu1  ;;  %9845 = vmatmul.mubr.msk.bf16.gmra.mrb[132].mxu0 %vm537_vm0, %v6496_v62  ;;  %v6381_v45 = vmax.f32 %v5937_v40, 0.0 }
 0x569   :  { %v5932_v42 = vadd.f32 %v11858_v24, %v5931_v52  ;;  %v6379_v8 = vmax.f32 %v5929_v41, 0.0 }
 0x56a   :  { %v6382_v47 = vmax.f32 %v5940_v12, 0.0 }
 0x56b   :  { %v6380_v27 = vmax.f32 %v5932_v42, 0.0 }
 0x56c   :  { %v6498_v31 = vpack.c.bf16 %v6382_v47, %v6381_v45 }
 0x56d   :  { %v6497_v56 = vpack.c.bf16 %v6380_v27, %v6379_v8  ;;  %v9718_v57 = vpop.f32.mrb[36].mxu1 }
 0x56e   :  { %v5953_v33 = vadd.f32 %v9718_v57, %v11858_v24  ;;  %v5944_v35 = vpop.f32.mrb[37].mxu1 }
 0x56f   :  { %v5945_v51 = vadd.f32 %v11858_v24, %v5944_v35  ;;  %v9719_v23 = vpop.f32.mrb[38].mxu1  ;;  %9848 = vmatprep.mubr.msk.bf16.mxu0 %vm537_vm0, %v6497_v56 }
 0x570   :  { %v5956_v44 = vadd.f32 %v9719_v23, %v11858_v24  ;;  %v5947_v34 = vpop.f32.mrb[39].mxu1  ;;  %9849 = vmatmul.mubr.msk.bf16.gmra.mrb[136].mxu0 %vm537_vm0, %v6498_v31  ;;  %v6385_v53 = vmax.f32 %v5953_v33, 0.0 }
 0x571   :  { %v5948_v63 = vadd.f32 %v11858_v24, %v5947_v34  ;;  %v6383_v26 = vmax.f32 %v5945_v51, 0.0 }
 0x572   :  { %v6386_v50 = vmax.f32 %v5956_v44, 0.0 }
 0x573   :  { %v6384_v13 = vmax.f32 %v5948_v63, 0.0 }
 0x574   :  { %v6500_v22 = vpack.c.bf16 %v6386_v50, %v6385_v53 }
 0x575   :  { %v6499_v2 = vpack.c.bf16 %v6384_v13, %v6383_v26  ;;  %v9722_v46 = vpop.f32.mrb[40].mxu1 }
 0x576   :  { %v5969_v59 = vadd.f32 %v9722_v46, %v11858_v24  ;;  %v5960_v14 = vpop.f32.mrb[41].mxu1 }
 0x577   :  { %v5961_v16 = vadd.f32 %v11858_v24, %v5960_v14  ;;  %v9723_v32 = vpop.f32.mrb[42].mxu1  ;;  %9852 = vmatprep.mubr.msk.bf16.mxu0 %vm537_vm0, %v6499_v2 }
 0x578   :  { %v5972_v19 = vadd.f32 %v9723_v32, %v11858_v24  ;;  %v5963_v1 = vpop.f32.mrb[43].mxu1  ;;  %9853 = vmatmul.mubr.msk.bf16.gmra.mrb[140].mxu0 %vm537_vm0, %v6500_v22  ;;  %v6389_v61 = vmax.f32 %v5969_v59, 0.0 }
 0x579   :  { %v5964_v25 = vadd.f32 %v11858_v24, %v5963_v1  ;;  %v6387_v17 = vmax.f32 %v5961_v16, 0.0 }
 0x57a   :  { %v6390_v4 = vmax.f32 %v5972_v19, 0.0 }
 0x57b   :  { %v6388_v38 = vmax.f32 %v5964_v25, 0.0 }
 0x57c   :  { %v6502_v60 = vpack.c.bf16 %v6390_v4, %v6389_v61 }
 0x57d   :  { %v6501_v3 = vpack.c.bf16 %v6388_v38, %v6387_v17  ;;  %v9726_v6 = vpop.f32.mrb[44].mxu1 }
 0x57e   :  { %v5985_v29 = vadd.f32 %v9726_v6, %v11858_v24  ;;  %v5976_v9 = vpop.f32.mrb[45].mxu1 }
 0x57f   :  { %v5977_v30 = vadd.f32 %v11858_v24, %v5976_v9  ;;  %v9727_v15 = vpop.f32.mrb[46].mxu1  ;;  %9856 = vmatprep.mubr.msk.bf16.mxu0 %vm537_vm0, %v6501_v3 }
 0x580   :  { %v5988_v28 = vadd.f32 %v9727_v15, %v11858_v24  ;;  %v5979_v18 = vpop.f32.mrb[47].mxu1  ;;  %9857 = vmatmul.mubr.msk.bf16.gmra.mrb[144].mxu0 %vm537_vm0, %v6502_v60  ;;  %v6393_v5 = vmax.f32 %v5985_v29, 0.0 }
 0x581   :  { %v5980_v7 = vadd.f32 %v11858_v24, %v5979_v18  ;;  %v6391_v21 = vmax.f32 %v5977_v30, 0.0 }
 0x582   :  { %v6394_v36 = vmax.f32 %v5988_v28, 0.0 }
 0x583   :  { %v6392_v0 = vmax.f32 %v5980_v7, 0.0 }
 0x584   :  { %v6504_v43 = vpack.c.bf16 %v6394_v36, %v6393_v5 }
 0x585   :  { %v6503_v54 = vpack.c.bf16 %v6392_v0, %v6391_v21  ;;  %v9730_v10 = vpop.f32.mrb[48].mxu1 }
 0x586   :  { %v6001_v55 = vadd.f32 %v9730_v10, %v11858_v24  ;;  %v5992_v37 = vpop.f32.mrb[49].mxu1 }
 0x587   :  { %v5993_v48 = vadd.f32 %v11858_v24, %v5992_v37  ;;  %v9731_v20 = vpop.f32.mrb[50].mxu1  ;;  %9860 = vmatprep.mubr.msk.bf16.mxu0 %vm537_vm0, %v6503_v54 }
 0x588   :  { %v6004_v62 = vadd.f32 %v9731_v20, %v11858_v24  ;;  %v5995_v39 = vpop.f32.mrb[51].mxu1  ;;  %9861 = vmatmul.mubr.msk.bf16.gmra.mrb[148].mxu0 %vm537_vm0, %v6504_v43  ;;  %v6397_v40 = vmax.f32 %v6001_v55, 0.0 }
 0x589   :  { %v5996_v49 = vadd.f32 %v11858_v24, %v5995_v39  ;;  %v6395_v41 = vmax.f32 %v5993_v48, 0.0 }
 0x58a   :  { %v6398_v11 = vmax.f32 %v6004_v62, 0.0 }
 0x58b   :  { %v6396_v58 = vmax.f32 %v5996_v49, 0.0 }
 0x58c   :  { %v6506_v12 = vpack.c.bf16 %v6398_v11, %v6397_v40 }
 0x58d   :  { %v6505_v52 = vpack.c.bf16 %v6396_v58, %v6395_v41  ;;  %v9734_v42 = vpop.f32.mrb[52].mxu1 }
 0x58e   :  { %v6017_v45 = vadd.f32 %v9734_v42, %v11858_v24  ;;  %v6008_v47 = vpop.f32.mrb[53].mxu1 }
 0x58f   :  { %v6009_v8 = vadd.f32 %v11858_v24, %v6008_v47  ;;  %v9735_v27 = vpop.f32.mrb[54].mxu1  ;;  %9864 = vmatprep.mubr.msk.bf16.mxu0 %vm537_vm0, %v6505_v52 }
 0x590   :  { %v6020_v31 = vadd.f32 %v9735_v27, %v11858_v24  ;;  %v6011_v56 = vpop.f32.mrb[55].mxu1  ;;  %9865 = vmatmul.mubr.msk.bf16.gmra.mrb[152].mxu0 %vm537_vm0, %v6506_v12  ;;  %v6401_v33 = vmax.f32 %v6017_v45, 0.0 }
 0x591   :  { %v6012_v57 = vadd.f32 %v11858_v24, %v6011_v56  ;;  %v6399_v51 = vmax.f32 %v6009_v8, 0.0 }
 0x592   :  { %v6402_v35 = vmax.f32 %v6020_v31, 0.0 }
 0x593   :  { %v6400_v23 = vmax.f32 %v6012_v57, 0.0 }
 0x594   :  { %v6508_v44 = vpack.c.bf16 %v6402_v35, %v6401_v33 }
 0x595   :  { %v6507_v34 = vpack.c.bf16 %v6400_v23, %v6399_v51  ;;  %v9738_v63 = vpop.f32.mrb[56].mxu1 }
 0x596   :  { %v6033_v53 = vadd.f32 %v9738_v63, %v11858_v24  ;;  %v6024_v50 = vpop.f32.mrb[57].mxu1 }
 0x597   :  { %v6025_v26 = vadd.f32 %v11858_v24, %v6024_v50  ;;  %v9739_v13 = vpop.f32.mrb[58].mxu1  ;;  %9868 = vmatprep.mubr.msk.bf16.mxu0 %vm537_vm0, %v6507_v34 }
 0x598   :  { %v6036_v22 = vadd.f32 %v9739_v13, %v11858_v24  ;;  %v6027_v2 = vpop.f32.mrb[59].mxu1  ;;  %9869 = vmatmul.mubr.msk.bf16.gmra.mrb[156].mxu0 %vm537_vm0, %v6508_v44  ;;  %v6405_v59 = vmax.f32 %v6033_v53, 0.0 }
 0x599   :  { %v6028_v46 = vadd.f32 %v11858_v24, %v6027_v2  ;;  %v6403_v16 = vmax.f32 %v6025_v26, 0.0 }
 0x59a   :  { %v6406_v14 = vmax.f32 %v6036_v22, 0.0 }
 0x59b   :  { %v6404_v32 = vmax.f32 %v6028_v46, 0.0 }
 0x59c   :  { %v6510_v19 = vpack.c.bf16 %v6406_v14, %v6405_v59 }
 0x59d   :  { %v6509_v1 = vpack.c.bf16 %v6404_v32, %v6403_v16  ;;  %v9742_v25 = vpop.f32.mrb[60].mxu1 }
 0x59e   :  { %v6049_v61 = vadd.f32 %v9742_v25, %v11858_v24  ;;  %v6040_v4 = vpop.f32.mrb[61].mxu1 }
 0x59f   :  { %v6041_v17 = vadd.f32 %v11858_v24, %v6040_v4  ;;  %v9743_v38 = vpop.f32.mrb[62].mxu1  ;;  %9872 = vmatprep.mubr.msk.bf16.mxu0 %vm537_vm0, %v6509_v1 }
 0x5a0   :  { %v6052_v60 = vadd.f32 %v9743_v38, %v11858_v24  ;;  %v6043_v3 = vpop.f32.mrb[63].mxu1  ;;  %9873 = vmatmul.mubr.msk.bf16.gmra.mrb[160].mxu0 %vm537_vm0, %v6510_v19  ;;  %v6409_v29 = vmax.f32 %v6049_v61, 0.0 }
 0x5a1   :  { %v6044_v6 = vadd.f32 %v11858_v24, %v6043_v3  ;;  %v6407_v30 = vmax.f32 %v6041_v17, 0.0 }
 0x5a2   :  { %v6410_v9 = vmax.f32 %v6052_v60, 0.0 }
 0x5a3   :  { %v6408_v15 = vmax.f32 %v6044_v6, 0.0 }
 0x5a4   :  { %v6512_v28 = vpack.c.bf16 %v6410_v9, %v6409_v29 }
 0x5a5   :  { %v6511_v18 = vpack.c.bf16 %v6408_v15, %v6407_v30  ;;  %v9746_v7 = vpop.f32.mrb[64].mxu1 }
 0x5a6   :  { %v6065_v5 = vadd.f32 %v9746_v7, %v11858_v24  ;;  %v6056_v36 = vpop.f32.mrb[65].mxu1 }
 0x5a7   :  { %v6057_v21 = vadd.f32 %v11858_v24, %v6056_v36  ;;  %v9747_v0 = vpop.f32.mrb[66].mxu1  ;;  %9876 = vmatprep.mubr.msk.bf16.mxu0 %vm537_vm0, %v6511_v18 }
 0x5a8   :  { %v6068_v43 = vadd.f32 %v9747_v0, %v11858_v24  ;;  %v6059_v54 = vpop.f32.mrb[67].mxu1  ;;  %9877 = vmatmul.mubr.msk.bf16.gmra.mrb[164].mxu0 %vm537_vm0, %v6512_v28  ;;  %v6413_v55 = vmax.f32 %v6065_v5, 0.0 }
 0x5a9   :  { %v6060_v10 = vadd.f32 %v11858_v24, %v6059_v54  ;;  %v6411_v48 = vmax.f32 %v6057_v21, 0.0 }
 0x5aa   :  { %v6414_v37 = vmax.f32 %v6068_v43, 0.0 }
 0x5ab   :  { %v6412_v20 = vmax.f32 %v6060_v10, 0.0 }
 0x5ac   :  { %v6514_v62 = vpack.c.bf16 %v6414_v37, %v6413_v55 }
 0x5ad   :  { %v6513_v39 = vpack.c.bf16 %v6412_v20, %v6411_v48  ;;  %v9750_v49 = vpop.f32.mrb[68].mxu1 }
 0x5ae   :  { %v6081_v40 = vadd.f32 %v9750_v49, %v11858_v24  ;;  %v6072_v11 = vpop.f32.mrb[69].mxu1 }
 0x5af   :  { %v6073_v41 = vadd.f32 %v11858_v24, %v6072_v11  ;;  %v9751_v58 = vpop.f32.mrb[70].mxu1  ;;  %9880 = vmatprep.mubr.msk.bf16.mxu0 %vm537_vm0, %v6513_v39 }
 0x5b0   :  { %v6084_v12 = vadd.f32 %v9751_v58, %v11858_v24  ;;  %v6075_v52 = vpop.f32.mrb[71].mxu1  ;;  %9881 = vmatmul.mubr.msk.bf16.gmra.mrb[168].mxu0 %vm537_vm0, %v6514_v62  ;;  %v6417_v45 = vmax.f32 %v6081_v40, 0.0 }
 0x5b1   :  { %v6076_v42 = vadd.f32 %v11858_v24, %v6075_v52  ;;  %v6415_v8 = vmax.f32 %v6073_v41, 0.0 }
 0x5b2   :  { %v6418_v47 = vmax.f32 %v6084_v12, 0.0 }
 0x5b3   :  { %v6416_v27 = vmax.f32 %v6076_v42, 0.0 }
 0x5b4   :  { %v6516_v31 = vpack.c.bf16 %v6418_v47, %v6417_v45 }
 0x5b5   :  { %v6515_v56 = vpack.c.bf16 %v6416_v27, %v6415_v8  ;;  %v9754_v57 = vpop.f32.mrb[72].mxu1 }
 0x5b6   :  { %v6097_v33 = vadd.f32 %v9754_v57, %v11858_v24  ;;  %v6088_v35 = vpop.f32.mrb[73].mxu1 }
 0x5b7   :  { %v6089_v51 = vadd.f32 %v11858_v24, %v6088_v35  ;;  %v9755_v23 = vpop.f32.mrb[74].mxu1  ;;  %9884 = vmatprep.mubr.msk.bf16.mxu0 %vm537_vm0, %v6515_v56 }
 0x5b8   :  { %v6100_v44 = vadd.f32 %v9755_v23, %v11858_v24  ;;  %v6091_v34 = vpop.f32.mrb[75].mxu1  ;;  %9885 = vmatmul.mubr.msk.bf16.gmra.mrb[172].mxu0 %vm537_vm0, %v6516_v31  ;;  %v6421_v53 = vmax.f32 %v6097_v33, 0.0 }
 0x5b9   :  { %v6092_v63 = vadd.f32 %v11858_v24, %v6091_v34  ;;  %v6419_v26 = vmax.f32 %v6089_v51, 0.0 }
 0x5ba   :  { %v6422_v50 = vmax.f32 %v6100_v44, 0.0 }
 0x5bb   :  { %v6420_v13 = vmax.f32 %v6092_v63, 0.0 }
 0x5bc   :  { %v6518_v22 = vpack.c.bf16 %v6422_v50, %v6421_v53 }
 0x5bd   :  { %v6517_v2 = vpack.c.bf16 %v6420_v13, %v6419_v26  ;;  %v9758_v46 = vpop.f32.mrb[76].mxu1 }
 0x5be   :  { %v6113_v59 = vadd.f32 %v9758_v46, %v11858_v24  ;;  %v6104_v14 = vpop.f32.mrb[77].mxu1 }
 0x5bf   :  { %v6105_v16 = vadd.f32 %v11858_v24, %v6104_v14  ;;  %v9759_v32 = vpop.f32.mrb[78].mxu1  ;;  %9888 = vmatprep.mubr.msk.bf16.mxu0 %vm537_vm0, %v6517_v2 }
 0x5c0   :  { %v6116_v19 = vadd.f32 %v9759_v32, %v11858_v24  ;;  %v6107_v1 = vpop.f32.mrb[79].mxu1  ;;  %9889 = vmatmul.mubr.msk.bf16.gmra.mrb[176].mxu0 %vm537_vm0, %v6518_v22  ;;  %v6425_v61 = vmax.f32 %v6113_v59, 0.0 }
 0x5c1   :  { %v6108_v25 = vadd.f32 %v11858_v24, %v6107_v1  ;;  %v6423_v17 = vmax.f32 %v6105_v16, 0.0 }
 0x5c2   :  { %v6426_v4 = vmax.f32 %v6116_v19, 0.0 }
 0x5c3   :  { %v6424_v38 = vmax.f32 %v6108_v25, 0.0 }
 0x5c4   :  { %v6520_v60 = vpack.c.bf16 %v6426_v4, %v6425_v61 }
 0x5c5   :  { %v6519_v3 = vpack.c.bf16 %v6424_v38, %v6423_v17  ;;  %v9762_v6 = vpop.f32.mrb[80].mxu1 }
 0x5c6   :  { %v6129_v29 = vadd.f32 %v9762_v6, %v11858_v24  ;;  %v6120_v9 = vpop.f32.mrb[81].mxu1 }
 0x5c7   :  { %v6121_v30 = vadd.f32 %v11858_v24, %v6120_v9  ;;  %v9763_v15 = vpop.f32.mrb[82].mxu1  ;;  %9892 = vmatprep.mubr.msk.bf16.mxu0 %vm537_vm0, %v6519_v3 }
 0x5c8   :  { %v6132_v28 = vadd.f32 %v9763_v15, %v11858_v24  ;;  %v6123_v18 = vpop.f32.mrb[83].mxu1  ;;  %9893 = vmatmul.mubr.msk.bf16.gmra.mrb[180].mxu0 %vm537_vm0, %v6520_v60  ;;  %v6429_v5 = vmax.f32 %v6129_v29, 0.0 }
 0x5c9   :  { %v6124_v7 = vadd.f32 %v11858_v24, %v6123_v18  ;;  %v6427_v21 = vmax.f32 %v6121_v30, 0.0 }
 0x5ca   :  { %v6430_v36 = vmax.f32 %v6132_v28, 0.0 }
 0x5cb   :  { %v6428_v0 = vmax.f32 %v6124_v7, 0.0 }
 0x5cc   :  { %v6522_v43 = vpack.c.bf16 %v6430_v36, %v6429_v5 }
 0x5cd   :  { %v6521_v54 = vpack.c.bf16 %v6428_v0, %v6427_v21  ;;  %v9766_v10 = vpop.f32.mrb[84].mxu1 }
 0x5ce   :  { %v6145_v55 = vadd.f32 %v9766_v10, %v11858_v24  ;;  %v6136_v37 = vpop.f32.mrb[85].mxu1 }
 0x5cf   :  { %v6137_v48 = vadd.f32 %v11858_v24, %v6136_v37  ;;  %v9767_v20 = vpop.f32.mrb[86].mxu1  ;;  %9896 = vmatprep.mubr.msk.bf16.mxu0 %vm537_vm0, %v6521_v54 }
 0x5d0   :  { %v6148_v62 = vadd.f32 %v9767_v20, %v11858_v24  ;;  %v6139_v39 = vpop.f32.mrb[87].mxu1  ;;  %9897 = vmatmul.mubr.msk.bf16.gmra.mrb[184].mxu0 %vm537_vm0, %v6522_v43  ;;  %v6433_v40 = vmax.f32 %v6145_v55, 0.0 }
 0x5d1   :  { %v6140_v49 = vadd.f32 %v11858_v24, %v6139_v39  ;;  %v6431_v41 = vmax.f32 %v6137_v48, 0.0 }
 0x5d2   :  { %v6434_v11 = vmax.f32 %v6148_v62, 0.0 }
 0x5d3   :  { %v6432_v58 = vmax.f32 %v6140_v49, 0.0 }
 0x5d4   :  { %v6524_v12 = vpack.c.bf16 %v6434_v11, %v6433_v40 }
 0x5d5   :  { %v6523_v52 = vpack.c.bf16 %v6432_v58, %v6431_v41  ;;  %v9770_v42 = vpop.f32.mrb[88].mxu1 }
 0x5d6   :  { %v6161_v45 = vadd.f32 %v9770_v42, %v11858_v24  ;;  %v6152_v47 = vpop.f32.mrb[89].mxu1 }
 0x5d7   :  { %v6153_v8 = vadd.f32 %v11858_v24, %v6152_v47  ;;  %v9771_v27 = vpop.f32.mrb[90].mxu1  ;;  %9900 = vmatprep.mubr.msk.bf16.mxu0 %vm537_vm0, %v6523_v52 }
 0x5d8   :  { %v6164_v31 = vadd.f32 %v9771_v27, %v11858_v24  ;;  %v6155_v56 = vpop.f32.mrb[91].mxu1  ;;  %9901 = vmatmul.mubr.msk.bf16.gmra.mrb[188].mxu0 %vm537_vm0, %v6524_v12  ;;  %v6437_v33 = vmax.f32 %v6161_v45, 0.0 }
 0x5d9   :  { %v6156_v57 = vadd.f32 %v11858_v24, %v6155_v56  ;;  %v6435_v51 = vmax.f32 %v6153_v8, 0.0 }
 0x5da   :  { %v6438_v35 = vmax.f32 %v6164_v31, 0.0 }
 0x5db   :  { %v6436_v23 = vmax.f32 %v6156_v57, 0.0 }
 0x5dc   :  { %v6526_v44 = vpack.c.bf16 %v6438_v35, %v6437_v33 }
 0x5dd   :  { %v6525_v34 = vpack.c.bf16 %v6436_v23, %v6435_v51  ;;  %v9774_v63 = vpop.f32.mrb[92].mxu1 }
 0x5de   :  { %v6177_v53 = vadd.f32 %v9774_v63, %v11858_v24  ;;  %v6168_v50 = vpop.f32.mrb[93].mxu1 }
 0x5df   :  { %v6169_v26 = vadd.f32 %v11858_v24, %v6168_v50  ;;  %v9775_v13 = vpop.f32.mrb[94].mxu1  ;;  %9904 = vmatprep.mubr.msk.bf16.mxu0 %vm537_vm0, %v6525_v34 }
 0x5e0   :  { %v6180_v22 = vadd.f32 %v9775_v13, %v11858_v24  ;;  %v6171_v2 = vpop.f32.mrb[95].mxu1  ;;  %9905 = vmatmul.mubr.msk.bf16.gmra.mrb[192].mxu0 %vm537_vm0, %v6526_v44  ;;  %v6441_v59 = vmax.f32 %v6177_v53, 0.0 }
 0x5e1   :  { %v6172_v46 = vadd.f32 %v11858_v24, %v6171_v2  ;;  %v6439_v16 = vmax.f32 %v6169_v26, 0.0 }
 0x5e2   :  { %v6442_v14 = vmax.f32 %v6180_v22, 0.0  ;;  %v12053_v22 = vld [vmem:[%s12465_s6] sm:$0xf] }
 0x5e3   :  { %v6440_v32 = vmax.f32 %v6172_v46, 0.0  ;;  %8948 = vmatprep.mubr.msk.bf16.mxu1 %vm537_vm0, %v12053_v22 }
 0x5e4   :  { %v6528_v19 = vpack.c.bf16 %v6442_v14, %v6441_v59 }
 0x5e5   :  { %v6527_v1 = vpack.c.bf16 %v6440_v32, %v6439_v16  ;;  %v9778_v25 = vpop.f32.mrb[96].mxu1 }
 0x5e6   :  { %v6193_v61 = vadd.f32 %v9778_v25, %v11858_v24  ;;  %v6184_v4 = vpop.f32.mrb[97].mxu1 }
 0x5e7   :  { %v6185_v17 = vadd.f32 %v11858_v24, %v6184_v4  ;;  %v9779_v38 = vpop.f32.mrb[98].mxu1  ;;  %9908 = vmatprep.mubr.msk.bf16.mxu0 %vm537_vm0, %v6527_v1 }
 0x5e8   :  { %v6196_v60 = vadd.f32 %v9779_v38, %v11858_v24  ;;  %v6187_v3 = vpop.f32.mrb[99].mxu1  ;;  %9909 = vmatmul.mubr.msk.bf16.gmra.mrb[196].mxu0 %vm537_vm0, %v6528_v19  ;;  %v6445_v29 = vmax.f32 %v6193_v61, 0.0 }
 0x5e9   :  { %v6188_v6 = vadd.f32 %v11858_v24, %v6187_v3  ;;  %v6443_v30 = vmax.f32 %v6185_v17, 0.0 }
 0x5ea   :  { %v6446_v9 = vmax.f32 %v6196_v60, 0.0 }
 0x5eb   :  { %v6444_v15 = vmax.f32 %v6188_v6, 0.0 }
 0x5ec   :  { %v6530_v28 = vpack.c.bf16 %v6446_v9, %v6445_v29 }
 0x5ed   :  { %v6529_v18 = vpack.c.bf16 %v6444_v15, %v6443_v30  ;;  %v9782_v7 = vpop.f32.mrb[100].mxu1 }
 0x5ee   :  { %v6209_v5 = vadd.f32 %v9782_v7, %v11858_v24  ;;  %v6200_v36 = vpop.f32.mrb[101].mxu1 }
 0x5ef   :  { %v6201_v21 = vadd.f32 %v11858_v24, %v6200_v36  ;;  %v9783_v0 = vpop.f32.mrb[102].mxu1  ;;  %9912 = vmatprep.mubr.msk.bf16.mxu0 %vm537_vm0, %v6529_v18  ;;  %v12069_v18 = vld [vmem:[%s12462_s5 + $0x6] ss:$0 sm:$0xff] }
 0x5f0   :  { %v6212_v43 = vadd.f32 %v9783_v0, %v11858_v24  ;;  %v6203_v54 = vpop.f32.mrb[103].mxu1  ;;  %9913 = vmatmul.mubr.msk.bf16.gmra.mrb[200].mxu0 %vm537_vm0, %v6530_v28  ;;  %v6449_v55 = vmax.f32 %v6209_v5, 0.0 }
 0x5f1   :  { %v6204_v10 = vadd.f32 %v11858_v24, %v6203_v54  ;;  %v6447_v48 = vmax.f32 %v6201_v21, 0.0 }
 0x5f2   :  { %v6450_v37 = vmax.f32 %v6212_v43, 0.0 }
 0x5f3   :  { %v6448_v20 = vmax.f32 %v6204_v10, 0.0 }
 0x5f4   :  { %v6532_v62 = vpack.c.bf16 %v6450_v37, %v6449_v55 }
 0x5f5   :  { %v6531_v39 = vpack.c.bf16 %v6448_v20, %v6447_v48  ;;  %v9786_v49 = vpop.f32.mrb[104].mxu1 }
 0x5f6   :  { %v6225_v40 = vadd.f32 %v9786_v49, %v11858_v24  ;;  %v6216_v11 = vpop.f32.mrb[105].mxu1 }
 0x5f7   :  { %v6217_v41 = vadd.f32 %v11858_v24, %v6216_v11  ;;  %v9787_v58 = vpop.f32.mrb[106].mxu1  ;;  %9916 = vmatprep.mubr.msk.bf16.mxu0 %vm537_vm0, %v6531_v39 }
 0x5f8   :  { %v6228_v12 = vadd.f32 %v9787_v58, %v11858_v24  ;;  %v6219_v52 = vpop.f32.mrb[107].mxu1  ;;  %9917 = vmatmul.mubr.msk.bf16.gmra.mrb[204].mxu0 %vm537_vm0, %v6532_v62  ;;  %v6453_v45 = vmax.f32 %v6225_v40, 0.0  ;;  %v12082_v40 = vld [vmem:[%s12462_s5 + $0x7] ss:$0 sm:$0xff] }
 0x5f9   :  { %v6220_v42 = vadd.f32 %v11858_v24, %v6219_v52  ;;  %v6451_v8 = vmax.f32 %v6217_v41, 0.0 }
 0x5fa   :  { %v6454_v47 = vmax.f32 %v6228_v12, 0.0 }
 0x5fb   :  { %v6452_v27 = vmax.f32 %v6220_v42, 0.0 }
 0x5fc   :  { %v6534_v31 = vpack.c.bf16 %v6454_v47, %v6453_v45 }
 0x5fd   :  { %v6533_v56 = vpack.c.bf16 %v6452_v27, %v6451_v8  ;;  %v9790_v57 = vpop.f32.mrb[108].mxu1 }
 0x5fe   :  { %v6241_v33 = vadd.f32 %v9790_v57, %v11858_v24  ;;  %v6232_v35 = vpop.f32.mrb[109].mxu1 }
 0x5ff   :  { %v6233_v51 = vadd.f32 %v11858_v24, %v6232_v35  ;;  %v9791_v23 = vpop.f32.mrb[110].mxu1  ;;  %9920 = vmatprep.mubr.msk.bf16.mxu0 %vm537_vm0, %v6533_v56 }
 0x600   :  { %v6244_v44 = vadd.f32 %v9791_v23, %v11858_v24  ;;  %v6235_v34 = vpop.f32.mrb[111].mxu1  ;;  %9921 = vmatmul.mubr.msk.bf16.gmra.mrb[208].mxu0 %vm537_vm0, %v6534_v31  ;;  %v6457_v53 = vmax.f32 %v6241_v33, 0.0 }
 0x601   :  { %v6236_v63 = vadd.f32 %v11858_v24, %v6235_v34  ;;  %v6455_v26 = vmax.f32 %v6233_v51, 0.0 }
 0x602   :  { %v6458_v50 = vmax.f32 %v6244_v44, 0.0 }
 0x603   :  { %v6456_v13 = vmax.f32 %v6236_v63, 0.0 }
 0x604   :  { %v6536_v2 = vpack.c.bf16 %v6458_v50, %v6457_v53 }
 0x605   :  { %v6535_v46 = vpack.c.bf16 %v6456_v13, %v6455_v26  ;;  %v9794_v59 = vpop.f32.mrb[112].mxu1 }
 0x606   :  { %v6257_v14 = vadd.f32 %v9794_v59, %v11858_v24  ;;  %v6248_v16 = vpop.f32.mrb[113].mxu1 }
 0x607   :  { %v6249_v32 = vadd.f32 %v11858_v24, %v6248_v16  ;;  %v9795_v19 = vpop.f32.mrb[114].mxu1  ;;  %9924 = vmatprep.mubr.msk.bf16.mxu0 %vm537_vm0, %v6535_v46 }
 0x608   :  { %v6260_v1 = vadd.f32 %v9795_v19, %v11858_v24  ;;  %v6251_v25 = vpop.f32.mrb[115].mxu1  ;;  %9925 = vmatmul.mubr.msk.bf16.gmra.mrb[212].mxu0 %vm537_vm0, %v6536_v2  ;;  %v6461_v4 = vmax.f32 %v6257_v14, 0.0 }
 0x609   :  { %v6252_v61 = vadd.f32 %v11858_v24, %v6251_v25  ;;  %v6459_v38 = vmax.f32 %v6249_v32, 0.0 }
 0x60a   :  { %v6462_v17 = vmax.f32 %v6260_v1, 0.0 }
 0x60b   :  { %v6460_v60 = vmax.f32 %v6252_v61, 0.0 }
 0x60c   :  { %v6538_v3 = vpack.c.bf16 %v6462_v17, %v6461_v4 }
 0x60d   :  { %v6537_v6 = vpack.c.bf16 %v6460_v60, %v6459_v38  ;;  %v9798_v29 = vpop.f32.mrb[116].mxu1 }
 0x60e   :  { %v6273_v9 = vadd.f32 %v9798_v29, %v11858_v24  ;;  %v6264_v30 = vpop.f32.mrb[117].mxu1 }
 0x60f   :  { %v6265_v15 = vadd.f32 %v11858_v24, %v6264_v30  ;;  %v9799_v28 = vpop.f32.mrb[118].mxu1  ;;  %9928 = vmatprep.mubr.msk.bf16.mxu0 %vm537_vm0, %v6537_v6 }
 0x610   :  { %v6276_v7 = vadd.f32 %v12069_v18, %v9799_v28  ;;  %v6267_v5 = vpop.f32.mrb[119].mxu1  ;;  %9929 = vmatmul.mubr.msk.bf16.gmra.mrb[216].mxu0 %vm537_vm0, %v6538_v3  ;;  %v6465_v21 = vmax.f32 %v6273_v9, 0.0 }
 0x611   :  { %v6268_v36 = vadd.f32 %v12069_v18, %v6267_v5  ;;  %v6463_v43 = vmax.f32 %v6265_v15, 0.0 }
 0x612   :  { %v6466_v0 = vmax.f32 %v6276_v7, 0.0 }
 0x613   :  { %v6464_v54 = vmax.f32 %v6268_v36, 0.0 }
 0x614   :  { %v6540_v24 = vpack.c.bf16 %v6466_v0, %v6465_v21 }
 0x615   :  { %v6539_v10 = vpack.c.bf16 %v6464_v54, %v6463_v43  ;;  %v9802_v55 = vpop.f32.mrb[120].mxu1 }
 0x616   :  { %v6289_v37 = vadd.f32 %v12069_v18, %v9802_v55  ;;  %v6280_v48 = vpop.f32.mrb[121].mxu1 }
 0x617   :  { %v6281_v20 = vadd.f32 %v12069_v18, %v6280_v48  ;;  %v9803_v62 = vpop.f32.mrb[122].mxu1  ;;  %9932 = vmatprep.mubr.msk.bf16.mxu0 %vm537_vm0, %v6539_v10 }
 0x618   :  { %v6292_v39 = vadd.f32 %v12069_v18, %v9803_v62  ;;  %v6283_v49 = vpop.f32.mrb[123].mxu1  ;;  %9933 = vmatmul.mubr.msk.bf16.gmra.mrb[220].mxu0 %vm537_vm0, %v6540_v24  ;;  %v6469_v41 = vmax.f32 %v6289_v37, 0.0 }
 0x619   :  { %v6284_v11 = vadd.f32 %v12069_v18, %v6283_v49  ;;  %v6467_v12 = vmax.f32 %v6281_v20, 0.0 }
 0x61a   :  { %v6470_v58 = vmax.f32 %v6292_v39, 0.0 }
 0x61b   :  { %v6468_v52 = vmax.f32 %v6284_v11, 0.0  ;;  %v9830_v42 = vpop.f32.mrb[116].mxu0 }
 0x61c   :  { %v6542_v45 = vpack.c.bf16 %v6470_v58, %v6469_v41  ;;  %v6827_v47 = vadd.f32 %v9830_v42, %v12082_v40  ;;  %v6818_v8 = vpop.f32.mrb[117].mxu0 }
 0x61d   :  { %v6541_v27 = vpack.c.bf16 %v6468_v52, %v6467_v12  ;;  %v6819_v31 = vadd.f32 %v12082_v40, %v6818_v8  ;;  %v9806_v56 = vpop.f32.mrb[124].mxu1  ;;  %v9831_v57 = vpop.f32.mrb[118].mxu0 }
 0x61e   :  { %v6305_v33 = vadd.f32 %v12069_v18, %v9806_v56  ;;  %v6830_v35 = vadd.f32 %v9831_v57, %v12082_v40  ;;  %v6296_v51 = vpop.f32.mrb[125].mxu1  ;;  %v6821_v23 = vpop.f32.mrb[119].mxu0  ;;  %v7331_v53 = vmax.f32 %v6827_v47, 0.0 }
 0x61f   :  { %v6297_v44 = vadd.f32 %v12069_v18, %v6296_v51  ;;  %v6822_v34 = vadd.f32 %v12082_v40, %v6821_v23  ;;  %v9807_v63 = vpop.f32.mrb[126].mxu1  ;;  %9936 = vmatprep.mubr.msk.bf16.mxu0 %vm537_vm0, %v6541_v27  ;;  %v7329_v2 = vmax.f32 %v6819_v31, 0.0 }
 0x620   :  { %v7332_v50 = vmax.f32 %v6830_v35, 0.0  ;;  %v6308_v26 = vadd.f32 %v12069_v18, %v9807_v63  ;;  %v6299_v13 = vpop.f32.mrb[127].mxu1  ;;  %9937 = vmatmul.mubr.msk.bf16.gmra.mrb[224].mxu0 %vm537_vm0, %v6542_v45  ;;  %v6473_v14 = vmax.f32 %v6305_v33, 0.0 }
 0x621   :  { %v7330_v46 = vmax.f32 %v6822_v34, 0.0  ;;  %v6300_v59 = vadd.f32 %v12069_v18, %v6299_v13  ;;  %v6471_v19 = vmax.f32 %v6297_v44, 0.0 }
 0x622   :  { %v12095_v16 = vpack.c.bf16 %v7332_v50, %v7331_v53  ;;  %v6474_v32 = vmax.f32 %v6308_v26, 0.0 }
 0x623   :  { %v12097_v1 = vpack.c.bf16 %v7330_v46, %v7329_v2  ;;  %v6472_v25 = vmax.f32 %v6300_v59, 0.0  ;;  %v9834_v61 = vpop.f32.mrb[120].mxu0 }
 0x624   :  { %v6544_v4 = vpack.c.bf16 %v6474_v32, %v6473_v14  ;;  %v6843_v17 = vadd.f32 %v9834_v61, %v12082_v40  ;;  %v6834_v38 = vpop.f32.mrb[121].mxu0 }
 0x625   :  { %v6543_v60 = vpack.c.bf16 %v6472_v25, %v6471_v19  ;;  %v6835_v3 = vadd.f32 %v12082_v40, %v6834_v38  ;;  %v9810_v6 = vpop.f32.mrb[128].mxu1  ;;  %v9835_v29 = vpop.f32.mrb[122].mxu0 }
 0x626   :  { %v6321_v9 = vadd.f32 %v12069_v18, %v9810_v6  ;;  %v6846_v30 = vadd.f32 %v9835_v29, %v12082_v40  ;;  %v6312_v15 = vpop.f32.mrb[129].mxu1  ;;  %v6837_v28 = vpop.f32.mrb[123].mxu0  ;;  %v7335_v21 = vmax.f32 %v6843_v17, 0.0 }
 0x627   :  { %v6313_v7 = vadd.f32 %v12069_v18, %v6312_v15  ;;  %v6838_v5 = vadd.f32 %v12082_v40, %v6837_v28  ;;  %v9811_v36 = vpop.f32.mrb[130].mxu1  ;;  %9940 = vmatprep.mubr.msk.bf16.mxu0 %vm537_vm0, %v6543_v60  ;;  %v7333_v24 = vmax.f32 %v6835_v3, 0.0 }
 0x628   :  { %v7336_v0 = vmax.f32 %v6846_v30, 0.0  ;;  %v6324_v43 = vadd.f32 %v12069_v18, %v9811_v36  ;;  %v6315_v54 = vpop.f32.mrb[131].mxu1  ;;  %9941 = vmatmul.mubr.msk.bf16.gmra.mrb[228].mxu0 %vm537_vm0, %v6544_v4  ;;  %v6477_v37 = vmax.f32 %v6321_v9, 0.0 }
 0x629   :  { %v7334_v10 = vmax.f32 %v6838_v5, 0.0  ;;  %v6316_v55 = vadd.f32 %v12069_v18, %v6315_v54  ;;  %v6475_v62 = vmax.f32 %v6313_v7, 0.0 }
 0x62a   :  { %v12109_v48 = vpack.c.bf16 %v7336_v0, %v7335_v21  ;;  %v6478_v20 = vmax.f32 %v6324_v43, 0.0 }
 0x62b   :  { %v12111_v39 = vpack.c.bf16 %v7334_v10, %v7333_v24  ;;  %v6476_v49 = vmax.f32 %v6316_v55, 0.0  ;;  %v9838_v11 = vpop.f32.mrb[124].mxu0 }
 0x62c   :  { %v6546_v41 = vpack.c.bf16 %v6478_v20, %v6477_v37  ;;  %v6859_v58 = vadd.f32 %v9838_v11, %v12082_v40  ;;  %v6850_v12 = vpop.f32.mrb[125].mxu0 }
 0x62d   :  { %v6545_v52 = vpack.c.bf16 %v6476_v49, %v6475_v62  ;;  %v6851_v42 = vadd.f32 %v12082_v40, %v6850_v12  ;;  %v9814_v45 = vpop.f32.mrb[132].mxu1  ;;  %v9839_v47 = vpop.f32.mrb[126].mxu0 }
 0x62e   :  { %v6337_v8 = vadd.f32 %v12069_v18, %v9814_v45  ;;  %v6862_v27 = vadd.f32 %v9839_v47, %v12082_v40  ;;  %v6328_v31 = vpop.f32.mrb[133].mxu1  ;;  %v6853_v56 = vpop.f32.mrb[127].mxu0  ;;  %v7339_v51 = vmax.f32 %v6859_v58, 0.0 }
 0x62f   :  { %v6329_v57 = vadd.f32 %v12069_v18, %v6328_v31  ;;  %v6854_v33 = vadd.f32 %v12082_v40, %v6853_v56  ;;  %v9815_v35 = vpop.f32.mrb[134].mxu1  ;;  %9944 = vmatprep.mubr.msk.bf16.mxu0 %vm537_vm0, %v6545_v52  ;;  %v7337_v63 = vmax.f32 %v6851_v42, 0.0 }
 0x630   :  { %v7340_v23 = vmax.f32 %v6862_v27, 0.0  ;;  %v6340_v44 = vadd.f32 %v12069_v18, %v9815_v35  ;;  %v6331_v34 = vpop.f32.mrb[135].mxu1  ;;  %9945 = vmatmul.mubr.msk.bf16.gmra.mrb[232].mxu0 %vm537_vm0, %v6546_v41  ;;  %v6481_v26 = vmax.f32 %v6337_v8, 0.0 }
 0x631   :  { %v7338_v53 = vmax.f32 %v6854_v33, 0.0  ;;  %v6332_v50 = vadd.f32 %v12069_v18, %v6331_v34  ;;  %v6479_v46 = vmax.f32 %v6329_v57, 0.0 }
 0x632   :  { %v12123_v13 = vpack.c.bf16 %v7340_v23, %v7339_v51  ;;  %v6482_v2 = vmax.f32 %v6340_v44, 0.0  ;;  %v7532_v44 = vsel %vm537_vm0, %v12097_v1, 0 }
 0x633   :  { %v12125_v59 = vpack.c.bf16 %v7338_v53, %v7337_v63  ;;  %v6480_v14 = vmax.f32 %v6332_v50, 0.0  ;;  %v9842_v32 = vpop.f32.mrb[128].mxu0 }
 0x634   :  { %v6548_v19 = vpack.c.bf16 %v6482_v2, %v6481_v26  ;;  %v6875_v25 = vadd.f32 %v9842_v32, %v12082_v40  ;;  %v6866_v61 = vpop.f32.mrb[129].mxu0 }
 0x635   :  { %v6547_v4 = vpack.c.bf16 %v6480_v14, %v6479_v46  ;;  %v6867_v17 = vadd.f32 %v12082_v40, %v6866_v61  ;;  %v9818_v38 = vpop.f32.mrb[136].mxu1  ;;  %v9843_v60 = vpop.f32.mrb[130].mxu0 }
 0x636   :  { %v6353_v3 = vadd.f32 %v12069_v18, %v9818_v38  ;;  %v6878_v6 = vadd.f32 %v9843_v60, %v12082_v40  ;;  %v6344_v29 = vpop.f32.mrb[137].mxu1  ;;  %v6869_v9 = vpop.f32.mrb[131].mxu0  ;;  %v7343_v7 = vmax.f32 %v6875_v25, 0.0 }
 0x637   :  { %v6345_v30 = vadd.f32 %v12069_v18, %v6344_v29  ;;  %v6870_v15 = vadd.f32 %v12082_v40, %v6869_v9  ;;  %v9819_v28 = vpop.f32.mrb[138].mxu1  ;;  %9948 = vmatprep.mubr.msk.bf16.mxu0 %vm537_vm0, %v6547_v4  ;;  %v7341_v0 = vmax.f32 %v6867_v17, 0.0  ;;  %v7535_v17 = vsel %vm537_vm0, %v12095_v16, 0 }
 0x638   :  { %v7344_v5 = vmax.f32 %v6878_v6, 0.0  ;;  %v6356_v36 = vadd.f32 %v12069_v18, %v9819_v28  ;;  %v6347_v21 = vpop.f32.mrb[139].mxu1  ;;  %9949 = vmatmul.mubr.msk.bf16.gmra.mrb[236].mxu0 %vm537_vm0, %v6548_v19  ;;  %v6485_v24 = vmax.f32 %v6353_v3, 0.0 }
 0x639   :  { %v7342_v43 = vmax.f32 %v6870_v15, 0.0  ;;  %v6348_v54 = vadd.f32 %v12069_v18, %v6347_v21  ;;  %v6483_v37 = vmax.f32 %v6345_v30, 0.0 }
 0x63a   :  { %v12137_v10 = vpack.c.bf16 %v7344_v5, %v7343_v7  ;;  %v6486_v55 = vmax.f32 %v6356_v36, 0.0 }
 0x63b   :  { %v12139_v20 = vpack.c.bf16 %v7342_v43, %v7341_v0  ;;  %v6484_v62 = vmax.f32 %v6348_v54, 0.0  ;;  %v9846_v49 = vpop.f32.mrb[132].mxu0  ;;  %v7538_v0 = vsel %vm537_vm0, %v12111_v39, 0  ;;  %v7522_v39 = vld [vmem:[%s12466_s7] sm:$0xff] }
 0x63c   :  { %v6550_v11 = vpack.c.bf16 %v6486_v55, %v6485_v24  ;;  %v6891_v41 = vadd.f32 %v9846_v49, %v12082_v40  ;;  %v6882_v58 = vpop.f32.mrb[133].mxu0 }
 0x63d   :  { %v6549_v12 = vpack.c.bf16 %v6484_v62, %v6483_v37  ;;  %v6883_v52 = vadd.f32 %v12082_v40, %v6882_v58  ;;  %v9847_v42 = vpop.f32.mrb[134].mxu0  ;;  %v10037_v58 = vmov 0  }
 0x63e   :  { %v6894_v45 = vadd.f32 %v9847_v42, %v12082_v40  ;;  %v6885_v18 = vpop.f32.mrb[135].mxu0  ;;  %v7347_v8 = vmax.f32 %v6891_v41, 0.0  ;;  %9998 = vset.pattern.permute.xlu0 %v10037_v58 }
 0x63f   :  { %v6886_v47 = vadd.f32 %v12082_v40, %v6885_v18  ;;  %9952 = vmatprep.mubr.msk.bf16.mxu0 %vm537_vm0, %v6549_v12  ;;  %v7345_v31 = vmax.f32 %v6883_v52, 0.0  ;;  %7525 = vperm.xlu0 %9998, %v7522_v39  }
 0x640   :  { %v7348_v27 = vmax.f32 %v6894_v45, 0.0  ;;  %9953 = vmatmul.mubr.msk.bf16.gmra.mrb[240].mxu0 %vm537_vm0, %v6550_v11 }
 0x641   :  { %v7346_v56 = vmax.f32 %v6886_v47, 0.0  ;;  %v7541_v47 = vsel %vm537_vm0, %v12109_v48, 0 }
 0x642   :  { %v7466_v57 = vpack.c.bf16 %v7348_v27, %v7347_v8 }
 0x643   :  { %v7465_v33 = vpack.c.bf16 %v7346_v56, %v7345_v31  ;;  %v9850_v35 = vpop.f32.mrb[136].mxu0 }
 0x644   :  { %v6907_v51 = vadd.f32 %v9850_v35, %v12082_v40  ;;  %v6898_v23 = vpop.f32.mrb[137].mxu0 }
 0x645   :  { %9964 = vmatprep.subr.msk.bf16.mxu1 %vm537_vm0, %v7465_v33  ;;  %v6899_v34 = vadd.f32 %v12082_v40, %v6898_v23  ;;  %v9851_v63 = vpop.f32.mrb[138].mxu0 }
 0x646   :  { %8933 = vmatpush3.bf16.xpose.msra.mxu1 %v7532_v44  ;;  %v6910_v53 = vadd.f32 %v9851_v63, %v12082_v40  ;;  %v6901_v50 = vpop.f32.mrb[139].mxu0  ;;  %v7351_v2 = vmax.f32 %v6907_v51, 0.0 }
 0x647   :  { %9965 = vmatprep.subr.msk.bf16.mxu1 %vm537_vm0, %v7466_v57  ;;  %v6902_v26 = vadd.f32 %v12082_v40, %v6901_v50  ;;  %v7349_v14 = vmax.f32 %v6899_v34, 0.0  ;;  %v7544_v50 = vsel %vm537_vm0, %v12125_v59, 0 }
 0x648   :  { %v7352_v46 = vmax.f32 %v6910_v53, 0.0 }
 0x649   :  { %v7350_v32 = vmax.f32 %v6902_v26, 0.0 }
 0x64a   :  { %v7468_v19 = vpack.c.bf16 %v7352_v46, %v7351_v2 }
 0x64b   :  { %v7467_v25 = vpack.c.bf16 %v7350_v32, %v7349_v14  ;;  %v9854_v61 = vpop.f32.mrb[140].mxu0 }
 0x64c   :  { %v6923_v1 = vadd.f32 %v9854_v61, %v12082_v40  ;;  %v6914_v4 = vpop.f32.mrb[141].mxu0 }
 0x64d   :  { %v6915_v38 = vadd.f32 %v12082_v40, %v6914_v4  ;;  %v9855_v60 = vpop.f32.mrb[142].mxu0 }
 0x64e   :  { %8935 = vmatpush3.bf16.xpose.msra.mxu1 %v7535_v17  ;;  %v6926_v3 = vadd.f32 %v9855_v60, %v12082_v40  ;;  %v6917_v6 = vpop.f32.mrb[143].mxu0  ;;  %v7355_v9 = vmax.f32 %v6923_v1, 0.0 }
 0x64f   :  { %9966 = vmatprep.subr.msk.bf16.mxu1 %vm537_vm0, %v7467_v25  ;;  %v6918_v29 = vadd.f32 %v12082_v40, %v6917_v6  ;;  %v7353_v15 = vmax.f32 %v6915_v38, 0.0 }
 0x650   :  { %v7356_v30 = vmax.f32 %v6926_v3, 0.0  ;;  %v7547_v3 = vsel %vm537_vm0, %v12123_v13, 0 }
 0x651   :  { %v7354_v28 = vmax.f32 %v6918_v29, 0.0 }
 0x652   :  { %v7470_v7 = vpack.c.bf16 %v7356_v30, %v7355_v9 }
 0x653   :  { %v7469_v5 = vpack.c.bf16 %v7354_v28, %v7353_v15  ;;  %v9858_v36 = vpop.f32.mrb[144].mxu0 }
 0x654   :  { %v6939_v16 = vadd.f32 %v9858_v36, %v12082_v40  ;;  %v6930_v21 = vpop.f32.mrb[145].mxu0 }
 0x655   :  { %v6931_v43 = vadd.f32 %v12082_v40, %v6930_v21  ;;  %v9859_v54 = vpop.f32.mrb[146].mxu0 }
 0x656   :  { %8937 = vmatpush3.bf16.xpose.msra.mxu1 %v7538_v0  ;;  %v6942_v24 = vadd.f32 %v9859_v54, %v12082_v40  ;;  %v6933_v55 = vpop.f32.mrb[147].mxu0  ;;  %v7359_v62 = vmax.f32 %v6939_v16, 0.0  ;;  %v7550_v54 = vsel %vm537_vm0, %v12139_v20, 0 }
 0x657   :  { %9967 = vmatprep.subr.msk.bf16.mxu1 %vm537_vm0, %v7468_v19  ;;  %v6934_v37 = vadd.f32 %v12082_v40, %v6933_v55  ;;  %v7357_v11 = vmax.f32 %v6931_v43, 0.0 }
 0x658   :  { %v7360_v49 = vmax.f32 %v6942_v24, 0.0 }
 0x659   :  { %v7358_v41 = vmax.f32 %v6934_v37, 0.0 }
 0x65a   :  { %v12172_v12 = vpack.c.bf16 %v7360_v49, %v7359_v62 }
 0x65b   :  { %v7471_v52 = vpack.c.bf16 %v7358_v41, %v7357_v11  ;;  %v9862_v42 = vpop.f32.mrb[148].mxu0 }
 0x65c   :  { %v6955_v45 = vadd.f32 %v9862_v42, %v12082_v40  ;;  %v6946_v18 = vpop.f32.mrb[149].mxu0 }
 0x65d   :  { %v6947_v8 = vadd.f32 %v12082_v40, %v6946_v18  ;;  %v9863_v27 = vpop.f32.mrb[150].mxu0 }
 0x65e   :  { %8939 = vmatpush3.bf16.xpose.msra.mxu1 %v7541_v47  ;;  %v6958_v31 = vadd.f32 %v9863_v27, %v12082_v40  ;;  %v6949_v56 = vpop.f32.mrb[151].mxu0  ;;  %v7363_v33 = vmax.f32 %v6955_v45, 0.0  ;;  %v7553_v27 = vsel %vm537_vm0, %v12137_v10, 0 }
 0x65f   :  { %9968 = vmatprep.subr.msk.bf16.mxu1 %vm537_vm0, %v7469_v5  ;;  %v6950_v57 = vadd.f32 %v12082_v40, %v6949_v56  ;;  %v7361_v51 = vmax.f32 %v6947_v8, 0.0 }
 0x660   :  { %v7364_v35 = vmax.f32 %v6958_v31, 0.0 }
 0x661   :  { %v7362_v23 = vmax.f32 %v6950_v57, 0.0 }
 0x662   :  { %v12181_v44 = vpack.c.bf16 %v7364_v35, %v7363_v33 }
 0x663   :  { %v12183_v34 = vpack.c.bf16 %v7362_v23, %v7361_v51  ;;  %v9866_v48 = vpop.f32.mrb[152].mxu0 }
 0x664   :  { %v6971_v63 = vadd.f32 %v9866_v48, %v12082_v40  ;;  %v6962_v53 = vpop.f32.mrb[153].mxu0 }
 0x665   :  { %v6963_v26 = vadd.f32 %v12082_v40, %v6962_v53  ;;  %v9867_v2 = vpop.f32.mrb[154].mxu0  ;;  %v7580_v10 = vsel %vm537_vm0, %v12183_v34, 0 }
 0x666   :  { %8941 = vmatpush3.bf16.xpose.msra.mxu1 %v7544_v50  ;;  %v6974_v46 = vadd.f32 %v9867_v2, %v12082_v40  ;;  %v6965_v14 = vpop.f32.mrb[155].mxu0  ;;  %v7367_v19 = vmax.f32 %v6971_v63, 0.0 }
 0x667   :  { %9969 = vmatprep.subr.msk.bf16.mxu1 %vm537_vm0, %v7470_v7  ;;  %v6966_v32 = vadd.f32 %v12082_v40, %v6965_v14  ;;  %v7365_v61 = vmax.f32 %v6963_v26, 0.0 }
 0x668   :  { %v7368_v25 = vmax.f32 %v6974_v46, 0.0 }
 0x669   :  { %v7366_v1 = vmax.f32 %v6966_v32, 0.0 }
 0x66a   :  { %v12192_v4 = vpack.c.bf16 %v7368_v25, %v7367_v19 }
 0x66b   :  { %v12194_v17 = vpack.c.bf16 %v7366_v1, %v7365_v61  ;;  %v9870_v59 = vpop.f32.mrb[156].mxu0 }
 0x66c   :  { %v6987_v38 = vadd.f32 %v9870_v59, %v12082_v40  ;;  %v6978_v60 = vpop.f32.mrb[157].mxu0 }
 0x66d   :  { %v6979_v6 = vadd.f32 %v12082_v40, %v6978_v60  ;;  %v9871_v29 = vpop.f32.mrb[158].mxu0 }
 0x66e   :  { %8943 = vmatpush3.bf16.xpose.msra.mxu1 %v7547_v3  ;;  %v6990_v9 = vadd.f32 %v9871_v29, %v12082_v40  ;;  %v6981_v30 = vpop.f32.mrb[159].mxu0  ;;  %v7371_v28 = vmax.f32 %v6987_v38, 0.0 }
 0x66f   :  { %9970 = vmatprep.subr.msk.bf16.mxu1 %vm537_vm0, %v7471_v52  ;;  %v6982_v15 = vadd.f32 %v12082_v40, %v6981_v30  ;;  %v7369_v5 = vmax.f32 %v6979_v6, 0.0  ;;  %v7583_v6 = vsel %vm537_vm0, %v12181_v44, 0 }
 0x670   :  { %v7372_v7 = vmax.f32 %v6990_v9, 0.0 }
 0x671   :  { %v7370_v36 = vmax.f32 %v6982_v15, 0.0 }
 0x672   :  { %v12203_v16 = vpack.c.bf16 %v7372_v7, %v7371_v28 }
 0x673   :  { %v12205_v21 = vpack.c.bf16 %v7370_v36, %v7369_v5  ;;  %v9874_v13 = vpop.f32.mrb[160].mxu0 }
 0x674   :  { %v7003_v0 = vadd.f32 %v9874_v13, %v12082_v40  ;;  %v6994_v43 = vpop.f32.mrb[161].mxu0 }
 0x675   :  { %v6995_v24 = vadd.f32 %v12082_v40, %v6994_v43  ;;  %v9875_v55 = vpop.f32.mrb[162].mxu0 }
 0x676   :  { %8945 = vmatpush3.bf16.xpose.msra.mxu1 %v7550_v54  ;;  %v7006_v37 = vadd.f32 %v9875_v55, %v12082_v40  ;;  %v6997_v62 = vpop.f32.mrb[163].mxu0  ;;  %v7375_v11 = vmax.f32 %v7003_v0, 0.0  ;;  %v7586_v55 = vsel %vm537_vm0, %v12194_v17, 0 }
 0x677   :  { %v6998_v49 = vadd.f32 %v12082_v40, %v6997_v62  ;;  %9971 = vmatprep.subr.msk.bf16.mxu1 %vm537_vm0, %v12172_v12  ;;  %v7373_v58 = vmax.f32 %v6995_v24, 0.0 }
 0x678   :  { %v7376_v41 = vmax.f32 %v7006_v37, 0.0 }
 0x679   :  { %v7374_v39 = vmax.f32 %v6998_v49, 0.0 }
 0x67a   :  { %v12215_v52 = vpack.c.bf16 %v7376_v41, %v7375_v11 }
 0x67b   :  { %v12217_v42 = vpack.c.bf16 %v7374_v39, %v7373_v58  ;;  %v9878_v20 = vpop.f32.mrb[164].mxu0 }
 0x67c   :  { %v7019_v45 = vadd.f32 %v9878_v20, %v12082_v40  ;;  %v7010_v18 = vpop.f32.mrb[165].mxu0 }
 0x67d   :  { %v7011_v47 = vadd.f32 %v12082_v40, %v7010_v18  ;;  %v9879_v8 = vpop.f32.mrb[166].mxu0 }
 0x67e   :  { %v7022_v12 = vadd.f32 %v9879_v8, %v12082_v40  ;;  %v7013_v31 = vpop.f32.mrb[167].mxu0  ;;  %8947 = vmatpush3.bf16.xpose.msra.mxu1 %v7553_v27  ;;  %v7379_v57 = vmax.f32 %v7019_v45, 0.0 }
 0x67f   :  { %v7014_v56 = vadd.f32 %v12082_v40, %v7013_v31  ;;  %v7377_v35 = vmax.f32 %v7011_v47, 0.0 }
 0x680   :  { %v7380_v33 = vmax.f32 %v7022_v12, 0.0  ;;  %v7589_v12 = vsel %vm537_vm0, %v12192_v4, 0 }
 0x681   :  { %v7378_v51 = vmax.f32 %v7014_v56, 0.0 }
 0x682   :  { %v7482_v23 = vpack.c.bf16 %v7380_v33, %v7379_v57 }
 0x683   :  { %v7481_v48 = vpack.c.bf16 %v7378_v51, %v7377_v35  ;;  %v9882_v63 = vpop.f32.mrb[168].mxu0 }
 0x684   :  { %v7035_v53 = vadd.f32 %v9882_v63, %v12082_v40  ;;  %v7026_v50 = vpop.f32.mrb[169].mxu0 }
 0x685   :  { %9972 = vmatprep.subr.msk.bf16.mxu1 %vm537_vm0, %v7481_v48  ;;  %8949 = vmatmul.mubr.msk.bf16.vlgmr.msra.gmra.mrb[140].mxu1 %vm537_vm0, %v12053_v22  ;;  %v7027_v26 = vadd.f32 %v12082_v40, %v7026_v50  ;;  %v9883_v2 = vpop.f32.mrb[170].mxu0 }
 0x686   :  { %8951 = vmatpush3.bf16.xpose.msra.mxu1 %v7580_v10  ;;  %v7038_v46 = vadd.f32 %v9883_v2, %v12082_v40  ;;  %v7029_v14 = vpop.f32.mrb[171].mxu0  ;;  %8966 = vmatprep.mubr.msk.bf16.mxu1 %vm537_vm0, %v12053_v22  ;;  %v7383_v19 = vmax.f32 %v7035_v53, 0.0  ;;  %v7592_v2 = vsel %vm537_vm0, %v12205_v21, 0 }
 0x687   :  { %9973 = vmatprep.subr.msk.bf16.mxu1 %vm537_vm0, %v7482_v23  ;;  %v7030_v32 = vadd.f32 %v12082_v40, %v7029_v14  ;;  %v7381_v61 = vmax.f32 %v7027_v26, 0.0 }
 0x688   :  { %v7384_v25 = vmax.f32 %v7038_v46, 0.0 }
 0x689   :  { %v7382_v1 = vmax.f32 %v7030_v32, 0.0 }
 0x68a   :  { %v7484_v59 = vpack.c.bf16 %v7384_v25, %v7383_v19 }
 0x68b   :  { %v7483_v34 = vpack.c.bf16 %v7382_v1, %v7381_v61  ;;  %v9886_v38 = vpop.f32.mrb[172].mxu0 }
 0x68c   :  { %v7051_v60 = vadd.f32 %v9886_v38, %v12082_v40  ;;  %v7042_v3 = vpop.f32.mrb[173].mxu0 }
 0x68d   :  { %v7043_v29 = vadd.f32 %v12082_v40, %v7042_v3  ;;  %v9887_v9 = vpop.f32.mrb[174].mxu0 }
 0x68e   :  { %8953 = vmatpush3.bf16.xpose.msra.mxu1 %v7583_v6  ;;  %v7054_v30 = vadd.f32 %v9887_v9, %v12082_v40  ;;  %v7045_v15 = vpop.f32.mrb[175].mxu0  ;;  %v7387_v7 = vmax.f32 %v7051_v60, 0.0 }
 0x68f   :  { %9974 = vmatprep.subr.msk.bf16.mxu1 %vm537_vm0, %v7483_v34  ;;  %v7046_v28 = vadd.f32 %v12082_v40, %v7045_v15  ;;  %v7385_v36 = vmax.f32 %v7043_v29, 0.0  ;;  %v7595_v29 = vsel %vm537_vm0, %v12203_v16, 0 }
 0x690   :  { %v7388_v5 = vmax.f32 %v7054_v30, 0.0 }
 0x691   :  { %v7386_v13 = vmax.f32 %v7046_v28, 0.0 }
 0x692   :  { %v7486_v0 = vpack.c.bf16 %v7388_v5, %v7387_v7 }
 0x693   :  { %v7485_v43 = vpack.c.bf16 %v7386_v13, %v7385_v36  ;;  %v9890_v54 = vpop.f32.mrb[176].mxu0 }
 0x694   :  { %v7067_v44 = vadd.f32 %v9890_v54, %v12082_v40  ;;  %v7058_v24 = vpop.f32.mrb[177].mxu0 }
 0x695   :  { %v7059_v37 = vadd.f32 %v12082_v40, %v7058_v24  ;;  %v9891_v62 = vpop.f32.mrb[178].mxu0 }
 0x696   :  { %8955 = vmatpush3.bf16.xpose.msra.mxu1 %v7586_v55  ;;  %v7070_v49 = vadd.f32 %v9891_v62, %v12082_v40  ;;  %v7061_v11 = vpop.f32.mrb[179].mxu0  ;;  %v7391_v58 = vmax.f32 %v7067_v44, 0.0  ;;  %v7598_v55 = vsel %vm537_vm0, %v12217_v42, 0 }
 0x697   :  { %9975 = vmatprep.subr.msk.bf16.mxu1 %vm537_vm0, %v7484_v59  ;;  %v7062_v41 = vadd.f32 %v12082_v40, %v7061_v11  ;;  %v7389_v20 = vmax.f32 %v7059_v37, 0.0 }
 0x698   :  { %v7392_v39 = vmax.f32 %v7070_v49, 0.0 }
 0x699   :  { %v7390_v45 = vmax.f32 %v7062_v41, 0.0 }
 0x69a   :  { %v12251_v18 = vpack.c.bf16 %v7392_v39, %v7391_v58 }
 0x69b   :  { %v7487_v47 = vpack.c.bf16 %v7390_v45, %v7389_v20  ;;  %v9894_v8 = vpop.f32.mrb[180].mxu0 }
 0x69c   :  { %v7083_v17 = vadd.f32 %v9894_v8, %v12082_v40  ;;  %v7074_v27 = vpop.f32.mrb[181].mxu0 }
 0x69d   :  { %v7075_v31 = vadd.f32 %v12082_v40, %v7074_v27  ;;  %v9895_v56 = vpop.f32.mrb[182].mxu0 }
 0x69e   :  { %8957 = vmatpush3.bf16.xpose.msra.mxu1 %v7589_v12  ;;  %v7086_v57 = vadd.f32 %v9895_v56, %v12082_v40  ;;  %v7077_v33 = vpop.f32.mrb[183].mxu0  ;;  %v7395_v51 = vmax.f32 %v7083_v17, 0.0  ;;  %v7601_v56 = vsel %vm537_vm0, %v12215_v52, 0 }
 0x69f   :  { %9976 = vmatprep.subr.msk.bf16.mxu1 %vm537_vm0, %v7485_v43  ;;  %v7078_v35 = vadd.f32 %v12082_v40, %v7077_v33  ;;  %v7393_v48 = vmax.f32 %v7075_v31, 0.0 }
 0x6a0   :  { %v7396_v23 = vmax.f32 %v7086_v57, 0.0 }
 0x6a1   :  { %v7394_v63 = vmax.f32 %v7078_v35, 0.0 }
 0x6a2   :  { %v12260_v53 = vpack.c.bf16 %v7396_v23, %v7395_v51 }
 0x6a3   :  { %v12262_v50 = vpack.c.bf16 %v7394_v63, %v7393_v48  ;;  %v9898_v4 = vpop.f32.mrb[184].mxu0 }
 0x6a4   :  { %v7099_v10 = vadd.f32 %v9898_v4, %v12082_v40  ;;  %v7090_v26 = vpop.f32.mrb[185].mxu0 }
 0x6a5   :  { %v7091_v46 = vadd.f32 %v12082_v40, %v7090_v26  ;;  %v9899_v14 = vpop.f32.mrb[186].mxu0  ;;  %v7628_v52 = vsel %vm537_vm0, %v12262_v50, 0 }
 0x6a6   :  { %8959 = vmatpush3.bf16.xpose.msra.mxu1 %v7592_v2  ;;  %v7102_v32 = vadd.f32 %v9899_v14, %v12082_v40  ;;  %v7093_v19 = vpop.f32.mrb[187].mxu0  ;;  %v7399_v61 = vmax.f32 %v7099_v10, 0.0 }
 0x6a7   :  { %9977 = vmatprep.subr.msk.bf16.mxu1 %vm537_vm0, %v7486_v0  ;;  %v7094_v25 = vadd.f32 %v12082_v40, %v7093_v19  ;;  %v7397_v59 = vmax.f32 %v7091_v46, 0.0 }
 0x6a8   :  { %v7400_v1 = vmax.f32 %v7102_v32, 0.0 }
 0x6a9   :  { %v7398_v34 = vmax.f32 %v7094_v25, 0.0 }
 0x6aa   :  { %v12271_v38 = vpack.c.bf16 %v7400_v1, %v7399_v61 }
 0x6ab   :  { %v12273_v60 = vpack.c.bf16 %v7398_v34, %v7397_v59  ;;  %v9902_v21 = vpop.f32.mrb[188].mxu0 }
 0x6ac   :  { %v7115_v3 = vadd.f32 %v9902_v21, %v12082_v40  ;;  %v7106_v6 = vpop.f32.mrb[189].mxu0 }
 0x6ad   :  { %v7107_v9 = vadd.f32 %v12082_v40, %v7106_v6  ;;  %v9903_v30 = vpop.f32.mrb[190].mxu0 }
 0x6ae   :  { %8961 = vmatpush3.bf16.xpose.msra.mxu1 %v7595_v29  ;;  %v7118_v15 = vadd.f32 %v9903_v30, %v12082_v40  ;;  %v7109_v28 = vpop.f32.mrb[191].mxu0  ;;  %v7403_v5 = vmax.f32 %v7115_v3, 0.0 }
 0x6af   :  { %9978 = vmatprep.subr.msk.bf16.mxu1 %vm537_vm0, %v7487_v47  ;;  %v7110_v7 = vadd.f32 %v12082_v40, %v7109_v28  ;;  %v7401_v13 = vmax.f32 %v7107_v9, 0.0  ;;  %v7631_v9 = vsel %vm537_vm0, %v12260_v53, 0 }
 0x6b0   :  { %v7404_v36 = vmax.f32 %v7118_v15, 0.0 }
 0x6b1   :  { %v7402_v0 = vmax.f32 %v7110_v7, 0.0 }
 0x6b2   :  { %v12282_v43 = vpack.c.bf16 %v7404_v36, %v7403_v5 }
 0x6b3   :  { %v12284_v54 = vpack.c.bf16 %v7402_v0, %v7401_v13  ;;  %v9906_v16 = vpop.f32.mrb[192].mxu0 }
 0x6b4   :  { %v7131_v44 = vadd.f32 %v9906_v16, %v12082_v40  ;;  %v7122_v24 = vpop.f32.mrb[193].mxu0 }
 0x6b5   :  { %v7123_v37 = vadd.f32 %v12082_v40, %v7122_v24  ;;  %v9907_v62 = vpop.f32.mrb[194].mxu0 }
 0x6b6   :  { %8963 = vmatpush3.bf16.xpose.msra.mxu1 %v7598_v55  ;;  %v7134_v49 = vadd.f32 %v9907_v62, %v12082_v40  ;;  %v7125_v11 = vpop.f32.mrb[195].mxu0  ;;  %v7407_v58 = vmax.f32 %v7131_v44, 0.0 }
 0x6b7   :  { %v7126_v41 = vadd.f32 %v12082_v40, %v7125_v11  ;;  %9979 = vmatprep.subr.msk.bf16.mxu1 %vm537_vm0, %v12251_v18  ;;  %v7405_v20 = vmax.f32 %v7123_v37, 0.0  ;;  %v7634_v37 = vsel %vm537_vm0, %v12273_v60, 0 }
 0x6b8   :  { %v7408_v39 = vmax.f32 %v7134_v49, 0.0 }
 0x6b9   :  { %v7406_v45 = vmax.f32 %v7126_v41, 0.0 }
 0x6ba   :  { %v12294_v47 = vpack.c.bf16 %v7408_v39, %v7407_v58 }
 0x6bb   :  { %v12296_v8 = vpack.c.bf16 %v7406_v45, %v7405_v20  ;;  %v9910_v42 = vpop.f32.mrb[196].mxu0 }
 0x6bc   :  { %v7147_v17 = vadd.f32 %v9910_v42, %v12082_v40  ;;  %v7138_v27 = vpop.f32.mrb[197].mxu0 }
 0x6bd   :  { %v7139_v12 = vadd.f32 %v12082_v40, %v7138_v27  ;;  %v9911_v31 = vpop.f32.mrb[198].mxu0 }
 0x6be   :  { %v7150_v18 = vadd.f32 %v9911_v31, %v12082_v40  ;;  %v7141_v57 = vpop.f32.mrb[199].mxu0  ;;  %8965 = vmatpush3.bf16.xpose.msra.mxu1 %v7601_v56  ;;  %v7411_v35 = vmax.f32 %v7147_v17, 0.0  ;;  %v7637_v56 = vsel %vm537_vm0, %v12271_v38, 0 }
 0x6bf   :  { %v7142_v33 = vadd.f32 %v12082_v40, %v7141_v57  ;;  %v7409_v23 = vmax.f32 %v7139_v12, 0.0 }
 0x6c0   :  { %v7412_v51 = vmax.f32 %v7150_v18, 0.0 }
 0x6c1   :  { %v7410_v48 = vmax.f32 %v7142_v33, 0.0 }
 0x6c2   :  { %v7498_v63 = vpack.c.bf16 %v7412_v51, %v7411_v35 }
 0x6c3   :  { %v7497_v4 = vpack.c.bf16 %v7410_v48, %v7409_v23  ;;  %v9914_v10 = vpop.f32.mrb[200].mxu0 }
 0x6c4   :  { %v7163_v26 = vadd.f32 %v9914_v10, %v12082_v40  ;;  %v7154_v2 = vpop.f32.mrb[201].mxu0 }
 0x6c5   :  { %9980 = vmatprep.subr.msk.bf16.mxu1 %vm537_vm0, %v7497_v4  ;;  %8967 = vmatmul.mubr.msk.bf16.vlgmr.msra.gmra.mrb[144].mxu1 %vm537_vm0, %v12053_v22  ;;  %v7155_v46 = vadd.f32 %v12082_v40, %v7154_v2  ;;  %v9915_v14 = vpop.f32.mrb[202].mxu0 }
 0x6c6   :  { %8969 = vmatpush3.bf16.xpose.msra.mxu1 %v7628_v52  ;;  %v7166_v32 = vadd.f32 %v9915_v14, %v12082_v40  ;;  %v7157_v19 = vpop.f32.mrb[203].mxu0  ;;  %8984 = vmatprep.mubr.msk.bf16.mxu1 %vm537_vm0, %v12053_v22  ;;  %v7415_v61 = vmax.f32 %v7163_v26, 0.0 }
 0x6c7   :  { %9981 = vmatprep.subr.msk.bf16.mxu1 %vm537_vm0, %v7498_v63  ;;  %v7158_v25 = vadd.f32 %v12082_v40, %v7157_v19  ;;  %v7413_v59 = vmax.f32 %v7155_v46, 0.0  ;;  %v7640_v46 = vsel %vm537_vm0, %v12284_v54, 0 }
 0x6c8   :  { %v7416_v1 = vmax.f32 %v7166_v32, 0.0 }
 0x6c9   :  { %v7414_v34 = vmax.f32 %v7158_v25, 0.0 }
 0x6ca   :  { %v7500_v21 = vpack.c.bf16 %v7416_v1, %v7415_v61 }
 0x6cb   :  { %v7499_v50 = vpack.c.bf16 %v7414_v34, %v7413_v59  ;;  %v9918_v3 = vpop.f32.mrb[204].mxu0 }
 0x6cc   :  { %v7179_v6 = vadd.f32 %v9918_v3, %v12082_v40  ;;  %v7170_v29 = vpop.f32.mrb[205].mxu0 }
 0x6cd   :  { %v7171_v30 = vadd.f32 %v12082_v40, %v7170_v29  ;;  %v9919_v22 = vpop.f32.mrb[206].mxu0 }
 0x6ce   :  { %8971 = vmatpush3.bf16.xpose.msra.mxu1 %v7631_v9  ;;  %v7182_v15 = vadd.f32 %v9919_v22, %v12082_v40  ;;  %v7173_v28 = vpop.f32.mrb[207].mxu0  ;;  %v7419_v5 = vmax.f32 %v7179_v6, 0.0  ;;  %v12357_v6 = vld [vmem:[%s12462_s5 + $0x7] ss:$0 sm:$0xff] }
 0x6cf   :  { %9982 = vmatprep.subr.msk.bf16.mxu1 %vm537_vm0, %v7499_v50  ;;  %v7174_v7 = vadd.f32 %v12082_v40, %v7173_v28  ;;  %v7417_v13 = vmax.f32 %v7171_v30, 0.0 }
 0x6d0   :  { %v7420_v36 = vmax.f32 %v7182_v15, 0.0 }
 0x6d1   :  { %v7418_v0 = vmax.f32 %v7174_v7, 0.0 }
 0x6d2   :  { %v7502_v16 = vpack.c.bf16 %v7420_v36, %v7419_v5 }
 0x6d3   :  { %v7501_v44 = vpack.c.bf16 %v7418_v0, %v7417_v13  ;;  %v9922_v24 = vpop.f32.mrb[208].mxu0 }
 0x6d4   :  { %v7195_v53 = vadd.f32 %v9922_v24, %v12082_v40  ;;  %v7186_v55 = vpop.f32.mrb[209].mxu0 }
 0x6d5   :  { %v7187_v62 = vadd.f32 %v12082_v40, %v7186_v55  ;;  %v9923_v49 = vpop.f32.mrb[210].mxu0  ;;  %v7646_v55 = vsel %vm537_vm0, %v12296_v8, 0 }
 0x6d6   :  { %8973 = vmatpush3.bf16.xpose.msra.mxu1 %v7634_v37  ;;  %v7198_v11 = vadd.f32 %v9923_v49, %v12082_v40  ;;  %v7189_v41 = vpop.f32.mrb[211].mxu0  ;;  %v7423_v39 = vmax.f32 %v7195_v53, 0.0 }
 0x6d7   :  { %9983 = vmatprep.subr.msk.bf16.mxu1 %vm537_vm0, %v7500_v21  ;;  %v7190_v58 = vadd.f32 %v12082_v40, %v7189_v41  ;;  %v7421_v45 = vmax.f32 %v7187_v62, 0.0 }
 0x6d8   :  { %v7424_v20 = vmax.f32 %v7198_v11, 0.0 }
 0x6d9   :  { %v7422_v42 = vmax.f32 %v7190_v58, 0.0 }
 0x6da   :  { %v12330_v17 = vpack.c.bf16 %v7424_v20, %v7423_v39 }
 0x6db   :  { %v7503_v27 = vpack.c.bf16 %v7422_v42, %v7421_v45  ;;  %v9926_v12 = vpop.f32.mrb[212].mxu0 }
 0x6dc   :  { %v7211_v60 = vadd.f32 %v9926_v12, %v12082_v40  ;;  %v7202_v31 = vpop.f32.mrb[213].mxu0 }
 0x6dd   :  { %v7203_v18 = vadd.f32 %v12082_v40, %v7202_v31  ;;  %v9927_v57 = vpop.f32.mrb[214].mxu0 }
 0x6de   :  { %8975 = vmatpush3.bf16.xpose.msra.mxu1 %v7637_v56  ;;  %v7214_v33 = vadd.f32 %v9927_v57, %v12082_v40  ;;  %v7205_v35 = vpop.f32.mrb[215].mxu0  ;;  %v7427_v23 = vmax.f32 %v7211_v60, 0.0 }
 0x6df   :  { %9984 = vmatprep.subr.msk.bf16.mxu1 %vm537_vm0, %v7501_v44  ;;  %v7206_v51 = vadd.f32 %v12082_v40, %v7205_v35  ;;  %v7425_v63 = vmax.f32 %v7203_v18, 0.0  ;;  %v7649_v18 = vsel %vm537_vm0, %v12294_v47, 0  ;;  %v12394_v47 = vld [vmem:[%s12465_s6] sm:$0xf] }
 0x6e0   :  { %v7428_v48 = vmax.f32 %v7214_v33, 0.0 }
 0x6e1   :  { %v7426_v4 = vmax.f32 %v7206_v51, 0.0 }
 0x6e2   :  { %v12339_v10 = vpack.c.bf16 %v7428_v48, %v7427_v23 }
 0x6e3   :  { %v12341_v26 = vpack.c.bf16 %v7426_v4, %v7425_v63  ;;  %v9930_v38 = vpop.f32.mrb[216].mxu0 }
 0x6e4   :  { %v7227_v2 = vadd.f32 %v9930_v38, %v12082_v40  ;;  %v7218_v52 = vpop.f32.mrb[217].mxu0 }
 0x6e5   :  { %v7219_v14 = vadd.f32 %v12082_v40, %v7218_v52  ;;  %v9931_v32 = vpop.f32.mrb[218].mxu0 }
 0x6e6   :  { %8977 = vmatpush3.bf16.xpose.msra.mxu1 %v7640_v46  ;;  %v7230_v19 = vadd.f32 %v9931_v32, %v12082_v40  ;;  %v7221_v25 = vpop.f32.mrb[219].mxu0  ;;  %v7431_v1 = vmax.f32 %v7227_v2, 0.0  ;;  %v7676_v32 = vsel %vm537_vm0, %v12341_v26, 0 }
 0x6e7   :  { %9985 = vmatprep.subr.msk.bf16.mxu1 %vm537_vm0, %v7502_v16  ;;  %v7222_v61 = vadd.f32 %v12082_v40, %v7221_v25  ;;  %v7429_v34 = vmax.f32 %v7219_v14, 0.0  ;;  %v7643_v40 = vsel %vm537_vm0, %v12282_v43, 0 }
 0x6e8   :  { %v7432_v59 = vmax.f32 %v7230_v19, 0.0 }
 0x6e9   :  { %v7430_v21 = vmax.f32 %v7222_v61, 0.0 }
 0x6ea   :  { %v12350_v50 = vpack.c.bf16 %v7432_v59, %v7431_v1 }
 0x6eb   :  { %v12352_v3 = vpack.c.bf16 %v7430_v21, %v7429_v34  ;;  %v9934_v54 = vpop.f32.mrb[220].mxu0 }
 0x6ec   :  { %v7243_v29 = vadd.f32 %v12357_v6, %v9934_v54  ;;  %v7234_v9 = vpop.f32.mrb[221].mxu0 }
 0x6ed   :  { %v7235_v30 = vadd.f32 %v12357_v6, %v7234_v9  ;;  %v9935_v22 = vpop.f32.mrb[222].mxu0 }
 0x6ee   :  { %8979 = vmatpush3.bf16.xpose.msra.mxu1 %v7643_v40  ;;  %v7246_v15 = vadd.f32 %v12357_v6, %v9935_v22  ;;  %v7237_v28 = vpop.f32.mrb[223].mxu0  ;;  %v7435_v5 = vmax.f32 %v7243_v29, 0.0 }
 0x6ef   :  { %9986 = vmatprep.subr.msk.bf16.mxu1 %vm537_vm0, %v7503_v27  ;;  %v7238_v7 = vadd.f32 %v12357_v6, %v7237_v28  ;;  %v7433_v13 = vmax.f32 %v7235_v30, 0.0 }
 0x6f0   :  { %v7436_v36 = vmax.f32 %v7246_v15, 0.0  ;;  %v7679_v15 = vsel %vm537_vm0, %v12339_v10, 0 }
 0x6f1   :  { %v7434_v0 = vmax.f32 %v7238_v7, 0.0 }
 0x6f2   :  { %v12366_v16 = vpack.c.bf16 %v7436_v36, %v7435_v5 }
 0x6f3   :  { %v12368_v44 = vpack.c.bf16 %v7434_v0, %v7433_v13  ;;  %v9938_v43 = vpop.f32.mrb[224].mxu0 }
 0x6f4   :  { %v7259_v24 = vadd.f32 %v12357_v6, %v9938_v43  ;;  %v7250_v53 = vpop.f32.mrb[225].mxu0 }
 0x6f5   :  { %v7251_v37 = vadd.f32 %v12357_v6, %v7250_v53  ;;  %v9939_v62 = vpop.f32.mrb[226].mxu0 }
 0x6f6   :  { %8981 = vmatpush3.bf16.xpose.msra.mxu1 %v7646_v55  ;;  %v7262_v49 = vadd.f32 %v12357_v6, %v9939_v62  ;;  %v7253_v11 = vpop.f32.mrb[227].mxu0  ;;  %v7439_v58 = vmax.f32 %v7259_v24, 0.0 }
 0x6f7   :  { %v7254_v41 = vadd.f32 %v12357_v6, %v7253_v11  ;;  %9987 = vmatprep.subr.msk.bf16.mxu1 %vm537_vm0, %v12330_v17  ;;  %v7437_v20 = vmax.f32 %v7251_v37, 0.0  ;;  %v7682_v11 = vsel %vm537_vm0, %v12352_v3, 0  ;;  %v7688_v3 = vsel %vm537_vm0, %v12368_v44, 0  ;;  %v7526_v44 = vpop.permute.xlu0 %7525 }
 0x6f8   :  { %v7440_v39 = vmax.f32 %v7262_v49, 0.0 }
 0x6f9   :  { %v7438_v45 = vmax.f32 %v7254_v41, 0.0 }
 0x6fa   :  { %v12378_v42 = vpack.c.bf16 %v7440_v39, %v7439_v58 }
 0x6fb   :  { %v12380_v27 = vpack.c.bf16 %v7438_v45, %v7437_v20  ;;  %v9942_v8 = vpop.f32.mrb[228].mxu0 }
 0x6fc   :  { %v7275_v12 = vadd.f32 %v12357_v6, %v9942_v8  ;;  %v7266_v60 = vpop.f32.mrb[229].mxu0 }
 0x6fd   :  { %v7267_v31 = vadd.f32 %v12357_v6, %v7266_v60  ;;  %v9943_v56 = vpop.f32.mrb[230].mxu0 }
 0x6fe   :  { %v7278_v17 = vadd.f32 %v12357_v6, %v9943_v56  ;;  %v7269_v57 = vpop.f32.mrb[231].mxu0  ;;  %8983 = vmatpush3.bf16.xpose.msra.mxu1 %v7649_v18  ;;  %v7443_v35 = vmax.f32 %v7275_v12, 0.0  ;;  %v7685_v56 = vsel %vm537_vm0, %v12350_v50, 0  ;;  %v7694_v18 = vsel %vm537_vm0, %v12380_v27, 0 }
 0x6ff   :  { %v7270_v33 = vadd.f32 %v12357_v6, %v7269_v57  ;;  %v7441_v23 = vmax.f32 %v7267_v31, 0.0  ;;  %v7697_v50 = vsel %vm537_vm0, %v12378_v42, 0 }
 0x700   :  { %v7444_v51 = vmax.f32 %v7278_v17, 0.0 }
 0x701   :  { %v7442_v48 = vmax.f32 %v7270_v33, 0.0 }
 0x702   :  { %v7514_v63 = vpack.c.bf16 %v7444_v51, %v7443_v35 }
 0x703   :  { %v7513_v4 = vpack.c.bf16 %v7442_v48, %v7441_v23  ;;  %v9946_v38 = vpop.f32.mrb[232].mxu0 }
 0x704   :  { %v7291_v2 = vadd.f32 %v12357_v6, %v9946_v38  ;;  %v7282_v52 = vpop.f32.mrb[233].mxu0 }
 0x705   :  { %v7283_v46 = vadd.f32 %v12357_v6, %v7282_v52  ;;  %v9947_v14 = vpop.f32.mrb[234].mxu0  ;;  %9988 = vmatprep.subr.msk.bf16.mxu1 %vm537_vm0, %v7513_v4  ;;  %8985 = vmatmul.mubr.msk.bf16.vlgmr.msra.gmra.mrb[148].mxu1 %vm537_vm0, %v12394_v47 }
 0x706   :  { %v7294_v19 = vadd.f32 %v12357_v6, %v9947_v14  ;;  %v7285_v25 = vpop.f32.mrb[235].mxu0  ;;  %8987 = vmatpush3.bf16.xpose.msra.mxu1 %v7676_v32  ;;  %9002 = vmatprep.mubr.msk.bf16.mxu1 %vm537_vm0, %v12394_v47  ;;  %v7447_v1 = vmax.f32 %v7291_v2, 0.0 }
 0x707   :  { %v7286_v61 = vadd.f32 %v12357_v6, %v7285_v25  ;;  %9989 = vmatprep.subr.msk.bf16.mxu1 %vm537_vm0, %v7514_v63  ;;  %v7445_v34 = vmax.f32 %v7283_v46, 0.0 }
 0x708   :  { %v7448_v59 = vmax.f32 %v7294_v19, 0.0 }
 0x709   :  { %v7446_v21 = vmax.f32 %v7286_v61, 0.0 }
 0x70a   :  { %v7516_v54 = vpack.c.bf16 %v7448_v59, %v7447_v1 }
 0x70b   :  { %v7515_v29 = vpack.c.bf16 %v7446_v21, %v7445_v34  ;;  %v9950_v9 = vpop.f32.mrb[236].mxu0 }
 0x70c   :  { %v7307_v26 = vadd.f32 %v12357_v6, %v9950_v9  ;;  %v7298_v40 = vpop.f32.mrb[237].mxu0 }
 0x70d   :  { %v7299_v30 = vadd.f32 %v12357_v6, %v7298_v40  ;;  %v9951_v22 = vpop.f32.mrb[238].mxu0 }
 0x70e   :  { %v7310_v28 = vadd.f32 %v12357_v6, %v9951_v22  ;;  %v7301_v7 = vpop.f32.mrb[239].mxu0  ;;  %8989 = vmatpush3.bf16.xpose.msra.mxu1 %v7679_v15  ;;  %v7451_v36 = vmax.f32 %v7307_v26, 0.0 }
 0x70f   :  { %v7302_v5 = vadd.f32 %v12357_v6, %v7301_v7  ;;  %9990 = vmatprep.subr.msk.bf16.mxu1 %vm537_vm0, %v7515_v29  ;;  %v7449_v0 = vmax.f32 %v7299_v30, 0.0 }
 0x710   :  { %v7452_v13 = vmax.f32 %v7310_v28, 0.0 }
 0x711   :  { %v7450_v43 = vmax.f32 %v7302_v5, 0.0 }
 0x712   :  { %v7518_v24 = vpack.c.bf16 %v7452_v13, %v7451_v36 }
 0x713   :  { %v7517_v53 = vpack.c.bf16 %v7450_v43, %v7449_v0  ;;  %v9954_v55 = vpop.f32.mrb[240].mxu0 }
 0x714   :  { %v7323_v37 = vadd.f32 %v12357_v6, %v9954_v55  ;;  %v7314_v62 = vpop.f32.mrb[241].mxu0 }
 0x715   :  { %v7315_v10 = vadd.f32 %v12357_v6, %v7314_v62  ;;  %v9955_v49 = vpop.f32.mrb[242].mxu0 }
 0x716   :  { %v7326_v41 = vadd.f32 %v12357_v6, %v9955_v49  ;;  %v7317_v58 = vpop.f32.mrb[243].mxu0  ;;  %8991 = vmatpush3.bf16.xpose.msra.mxu1 %v7682_v11  ;;  %v7455_v20 = vmax.f32 %v7323_v37, 0.0 }
 0x717   :  { %v7318_v39 = vadd.f32 %v12357_v6, %v7317_v58  ;;  %9991 = vmatprep.subr.msk.bf16.mxu1 %vm537_vm0, %v7516_v54  ;;  %v7453_v8 = vmax.f32 %v7315_v10, 0.0  ;;  %v7691_v6 = vsel %vm537_vm0, %v12366_v16, 0 }
 0x718   :  { %v7456_v45 = vmax.f32 %v7326_v41, 0.0 }
 0x719   :  { %v7454_v12 = vmax.f32 %v7318_v39, 0.0 }
 0x71a   :  { %v7520_v60 = vpack.c.bf16 %v7456_v45, %v7455_v20 }
 0x71b   :  { %v7519_v31 = vpack.c.bf16 %v7454_v12, %v7453_v8 }
 0x71e   :  { %8993 = vmatpush3.bf16.xpose.msra.mxu1 %v7685_v56 }
 0x71f   :  { %9992 = vmatprep.subr.msk.bf16.mxu1 %vm537_vm0, %v7517_v53 }
 0x726   :  { %8995 = vmatpush3.bf16.xpose.msra.mxu1 %v7688_v3 }
 0x727   :  { %9993 = vmatprep.subr.msk.bf16.mxu1 %vm537_vm0, %v7518_v24 }
 0x72e   :  { %8997 = vmatpush3.bf16.xpose.msra.mxu1 %v7691_v6 }
 0x72f   :  { %9994 = vmatprep.subr.msk.bf16.mxu1 %vm537_vm0, %v7519_v31 }
 0x736   :  { %8999 = vmatpush3.bf16.xpose.msra.mxu1 %v7694_v18 }
 0x737   :  { %9995 = vmatprep.subr.msk.bf16.mxu1 %vm537_vm0, %v7520_v60 }
 0x73e   :  { %9001 = vmatpush3.bf16.xpose.msra.mxu1 %v7697_v50 }
 0x745   :  { %9003 = vmatmul.mubr.msk.bf16.vlgmr.msra.gmra.mrb[152].mxu1 %vm537_vm0, %v12394_v47 }
 0x758   :  { %v7757_v17 = vpop.f32.mrb[140].mxu1 }
 0x759   :  { %v7759_v57 = vpop.f32.mrb[141].mxu1  ;;  %v7758_v16 = vadd.f32 %v7757_v17, %v7526_v44 }
 0x75a   :  { %v7761_v33 = vpop.f32.mrb[142].mxu1  ;;  %v7760_v35 = vadd.f32 %v7759_v57, %v7526_v44 }
 0x75b   :  { %7887 = vst [vmem:[%s12467_s8] sm:$0xff] %v7758_v16  ;;  %v7762_v27 = vpop.f32.mrb[143].mxu1 }
 0x75c   :  { %8449 = vst [vmem:[%s12467_s8 + $0x8] sm:$0xff] %v7760_v35 }
 0x798   :  { %v7798_v42 = vpop.f32.mrb[144].mxu1 }
 0x799   :  { %v7799_v51 = vadd.f32 %v7798_v42, %v7526_v44  ;;  %v7800_v23 = vpop.f32.mrb[145].mxu1 }
 0x79a   :  { %v7801_v48 = vadd.f32 %v7800_v23, %v7526_v44  ;;  %v7802_v63 = vpop.f32.mrb[146].mxu1 }
 0x79b   :  { %8450 = vst [vmem:[%s12467_s8 + $0x10] sm:$0xff] %v7799_v51  ;;  %v7803_v4 = vpop.f32.mrb[147].mxu1 }
 0x79c   :  { %8451 = vst [vmem:[%s12467_s8 + $0x18] sm:$0xff] %v7801_v48 }
 0x7d8   :  { %v7839_v38 = vpop.f32.mrb[148].mxu1 }
 0x7d9   :  { %v7840_v2 = vadd.f32 %v7839_v38, %v7526_v44  ;;  %v7841_v52 = vpop.f32.mrb[149].mxu1 }
 0x7da   :  { %v7842_v46 = vadd.f32 %v7841_v52, %v7526_v44  ;;  %v7843_v14 = vpop.f32.mrb[150].mxu1 }
 0x7db   :  { %8452 = vst [vmem:[%s12467_s8 + $0x20] sm:$0xff] %v7840_v2  ;;  %v7844_v47 = vpop.f32.mrb[151].mxu1 }
 0x7dc   :  { %8453 = vst [vmem:[%s12467_s8 + $0x28] sm:$0xff] %v7842_v46 }
 0x818   :  { %v7880_v32 = vpop.f32.mrb[152].mxu1 }
 0x819   :  { %v7881_v19 = vadd.f32 %v7880_v32, %v7526_v44  ;;  %v7882_v25 = vpop.f32.mrb[153].mxu1 }
 0x81a   :  { %v7883_v61 = vadd.f32 %v7882_v25, %v7526_v44  ;;  %v7884_v1 = vpop.f32.mrb[154].mxu1 }
 0x81b   :  { %8454 = vst [vmem:[%s12467_s8 + $0x30] sm:$0xff] %v7881_v19  ;;  %v7885_v59 = vpop.f32.mrb[155].mxu1 }
 0x81c   :  { %8455 = vst [vmem:[%s12467_s8 + $0x38] sm:$0xff] %v7883_v61 }

</bundles_post_ra>
